<compile_context>
chip_gen: v6e
topology: v6e:2x2x1
jax: 0.10.0
libtpu: 0.0.40
codegen_flags: <defaults>
</compile_context>

<pallas_src>
import functools

import jax
import jax.numpy as jnp
from jax.experimental import pallas as pl
from jax.experimental.pallas import tpu as pltpu

BN_EPS = 1e-5
NUM_CLASSES = 3000  # default num_fonts in the reference module


# ----------------------------------------------------------------------------
# Generation-aware VMEM limit and tile pickers
# ----------------------------------------------------------------------------
def _vmem_limit_bytes():
    cap = 64 * 1024 * 1024          # conservative default (v7x physical VMEM/TC)
    try:
        cap = int(pltpu.get_tpu_info().vmem_capacity_bytes)
    except Exception:
        pass
    return int(min(96 * 1024 * 1024, (cap * 3) // 4))


_VMEM_LIMIT = _vmem_limit_bytes()


def _round_up(v, m):
    return ((v + m - 1) // m) * m


def _pick_tile_m_fc(m):
    # Batch dim for FC layers: tiny (2) in practice — one tile unless large.
    if m <= 1024:
        return m
    for c in (1024, 512, 256, 128):
        if m % c == 0:
            return c
    return m


def _pick_tile_n(n):
    # Big, lane-dense N tiles (weights stream / double-buffer), but keep >= 2
    # tiles so v7x's two TensorCores both get work and DMA stays pipelined.
    for c in (1536, 1024, 512, 256, 128):
        if n % c == 0 and n // c >= 2:
            return c
    return n


def _pick_tile_m_conv(m):
    # >= 2 M-tiles (v7x megacore + patch-DMA/compute overlap), multiples of 8.
    for c in (1024, 512, 256, 128, 64, 32, 16, 8):
        if c < m and m % c == 0:
            return c
    return m


# ----------------------------------------------------------------------------
# Fused conv kernel: (im2col quadrants) @ W -> max over quadrants -> +bias -> ReLU
# ----------------------------------------------------------------------------
def _conv_pool_kernel(p_ref, w_ref, b_ref, o_ref):
    # p_ref: (4, tm, Kp) bf16 patches (one slice per 2x2-pool quadrant)
    # w_ref: (Kp, Coutp) bf16 weights (BN scale folded, zero-padded rows/cols)
    # b_ref: (1, Coutp) f32 folded bias (zero-padded)
    acc = jnp.dot(p_ref[0], w_ref[...], preferred_element_type=jnp.float32)
    for q in range(1, 4):
        acc = jnp.maximum(
            acc, jnp.dot(p_ref[q], w_ref[...], preferred_element_type=jnp.float32))
    o_ref[...] = jnp.maximum(acc + b_ref[...], 0.0).astype(o_ref.dtype)


def conv3x3_bn_relu_pool(x_nhwc, wmat, bias):
    """3x3 conv (pad=1, stride=1) + eval-BN + ReLU + 2x2 maxpool, fused.

    x_nhwc: (B, H, W, Cin) bf16 activations.
    wmat:   (Kp, Coutp) bf16, prepared by prepare_params (BN scale folded,
            K and Cout zero-padded to 128-lane multiples).
    bias:   (Cout,) f32 folded bias (unpadded — its length gives the true Cout).
    Returns (B, H//2, W//2, Cout) bf16.
    """
    b, h, w, cin = x_nhwc.shape
    k = cin * 9
    k_pad, cout_pad = wmat.shape
    cout = bias.shape[0]

    # im2col grouped by 2x2-pool quadrant so the kernel pools with a plain
    # elementwise max over 4 MXU matmuls (no in-kernel reshapes / strided
    # slices).  Lane dim padded to k_pad so the HBM->VMEM patch copy is dense.
    xp = jnp.pad(x_nhwc, ((0, 0), (1, 1), (1, 1), (0, 0)))
    taps = [xp[:, dy:dy + h, dx:dx + w, :] for dy in range(3) for dx in range(3)]
    p = jnp.stack(taps, axis=-1).reshape(b, h, w, k)          # (B,H,W,Cin*9)
    p = p.reshape(b, h // 2, 2, w // 2, 2, k)
    p = p.transpose(2, 4, 0, 1, 3, 5).reshape(4, b * (h // 2) * (w // 2), k)
    if k_pad != k:
        p = jnp.pad(p, ((0, 0), (0, 0), (0, k_pad - k)))

    bias2d = jnp.pad(bias, (0, cout_pad - cout)).reshape(1, cout_pad)

    mp = p.shape[1]
    tm = _pick_tile_m_conv(mp)
    grid = (mp // tm,)

    out = pl.pallas_call(
        _conv_pool_kernel,
        out_shape=jax.ShapeDtypeStruct((mp, cout_pad), jnp.bfloat16),
        grid_spec=pltpu.PrefetchScalarGridSpec(
            num_scalar_prefetch=0,
            grid=grid,
            in_specs=[
                pl.BlockSpec((4, tm, k_pad), lambda i: (0, i, 0)),
                pl.BlockSpec((k_pad, cout_pad), lambda i: (0, 0)),
                pl.BlockSpec((1, cout_pad), lambda i: (0, 0)),
            ],
            out_specs=pl.BlockSpec((tm, cout_pad), lambda i: (i, 0)),
        ),
        compiler_params=pltpu.CompilerParams(
            dimension_semantics=("parallel",),
            vmem_limit_bytes=_VMEM_LIMIT,
        ),
    )(p, wmat, bias2d)

    if cout != cout_pad:
        out = out[:, :cout]
    return out.reshape(b, h // 2, w // 2, cout)


# ----------------------------------------------------------------------------
# FC kernel: bf16 matmul (N-tiled, weight-streamed) + bias + optional ReLU
# ----------------------------------------------------------------------------
def _fc_kernel(x_ref, w_ref, b_ref, o_ref, *, apply_relu):
    y = jnp.dot(x_ref[...], w_ref[...], preferred_element_type=jnp.float32)
    y = y + b_ref[...]
    if apply_relu:
        y = jnp.maximum(y, 0.0)
    o_ref[...] = y.astype(o_ref.dtype)


def fc_bias_act(x, wmat, bias, *, apply_relu, out_dtype=jnp.float32):
    """relu?(x @ wmat + bias).

    x: (M, K).  wmat: (K, Np) bf16 prepared weights (BN scale folded, N padded
    to a 128-lane multiple).  bias: (N,) f32 unpadded (its length gives the
    true N; padded logits columns are sliced off).
    """
    m, k = x.shape
    n_pad = wmat.shape[1]
    n_true = bias.shape[0]
    x = x.astype(jnp.bfloat16)
    bias2d = jnp.pad(bias, (0, n_pad - n_true)).reshape(1, n_pad)

    tm = _pick_tile_m_fc(m)
    tn = _pick_tile_n(n_pad)
    grid = (m // tm, n_pad // tn)

    kernel = functools.partial(_fc_kernel, apply_relu=apply_relu)
    out = pl.pallas_call(
        kernel,
        out_shape=jax.ShapeDtypeStruct((m, n_pad), out_dtype),
        grid_spec=pltpu.PrefetchScalarGridSpec(
            num_scalar_prefetch=0,
            grid=grid,
            in_specs=[
                pl.BlockSpec((tm, k), lambda i, j: (i, 0)),
                pl.BlockSpec((k, tn), lambda i, j: (0, j)),
                pl.BlockSpec((1, tn), lambda i, j: (0, j)),
            ],
            out_specs=pl.BlockSpec((tm, tn), lambda i, j: (i, j)),
        ),
        compiler_params=pltpu.CompilerParams(
            dimension_semantics=("parallel", "parallel"),
            vmem_limit_bytes=_VMEM_LIMIT,
        ),
    )(x, wmat, bias2d)

    if n_true != n_pad:
        out = out[:, :n_true]
    return out


# ----------------------------------------------------------------------------
# BN folding (eval-mode running stats)
# ----------------------------------------------------------------------------
def fold_bn(linear_bias, gamma, beta, mean, var):
    scale = gamma / jnp.sqrt(var + BN_EPS)
    bias = beta + (linear_bias - mean) * scale
    return scale, bias


# ----------------------------------------------------------------------------
# One-time weight preparation (runs ONCE, outside the jitted forward)
# ----------------------------------------------------------------------------
def prepare_params(params):
    """Fold BN into weights/biases, reshape/pad/cast to the kernel layouts."""
    prep = {}
    # Conv layers: im2col weight matrix with BN scale folded into columns,
    # K zero-padded to a 128 multiple, Cout zero-padded to 128 lanes.
    for i in (1, 2, 3):
        w_pt = params[f"conv{i}_w"]                      # (Cout, Cin, 3, 3)
        cout, cin = int(w_pt.shape[0]), int(w_pt.shape[1])
        k = cin * 9
        k_pad = _round_up(k, 128)
        cout_pad = _round_up(cout, 128)
        scale, bias = fold_bn(params[f"conv{i}_b"], params[f"bn{i}_gamma"],
                              params[f"bn{i}_beta"], params[f"bn{i}_mean"],
                              params[f"bn{i}_var"])
        wmat = jnp.transpose(w_pt, (1, 2, 3, 0)).reshape(k, cout) * scale[None, :]
        wmat = jnp.pad(wmat, ((0, k_pad - k), (0, cout_pad - cout)))
        prep[f"conv{i}_w"] = wmat.astype(jnp.bfloat16)
        prep[f"conv{i}_b"] = bias.astype(jnp.float32)     # unpadded (true Cout)

    # fc1 + bn4 (BN scale folded into the weight columns)
    scale4, bias4 = fold_bn(params["fc1_b"], params["bn4_gamma"],
                            params["bn4_beta"], params["bn4_mean"],
                            params["bn4_var"])
    prep["fc1_w"] = (params["fc1_w"].T * scale4[None, :]).astype(jnp.bfloat16)
    prep["fc1_b"] = bias4.astype(jnp.float32)

    # fc2: pad the 3000-class output to a 128-lane multiple (3072) once.
    num_classes = int(params["fc2_w"].shape[0])
    n_pad = _round_up(num_classes, 128)
    prep["fc2_w"] = jnp.pad(params["fc2_w"].T,
                            ((0, 0), (0, n_pad - num_classes))).astype(jnp.bfloat16)
    prep["fc2_b"] = params["fc2_b"].astype(jnp.float32)   # unpadded (true N)
    return prep


# ----------------------------------------------------------------------------
# Parameter init (deterministic, synthetic, PyTorch layouts)
# ----------------------------------------------------------------------------
def init_params(key, num_classes=NUM_CLASSES):
    keys = jax.random.split(key, 16)
    p = {}

    def norm(k, shape, s=0.05):
        return (s * jax.random.normal(k, shape)).astype(jnp.float32)

    p["conv1_w"] = norm(keys[0], (32, 1, 3, 3));   p["conv1_b"] = norm(keys[1], (32,))
    p["conv2_w"] = norm(keys[2], (64, 32, 3, 3));  p["conv2_b"] = norm(keys[3], (64,))
    p["conv3_w"] = norm(keys[4], (128, 64, 3, 3)); p["conv3_b"] = norm(keys[5], (128,))
    p["fc1_w"] = norm(keys[6], (512, 128 * 4 * 4)); p["fc1_b"] = norm(keys[7], (512,))
    p["fc2_w"] = norm(keys[8], (num_classes, 512)); p["fc2_b"] = norm(keys[9], (num_classes,))

    for i, c, k in ((1, 32, 10), (2, 64, 11), (3, 128, 12), (4, 512, 13)):
        sub = jax.random.split(keys[k], 4)
        p[f"bn{i}_gamma"] = (1.0 + 0.1 * jax.random.normal(sub[0], (c,))).astype(jnp.float32)
        p[f"bn{i}_beta"] = (0.1 * jax.random.normal(sub[1], (c,))).astype(jnp.float32)
        p[f"bn{i}_mean"] = (0.1 * jax.random.normal(sub[2], (c,))).astype(jnp.float32)
        p[f"bn{i}_var"] = (1.0 + 0.1 * jnp.abs(jax.random.normal(sub[3], (c,)))).astype(jnp.float32)
    return p


# ----------------------------------------------------------------------------
# Forward pass (inference / model.eval() semantics) — takes PREPARED params
# ----------------------------------------------------------------------------
def font_cnn_forward(x_nchw, prep):
    # NCHW -> NHWC, cast to bf16 once so im2col glue moves bf16, not f32.
    x = jnp.transpose(x_nchw, (0, 2, 3, 1)).astype(jnp.bfloat16)

    # conv -> bn -> relu -> maxpool (fused), x3
    for i in (1, 2, 3):
        x = conv3x3_bn_relu_pool(x, prep[f"conv{i}_w"], prep[f"conv{i}_b"])

    # Flatten exactly like torch.nn.Flatten on NCHW: (N, C*H*W) with C-major.
    n, h, w, c = x.shape
    flat = jnp.transpose(x, (0, 3, 1, 2)).reshape(n, c * h * w)

    # fc1 -> bn4 -> relu (BN scale pre-folded into the weight columns)
    hdn = fc_bias_act(flat, prep["fc1_w"], prep["fc1_b"],
                      apply_relu=True, out_dtype=jnp.bfloat16)
    # TODO(synk): Dropout(0.6) is inference-mode identity here (no RNG masking).

    # fc2: lane-dense padded 3072-wide tiles; fc_bias_act slices back to 3000.
    logits = fc_bias_act(hdn, prep["fc2_w"], prep["fc2_b"],
                         apply_relu=False, out_dtype=jnp.float32)
    return logits


if __name__ == "__main__":
    key = jax.random.PRNGKey(0)
    pkey, xkey = jax.random.split(key)
    params = init_params(pkey, num_classes=NUM_CLASSES)
    prep = jax.block_until_ready(prepare_params(params))   # one-time prep, outside jit
    # fc1 expects 128*4*4 features -> input spatial is 32x32 (32 -> 16 -> 8 -> 4)
    x = jax.random.normal(xkey, (2, 1, 32, 32), jnp.float32)  # NCHW like PyTorch
    fwd = jax.jit(font_cnn_forward)
    out = jax.block_until_ready(fwd(x, prep))
    assert out.shape == (2, NUM_CLASSES), out.shape
    assert bool(jnp.all(jnp.isfinite(out)))
    print("KERNEL_OK")
</pallas_src>

<mosaic_0001>
module attributes {stable_mosaic.version = 11 : i64} {
  func.func @_conv_pool_kernel(%arg0: i32, %arg1: memref<4x256x128xbf16, #tpu.memory_space<vmem>>, %arg2: memref<128x128xbf16, #tpu.memory_space<vmem>>, %arg3: memref<1x128xf32, #tpu.memory_space<vmem>>, %arg4: memref<256x128xbf16, #tpu.memory_space<vmem>>) attributes {dimension_semantics = [#tpu.dimension_semantics<parallel>], iteration_bounds = array<i64: 2>, scalar_prefetch = 0 : i64, scratch_operands = 0 : i64, tpu.core_type = #tpu.core_type<tc>, window_params = [{transform_indices = @transform_0, window_bounds = array<i64: 4, 256, 128>}, {pipeline_mode = #tpu.pipeline_mode<synchronous>, transform_indices = @transform_1, window_bounds = array<i64: 128, 128>}, {pipeline_mode = #tpu.pipeline_mode<synchronous>, transform_indices = @transform_2, window_bounds = array<i64: 1, 128>}, {transform_indices = @transform_3, window_bounds = array<i64: 256, 128>}]} {
    %c0 = arith.constant 0 : index
    %c0_0 = arith.constant 0 : index
    %c0_1 = arith.constant 0 : index
    %0 = vector.load %arg1[%c0, %c0_0, %c0_1] : memref<4x256x128xbf16, #tpu.memory_space<vmem>>, vector<1x256x128xbf16>
    %1 = vector.shape_cast %0 : vector<1x256x128xbf16> to vector<256x128xbf16>
    %c0_2 = arith.constant 0 : index
    %c0_3 = arith.constant 0 : index
    %2 = vector.load %arg2[%c0_2, %c0_3] : memref<128x128xbf16, #tpu.memory_space<vmem>>, vector<128x128xbf16>
    %cst = arith.constant dense<0.000000e+00> : vector<256x128xf32>
    %3 = tpu.matmul %1, %2, %cst {dimension_numbers = #tpu.dot_dimension_numbers<[1], [0], [0], [1], [0, 0, 1, 1], [], []>} : vector<256x128xbf16>, vector<128x128xbf16>, vector<256x128xf32> -> vector<256x128xf32>
    %c1 = arith.constant 1 : index
    %c0_4 = arith.constant 0 : index
    %c0_5 = arith.constant 0 : index
    %4 = vector.load %arg1[%c1, %c0_4, %c0_5] : memref<4x256x128xbf16, #tpu.memory_space<vmem>>, vector<1x256x128xbf16>
    %5 = vector.shape_cast %4 : vector<1x256x128xbf16> to vector<256x128xbf16>
    %c0_6 = arith.constant 0 : index
    %c0_7 = arith.constant 0 : index
    %6 = vector.load %arg2[%c0_6, %c0_7] : memref<128x128xbf16, #tpu.memory_space<vmem>>, vector<128x128xbf16>
    %cst_8 = arith.constant dense<0.000000e+00> : vector<256x128xf32>
    %7 = tpu.matmul %5, %6, %cst_8 {dimension_numbers = #tpu.dot_dimension_numbers<[1], [0], [0], [1], [0, 0, 1, 1], [], []>} : vector<256x128xbf16>, vector<128x128xbf16>, vector<256x128xf32> -> vector<256x128xf32>
    %8 = arith.maximumf %3, %7 : vector<256x128xf32>
    %c2 = arith.constant 2 : index
    %c0_9 = arith.constant 0 : index
    %c0_10 = arith.constant 0 : index
    %9 = vector.load %arg1[%c2, %c0_9, %c0_10] : memref<4x256x128xbf16, #tpu.memory_space<vmem>>, vector<1x256x128xbf16>
    %10 = vector.shape_cast %9 : vector<1x256x128xbf16> to vector<256x128xbf16>
    %c0_11 = arith.constant 0 : index
    %c0_12 = arith.constant 0 : index
    %11 = vector.load %arg2[%c0_11, %c0_12] : memref<128x128xbf16, #tpu.memory_space<vmem>>, vector<128x128xbf16>
    %cst_13 = arith.constant dense<0.000000e+00> : vector<256x128xf32>
    %12 = tpu.matmul %10, %11, %cst_13 {dimension_numbers = #tpu.dot_dimension_numbers<[1], [0], [0], [1], [0, 0, 1, 1], [], []>} : vector<256x128xbf16>, vector<128x128xbf16>, vector<256x128xf32> -> vector<256x128xf32>
    %13 = arith.maximumf %8, %12 : vector<256x128xf32>
    %c3 = arith.constant 3 : index
    %c0_14 = arith.constant 0 : index
    %c0_15 = arith.constant 0 : index
    %14 = vector.load %arg1[%c3, %c0_14, %c0_15] : memref<4x256x128xbf16, #tpu.memory_space<vmem>>, vector<1x256x128xbf16>
    %15 = vector.shape_cast %14 : vector<1x256x128xbf16> to vector<256x128xbf16>
    %c0_16 = arith.constant 0 : index
    %c0_17 = arith.constant 0 : index
    %16 = vector.load %arg2[%c0_16, %c0_17] : memref<128x128xbf16, #tpu.memory_space<vmem>>, vector<128x128xbf16>
    %cst_18 = arith.constant dense<0.000000e+00> : vector<256x128xf32>
    %17 = tpu.matmul %15, %16, %cst_18 {dimension_numbers = #tpu.dot_dimension_numbers<[1], [0], [0], [1], [0, 0, 1, 1], [], []>} : vector<256x128xbf16>, vector<128x128xbf16>, vector<256x128xf32> -> vector<256x128xf32>
    %18 = arith.maximumf %13, %17 : vector<256x128xf32>
    %c0_19 = arith.constant 0 : index
    %c0_20 = arith.constant 0 : index
    %19 = vector.load %arg3[%c0_19, %c0_20] : memref<1x128xf32, #tpu.memory_space<vmem>>, vector<1x128xf32>
    %20 = vector.broadcast %19 : vector<1x128xf32> to vector<256x128xf32>
    %21 = arith.addf %18, %20 : vector<256x128xf32>
    %cst_21 = arith.constant 0.000000e+00 : f32
    %22 = vector.broadcast %cst_21 : f32 to vector<256x128xf32>
    %23 = arith.maximumf %21, %22 : vector<256x128xf32>
    %24 = arith.truncf %23 : vector<256x128xf32> to vector<256x128xbf16>
    %c0_22 = arith.constant 0 : index
    %c0_23 = arith.constant 0 : index
    %25 = vector.load %arg4[%c0_22, %c0_23] : memref<256x128xbf16, #tpu.memory_space<vmem>>, vector<256x128xbf16>
    tpu.vector_store %arg4[%c0_22, %c0_23], %24 {strides = array<i32>} : memref<256x128xbf16, #tpu.memory_space<vmem>>, vector<256x128xbf16>,
    return
  }
  func.func @transform_0(%arg0: i32) -> (i32, i32, i32) {
    %c0_i32 = arith.constant 0 : i32
    %c0_i32_0 = arith.constant 0 : i32
    %c0_i32_1 = arith.constant 0 : i32
    return %c0_i32, %arg0, %c0_i32_0 : i32, i32, i32
  }
  func.func @transform_1(%arg0: i32) -> (i32, i32) {
    %c0_i32 = arith.constant 0 : i32
    %c0_i32_0 = arith.constant 0 : i32
    %c0_i32_1 = arith.constant 0 : i32
    return %c0_i32, %c0_i32_0 : i32, i32
  }
  func.func @transform_2(%arg0: i32) -> (i32, i32) {
    %c0_i32 = arith.constant 0 : i32
    %c0_i32_0 = arith.constant 0 : i32
    %c0_i32_1 = arith.constant 0 : i32
    return %c0_i32, %c0_i32_0 : i32, i32
  }
  func.func @transform_3(%arg0: i32) -> (i32, i32) {
    %c0_i32 = arith.constant 0 : i32
    %c0_i32_0 = arith.constant 0 : i32
    return %arg0, %c0_i32 : i32, i32
  }
}

module attributes {stable_mosaic.version = 11 : i64} {
  func.func @_conv_pool_kernel(%arg0: i32, %arg1: memref<4x64x384xbf16, #tpu.memory_space<vmem>>, %arg2: memref<384x128xbf16, #tpu.memory_space<vmem>>, %arg3: memref<1x128xf32, #tpu.memory_space<vmem>>, %arg4: memref<64x128xbf16, #tpu.memory_space<vmem>>) attributes {dimension_semantics = [#tpu.dimension_semantics<parallel>], iteration_bounds = array<i64: 2>, scalar_prefetch = 0 : i64, scratch_operands = 0 : i64, tpu.core_type = #tpu.core_type<tc>, window_params = [{transform_indices = @transform_0, window_bounds = array<i64: 4, 64, 384>}, {pipeline_mode = #tpu.pipeline_mode<synchronous>, transform_indices = @transform_1, window_bounds = array<i64: 384, 128>}, {pipeline_mode = #tpu.pipeline_mode<synchronous>, transform_indices = @transform_2, window_bounds = array<i64: 1, 128>}, {transform_indices = @transform_3, window_bounds = array<i64: 64, 128>}]} {
    %c0 = arith.constant 0 : index
    %c0_0 = arith.constant 0 : index
    %c0_1 = arith.constant 0 : index
    %0 = vector.load %arg1[%c0, %c0_0, %c0_1] : memref<4x64x384xbf16, #tpu.memory_space<vmem>>, vector<1x64x384xbf16>
    %1 = vector.shape_cast %0 : vector<1x64x384xbf16> to vector<64x384xbf16>
    %c0_2 = arith.constant 0 : index
    %c0_3 = arith.constant 0 : index
    %2 = vector.load %arg2[%c0_2, %c0_3] : memref<384x128xbf16, #tpu.memory_space<vmem>>, vector<384x128xbf16>
    %cst = arith.constant dense<0.000000e+00> : vector<64x128xf32>
    %3 = tpu.matmul %1, %2, %cst {dimension_numbers = #tpu.dot_dimension_numbers<[1], [0], [0], [1], [0, 0, 1, 1], [], []>} : vector<64x384xbf16>, vector<384x128xbf16>, vector<64x128xf32> -> vector<64x128xf32>
    %c1 = arith.constant 1 : index
    %c0_4 = arith.constant 0 : index
    %c0_5 = arith.constant 0 : index
    %4 = vector.load %arg1[%c1, %c0_4, %c0_5] : memref<4x64x384xbf16, #tpu.memory_space<vmem>>, vector<1x64x384xbf16>
    %5 = vector.shape_cast %4 : vector<1x64x384xbf16> to vector<64x384xbf16>
    %c0_6 = arith.constant 0 : index
    %c0_7 = arith.constant 0 : index
    %6 = vector.load %arg2[%c0_6, %c0_7] : memref<384x128xbf16, #tpu.memory_space<vmem>>, vector<384x128xbf16>
    %cst_8 = arith.constant dense<0.000000e+00> : vector<64x128xf32>
    %7 = tpu.matmul %5, %6, %cst_8 {dimension_numbers = #tpu.dot_dimension_numbers<[1], [0], [0], [1], [0, 0, 1, 1], [], []>} : vector<64x384xbf16>, vector<384x128xbf16>, vector<64x128xf32> -> vector<64x128xf32>
    %8 = arith.maximumf %3, %7 : vector<64x128xf32>
    %c2 = arith.constant 2 : index
    %c0_9 = arith.constant 0 : index
    %c0_10 = arith.constant 0 : index
    %9 = vector.load %arg1[%c2, %c0_9, %c0_10] : memref<4x64x384xbf16, #tpu.memory_space<vmem>>, vector<1x64x384xbf16>
    %10 = vector.shape_cast %9 : vector<1x64x384xbf16> to vector<64x384xbf16>
    %c0_11 = arith.constant 0 : index
    %c0_12 = arith.constant 0 : index
    %11 = vector.load %arg2[%c0_11, %c0_12] : memref<384x128xbf16, #tpu.memory_space<vmem>>, vector<384x128xbf16>
    %cst_13 = arith.constant dense<0.000000e+00> : vector<64x128xf32>
    %12 = tpu.matmul %10, %11, %cst_13 {dimension_numbers = #tpu.dot_dimension_numbers<[1], [0], [0], [1], [0, 0, 1, 1], [], []>} : vector<64x384xbf16>, vector<384x128xbf16>, vector<64x128xf32> -> vector<64x128xf32>
    %13 = arith.maximumf %8, %12 : vector<64x128xf32>
    %c3 = arith.constant 3 : index
    %c0_14 = arith.constant 0 : index
    %c0_15 = arith.constant 0 : index
    %14 = vector.load %arg1[%c3, %c0_14, %c0_15] : memref<4x64x384xbf16, #tpu.memory_space<vmem>>, vector<1x64x384xbf16>
    %15 = vector.shape_cast %14 : vector<1x64x384xbf16> to vector<64x384xbf16>
    %c0_16 = arith.constant 0 : index
    %c0_17 = arith.constant 0 : index
    %16 = vector.load %arg2[%c0_16, %c0_17] : memref<384x128xbf16, #tpu.memory_space<vmem>>, vector<384x128xbf16>
    %cst_18 = arith.constant dense<0.000000e+00> : vector<64x128xf32>
    %17 = tpu.matmul %15, %16, %cst_18 {dimension_numbers = #tpu.dot_dimension_numbers<[1], [0], [0], [1], [0, 0, 1, 1], [], []>} : vector<64x384xbf16>, vector<384x128xbf16>, vector<64x128xf32> -> vector<64x128xf32>
    %18 = arith.maximumf %13, %17 : vector<64x128xf32>
    %c0_19 = arith.constant 0 : index
    %c0_20 = arith.constant 0 : index
    %19 = vector.load %arg3[%c0_19, %c0_20] : memref<1x128xf32, #tpu.memory_space<vmem>>, vector<1x128xf32>
    %20 = vector.broadcast %19 : vector<1x128xf32> to vector<64x128xf32>
    %21 = arith.addf %18, %20 : vector<64x128xf32>
    %cst_21 = arith.constant 0.000000e+00 : f32
    %22 = vector.broadcast %cst_21 : f32 to vector<64x128xf32>
    %23 = arith.maximumf %21, %22 : vector<64x128xf32>
    %24 = arith.truncf %23 : vector<64x128xf32> to vector<64x128xbf16>
    %c0_22 = arith.constant 0 : index
    %c0_23 = arith.constant 0 : index
    %25 = vector.load %arg4[%c0_22, %c0_23] : memref<64x128xbf16, #tpu.memory_space<vmem>>, vector<64x128xbf16>
    tpu.vector_store %arg4[%c0_22, %c0_23], %24 {strides = array<i32>} : memref<64x128xbf16, #tpu.memory_space<vmem>>, vector<64x128xbf16>,
    return
  }
  func.func @transform_0(%arg0: i32) -> (i32, i32, i32) {
    %c0_i32 = arith.constant 0 : i32
    %c0_i32_0 = arith.constant 0 : i32
    %c0_i32_1 = arith.constant 0 : i32
    return %c0_i32, %arg0, %c0_i32_0 : i32, i32, i32
  }
  func.func @transform_1(%arg0: i32) -> (i32, i32) {
    %c0_i32 = arith.constant 0 : i32
    %c0_i32_0 = arith.constant 0 : i32
    %c0_i32_1 = arith.constant 0 : i32
    return %c0_i32, %c0_i32_0 : i32, i32
  }
  func.func @transform_2(%arg0: i32) -> (i32, i32) {
    %c0_i32 = arith.constant 0 : i32
    %c0_i32_0 = arith.constant 0 : i32
    %c0_i32_1 = arith.constant 0 : i32
    return %c0_i32, %c0_i32_0 : i32, i32
  }
  func.func @transform_3(%arg0: i32) -> (i32, i32) {
    %c0_i32 = arith.constant 0 : i32
    %c0_i32_0 = arith.constant 0 : i32
    return %arg0, %c0_i32 : i32, i32
  }
}

module attributes {stable_mosaic.version = 11 : i64} {
  func.func @_conv_pool_kernel(%arg0: i32, %arg1: memref<4x16x640xbf16, #tpu.memory_space<vmem>>, %arg2: memref<640x128xbf16, #tpu.memory_space<vmem>>, %arg3: memref<1x128xf32, #tpu.memory_space<vmem>>, %arg4: memref<16x128xbf16, #tpu.memory_space<vmem>>) attributes {dimension_semantics = [#tpu.dimension_semantics<parallel>], iteration_bounds = array<i64: 2>, scalar_prefetch = 0 : i64, scratch_operands = 0 : i64, tpu.core_type = #tpu.core_type<tc>, window_params = [{transform_indices = @transform_0, window_bounds = array<i64: 4, 16, 640>}, {pipeline_mode = #tpu.pipeline_mode<synchronous>, transform_indices = @transform_1, window_bounds = array<i64: 640, 128>}, {pipeline_mode = #tpu.pipeline_mode<synchronous>, transform_indices = @transform_2, window_bounds = array<i64: 1, 128>}, {transform_indices = @transform_3, window_bounds = array<i64: 16, 128>}]} {
    %c0 = arith.constant 0 : index
    %c0_0 = arith.constant 0 : index
    %c0_1 = arith.constant 0 : index
    %0 = vector.load %arg1[%c0, %c0_0, %c0_1] : memref<4x16x640xbf16, #tpu.memory_space<vmem>>, vector<1x16x640xbf16>
    %1 = vector.shape_cast %0 : vector<1x16x640xbf16> to vector<16x640xbf16>
    %c0_2 = arith.constant 0 : index
    %c0_3 = arith.constant 0 : index
    %2 = vector.load %arg2[%c0_2, %c0_3] : memref<640x128xbf16, #tpu.memory_space<vmem>>, vector<640x128xbf16>
    %cst = arith.constant dense<0.000000e+00> : vector<16x128xf32>
    %3 = tpu.matmul %1, %2, %cst {dimension_numbers = #tpu.dot_dimension_numbers<[1], [0], [0], [1], [0, 0, 1, 1], [], []>} : vector<16x640xbf16>, vector<640x128xbf16>, vector<16x128xf32> -> vector<16x128xf32>
    %c1 = arith.constant 1 : index
    %c0_4 = arith.constant 0 : index
    %c0_5 = arith.constant 0 : index
    %4 = vector.load %arg1[%c1, %c0_4, %c0_5] : memref<4x16x640xbf16, #tpu.memory_space<vmem>>, vector<1x16x640xbf16>
    %5 = vector.shape_cast %4 : vector<1x16x640xbf16> to vector<16x640xbf16>
    %c0_6 = arith.constant 0 : index
    %c0_7 = arith.constant 0 : index
    %6 = vector.load %arg2[%c0_6, %c0_7] : memref<640x128xbf16, #tpu.memory_space<vmem>>, vector<640x128xbf16>
    %cst_8 = arith.constant dense<0.000000e+00> : vector<16x128xf32>
    %7 = tpu.matmul %5, %6, %cst_8 {dimension_numbers = #tpu.dot_dimension_numbers<[1], [0], [0], [1], [0, 0, 1, 1], [], []>} : vector<16x640xbf16>, vector<640x128xbf16>, vector<16x128xf32> -> vector<16x128xf32>
    %8 = arith.maximumf %3, %7 : vector<16x128xf32>
    %c2 = arith.constant 2 : index
    %c0_9 = arith.constant 0 : index
    %c0_10 = arith.constant 0 : index
    %9 = vector.load %arg1[%c2, %c0_9, %c0_10] : memref<4x16x640xbf16, #tpu.memory_space<vmem>>, vector<1x16x640xbf16>
    %10 = vector.shape_cast %9 : vector<1x16x640xbf16> to vector<16x640xbf16>
    %c0_11 = arith.constant 0 : index
    %c0_12 = arith.constant 0 : index
    %11 = vector.load %arg2[%c0_11, %c0_12] : memref<640x128xbf16, #tpu.memory_space<vmem>>, vector<640x128xbf16>
    %cst_13 = arith.constant dense<0.000000e+00> : vector<16x128xf32>
    %12 = tpu.matmul %10, %11, %cst_13 {dimension_numbers = #tpu.dot_dimension_numbers<[1], [0], [0], [1], [0, 0, 1, 1], [], []>} : vector<16x640xbf16>, vector<640x128xbf16>, vector<16x128xf32> -> vector<16x128xf32>
    %13 = arith.maximumf %8, %12 : vector<16x128xf32>
    %c3 = arith.constant 3 : index
    %c0_14 = arith.constant 0 : index
    %c0_15 = arith.constant 0 : index
    %14 = vector.load %arg1[%c3, %c0_14, %c0_15] : memref<4x16x640xbf16, #tpu.memory_space<vmem>>, vector<1x16x640xbf16>
    %15 = vector.shape_cast %14 : vector<1x16x640xbf16> to vector<16x640xbf16>
    %c0_16 = arith.constant 0 : index
    %c0_17 = arith.constant 0 : index
    %16 = vector.load %arg2[%c0_16, %c0_17] : memref<640x128xbf16, #tpu.memory_space<vmem>>, vector<640x128xbf16>
    %cst_18 = arith.constant dense<0.000000e+00> : vector<16x128xf32>
    %17 = tpu.matmul %15, %16, %cst_18 {dimension_numbers = #tpu.dot_dimension_numbers<[1], [0], [0], [1], [0, 0, 1, 1], [], []>} : vector<16x640xbf16>, vector<640x128xbf16>, vector<16x128xf32> -> vector<16x128xf32>
    %18 = arith.maximumf %13, %17 : vector<16x128xf32>
    %c0_19 = arith.constant 0 : index
    %c0_20 = arith.constant 0 : index
    %19 = vector.load %arg3[%c0_19, %c0_20] : memref<1x128xf32, #tpu.memory_space<vmem>>, vector<1x128xf32>
    %20 = vector.broadcast %19 : vector<1x128xf32> to vector<16x128xf32>
    %21 = arith.addf %18, %20 : vector<16x128xf32>
    %cst_21 = arith.constant 0.000000e+00 : f32
    %22 = vector.broadcast %cst_21 : f32 to vector<16x128xf32>
    %23 = arith.maximumf %21, %22 : vector<16x128xf32>
    %24 = arith.truncf %23 : vector<16x128xf32> to vector<16x128xbf16>
    %c0_22 = arith.constant 0 : index
    %c0_23 = arith.constant 0 : index
    %25 = vector.load %arg4[%c0_22, %c0_23] : memref<16x128xbf16, #tpu.memory_space<vmem>>, vector<16x128xbf16>
    tpu.vector_store %arg4[%c0_22, %c0_23], %24 {strides = array<i32>} : memref<16x128xbf16, #tpu.memory_space<vmem>>, vector<16x128xbf16>,
    return
  }
  func.func @transform_0(%arg0: i32) -> (i32, i32, i32) {
    %c0_i32 = arith.constant 0 : i32
    %c0_i32_0 = arith.constant 0 : i32
    %c0_i32_1 = arith.constant 0 : i32
    return %c0_i32, %arg0, %c0_i32_0 : i32, i32, i32
  }
  func.func @transform_1(%arg0: i32) -> (i32, i32) {
    %c0_i32 = arith.constant 0 : i32
    %c0_i32_0 = arith.constant 0 : i32
    %c0_i32_1 = arith.constant 0 : i32
    return %c0_i32, %c0_i32_0 : i32, i32
  }
  func.func @transform_2(%arg0: i32) -> (i32, i32) {
    %c0_i32 = arith.constant 0 : i32
    %c0_i32_0 = arith.constant 0 : i32
    %c0_i32_1 = arith.constant 0 : i32
    return %c0_i32, %c0_i32_0 : i32, i32
  }
  func.func @transform_3(%arg0: i32) -> (i32, i32) {
    %c0_i32 = arith.constant 0 : i32
    %c0_i32_0 = arith.constant 0 : i32
    return %arg0, %c0_i32 : i32, i32
  }
}

module attributes {stable_mosaic.version = 11 : i64} {
  func.func @_fc_kernel(%arg0: i32, %arg1: i32, %arg2: memref<2x2048xbf16, #tpu.memory_space<vmem>>, %arg3: memref<2048x256xbf16, #tpu.memory_space<vmem>>, %arg4: memref<1x256xf32, #tpu.memory_space<vmem>>, %arg5: memref<2x256xbf16, #tpu.memory_space<vmem>>) attributes {dimension_semantics = [#tpu.dimension_semantics<parallel>, #tpu.dimension_semantics<parallel>], iteration_bounds = array<i64: 1, 2>, scalar_prefetch = 0 : i64, scratch_operands = 0 : i64, tpu.core_type = #tpu.core_type<tc>, window_params = [{transform_indices = @transform_0, window_bounds = array<i64: 2, 2048>}, {transform_indices = @transform_1, window_bounds = array<i64: 2048, 256>}, {transform_indices = @transform_2, window_bounds = array<i64: 1, 256>}, {transform_indices = @transform_3, window_bounds = array<i64: 2, 256>}]} {
    %c0 = arith.constant 0 : index
    %c0_0 = arith.constant 0 : index
    %0 = vector.load %arg2[%c0, %c0_0] : memref<2x2048xbf16, #tpu.memory_space<vmem>>, vector<2x2048xbf16>
    %c0_1 = arith.constant 0 : index
    %c0_2 = arith.constant 0 : index
    %1 = vector.load %arg3[%c0_1, %c0_2] : memref<2048x256xbf16, #tpu.memory_space<vmem>>, vector<2048x256xbf16>
    %cst = arith.constant dense<0.000000e+00> : vector<2x256xf32>
    %2 = tpu.matmul %0, %1, %cst {dimension_numbers = #tpu.dot_dimension_numbers<[1], [0], [0], [1], [0, 0, 1, 1], [], []>} : vector<2x2048xbf16>, vector<2048x256xbf16>, vector<2x256xf32> -> vector<2x256xf32>
    %c0_3 = arith.constant 0 : index
    %c0_4 = arith.constant 0 : index
    %3 = vector.load %arg4[%c0_3, %c0_4] : memref<1x256xf32, #tpu.memory_space<vmem>>, vector<1x256xf32>
    %4 = vector.broadcast %3 : vector<1x256xf32> to vector<2x256xf32>
    %5 = arith.addf %2, %4 : vector<2x256xf32>
    %cst_5 = arith.constant 0.000000e+00 : f32
    %6 = vector.broadcast %cst_5 : f32 to vector<2x256xf32>
    %7 = arith.maximumf %5, %6 : vector<2x256xf32>
    %8 = arith.truncf %7 : vector<2x256xf32> to vector<2x256xbf16>
    %c0_6 = arith.constant 0 : index
    %c0_7 = arith.constant 0 : index
    %9 = vector.load %arg5[%c0_6, %c0_7] : memref<2x256xbf16, #tpu.memory_space<vmem>>, vector<2x256xbf16>
    tpu.vector_store %arg5[%c0_6, %c0_7], %8 {strides = array<i32>} : memref<2x256xbf16, #tpu.memory_space<vmem>>, vector<2x256xbf16>,
    return
  }
  func.func @transform_0(%arg0: i32, %arg1: i32) -> (i32, i32) {
    %c0_i32 = arith.constant 0 : i32
    %c0_i32_0 = arith.constant 0 : i32
    return %arg0, %c0_i32 : i32, i32
  }
  func.func @transform_1(%arg0: i32, %arg1: i32) -> (i32, i32) {
    %c0_i32 = arith.constant 0 : i32
    %c0_i32_0 = arith.constant 0 : i32
    return %c0_i32, %arg1 : i32, i32
  }
  func.func @transform_2(%arg0: i32, %arg1: i32) -> (i32, i32) {
    %c0_i32 = arith.constant 0 : i32
    %c0_i32_0 = arith.constant 0 : i32
    return %c0_i32, %arg1 : i32, i32
  }
  func.func @transform_3(%arg0: i32, %arg1: i32) -> (i32, i32) {
    %c0_i32 = arith.constant 0 : i32
    return %arg0, %arg1 : i32, i32
  }
}

module attributes {stable_mosaic.version = 11 : i64} {
  func.func @_fc_kernel(%arg0: i32, %arg1: i32, %arg2: memref<2x512xbf16, #tpu.memory_space<vmem>>, %arg3: memref<512x1536xbf16, #tpu.memory_space<vmem>>, %arg4: memref<1x1536xf32, #tpu.memory_space<vmem>>, %arg5: memref<2x1536xf32, #tpu.memory_space<vmem>>) attributes {dimension_semantics = [#tpu.dimension_semantics<parallel>, #tpu.dimension_semantics<parallel>], iteration_bounds = array<i64: 1, 2>, scalar_prefetch = 0 : i64, scratch_operands = 0 : i64, tpu.core_type = #tpu.core_type<tc>, window_params = [{transform_indices = @transform_0, window_bounds = array<i64: 2, 512>}, {transform_indices = @transform_1, window_bounds = array<i64: 512, 1536>}, {transform_indices = @transform_2, window_bounds = array<i64: 1, 1536>}, {transform_indices = @transform_3, window_bounds = array<i64: 2, 1536>}]} {
    %c0 = arith.constant 0 : index
    %c0_0 = arith.constant 0 : index
    %0 = vector.load %arg2[%c0, %c0_0] : memref<2x512xbf16, #tpu.memory_space<vmem>>, vector<2x512xbf16>
    %c0_1 = arith.constant 0 : index
    %c0_2 = arith.constant 0 : index
    %1 = vector.load %arg3[%c0_1, %c0_2] : memref<512x1536xbf16, #tpu.memory_space<vmem>>, vector<512x1536xbf16>
    %cst = arith.constant dense<0.000000e+00> : vector<2x1536xf32>
    %2 = tpu.matmul %0, %1, %cst {dimension_numbers = #tpu.dot_dimension_numbers<[1], [0], [0], [1], [0, 0, 1, 1], [], []>} : vector<2x512xbf16>, vector<512x1536xbf16>, vector<2x1536xf32> -> vector<2x1536xf32>
    %c0_3 = arith.constant 0 : index
    %c0_4 = arith.constant 0 : index
    %3 = vector.load %arg4[%c0_3, %c0_4] : memref<1x1536xf32, #tpu.memory_space<vmem>>, vector<1x1536xf32>
    %4 = vector.broadcast %3 : vector<1x1536xf32> to vector<2x1536xf32>
    %5 = arith.addf %2, %4 : vector<2x1536xf32>
    %c0_5 = arith.constant 0 : index
    %c0_6 = arith.constant 0 : index
    %6 = vector.load %arg5[%c0_5, %c0_6] : memref<2x1536xf32, #tpu.memory_space<vmem>>, vector<2x1536xf32>
    tpu.vector_store %arg5[%c0_5, %c0_6], %5 {strides = array<i32>} : memref<2x1536xf32, #tpu.memory_space<vmem>>, vector<2x1536xf32>,
    return
  }
  func.func @transform_0(%arg0: i32, %arg1: i32) -> (i32, i32) {
    %c0_i32 = arith.constant 0 : i32
    %c0_i32_0 = arith.constant 0 : i32
    return %arg0, %c0_i32 : i32, i32
  }
  func.func @transform_1(%arg0: i32, %arg1: i32) -> (i32, i32) {
    %c0_i32 = arith.constant 0 : i32
    %c0_i32_0 = arith.constant 0 : i32
    return %c0_i32, %arg1 : i32, i32
  }
  func.func @transform_2(%arg0: i32, %arg1: i32) -> (i32, i32) {
    %c0_i32 = arith.constant 0 : i32
    %c0_i32_0 = arith.constant 0 : i32
    return %c0_i32, %arg1 : i32, i32
  }
  func.func @transform_3(%arg0: i32, %arg1: i32) -> (i32, i32) {
    %c0_i32 = arith.constant 0 : i32
    return %arg0, %arg1 : i32, i32
  }
}

</mosaic_0001>

<bundles_post_ra>
// kernel: font_cnn_forward.5
= control target key start
LH: loop header
LB: loop body
LE: loop exit
PB: predicated region body
PF: predicated region fallthrough
CT: control target
= control target key end

     0   :  { %s3108_s12 = smov 0   ;;  %s3110_s13 = smov 0   ;;  %s3737_s0 = inlined_call_operand.vmem [shape: bf16[4,512,128], index: 0, kind: input, shape index: {}]   ;;  %s3738_s1 = inlined_call_operand.vmem [shape: bf16[128,128], index: 1, kind: input, shape index: {}]   ;;  %s3739_s2 = inlined_call_operand.vmem [shape: f32[1,128], index: 2, kind: input, shape index: {}]   ;;  %s3740_s3 = inlined_call_operand.vmem [shape: bf16[512,128], index: 3, kind: output, shape index: {}]  }
   0x1   :  { %s3112_s14 = smov 0  }
   0x2 LB: > { %s2338_s15 = sadd.s32 4294967295, %s3086_s14   ;;  %s3125_s16 = sadd.s32 1, %s3086_s14   ;;  %s3086_s14 = sphi %s3112_s14, %s3793_s14   ;;  %s3082_s13 = sphi %s3110_s13, %s3792_s13   ;;  %s3078_s12 = sphi %s3108_s12, %s3791_s12  }
   0x3   : > { %s17_s17 = ssub.s32 %s3086_s14, %s3125_s16  ;;  %s20_s18 = sadd.s32 1, %s3082_s13 }
   0x4   : > { %p18_p0 = scmp.eq.s32.totalorder %s17_s17, 0  ;;  %p27_p1 = scmp.ne.s32.totalorder %s3082_s13, %s3078_s12 }
   0x5   : > { %p28_p2 = scmp.eq.s32.totalorder %s3086_s14, 0  ;;  %p2341_p4 = scmp.ge.s32.totalorder %s3086_s14, 2 }
   0x6   : > { %s3134_s19 = scalar_select %p18_p0, %s3082_s13, %s20_s18  }
   0x7   : > { %p29_p3 = por %p28_p2, %p27_p1  ;;  %127 = sbr.rel (%p2341_p4) target bundleno = 48 (0x30), region = 24 }
   0xc   : > { %130 = sbr.rel (!%p29_p3) target bundleno = 48 (0x30), region = 28  ;;  %s132_s20 = sand.u32 (%p29_p3), 1, %s3082_s13  }
   0xd   : > { %s2552_s21 = sshll.u32 (%p29_p3), %s3086_s14, 7  ;;  %s2342_s22 = sshll.u32 (%p29_p3), %s132_s20, 9 }
   0xe   : > { %s3142_s25 = scalar_lea.vmem (%p29_p3), %s3737_s0, %s2552_s21  ;;  %s3147_s26 = scalar_lea.vmem (%p29_p3), [#allocation2], %s2342_s22 }
   0xf   : > { %v154_v0 = vld [vmem:[%s3142_s25] sm:$0xff] (%p29_p3)   ;;  %v158_v1 = vld [vmem:[%s3142_s25 + $0x8] sm:$0xff] (%p29_p3)   ;;  %v162_v2 = vld [vmem:[%s3142_s25 + $0x10] sm:$0xff] (%p29_p3)  }
  0x10   : > { %155 = vst [vmem:[%s3147_s26] sm:$0xff] (%p29_p3), %v154_v0   ;;  %159 = vst [vmem:[%s3147_s26 + $0x8] sm:$0xff] (%p29_p3), %v158_v1   ;;  %v166_v3 = vld [vmem:[%s3142_s25 + $0x18] sm:$0xff] (%p29_p3)   ;;  %v170_v4 = vld [vmem:[%s3142_s25 + $0x20] sm:$0xff] (%p29_p3)  }
  0x11   : > { %163 = vst [vmem:[%s3147_s26 + $0x10] sm:$0xff] %v162_v2   ;;  %v174_v5 = vld [vmem:[%s3142_s25 + $0x28] sm:$0xff]   ;;  %167 = vst [vmem:[%s3147_s26 + $0x18] sm:$0xff] %v166_v3   ;;  %v178_v6 = vld [vmem:[%s3142_s25 + $0x30] sm:$0xff]  }
  0x12   : > { %171 = vst [vmem:[%s3147_s26 + $0x20] sm:$0xff] %v170_v4   ;;  %175 = vst [vmem:[%s3147_s26 + $0x28] sm:$0xff] %v174_v5   ;;  %v182_v7 = vld [vmem:[%s3142_s25 + $0x38] sm:$0xff]   ;;  %v186_v8 = vld [vmem:[%s3142_s25 + $0x40] sm:$0xff]  }
  0x13   : > { %179 = vst [vmem:[%s3147_s26 + $0x30] sm:$0xff] %v178_v6   ;;  %183 = vst [vmem:[%s3147_s26 + $0x38] sm:$0xff] %v182_v7   ;;  %v190_v9 = vld [vmem:[%s3142_s25 + $0x48] sm:$0xff]   ;;  %v194_v10 = vld [vmem:[%s3142_s25 + $0x50] sm:$0xff]  }
  0x14   : > { %187 = vst [vmem:[%s3147_s26 + $0x40] sm:$0xff] %v186_v8   ;;  %v198_v11 = vld [vmem:[%s3142_s25 + $0x58] sm:$0xff]   ;;  %191 = vst [vmem:[%s3147_s26 + $0x48] sm:$0xff] %v190_v9   ;;  %v202_v12 = vld [vmem:[%s3142_s25 + $0x60] sm:$0xff]  }
  0x15   : > { %195 = vst [vmem:[%s3147_s26 + $0x50] sm:$0xff] %v194_v10   ;;  %199 = vst [vmem:[%s3147_s26 + $0x58] sm:$0xff] %v198_v11   ;;  %v206_v13 = vld [vmem:[%s3142_s25 + $0x68] sm:$0xff]   ;;  %v210_v14 = vld [vmem:[%s3142_s25 + $0x70] sm:$0xff]  }
  0x16   : > { %203 = vst [vmem:[%s3147_s26 + $0x60] sm:$0xff] %v202_v12   ;;  %207 = vst [vmem:[%s3147_s26 + $0x68] sm:$0xff] %v206_v13   ;;  %v214_v15 = vld [vmem:[%s3142_s25 + $0x78] sm:$0xff]   ;;  %v218_v16 = vld [vmem:[%s3142_s25 + $0x100] sm:$0xff]  }
  0x17   : > { %211 = vst [vmem:[%s3147_s26 + $0x70] sm:$0xff] %v210_v14   ;;  %v222_v17 = vld [vmem:[%s3142_s25 + $0x108] sm:$0xff]   ;;  %215 = vst [vmem:[%s3147_s26 + $0x78] sm:$0xff] %v214_v15   ;;  %v226_v18 = vld [vmem:[%s3142_s25 + $0x110] sm:$0xff]  }
  0x18   : > { %219 = vst [vmem:[%s3147_s26 + $0x80] sm:$0xff] %v218_v16   ;;  %223 = vst [vmem:[%s3147_s26 + $0x88] sm:$0xff] %v222_v17   ;;  %v230_v19 = vld [vmem:[%s3142_s25 + $0x118] sm:$0xff]   ;;  %v234_v20 = vld [vmem:[%s3142_s25 + $0x120] sm:$0xff]  }
  0x19   : > { %227 = vst [vmem:[%s3147_s26 + $0x90] sm:$0xff] %v226_v18   ;;  %231 = vst [vmem:[%s3147_s26 + $0x98] sm:$0xff] %v230_v19   ;;  %v238_v21 = vld [vmem:[%s3142_s25 + $0x128] sm:$0xff]   ;;  %v242_v22 = vld [vmem:[%s3142_s25 + $0x130] sm:$0xff]  }
  0x1a   : > { %235 = vst [vmem:[%s3147_s26 + $0xa0] sm:$0xff] %v234_v20   ;;  %v246_v23 = vld [vmem:[%s3142_s25 + $0x138] sm:$0xff]   ;;  %239 = vst [vmem:[%s3147_s26 + $0xa8] sm:$0xff] %v238_v21   ;;  %v250_v24 = vld [vmem:[%s3142_s25 + $0x140] sm:$0xff]  }
  0x1b   : > { %243 = vst [vmem:[%s3147_s26 + $0xb0] sm:$0xff] %v242_v22   ;;  %247 = vst [vmem:[%s3147_s26 + $0xb8] sm:$0xff] %v246_v23   ;;  %v254_v25 = vld [vmem:[%s3142_s25 + $0x148] sm:$0xff]   ;;  %v258_v26 = vld [vmem:[%s3142_s25 + $0x150] sm:$0xff]  }
  0x1c   : > { %251 = vst [vmem:[%s3147_s26 + $0xc0] sm:$0xff] %v250_v24   ;;  %255 = vst [vmem:[%s3147_s26 + $0xc8] sm:$0xff] %v254_v25   ;;  %v262_v27 = vld [vmem:[%s3142_s25 + $0x158] sm:$0xff]   ;;  %v266_v28 = vld [vmem:[%s3142_s25 + $0x160] sm:$0xff]  }
  0x1d   : > { %259 = vst [vmem:[%s3147_s26 + $0xd0] sm:$0xff] %v258_v26   ;;  %v270_v29 = vld [vmem:[%s3142_s25 + $0x168] sm:$0xff]   ;;  %263 = vst [vmem:[%s3147_s26 + $0xd8] sm:$0xff] %v262_v27   ;;  %v274_v30 = vld [vmem:[%s3142_s25 + $0x170] sm:$0xff]  }
  0x1e   : > { %267 = vst [vmem:[%s3147_s26 + $0xe0] sm:$0xff] %v266_v28   ;;  %271 = vst [vmem:[%s3147_s26 + $0xe8] sm:$0xff] %v270_v29   ;;  %v278_v31 = vld [vmem:[%s3142_s25 + $0x178] sm:$0xff]   ;;  %v282_v32 = vld [vmem:[%s3142_s25 + $0x200] sm:$0xff]  }
  0x1f   : > { %275 = vst [vmem:[%s3147_s26 + $0xf0] sm:$0xff] %v274_v30   ;;  %279 = vst [vmem:[%s3147_s26 + $0xf8] sm:$0xff] %v278_v31   ;;  %v286_v33 = vld [vmem:[%s3142_s25 + $0x208] sm:$0xff]   ;;  %v290_v34 = vld [vmem:[%s3142_s25 + $0x210] sm:$0xff]  }
  0x20   : > { %283 = vst [vmem:[%s3147_s26 + $0x100] sm:$0xff] %v282_v32   ;;  %v294_v35 = vld [vmem:[%s3142_s25 + $0x218] sm:$0xff]   ;;  %287 = vst [vmem:[%s3147_s26 + $0x108] sm:$0xff] %v286_v33   ;;  %v298_v36 = vld [vmem:[%s3142_s25 + $0x220] sm:$0xff]  }
  0x21   : > { %291 = vst [vmem:[%s3147_s26 + $0x110] sm:$0xff] %v290_v34   ;;  %295 = vst [vmem:[%s3147_s26 + $0x118] sm:$0xff] %v294_v35   ;;  %v302_v37 = vld [vmem:[%s3142_s25 + $0x228] sm:$0xff]   ;;  %v306_v38 = vld [vmem:[%s3142_s25 + $0x230] sm:$0xff]  }
  0x22   : > { %299 = vst [vmem:[%s3147_s26 + $0x120] sm:$0xff] %v298_v36   ;;  %303 = vst [vmem:[%s3147_s26 + $0x128] sm:$0xff] %v302_v37   ;;  %v310_v39 = vld [vmem:[%s3142_s25 + $0x238] sm:$0xff]   ;;  %v314_v40 = vld [vmem:[%s3142_s25 + $0x240] sm:$0xff]  }
  0x23   : > { %307 = vst [vmem:[%s3147_s26 + $0x130] sm:$0xff] %v306_v38   ;;  %v318_v41 = vld [vmem:[%s3142_s25 + $0x248] sm:$0xff]   ;;  %311 = vst [vmem:[%s3147_s26 + $0x138] sm:$0xff] %v310_v39   ;;  %v322_v42 = vld [vmem:[%s3142_s25 + $0x250] sm:$0xff]  }
  0x24   : > { %315 = vst [vmem:[%s3147_s26 + $0x140] sm:$0xff] %v314_v40   ;;  %319 = vst [vmem:[%s3147_s26 + $0x148] sm:$0xff] %v318_v41   ;;  %v326_v43 = vld [vmem:[%s3142_s25 + $0x258] sm:$0xff]   ;;  %v330_v44 = vld [vmem:[%s3142_s25 + $0x260] sm:$0xff]  }
  0x25   : > { %323 = vst [vmem:[%s3147_s26 + $0x150] sm:$0xff] %v322_v42   ;;  %327 = vst [vmem:[%s3147_s26 + $0x158] sm:$0xff] %v326_v43   ;;  %v334_v45 = vld [vmem:[%s3142_s25 + $0x268] sm:$0xff]   ;;  %v338_v46 = vld [vmem:[%s3142_s25 + $0x270] sm:$0xff]  }
  0x26   : > { %331 = vst [vmem:[%s3147_s26 + $0x160] sm:$0xff] %v330_v44   ;;  %v342_v47 = vld [vmem:[%s3142_s25 + $0x278] sm:$0xff]   ;;  %335 = vst [vmem:[%s3147_s26 + $0x168] sm:$0xff] %v334_v45   ;;  %v346_v48 = vld [vmem:[%s3142_s25 + $0x300] sm:$0xff]  }
  0x27   : > { %339 = vst [vmem:[%s3147_s26 + $0x170] sm:$0xff] %v338_v46   ;;  %343 = vst [vmem:[%s3147_s26 + $0x178] sm:$0xff] %v342_v47   ;;  %v350_v49 = vld [vmem:[%s3142_s25 + $0x308] sm:$0xff]   ;;  %v354_v50 = vld [vmem:[%s3142_s25 + $0x310] sm:$0xff]  }
  0x28   : > { %347 = vst [vmem:[%s3147_s26 + $0x180] sm:$0xff] %v346_v48   ;;  %351 = vst [vmem:[%s3147_s26 + $0x188] sm:$0xff] %v350_v49   ;;  %v358_v51 = vld [vmem:[%s3142_s25 + $0x318] sm:$0xff]   ;;  %v362_v52 = vld [vmem:[%s3142_s25 + $0x320] sm:$0xff]  }
  0x29   : > { %355 = vst [vmem:[%s3147_s26 + $0x190] sm:$0xff] %v354_v50   ;;  %v366_v53 = vld [vmem:[%s3142_s25 + $0x328] sm:$0xff]   ;;  %359 = vst [vmem:[%s3147_s26 + $0x198] sm:$0xff] %v358_v51   ;;  %v370_v54 = vld [vmem:[%s3142_s25 + $0x330] sm:$0xff]  }
  0x2a   : > { %363 = vst [vmem:[%s3147_s26 + $0x1a0] sm:$0xff] %v362_v52   ;;  %367 = vst [vmem:[%s3147_s26 + $0x1a8] sm:$0xff] %v366_v53   ;;  %v374_v55 = vld [vmem:[%s3142_s25 + $0x338] sm:$0xff]   ;;  %v378_v56 = vld [vmem:[%s3142_s25 + $0x340] sm:$0xff]  }
  0x2b   : > { %371 = vst [vmem:[%s3147_s26 + $0x1b0] sm:$0xff] %v370_v54   ;;  %375 = vst [vmem:[%s3147_s26 + $0x1b8] sm:$0xff] %v374_v55   ;;  %v382_v57 = vld [vmem:[%s3142_s25 + $0x348] sm:$0xff]   ;;  %v386_v58 = vld [vmem:[%s3142_s25 + $0x350] sm:$0xff]  }
  0x2c   : > { %379 = vst [vmem:[%s3147_s26 + $0x1c0] sm:$0xff] %v378_v56   ;;  %v390_v59 = vld [vmem:[%s3142_s25 + $0x358] sm:$0xff]   ;;  %383 = vst [vmem:[%s3147_s26 + $0x1c8] sm:$0xff] %v382_v57   ;;  %v394_v60 = vld [vmem:[%s3142_s25 + $0x360] sm:$0xff]  }
  0x2d   : > { %387 = vst [vmem:[%s3147_s26 + $0x1d0] sm:$0xff] %v386_v58   ;;  %391 = vst [vmem:[%s3147_s26 + $0x1d8] sm:$0xff] %v390_v59   ;;  %v398_v61 = vld [vmem:[%s3142_s25 + $0x368] sm:$0xff]   ;;  %v402_v62 = vld [vmem:[%s3142_s25 + $0x370] sm:$0xff]  }
  0x2e   : > { %395 = vst [vmem:[%s3147_s26 + $0x1e0] sm:$0xff] %v394_v60   ;;  %399 = vst [vmem:[%s3147_s26 + $0x1e8] sm:$0xff] %v398_v61   ;;  %v406_v63 = vld [vmem:[%s3142_s25 + $0x378] sm:$0xff]  }
  0x2f   : > { %403 = vst [vmem:[%s3147_s26 + $0x1f0] sm:$0xff] %v402_v62   ;;  %407 = vst [vmem:[%s3147_s26 + $0x1f8] sm:$0xff] %v406_v63  }
  0x30 PF: > { %p2345_p5 = scmp.ge.s32.totalorder %s3086_s14, 1  ;;  %p688_p6 = scmp.lt.s32.totalorder %s3086_s14, 3 }
  0x32   : > { %p689_p7 = pnand %p2345_p5, %p688_p6 }
  0x34   : > { %692 = sbr.rel (%p689_p7) target bundleno = 420 (0x1a4), region = 69 }
  0x39   : > { %v2992_v0 = vld [vmem:[%s3738_s1 + $0x38] sm:$0xff]   ;;  %s695_s29 = sand.u32 1, %s3078_s12   ;;  %v2993_v1 = vld [vmem:[%s3738_s1 + $0x30] sm:$0xff]   ;;  %v3286_v2 = vld [vmem:[%s3738_s1 + $0x28] sm:$0xff]   ;;  %s2347_s24 = sshll.u32 %s2338_s15, 5 }
  0x3a   : > { %2776 = vmatprep.subr.bf16.mxu0 %v2992_v0  ;;  %2824 = vmatprep.subr.bf16.mxu1 %v2992_v0  ;;  %s2346_s5 = sshll.u32 %s695_s29, 9  ;;  %v3291_v3 = vld [vmem:[%s3738_s1 + $0x20] sm:$0xff]   ;;  %v3306_v6 = vld [vmem:[%s3738_s1 + $0x18] sm:$0xff]   ;;  %v3315_v7 = vld [vmem:[%s3738_s1 + $0x10] sm:$0xff]   ;;  %p720_p8 = scmp.lt.s32.totalorder %s2347_s24, 63 }
  0x3b   : > { %2777 = vmatpush3.bf16.msra.mxu0 %v2992_v0  ;;  %2825 = vmatpush3.bf16.msra.mxu1 %v2992_v0  ;;  %s3295_s10 = scalar_lea.vmem [#allocation2], %s2346_s5  ;;  %v3324_v8 = vld [vmem:[%s3738_s1 + $0x8] sm:$0xff]   ;;  %v3333_v9 = vld [vmem:[%s3738_s1] sm:$0xff]  }
  0x3c   : > { %2778 = vmatprep.subr.bf16.mxu0 %v2993_v1  ;;  %2826 = vmatprep.subr.bf16.mxu1 %v2993_v1  ;;  %v3000_v4 = vld [vmem:[%s3295_s10] sm:$0xff]   ;;  %v3002_v10 = vld [vmem:[%s3295_s10 + $0x8] sm:$0xff]   ;;  %v3004_v12 = vld [vmem:[%s3295_s10 + $0x10] sm:$0xff]   ;;  %s3795_s24 = smov (!%p720_p8, %s2347_s24), 63 }
  0x3d   : > { %v3001_v5 = vld [vmem:[%s3295_s10 + $0x80] sm:$0xff]   ;;  %2792 = vmatprep.mubr.bf16.mxu0 %v3000_v4  ;;  %v3003_v11 = vld [vmem:[%s3295_s10 + $0x88] sm:$0xff]   ;;  %v3005_v13 = vld [vmem:[%s3295_s10 + $0x90] sm:$0xff]   ;;  %s2348_s15 = sshll.u32 %s3795_s24, 2 }
  0x3e   : > { %2840 = vmatprep.mubr.bf16.mxu1 %v3001_v5  ;;  %v3006_v14 = vld [vmem:[%s3295_s10 + $0x18] sm:$0xff]   ;;  %v3008_v16 = vld [vmem:[%s3295_s10 + $0x20] sm:$0xff]   ;;  %v3010_v18 = vld [vmem:[%s3295_s10 + $0x28] sm:$0xff]   ;;  %s3621_s28 = scalar_lea.vmem %s3740_s3, %s2348_s15 }
  0x3f   : > { %2779 = vmatpush3.bf16.msra.mxu0 %v2993_v1  ;;  %2827 = vmatpush3.bf16.msra.mxu1 %v2993_v1  ;;  %v3007_v15 = vld [vmem:[%s3295_s10 + $0x98] sm:$0xff]   ;;  %v3009_v17 = vld [vmem:[%s3295_s10 + $0xa0] sm:$0xff]   ;;  %v3011_v19 = vld [vmem:[%s3295_s10 + $0xa8] sm:$0xff]  }
  0x40   : > { %2780 = vmatprep.subr.bf16.mxu0 %v3286_v2  ;;  %2828 = vmatprep.subr.bf16.mxu1 %v3286_v2  ;;  %v3012_v20 = vld [vmem:[%s3295_s10 + $0x30] sm:$0xff]   ;;  %v3014_v22 = vld [vmem:[%s3295_s10 + $0x38] sm:$0xff]   ;;  %v3016_v24 = vld [vmem:[%s3295_s10 + $0x40] sm:$0xff]  }
  0x41   : > { %v3013_v21 = vld [vmem:[%s3295_s10 + $0xb0] sm:$0xff]   ;;  %v3015_v23 = vld [vmem:[%s3295_s10 + $0xb8] sm:$0xff]   ;;  %v3017_v25 = vld [vmem:[%s3295_s10 + $0xc0] sm:$0xff]  }
  0x42   : > { %v3018_v26 = vld [vmem:[%s3295_s10 + $0x48] sm:$0xff]   ;;  %v3020_v28 = vld [vmem:[%s3295_s10 + $0x50] sm:$0xff]   ;;  %v3022_v30 = vld [vmem:[%s3295_s10 + $0x58] sm:$0xff]  }
  0x43   : > { %2781 = vmatpush3.bf16.msra.mxu0 %v3286_v2  ;;  %2829 = vmatpush3.bf16.msra.mxu1 %v3286_v2  ;;  %v3019_v27 = vld [vmem:[%s3295_s10 + $0xc8] sm:$0xff]   ;;  %v3021_v29 = vld [vmem:[%s3295_s10 + $0xd0] sm:$0xff]   ;;  %v3023_v31 = vld [vmem:[%s3295_s10 + $0xd8] sm:$0xff]  }
  0x44   : > { %2782 = vmatprep.subr.bf16.mxu0 %v3291_v3  ;;  %2830 = vmatprep.subr.bf16.mxu1 %v3291_v3  ;;  %v3024_v32 = vld [vmem:[%s3295_s10 + $0x60] sm:$0xff]   ;;  %v3026_v34 = vld [vmem:[%s3295_s10 + $0x68] sm:$0xff]   ;;  %v3028_v36 = vld [vmem:[%s3295_s10 + $0x70] sm:$0xff]  }
  0x45   : > { %v3025_v33 = vld [vmem:[%s3295_s10 + $0xe0] sm:$0xff]   ;;  %v3027_v35 = vld [vmem:[%s3295_s10 + $0xe8] sm:$0xff]   ;;  %v3029_v37 = vld [vmem:[%s3295_s10 + $0xf0] sm:$0xff]  }
  0x46   : > { %v3030_v38 = vld [vmem:[%s3295_s10 + $0x78] sm:$0xff]   ;;  %v3032_v40 = vld [vmem:[%s3295_s10 + $0x100] sm:$0xff]   ;;  %v3034_v42 = vld [vmem:[%s3295_s10 + $0x108] sm:$0xff]  }
  0x47   : > { %2783 = vmatpush3.bf16.msra.mxu0 %v3291_v3  ;;  %2831 = vmatpush3.bf16.msra.mxu1 %v3291_v3  ;;  %v3031_v39 = vld [vmem:[%s3295_s10 + $0xf8] sm:$0xff]   ;;  %v3033_v41 = vld [vmem:[%s3295_s10 + $0x180] sm:$0xff]   ;;  %v3035_v43 = vld [vmem:[%s3295_s10 + $0x188] sm:$0xff]  }
  0x48   : > { %2784 = vmatprep.subr.bf16.mxu0 %v3306_v6  ;;  %2832 = vmatprep.subr.bf16.mxu1 %v3306_v6  ;;  %v3036_v44 = vld [vmem:[%s3295_s10 + $0x110] sm:$0xff]   ;;  %v3038_v46 = vld [vmem:[%s3295_s10 + $0x118] sm:$0xff]   ;;  %v3040_v48 = vld [vmem:[%s3295_s10 + $0x120] sm:$0xff]  }
  0x49   : > { %v3037_v45 = vld [vmem:[%s3295_s10 + $0x190] sm:$0xff]   ;;  %v3039_v47 = vld [vmem:[%s3295_s10 + $0x198] sm:$0xff]   ;;  %v3041_v49 = vld [vmem:[%s3295_s10 + $0x1a0] sm:$0xff]  }
  0x4a   : > { %v3042_v50 = vld [vmem:[%s3295_s10 + $0x128] sm:$0xff]   ;;  %v3044_v52 = vld [vmem:[%s3295_s10 + $0x130] sm:$0xff]   ;;  %v3046_v54 = vld [vmem:[%s3295_s10 + $0x138] sm:$0xff]  }
  0x4b   : > { %2785 = vmatpush3.bf16.msra.mxu0 %v3306_v6  ;;  %2833 = vmatpush3.bf16.msra.mxu1 %v3306_v6  ;;  %v3043_v51 = vld [vmem:[%s3295_s10 + $0x1a8] sm:$0xff]   ;;  %v3045_v53 = vld [vmem:[%s3295_s10 + $0x1b0] sm:$0xff]   ;;  %v3047_v55 = vld [vmem:[%s3295_s10 + $0x1b8] sm:$0xff]  }
  0x4c   : > { %2786 = vmatprep.subr.bf16.mxu0 %v3315_v7  ;;  %2834 = vmatprep.subr.bf16.mxu1 %v3315_v7  ;;  %v3048_v56 = vld [vmem:[%s3295_s10 + $0x140] sm:$0xff]   ;;  %v3050_v58 = vld [vmem:[%s3295_s10 + $0x148] sm:$0xff]   ;;  %v3052_v60 = vld [vmem:[%s3295_s10 + $0x150] sm:$0xff]  }
  0x4d   : > { %v3049_v57 = vld [vmem:[%s3295_s10 + $0x1c0] sm:$0xff]   ;;  %v3051_v59 = vld [vmem:[%s3295_s10 + $0x1c8] sm:$0xff]   ;;  %v3053_v61 = vld [vmem:[%s3295_s10 + $0x1d0] sm:$0xff]  }
  0x4e   : > { %v3054_v62 = vld [vmem:[%s3295_s10 + $0x158] sm:$0xff]   ;;  %v3060_v4 = vld [vmem:[%s3295_s10 + $0x170] sm:$0xff]  }
  0x4f   : > { %2787 = vmatpush3.bf16.msra.mxu0 %v3315_v7  ;;  %2835 = vmatpush3.bf16.msra.mxu1 %v3315_v7  ;;  %v3055_v63 = vld [vmem:[%s3295_s10 + $0x1d8] sm:$0xff]   ;;  %v3061_v5 = vld [vmem:[%s3295_s10 + $0x1f0] sm:$0xff]  }
  0x50   : > { %2788 = vmatprep.subr.bf16.mxu0 %v3324_v8  ;;  %2836 = vmatprep.subr.bf16.mxu1 %v3324_v8 }
  0x53   : > { %2789 = vmatpush3.bf16.msra.mxu0 %v3324_v8  ;;  %2837 = vmatpush3.bf16.msra.mxu1 %v3324_v8 }
  0x54   : > { %2790 = vmatprep.subr.bf16.mxu0 %v3333_v9  ;;  %2838 = vmatprep.subr.bf16.mxu1 %v3333_v9 }
  0x57   : > { %2791 = vmatpush3.bf16.msra.mxu0 %v3333_v9  ;;  %2839 = vmatpush3.bf16.msra.mxu1 %v3333_v9 }
  0x58   : > { %2872 = vmatprep.subr.bf16.mxu0 %v2992_v0  ;;  %2920 = vmatprep.subr.bf16.mxu1 %v2992_v0 }
  0x5a   : > { %2793 = vmatmul.mubr.bf16.vlgmr.msra.gmra.mxu0 %v3002_v10  ;;  %2841 = vmatmul.mubr.bf16.vlgmr.msra.gmra.mxu1 %v3003_v11 }
  0x5b   : > { %2873 = vmatpush3.bf16.msra.mxu0 %v2992_v0  ;;  %2921 = vmatpush3.bf16.msra.mxu1 %v2992_v0  ;;  %v3056_v0 = vld [vmem:[%s3295_s10 + $0x160] sm:$0xff]  }
  0x5c   : > { %2796 = vmatprep.mubr.bf16.mxu0 %v3004_v12  ;;  %2844 = vmatprep.mubr.bf16.mxu1 %v3005_v13 }
  0x5d   : > { %2874 = vmatprep.subr.bf16.mxu0 %v2993_v1  ;;  %2922 = vmatprep.subr.bf16.mxu1 %v2993_v1 }
  0x5f   : > { %2875 = vmatpush3.bf16.msra.mxu0 %v2993_v1  ;;  %2923 = vmatpush3.bf16.msra.mxu1 %v2993_v1  ;;  %v3057_v1 = vld [vmem:[%s3295_s10 + $0x1e0] sm:$0xff]  }
  0x60   : > { %2876 = vmatprep.subr.bf16.mxu0 %v3286_v2  ;;  %2924 = vmatprep.subr.bf16.mxu1 %v3286_v2 }
  0x62   : > { %2797 = vmatmul.mubr.bf16.gmra.mxu0 %v3006_v14  ;;  %2845 = vmatmul.mubr.bf16.gmra.mxu1 %v3007_v15 }
  0x63   : > { %2800 = vmatprep.mubr.bf16.mxu0 %v3008_v16  ;;  %2848 = vmatprep.mubr.bf16.mxu1 %v3009_v17 }
  0x64   : > { %2877 = vmatpush3.bf16.msra.mxu0 %v3286_v2  ;;  %2925 = vmatpush3.bf16.msra.mxu1 %v3286_v2  ;;  %v3058_v2 = vld [vmem:[%s3295_s10 + $0x168] sm:$0xff]  }
  0x65   : > { %2878 = vmatprep.subr.bf16.mxu0 %v3291_v3  ;;  %2926 = vmatprep.subr.bf16.mxu1 %v3291_v3 }
  0x68   : > { %2879 = vmatpush3.bf16.msra.mxu0 %v3291_v3  ;;  %2927 = vmatpush3.bf16.msra.mxu1 %v3291_v3  ;;  %v3059_v3 = vld [vmem:[%s3295_s10 + $0x1e8] sm:$0xff]  }
  0x69   : > { %2880 = vmatprep.subr.bf16.mxu0 %v3306_v6  ;;  %2928 = vmatprep.subr.bf16.mxu1 %v3306_v6 }
  0x6a   : > { %2801 = vmatmul.mubr.bf16.gmra.mxu0 %v3010_v18  ;;  %2849 = vmatmul.mubr.bf16.gmra.mxu1 %v3011_v19 }
  0x6b   : > { %2804 = vmatprep.mubr.bf16.mxu0 %v3012_v20  ;;  %2852 = vmatprep.mubr.bf16.mxu1 %v3013_v21 }
  0x6c   : > { %2881 = vmatpush3.bf16.msra.mxu0 %v3306_v6  ;;  %2929 = vmatpush3.bf16.msra.mxu1 %v3306_v6  ;;  %v3062_v6 = vld [vmem:[%s3295_s10 + $0x178] sm:$0xff]  }
  0x6d   : > { %2882 = vmatprep.subr.bf16.mxu0 %v3315_v7  ;;  %2930 = vmatprep.subr.bf16.mxu1 %v3315_v7 }
  0x70   : > { %2883 = vmatpush3.bf16.msra.mxu0 %v3315_v7  ;;  %2931 = vmatpush3.bf16.msra.mxu1 %v3315_v7  ;;  %v3063_v7 = vld [vmem:[%s3295_s10 + $0x1f8] sm:$0xff]  }
  0x71   : > { %2884 = vmatprep.subr.bf16.mxu0 %v3324_v8  ;;  %2932 = vmatprep.subr.bf16.mxu1 %v3324_v8 }
  0x72   : > { %2805 = vmatmul.mubr.bf16.gmra.mxu0 %v3014_v22  ;;  %2853 = vmatmul.mubr.bf16.gmra.mxu1 %v3015_v23 }
  0x73   : > { %2808 = vmatprep.mubr.bf16.mxu0 %v3016_v24  ;;  %2856 = vmatprep.mubr.bf16.mxu1 %v3017_v25 }
  0x74   : > { %2885 = vmatpush3.bf16.msra.mxu0 %v3324_v8  ;;  %2933 = vmatpush3.bf16.msra.mxu1 %v3324_v8 }
  0x75   : > { %2886 = vmatprep.subr.bf16.mxu0 %v3333_v9  ;;  %2934 = vmatprep.subr.bf16.mxu1 %v3333_v9 }
  0x78   : > { %2887 = vmatpush3.bf16.msra.mxu0 %v3333_v9  ;;  %2935 = vmatpush3.bf16.msra.mxu1 %v3333_v9 }
  0x7a   : > { %2809 = vmatmul.mubr.bf16.gmra.mxu0 %v3018_v26  ;;  %2857 = vmatmul.mubr.bf16.gmra.mxu1 %v3019_v27 }
  0x7b   : > { %2812 = vmatprep.mubr.bf16.mxu0 %v3020_v28  ;;  %2860 = vmatprep.mubr.bf16.mxu1 %v3021_v29 }
  0x82   : > { %2813 = vmatmul.mubr.bf16.gmra.mxu0 %v3022_v30  ;;  %2861 = vmatmul.mubr.bf16.gmra.mxu1 %v3023_v31 }
  0x83   : > { %2816 = vmatprep.mubr.bf16.mxu0 %v3024_v32  ;;  %2864 = vmatprep.mubr.bf16.mxu1 %v3025_v33 }
  0x8a   : > { %2817 = vmatmul.mubr.bf16.gmra.mxu0 %v3026_v34  ;;  %2865 = vmatmul.mubr.bf16.gmra.mxu1 %v3027_v35 }
  0x8b   : > { %2820 = vmatprep.mubr.bf16.mxu0 %v3028_v36  ;;  %2868 = vmatprep.mubr.bf16.mxu1 %v3029_v37 }
  0x92   : > { %2821 = vmatmul.mubr.bf16.gmra.mxu0 %v3030_v38  ;;  %2869 = vmatmul.mubr.bf16.gmra.mxu1 %v3031_v39 }
  0x93   : > { %2888 = vmatprep.mubr.bf16.mxu0 %v3032_v40  ;;  %2936 = vmatprep.mubr.bf16.mxu1 %v3033_v41 }
  0x9a   : > { %2889 = vmatmul.mubr.bf16.vlgmr.msra.gmra.mxu0 %v3034_v42  ;;  %2937 = vmatmul.mubr.bf16.vlgmr.msra.gmra.mxu1 %v3035_v43 }
  0x9b   : > { %2892 = vmatprep.mubr.bf16.mxu0 %v3036_v44  ;;  %2940 = vmatprep.mubr.bf16.mxu1 %v3037_v45 }
  0xa2   : > { %2893 = vmatmul.mubr.bf16.gmra.mxu0 %v3038_v46  ;;  %2941 = vmatmul.mubr.bf16.gmra.mxu1 %v3039_v47 }
  0xa3   : > { %2896 = vmatprep.mubr.bf16.mxu0 %v3040_v48  ;;  %2944 = vmatprep.mubr.bf16.mxu1 %v3041_v49 }
  0xaa   : > { %2897 = vmatmul.mubr.bf16.gmra.mxu0 %v3042_v50  ;;  %2945 = vmatmul.mubr.bf16.gmra.mxu1 %v3043_v51 }
  0xab   : > { %2900 = vmatprep.mubr.bf16.mxu0 %v3044_v52  ;;  %2948 = vmatprep.mubr.bf16.mxu1 %v3045_v53 }
  0xb2   : > { %2901 = vmatmul.mubr.bf16.gmra.mxu0 %v3046_v54  ;;  %2949 = vmatmul.mubr.bf16.gmra.mxu1 %v3047_v55 }
  0xb3   : > { %2904 = vmatprep.mubr.bf16.mxu0 %v3048_v56  ;;  %2952 = vmatprep.mubr.bf16.mxu1 %v3049_v57 }
  0xba   : > { %2905 = vmatmul.mubr.bf16.gmra.mxu0 %v3050_v58  ;;  %2953 = vmatmul.mubr.bf16.gmra.mxu1 %v3051_v59 }
  0xbb   : > { %2908 = vmatprep.mubr.bf16.mxu0 %v3052_v60  ;;  %2956 = vmatprep.mubr.bf16.mxu1 %v3053_v61 }
  0xc2   : > { %2909 = vmatmul.mubr.bf16.gmra.mxu0 %v3054_v62  ;;  %2957 = vmatmul.mubr.bf16.gmra.mxu1 %v3055_v63 }
  0xc3   : > { %2912 = vmatprep.mubr.bf16.mxu0 %v3056_v0  ;;  %2960 = vmatprep.mubr.bf16.mxu1 %v3057_v1 }
  0xca   : > { %2913 = vmatmul.mubr.bf16.gmra.mxu0 %v3058_v2  ;;  %2961 = vmatmul.mubr.bf16.gmra.mxu1 %v3059_v3 }
  0xcb   : > { %2916 = vmatprep.mubr.bf16.mxu0 %v3060_v4  ;;  %2964 = vmatprep.mubr.bf16.mxu1 %v3061_v5 }
  0xd2   : > { %2917 = vmatmul.mubr.bf16.gmra.mxu0 %v3062_v6  ;;  %2965 = vmatmul.mubr.bf16.gmra.mxu1 %v3063_v7 }
 0x11a   : > { %v3427_v8 = vpop.f32.mrf.mxu0  ;;  %v3429_v9 = vpop.f32.mrf.mxu1 }
 0x11b   : > { %v3761_v6 = vmax.f32 %v3427_v8, %v3429_v9 }
 0x11c   : > { %v3433_v11 = vpop.f32.mrf.mxu0  ;;  %v3435_v12 = vpop.f32.mrf.mxu1 }
 0x11e   : > { %v3439_v14 = vpop.f32.mrf.mxu0  ;;  %v3441_v15 = vpop.f32.mrf.mxu1 }
 0x11f   : > { %v1372_v63 = vmax.f32 %v3439_v14, %v3441_v15 }
 0x120   : > { %v3443_v16 = vpop.f32.mrf.mxu0  ;;  %v3445_v17 = vpop.f32.mrf.mxu1 }
 0x121   : > { %v1370_v8 = vmax.f32 %v3443_v16, %v3445_v17 }
 0x122   : > { %v3447_v18 = vpop.f32.mrf.mxu0  ;;  %v3449_v19 = vpop.f32.mrf.mxu1 }
 0x123   : > { %v3763_v16 = vmax.f32 %v3447_v18, %v3449_v19 }
 0x124   : > { %v3453_v21 = vpop.f32.mrf.mxu0  ;;  %v3455_v22 = vpop.f32.mrf.mxu1 }
 0x126   : > { %v3459_v24 = vpop.f32.mrf.mxu0  ;;  %v3461_v25 = vpop.f32.mrf.mxu1 }
 0x128   : > { %v3463_v26 = vpop.f32.mrf.mxu0  ;;  %v3465_v27 = vpop.f32.mrf.mxu1 }
 0x12a   : > { %v3467_v28 = vpop.f32.mrf.mxu0  ;;  %v3469_v29 = vpop.f32.mrf.mxu1 }
 0x12c   : > { %v3473_v31 = vpop.f32.mrf.mxu0  ;;  %v3475_v32 = vpop.f32.mrf.mxu1 }
 0x12e   : > { %v3479_v34 = vpop.f32.mrf.mxu0  ;;  %v3481_v35 = vpop.f32.mrf.mxu1 }
 0x130   : > { %v3483_v36 = vpop.f32.mrf.mxu0  ;;  %v3485_v37 = vpop.f32.mrf.mxu1 }
 0x132   : > { %v3487_v38 = vpop.f32.mrf.mxu0  ;;  %v3489_v39 = vpop.f32.mrf.mxu1 }
 0x134   : > { %v3493_v41 = vpop.f32.mrf.mxu0  ;;  %v3495_v42 = vpop.f32.mrf.mxu1 }
 0x136   : > { %v3499_v44 = vpop.f32.mrf.mxu0  ;;  %v3501_v45 = vpop.f32.mrf.mxu1 }
 0x138   : > { %v3503_v46 = vpop.f32.mrf.mxu0  ;;  %v3505_v47 = vpop.f32.mrf.mxu1 }
 0x13a   : > { %v3507_v48 = vpop.f32.mrf.mxu0  ;;  %v3509_v49 = vpop.f32.mrf.mxu1 }
 0x13c   : > { %v3513_v51 = vpop.f32.mrf.mxu0  ;;  %v3515_v52 = vpop.f32.mrf.mxu1 }
 0x13e   : > { %v3519_v54 = vpop.f32.mrf.mxu0  ;;  %v3521_v55 = vpop.f32.mrf.mxu1 }
 0x140   : > { %v3523_v56 = vpop.f32.mrf.mxu0  ;;  %v3525_v57 = vpop.f32.mrf.mxu1 }
 0x142   : > { %v3527_v58 = vpop.f32.mrf.mxu0  ;;  %v3529_v59 = vpop.f32.mrf.mxu1 }
 0x144   : > { %v3533_v61 = vpop.f32.mrf.mxu0  ;;  %v3535_v62 = vpop.f32.mrf.mxu1 }
 0x146   : > { %v3539_v0 = vpop.f32.mrf.mxu0  ;;  %v3541_v1 = vpop.f32.mrf.mxu1 }
 0x148   : > { %v3543_v2 = vpop.f32.mrf.mxu0  ;;  %v3545_v3 = vpop.f32.mrf.mxu1 }
 0x14a   : > { %v3547_v4 = vpop.f32.mrf.mxu0  ;;  %v3549_v5 = vpop.f32.mrf.mxu1 }
 0x14c   : > { %v3553_v7 = vpop.f32.mrf.mxu0  ;;  %v3555_v60 = vpop.f32.mrf.mxu1 }
 0x14d   : > { %3747 = vst [vmem:[#allocation3_spill] sm:$0xff] %v3553_v7  ;;  %3748 = vst [vmem:[#allocation4_spill] sm:$0xff] %v3555_v60 }
 0x14e   : > { %v3559_v53 = vpop.f32.mrf.mxu0  ;;  %v3561_v50 = vpop.f32.mrf.mxu1 }
 0x14f   : > { %3749 = vst [vmem:[#allocation5_spill] sm:$0xff] %v3559_v53  ;;  %3750 = vst [vmem:[#allocation6_spill] sm:$0xff] %v3561_v50 }
 0x150   : > { %v3563_v43 = vpop.f32.mrf.mxu0  ;;  %v3565_v40 = vpop.f32.mrf.mxu1 }
 0x151   : > { %3751 = vst [vmem:[#allocation7_spill] sm:$0xff] %v3563_v43  ;;  %3752 = vst [vmem:[#allocation8_spill] sm:$0xff] %v3565_v40 }
 0x152   : > { %v3567_v33 = vpop.f32.mrf.mxu0  ;;  %v3569_v30 = vpop.f32.mrf.mxu1 }
 0x153   : > { %3753 = vst [vmem:[#allocation9_spill] sm:$0xff] %v3567_v33  ;;  %3754 = vst [vmem:[#allocation10_spill] sm:$0xff] %v3569_v30 }
 0x154   : > { %v3573_v23 = vpop.f32.mrf.mxu0  ;;  %v3575_v20 = vpop.f32.mrf.mxu1 }
 0x155   : > { %3755 = vst [vmem:[#allocation11_spill] sm:$0xff] %v3573_v23  ;;  %3756 = vst [vmem:[#allocation12_spill] sm:$0xff] %v3575_v20 }
 0x156   : > { %v3579_v13 = vpop.f32.mrf.mxu0  ;;  %v3581_v10 = vpop.f32.mrf.mxu1 }
 0x157   : > { %3757 = vst [vmem:[#allocation13_spill] sm:$0xff] %v3579_v13  ;;  %3758 = vst [vmem:[#allocation14_spill] sm:$0xff] %v3581_v10 }
 0x158   : > { %v3583_v43 = vpop.f32.mrf.mxu0  ;;  %v3585_v40 = vpop.f32.mrf.mxu1 }
 0x159   : > { %3759 = vst [vmem:[#allocation15_spill] sm:$0xff] %v3583_v43  ;;  %3760 = vst [vmem:[#allocation16_spill] sm:$0xff] %v3585_v40  ;;  %v3762_v43 = vmax.f32 %v3433_v11, %v3435_v12  ;;  %v3600_v40 = vld [vmem:[%s3739_s2] ss:$0 sm:$0xff] }
 0x15a   : > { %v2890_v60 = vpop.f32.mrf.mxu0  ;;  %v2938_v7 = vpop.f32.mrf.mxu1 }
 0x15b   : > { %v1693_v30 = vmax.f32 %v3761_v6, %v2890_v60 }
 0x15c   : > { %v1564_v33 = vpop.f32.mrf.mxu0  ;;  %v1886_v53 = vpop.f32.mrf.mxu1 }
 0x15d   : > { %v2015_v13 = vmax.f32 %v1693_v30, %v2938_v7  ;;  %v1691_v10 = vmax.f32 %v3762_v43, %v1564_v33 }
 0x15e   : > { %v2891_v20 = vpop.f32.mrf.mxu0  ;;  %v2939_v23 = vpop.f32.mrf.mxu1 }
 0x15f   : > { %v2013_v9 = vmax.f32 %v1691_v10, %v1886_v53  ;;  %v1694_v60 = vmax.f32 %v1372_v63, %v2891_v20  ;;  %v2054_v15 = vadd.f32 %v3600_v40, %v2015_v13 }
 0x160   : > { %v1567_v6 = vpop.f32.mrf.mxu0  ;;  %v1889_v14 = vpop.f32.mrf.mxu1 }
 0x161   : > { %v2016_v30 = vmax.f32 %v1694_v60, %v2939_v23  ;;  %v1692_v11 = vmax.f32 %v1370_v8, %v1567_v6  ;;  %v2052_v43 = vadd.f32 %v3600_v40, %v2013_v9  ;;  %v2086_v53 = vmax.f32 %v2054_v15, 0.0 }
 0x162   : > { %v2894_v12 = vpop.f32.mrf.mxu0  ;;  %v2942_v33 = vpop.f32.mrf.mxu1  ;;  %v3764_v23 = vmax.f32 %v3453_v21, %v3455_v22  ;;  %v1376_v9 = vmax.f32 %v3459_v24, %v3461_v25  ;;  %v1374_v60 = vmax.f32 %v3463_v26, %v3465_v27 }
 0x163   : > { %v2055_v7 = vadd.f32 %v3600_v40, %v2016_v30  ;;  %v2014_v50 = vmax.f32 %v1692_v11, %v1889_v14  ;;  %v1697_v10 = vmax.f32 %v3763_v16, %v2894_v12  ;;  %v2084_v6 = vmax.f32 %v2052_v43, 0.0 }
 0x164   : > { %v1580_v17 = vpop.f32.mrf.mxu0  ;;  %v1902_v20 = vpop.f32.mrf.mxu1  ;;  %v3765_v43 = vmax.f32 %v3467_v28, %v3469_v29 }
 0x165   : > { %v2087_v63 = vmax.f32 %v2055_v7, 0.0  ;;  %v2053_v13 = vadd.f32 %v3600_v40, %v2014_v50  ;;  %v1695_v8 = vmax.f32 %v3764_v23, %v1580_v17  ;;  %v2019_v18 = vmax.f32 %v1697_v10, %v2942_v33 }
 0x166   : > { %v2895_v19 = vpop.f32.mrf.mxu0  ;;  %v2943_v50 = vpop.f32.mrf.mxu1 }
 0x167   : > { %v2593_v14 = vpack.c.bf16 %v2087_v63, %v2086_v53  ;;  %v2085_v21 = vmax.f32 %v2053_v13, 0.0  ;;  %v2017_v22 = vmax.f32 %v1695_v8, %v1902_v20  ;;  %v1698_v15 = vmax.f32 %v1376_v9, %v2895_v19 }
 0x168   : > { %v1583_v30 = vpop.f32.mrf.mxu0  ;;  %v1905_v24 = vpop.f32.mrf.mxu1  ;;  %v2058_v27 = vadd.f32 %v3600_v40, %v2019_v18  ;;  %v1380_v63 = vmax.f32 %v3479_v34, %v3481_v35  ;;  %v3766_v8 = vmax.f32 %v3473_v31, %v3475_v32 }
 0x169   : > { %2665 = vst [vmem:[%s3621_s28 + $0x8] sm:$0xff] %v2593_v14   ;;  %v2588_v25 = vpack.c.bf16 %v2085_v21, %v2084_v6  ;;  %v1696_v26 = vmax.f32 %v1374_v60, %v1583_v30  ;;  %v2020_v11 = vmax.f32 %v1698_v15, %v2943_v50  ;;  %v2056_v33 = vadd.f32 %v3600_v40, %v2017_v22 }
 0x16a   : > { %v2898_v12 = vpop.f32.mrf.mxu0  ;;  %v2946_v7 = vpop.f32.mrf.mxu1  ;;  %v2090_v60 = vmax.f32 %v2058_v27, 0.0  ;;  %v1378_v14 = vmax.f32 %v3483_v36, %v3485_v37  ;;  %v3767_v27 = vmax.f32 %v3487_v38, %v3489_v39  ;;  %v1384_v36 = vmax.f32 %v3499_v44, %v3501_v45 }
 0x16b   : > { %2589 = vst [vmem:[%s3621_s28] sm:$0xff] %v2588_v25   ;;  %v2018_v16 = vmax.f32 %v1696_v26, %v1905_v24  ;;  %v1701_v10 = vmax.f32 %v3765_v43, %v2898_v12  ;;  %v2059_v17 = vadd.f32 %v3600_v40, %v2020_v11  ;;  %v2088_v29 = vmax.f32 %v2056_v33, 0.0 }
 0x16c   : > { %v1596_v20 = vpop.f32.mrf.mxu0  ;;  %v1918_v53 = vpop.f32.mrf.mxu1  ;;  %v1382_v44 = vmax.f32 %v3503_v46, %v3505_v47 }
 0x16d   : > { %v2057_v13 = vadd.f32 %v3600_v40, %v2018_v16  ;;  %v2023_v23 = vmax.f32 %v1701_v10, %v2946_v7  ;;  %v1699_v9 = vmax.f32 %v3766_v8, %v1596_v20  ;;  %v2091_v18 = vmax.f32 %v2059_v17, 0.0 }
 0x16e   : > { %v2899_v19 = vpop.f32.mrf.mxu0  ;;  %v2947_v28 = vpop.f32.mrf.mxu1  ;;  %v3768_v17 = vmax.f32 %v3493_v41, %v3495_v42 }
 0x16f   : > { %v2089_v50 = vmax.f32 %v2057_v13, 0.0  ;;  %v1702_v6 = vmax.f32 %v1380_v63, %v2899_v19  ;;  %v2603_v34 = vpack.c.bf16 %v2091_v18, %v2090_v60  ;;  %v2021_v35 = vmax.f32 %v1699_v9, %v1918_v53 }
 0x170   : > { %v1599_v21 = vpop.f32.mrf.mxu0  ;;  %v1921_v22 = vpop.f32.mrf.mxu1  ;;  %v2062_v31 = vadd.f32 %v3600_v40, %v2023_v23 }
 0x171   : > { %v2598_v15 = vpack.c.bf16 %v2089_v50, %v2088_v29  ;;  %v2024_v32 = vmax.f32 %v1702_v6, %v2947_v28  ;;  %2667 = vst [vmem:[%s3621_s28 + $0x18] sm:$0xff] %v2603_v34   ;;  %v1700_v30 = vmax.f32 %v1378_v14, %v1599_v21  ;;  %v2060_v37 = vadd.f32 %v3600_v40, %v2021_v35 }
 0x172   : > { %v2902_v24 = vpop.f32.mrf.mxu0  ;;  %v2950_v25 = vpop.f32.mrf.mxu1  ;;  %v2094_v16 = vmax.f32 %v2062_v31, 0.0  ;;  %v3769_v6 = vmax.f32 %v3507_v48, %v3509_v49  ;;  %v3770_v31 = vmax.f32 %v3513_v51, %v3515_v52 }
 0x173   : > { %2666 = vst [vmem:[%s3621_s28 + $0x10] sm:$0xff] %v2598_v15   ;;  %v2063_v26 = vadd.f32 %v3600_v40, %v2024_v32  ;;  %v1705_v11 = vmax.f32 %v3767_v27, %v2902_v24  ;;  %v2022_v12 = vmax.f32 %v1700_v30, %v1921_v22  ;;  %v2092_v23 = vmax.f32 %v2060_v37, 0.0 }
 0x174   : > { %v1612_v7 = vpop.f32.mrf.mxu0  ;;  %v1934_v33 = vpop.f32.mrf.mxu1  ;;  %v1388_v30 = vmax.f32 %v3519_v54, %v3521_v55  ;;  %v1386_v24 = vmax.f32 %v3523_v56, %v3525_v57 }
 0x175   : > { %v2095_v43 = vmax.f32 %v2063_v26, 0.0  ;;  %v2027_v10 = vmax.f32 %v1705_v11, %v2950_v25  ;;  %v1703_v20 = vmax.f32 %v3768_v17, %v1612_v7  ;;  %v2061_v53 = vadd.f32 %v3600_v40, %v2022_v12 }
 0x176   : > { %v2903_v38 = vpop.f32.mrf.mxu0  ;;  %v2951_v39 = vpop.f32.mrf.mxu1 }
 0x177   : > { %v2613_v45 = vpack.c.bf16 %v2095_v43, %v2094_v16  ;;  %v2025_v63 = vmax.f32 %v1703_v20, %v1934_v33  ;;  %v1706_v13 = vmax.f32 %v1384_v36, %v2903_v38  ;;  %v2093_v8 = vmax.f32 %v2061_v53, 0.0 }
 0x178   : > { %v1615_v9 = vpop.f32.mrf.mxu0  ;;  %v1937_v60 = vpop.f32.mrf.mxu1  ;;  %v2066_v18 = vadd.f32 %v3600_v40, %v2027_v10  ;;  %v3771_v43 = vmax.f32 %v3527_v58, %v3529_v59  ;;  %v1392_v38 = vmax.f32 %v3539_v0, %v3541_v1 }
 0x179   : > { %2669 = vst [vmem:[%s3621_s28 + $0x28] sm:$0xff] %v2613_v45   ;;  %v2028_v41 = vmax.f32 %v1706_v13, %v2951_v39  ;;  %v1704_v42 = vmax.f32 %v1382_v44, %v1615_v9  ;;  %v2608_v19 = vpack.c.bf16 %v2093_v8, %v2092_v23  ;;  %v2064_v50 = vadd.f32 %v3600_v40, %v2025_v63 }
 0x17a   : > { %v2906_v28 = vpop.f32.mrf.mxu0  ;;  %v2954_v29 = vpop.f32.mrf.mxu1  ;;  %v2098_v21 = vmax.f32 %v2066_v18, 0.0  ;;  %v3772_v45 = vmax.f32 %v3533_v61, %v3535_v62  ;;  %v1390_v18 = vmax.f32 %v3543_v2, %v3545_v3  ;;  %v3774_v2 = vld [vmem:[#allocation6_spill] sm:$0xff]  ;;  %v3775_v3 = vld [vmem:[#allocation5_spill] sm:$0xff] }
 0x17b   : > { %v2067_v46 = vadd.f32 %v3600_v40, %v2028_v41  ;;  %v2026_v47 = vmax.f32 %v1704_v42, %v1937_v60  ;;  %v1709_v14 = vmax.f32 %v3769_v6, %v2906_v28  ;;  %2668 = vst [vmem:[%s3621_s28 + $0x20] sm:$0xff] %v2608_v19   ;;  %v2096_v26 = vmax.f32 %v2064_v50, 0.0 }
 0x17c   : > { %v1628_v34 = vpop.f32.mrf.mxu0  ;;  %v1950_v35 = vpop.f32.mrf.mxu1 }
 0x17d   : > { %v2099_v22 = vmax.f32 %v2067_v46, 0.0  ;;  %v2065_v15 = vadd.f32 %v3600_v40, %v2026_v47  ;;  %v1707_v32 = vmax.f32 %v3770_v31, %v1628_v34  ;;  %v2031_v48 = vmax.f32 %v1709_v14, %v2954_v29 }
 0x17e   : > { %v2907_v49 = vpop.f32.mrf.mxu0  ;;  %v2955_v25 = vpop.f32.mrf.mxu1  ;;  %v3773_v47 = vmax.f32 %v3547_v4, %v3549_v5  ;;  %v1396_v14 = vmax.f32 %v3775_v3, %v3774_v2 }
 0x17f   : > { %v2623_v27 = vpack.c.bf16 %v2099_v22, %v2098_v21  ;;  %v2097_v11 = vmax.f32 %v2065_v15, 0.0  ;;  %v2029_v36 = vmax.f32 %v1707_v32, %v1950_v35  ;;  %v1710_v37 = vmax.f32 %v1388_v30, %v2907_v49  ;;  %v3776_v30 = vld [vmem:[#allocation3_spill] sm:$0xff] }
 0x180   : > { %v1631_v12 = vpop.f32.mrf.mxu0  ;;  %v1953_v7 = vpop.f32.mrf.mxu1  ;;  %v2070_v33 = vadd.f32 %v3600_v40, %v2031_v48 }
 0x181   : > { %2671 = vst [vmem:[%s3621_s28 + $0x38] sm:$0xff] %v2623_v27   ;;  %v2618_v51 = vpack.c.bf16 %v2097_v11, %v2096_v26  ;;  %v1708_v52 = vmax.f32 %v1386_v24, %v1631_v12  ;;  %v2032_v54 = vmax.f32 %v1710_v37, %v2955_v25  ;;  %v2068_v56 = vadd.f32 %v3600_v40, %v2029_v36  ;;  %v3777_v24 = vld [vmem:[#allocation4_spill] sm:$0xff]  ;;  %v3780_v27 = vld [vmem:[#allocation7_spill] sm:$0xff] }
 0x182   : > { %v2910_v55 = vpop.f32.mrf.mxu0  ;;  %v2958_v16 = vpop.f32.mrf.mxu1  ;;  %v2102_v13 = vmax.f32 %v2070_v33, 0.0  ;;  %v3778_v48 = vmax.f32 %v3776_v30, %v3777_v24  ;;  %v3779_v26 = vld [vmem:[#allocation8_spill] sm:$0xff] }
 0x183   : > { %2670 = vst [vmem:[%s3621_s28 + $0x30] sm:$0xff] %v2618_v51   ;;  %v2030_v57 = vmax.f32 %v1708_v52, %v1953_v7  ;;  %v1713_v10 = vmax.f32 %v3771_v43, %v2910_v55  ;;  %v2071_v17 = vadd.f32 %v3600_v40, %v2032_v54  ;;  %v2100_v59 = vmax.f32 %v2068_v56, 0.0 }
 0x184   : > { %v1644_v20 = vpop.f32.mrf.mxu0  ;;  %v1966_v53 = vpop.f32.mrf.mxu1  ;;  %v1394_v11 = vmax.f32 %v3780_v27, %v3779_v26 }
 0x185   : > { %v2069_v39 = vadd.f32 %v3600_v40, %v2030_v57  ;;  %v2035_v44 = vmax.f32 %v1713_v10, %v2958_v16  ;;  %v1711_v63 = vmax.f32 %v3772_v45, %v1644_v20  ;;  %v2103_v23 = vmax.f32 %v2071_v17, 0.0 }
 0x186   : > { %v2911_v8 = vpop.f32.mrf.mxu0  ;;  %v2959_v58 = vpop.f32.mrf.mxu1 }
 0x187   : > { %v2101_v9 = vmax.f32 %v2069_v39, 0.0  ;;  %v1714_v60 = vmax.f32 %v1392_v38, %v2911_v8  ;;  %v2633_v0 = vpack.c.bf16 %v2103_v23, %v2102_v13  ;;  %v2033_v1 = vmax.f32 %v1711_v63, %v1966_v53  ;;  %v3781_v53 = vld [vmem:[#allocation9_spill] sm:$0xff]  ;;  %v3782_v38 = vld [vmem:[#allocation10_spill] sm:$0xff] }
 0x188   : > { %v1647_v41 = vpop.f32.mrf.mxu0  ;;  %v1969_v42 = vpop.f32.mrf.mxu1  ;;  %v2074_v61 = vadd.f32 %v3600_v40, %v2035_v44  ;;  %v3783_v39 = vmax.f32 %v3781_v53, %v3782_v38 }
 0x189   : > { %v2628_v19 = vpack.c.bf16 %v2101_v9, %v2100_v59  ;;  %v2036_v62 = vmax.f32 %v1714_v60, %v2959_v58  ;;  %2673 = vst [vmem:[%s3621_s28 + $0x48] sm:$0xff] %v2633_v0   ;;  %v1712_v28 = vmax.f32 %v1390_v18, %v1647_v41  ;;  %v2072_v34 = vadd.f32 %v3600_v40, %v2033_v1  ;;  %v3784_v58 = vld [vmem:[#allocation11_spill] sm:$0xff]  ;;  %v3785_v59 = vld [vmem:[#allocation12_spill] sm:$0xff]  ;;  %v3787_v18 = vld [vmem:[#allocation14_spill] sm:$0xff] }
 0x18a   : > { %v2914_v29 = vpop.f32.mrf.mxu0  ;;  %v2962_v50 = vpop.f32.mrf.mxu1  ;;  %v2106_v15 = vmax.f32 %v2074_v61, 0.0  ;;  %v3786_v9 = vmax.f32 %v3784_v58, %v3785_v59  ;;  %v3788_v0 = vld [vmem:[#allocation13_spill] sm:$0xff]  ;;  %v3789_v41 = vld [vmem:[#allocation16_spill] sm:$0xff] }
 0x18b   : > { %2672 = vst [vmem:[%s3621_s28 + $0x40] sm:$0xff] %v2628_v19   ;;  %v2075_v46 = vadd.f32 %v3600_v40, %v2036_v62  ;;  %v1717_v6 = vmax.f32 %v3773_v47, %v2914_v29  ;;  %v2034_v35 = vmax.f32 %v1712_v28, %v1969_v42  ;;  %v2104_v7 = vmax.f32 %v2072_v34, 0.0  ;;  %v3790_v42 = vld [vmem:[#allocation15_spill] sm:$0xff] }
 0x18c   : > { %v1660_v21 = vpop.f32.mrf.mxu0  ;;  %v1982_v22 = vpop.f32.mrf.mxu1  ;;  %v1400_v1 = vmax.f32 %v3788_v0, %v3787_v18  ;;  %v1398_v19 = vmax.f32 %v3790_v42, %v3789_v41 }
 0x18d   : > { %v2107_v31 = vmax.f32 %v2075_v46, 0.0  ;;  %v2039_v32 = vmax.f32 %v1717_v6, %v2962_v50  ;;  %v1715_v49 = vmax.f32 %v3778_v48, %v1660_v21  ;;  %v2073_v25 = vadd.f32 %v3600_v40, %v2034_v35 }
 0x18e   : > { %v2915_v4 = vpop.f32.mrf.mxu0  ;;  %v2963_v5 = vpop.f32.mrf.mxu1 }
 0x18f   : > { %v2643_v36 = vpack.c.bf16 %v2107_v31, %v2106_v15  ;;  %v2037_v37 = vmax.f32 %v1715_v49, %v1982_v22  ;;  %v1718_v12 = vmax.f32 %v1396_v14, %v2915_v4  ;;  %v2105_v51 = vmax.f32 %v2073_v25, 0.0 }
 0x190   : > { %v1663_v52 = vpop.f32.mrf.mxu0  ;;  %v1985_v33 = vpop.f32.mrf.mxu1  ;;  %v2078_v54 = vadd.f32 %v3600_v40, %v2039_v32 }
 0x191   : > { %2675 = vst [vmem:[%s3621_s28 + $0x58] sm:$0xff] %v2643_v36   ;;  %v2040_v55 = vmax.f32 %v1718_v12, %v2963_v5  ;;  %v1716_v16 = vmax.f32 %v1394_v11, %v1663_v52  ;;  %v2638_v56 = vpack.c.bf16 %v2105_v51, %v2104_v7  ;;  %v2076_v10 = vadd.f32 %v3600_v40, %v2037_v37 }
 0x192   : > { %v2918_v57 = vpop.f32.mrf.mxu0  ;;  %v2966_v43 = vpop.f32.mrf.mxu1  ;;  %v2110_v13 = vmax.f32 %v2078_v54, 0.0 }
 0x193   : > { %v2079_v17 = vadd.f32 %v3600_v40, %v2040_v55  ;;  %v2038_v20 = vmax.f32 %v1716_v16, %v1985_v33  ;;  %v1721_v44 = vmax.f32 %v3783_v39, %v2918_v57  ;;  %2674 = vst [vmem:[%s3621_s28 + $0x50] sm:$0xff] %v2638_v56   ;;  %v2108_v29 = vmax.f32 %v2076_v10, 0.0 }
 0x194   : > { %v1676_v45 = vpop.f32.mrf.mxu0  ;;  %v1998_v63 = vpop.f32.mrf.mxu1 }
 0x195   : > { %v2111_v23 = vmax.f32 %v2079_v17, 0.0  ;;  %v2077_v8 = vadd.f32 %v3600_v40, %v2038_v20  ;;  %v1719_v60 = vmax.f32 %v3786_v9, %v1676_v45  ;;  %v2043_v61 = vmax.f32 %v1721_v44, %v2966_v43 }
 0x196   : > { %v2919_v62 = vpop.f32.mrf.mxu0  ;;  %v2967_v28 = vpop.f32.mrf.mxu1 }
 0x197   : > { %v2653_v50 = vpack.c.bf16 %v2111_v23, %v2110_v13  ;;  %v2109_v46 = vmax.f32 %v2077_v8, 0.0  ;;  %v2041_v47 = vmax.f32 %v1719_v60, %v1998_v63  ;;  %v1722_v6 = vmax.f32 %v1400_v1, %v2919_v62 }
 0x198   : > { %v1679_v2 = vpop.f32.mrf.mxu0  ;;  %v2082_v34 = vadd.f32 %v3600_v40, %v2043_v61  ;;  %v2001_v21 = vpop.f32.mrf.mxu1 }
 0x199   : > { %2677 = vst [vmem:[%s3621_s28 + $0x68] sm:$0xff] %v2653_v50   ;;  %v2648_v3 = vpack.c.bf16 %v2109_v46, %v2108_v29  ;;  %v1720_v14 = vmax.f32 %v1398_v19, %v1679_v2  ;;  %v2044_v35 = vmax.f32 %v1722_v6, %v2967_v28  ;;  %v2080_v22 = vadd.f32 %v3600_v40, %v2041_v47 }
 0x19a   : > { %v2114_v30 = vmax.f32 %v2082_v34, 0.0 }
 0x19b   : > { %2676 = vst [vmem:[%s3621_s28 + $0x60] sm:$0xff] %v2648_v3   ;;  %v2042_v15 = vmax.f32 %v1720_v14, %v2001_v21  ;;  %v2083_v31 = vadd.f32 %v3600_v40, %v2044_v35  ;;  %v2112_v48 = vmax.f32 %v2080_v22, 0.0 }
 0x19d   : > { %v2081_v32 = vadd.f32 %v3600_v40, %v2042_v15  ;;  %v2115_v24 = vmax.f32 %v2083_v31, 0.0 }
 0x19f   : > { %v2113_v49 = vmax.f32 %v2081_v32, 0.0  ;;  %v2663_v25 = vpack.c.bf16 %v2115_v24, %v2114_v30 }
 0x1a1   : > { %v2658_v4 = vpack.c.bf16 %v2113_v49, %v2112_v48  ;;  %2679 = vst [vmem:[%s3621_s28 + $0x78] sm:$0xff] %v2663_v25  }
 0x1a3   : > { %2678 = vst [vmem:[%s3621_s28 + $0x70] sm:$0xff] %v2658_v4  }
 0x1a4 PF: > { %p10_p9 = scmp.ge.s32.totalorder %s3125_s16, 4   ;;  %s3791_s12 = smov %s3082_s13 }
 0x1a5   : > { %s3792_s13 = smov %s3134_s19  ;;  %s3793_s14 = smov %s3125_s16 }
 0x1a6   :  { %12 = sbr.rel (!%p10_p9) target bundleno = 2 (0x2), region = 111 }

// kernel: font_cnn_forward.6
= control target key start
LH: loop header
LB: loop body
LE: loop exit
PB: predicated region body
PF: predicated region fallthrough
CT: control target
= control target key end

     0   :  { %s2218_s12 = smov 0   ;;  %s2220_s13 = smov 0   ;;  %s2836_s0 = inlined_call_operand.vmem [shape: bf16[4,128,384], index: 0, kind: input, shape index: {}]   ;;  %s2837_s1 = inlined_call_operand.vmem [shape: bf16[384,128], index: 1, kind: input, shape index: {}]   ;;  %s2838_s2 = inlined_call_operand.vmem [shape: f32[1,128], index: 2, kind: input, shape index: {}]   ;;  %s2839_s3 = inlined_call_operand.vmem [shape: bf16[128,128], index: 3, kind: output, shape index: {}]  }
   0x1   :  { %s2222_s14 = smov 0  }
   0x2 LB: > { %s1519_s15 = sadd.s32 4294967295, %s2196_s14   ;;  %s2235_s16 = sadd.s32 1, %s2196_s14   ;;  %s2196_s14 = sphi %s2222_s14, %s2848_s14   ;;  %s2192_s13 = sphi %s2220_s13, %s2847_s13   ;;  %s2188_s12 = sphi %s2218_s12, %s2846_s12  }
   0x3   : > { %s17_s17 = ssub.s32 %s2196_s14, %s2235_s16  ;;  %s20_s18 = sadd.s32 1, %s2192_s13 }
   0x4   : > { %p18_p0 = scmp.eq.s32.totalorder %s17_s17, 0  ;;  %p27_p1 = scmp.ne.s32.totalorder %s2192_s13, %s2188_s12 }
   0x5   : > { %p28_p2 = scmp.eq.s32.totalorder %s2196_s14, 0  ;;  %p1522_p4 = scmp.ge.s32.totalorder %s2196_s14, 2 }
   0x6   : > { %s2244_s19 = scalar_select %p18_p0, %s2192_s13, %s20_s18  }
   0x7   : > { %p29_p3 = por %p28_p2, %p27_p1  ;;  %127 = sbr.rel (%p1522_p4) target bundleno = 54 (0x36), region = 24 }
   0xc   : > { %130 = sbr.rel (!%p29_p3) target bundleno = 54 (0x36), region = 28  ;;  %s132_s20 = sand.u32 (%p29_p3), 1, %s2192_s13  }
   0xd   : > { %s2060_s21 = smul.u32 (%p29_p3), 96, %s2196_s14 }
   0xe   : > { %s2059_s22 = smul.u32 (%p29_p3), 384, %s132_s20 }
   0xf   : > { %s2252_s25 = scalar_lea.vmem (%p29_p3), %s2836_s0, %s2060_s21 }
  0x10   : > { %v153_v0 = vld [vmem:[%s2252_s25] sm:$0xff] (%p29_p3)  ;;  %v155_v1 = vld [vmem:[%s2252_s25 + $0xc] sm:$0xff] (%p29_p3)  ;;  %v157_v2 = vld [vmem:[%s2252_s25 + $0x18] sm:$0xff] (%p29_p3)  ;;  %s2257_s26 = scalar_lea.vmem (%p29_p3), [#allocation2], %s2059_s22 }
  0x11   : > { %154 = vst [vmem:[%s2257_s26] sm:$0xff] %v153_v0  ;;  %156 = vst [vmem:[%s2257_s26 + $0xc] sm:$0xff] %v155_v1  ;;  %v159_v3 = vld [vmem:[%s2252_s25 + $0x24] sm:$0xff]  ;;  %v161_v4 = vld [vmem:[%s2252_s25 + $0x30] sm:$0xff] }
  0x12   : > { %158 = vst [vmem:[%s2257_s26 + $0x18] sm:$0xff] %v157_v2  ;;  %v163_v5 = vld [vmem:[%s2252_s25 + $0x3c] sm:$0xff]  ;;  %160 = vst [vmem:[%s2257_s26 + $0x24] sm:$0xff] %v159_v3  ;;  %v165_v6 = vld [vmem:[%s2252_s25 + $0x48] sm:$0xff] }
  0x13   : > { %162 = vst [vmem:[%s2257_s26 + $0x30] sm:$0xff] %v161_v4  ;;  %164 = vst [vmem:[%s2257_s26 + $0x3c] sm:$0xff] %v163_v5  ;;  %v167_v7 = vld [vmem:[%s2252_s25 + $0x54] sm:$0xff]  ;;  %v169_v8 = vld [vmem:[%s2252_s25 + $0xc0] sm:$0xff] }
  0x14   : > { %166 = vst [vmem:[%s2257_s26 + $0x48] sm:$0xff] %v165_v6  ;;  %168 = vst [vmem:[%s2257_s26 + $0x54] sm:$0xff] %v167_v7  ;;  %v171_v9 = vld [vmem:[%s2252_s25 + $0xcc] sm:$0xff]  ;;  %v173_v10 = vld [vmem:[%s2252_s25 + $0xd8] sm:$0xff] }
  0x15   : > { %170 = vst [vmem:[%s2257_s26 + $0x60] sm:$0xff] %v169_v8  ;;  %v175_v11 = vld [vmem:[%s2252_s25 + $0xe4] sm:$0xff]  ;;  %172 = vst [vmem:[%s2257_s26 + $0x6c] sm:$0xff] %v171_v9  ;;  %v177_v12 = vld [vmem:[%s2252_s25 + $0xf0] sm:$0xff] }
  0x16   : > { %174 = vst [vmem:[%s2257_s26 + $0x78] sm:$0xff] %v173_v10  ;;  %176 = vst [vmem:[%s2257_s26 + $0x84] sm:$0xff] %v175_v11  ;;  %v179_v13 = vld [vmem:[%s2252_s25 + $0xfc] sm:$0xff]  ;;  %v181_v14 = vld [vmem:[%s2252_s25 + $0x108] sm:$0xff] }
  0x17   : > { %178 = vst [vmem:[%s2257_s26 + $0x90] sm:$0xff] %v177_v12  ;;  %180 = vst [vmem:[%s2257_s26 + $0x9c] sm:$0xff] %v179_v13  ;;  %v183_v15 = vld [vmem:[%s2252_s25 + $0x114] sm:$0xff]  ;;  %v185_v16 = vld [vmem:[%s2252_s25 + $0x180] sm:$0xff] }
  0x18   : > { %182 = vst [vmem:[%s2257_s26 + $0xa8] sm:$0xff] %v181_v14  ;;  %v187_v17 = vld [vmem:[%s2252_s25 + $0x18c] sm:$0xff]  ;;  %184 = vst [vmem:[%s2257_s26 + $0xb4] sm:$0xff] %v183_v15  ;;  %v189_v18 = vld [vmem:[%s2252_s25 + $0x198] sm:$0xff] }
  0x19   : > { %186 = vst [vmem:[%s2257_s26 + $0xc0] sm:$0xff] %v185_v16  ;;  %188 = vst [vmem:[%s2257_s26 + $0xcc] sm:$0xff] %v187_v17  ;;  %v191_v19 = vld [vmem:[%s2252_s25 + $0x1a4] sm:$0xff]  ;;  %v193_v20 = vld [vmem:[%s2252_s25 + $0x1b0] sm:$0xff] }
  0x1a   : > { %190 = vst [vmem:[%s2257_s26 + $0xd8] sm:$0xff] %v189_v18  ;;  %192 = vst [vmem:[%s2257_s26 + $0xe4] sm:$0xff] %v191_v19  ;;  %v195_v21 = vld [vmem:[%s2252_s25 + $0x1bc] sm:$0xff]  ;;  %v197_v22 = vld [vmem:[%s2252_s25 + $0x1c8] sm:$0xff] }
  0x1b   : > { %194 = vst [vmem:[%s2257_s26 + $0xf0] sm:$0xff] %v193_v20  ;;  %v199_v23 = vld [vmem:[%s2252_s25 + $0x1d4] sm:$0xff]  ;;  %196 = vst [vmem:[%s2257_s26 + $0xfc] sm:$0xff] %v195_v21  ;;  %v201_v24 = vld [vmem:[%s2252_s25 + $0x240] sm:$0xff] }
  0x1c   : > { %198 = vst [vmem:[%s2257_s26 + $0x108] sm:$0xff] %v197_v22  ;;  %200 = vst [vmem:[%s2257_s26 + $0x114] sm:$0xff] %v199_v23  ;;  %v203_v25 = vld [vmem:[%s2252_s25 + $0x24c] sm:$0xff]  ;;  %v205_v26 = vld [vmem:[%s2252_s25 + $0x258] sm:$0xff] }
  0x1d   : > { %202 = vst [vmem:[%s2257_s26 + $0x120] sm:$0xff] %v201_v24  ;;  %204 = vst [vmem:[%s2257_s26 + $0x12c] sm:$0xff] %v203_v25  ;;  %v207_v27 = vld [vmem:[%s2252_s25 + $0x264] sm:$0xff]  ;;  %v209_v28 = vld [vmem:[%s2252_s25 + $0x270] sm:$0xff] }
  0x1e   : > { %206 = vst [vmem:[%s2257_s26 + $0x138] sm:$0xff] %v205_v26  ;;  %v211_v29 = vld [vmem:[%s2252_s25 + $0x27c] sm:$0xff]  ;;  %208 = vst [vmem:[%s2257_s26 + $0x144] sm:$0xff] %v207_v27  ;;  %v213_v30 = vld [vmem:[%s2252_s25 + $0x288] sm:$0xff] }
  0x1f   : > { %210 = vst [vmem:[%s2257_s26 + $0x150] sm:$0xff] %v209_v28  ;;  %212 = vst [vmem:[%s2257_s26 + $0x15c] sm:$0xff] %v211_v29  ;;  %v215_v31 = vld [vmem:[%s2252_s25 + $0x294] sm:$0xff]  ;;  %v1526_v32 = vld [vmem:[%s2252_s25 + $0x8] sm:$0xf] }
  0x20   : > { %214 = vst [vmem:[%s2257_s26 + $0x168] sm:$0xff] %v213_v30  ;;  %216 = vst [vmem:[%s2257_s26 + $0x174] sm:$0xff] %v215_v31  ;;  %v1528_v33 = vld [vmem:[%s2252_s25 + $0x14] sm:$0xf]  ;;  %v1530_v34 = vld [vmem:[%s2252_s25 + $0x20] sm:$0xf] }
  0x21   : > { %1527 = vst [vmem:[%s2257_s26 + $0x8] sm:$0xf] %v1526_v32  ;;  %v1532_v35 = vld [vmem:[%s2252_s25 + $0x2c] sm:$0xf]  ;;  %1529 = vst [vmem:[%s2257_s26 + $0x14] sm:$0xf] %v1528_v33 }
  0x22   : > { %1531 = vst [vmem:[%s2257_s26 + $0x20] sm:$0xf] %v1530_v34  ;;  %1533 = vst [vmem:[%s2257_s26 + $0x2c] sm:$0xf] %v1532_v35  ;;  %v1534_v36 = vld [vmem:[%s2252_s25 + $0x38] sm:$0xf] }
  0x23   : > { %v1536_v37 = vld [vmem:[%s2252_s25 + $0x44] sm:$0xf]  ;;  %v1538_v38 = vld [vmem:[%s2252_s25 + $0x50] sm:$0xf]  ;;  %1535 = vst [vmem:[%s2257_s26 + $0x38] sm:$0xf] %v1534_v36 }
  0x24   : > { %1537 = vst [vmem:[%s2257_s26 + $0x44] sm:$0xf] %v1536_v37  ;;  %1539 = vst [vmem:[%s2257_s26 + $0x50] sm:$0xf] %v1538_v38  ;;  %v1540_v39 = vld [vmem:[%s2252_s25 + $0x5c] sm:$0xf] }
  0x25   : > { %v1542_v40 = vld [vmem:[%s2252_s25 + $0xc8] sm:$0xf]  ;;  %v1544_v41 = vld [vmem:[%s2252_s25 + $0xd4] sm:$0xf]  ;;  %1541 = vst [vmem:[%s2257_s26 + $0x5c] sm:$0xf] %v1540_v39 }
  0x26   : > { %1543 = vst [vmem:[%s2257_s26 + $0x68] sm:$0xf] %v1542_v40  ;;  %1545 = vst [vmem:[%s2257_s26 + $0x74] sm:$0xf] %v1544_v41  ;;  %v1546_v42 = vld [vmem:[%s2252_s25 + $0xe0] sm:$0xf] }
  0x27   : > { %v1548_v43 = vld [vmem:[%s2252_s25 + $0xec] sm:$0xf]  ;;  %v1550_v44 = vld [vmem:[%s2252_s25 + $0xf8] sm:$0xf]  ;;  %1547 = vst [vmem:[%s2257_s26 + $0x80] sm:$0xf] %v1546_v42 }
  0x28   : > { %1549 = vst [vmem:[%s2257_s26 + $0x8c] sm:$0xf] %v1548_v43  ;;  %1551 = vst [vmem:[%s2257_s26 + $0x98] sm:$0xf] %v1550_v44  ;;  %v1552_v45 = vld [vmem:[%s2252_s25 + $0x104] sm:$0xf] }
  0x29   : > { %v1554_v46 = vld [vmem:[%s2252_s25 + $0x110] sm:$0xf]  ;;  %v1556_v47 = vld [vmem:[%s2252_s25 + $0x11c] sm:$0xf]  ;;  %1553 = vst [vmem:[%s2257_s26 + $0xa4] sm:$0xf] %v1552_v45 }
  0x2a   : > { %1555 = vst [vmem:[%s2257_s26 + $0xb0] sm:$0xf] %v1554_v46  ;;  %1557 = vst [vmem:[%s2257_s26 + $0xbc] sm:$0xf] %v1556_v47  ;;  %v1558_v48 = vld [vmem:[%s2252_s25 + $0x188] sm:$0xf] }
  0x2b   : > { %v1560_v49 = vld [vmem:[%s2252_s25 + $0x194] sm:$0xf]  ;;  %v1562_v50 = vld [vmem:[%s2252_s25 + $0x1a0] sm:$0xf]  ;;  %1559 = vst [vmem:[%s2257_s26 + $0xc8] sm:$0xf] %v1558_v48 }
  0x2c   : > { %1561 = vst [vmem:[%s2257_s26 + $0xd4] sm:$0xf] %v1560_v49  ;;  %1563 = vst [vmem:[%s2257_s26 + $0xe0] sm:$0xf] %v1562_v50  ;;  %v1564_v51 = vld [vmem:[%s2252_s25 + $0x1ac] sm:$0xf] }
  0x2d   : > { %v1566_v52 = vld [vmem:[%s2252_s25 + $0x1b8] sm:$0xf]  ;;  %v1568_v53 = vld [vmem:[%s2252_s25 + $0x1c4] sm:$0xf]  ;;  %1565 = vst [vmem:[%s2257_s26 + $0xec] sm:$0xf] %v1564_v51 }
  0x2e   : > { %1567 = vst [vmem:[%s2257_s26 + $0xf8] sm:$0xf] %v1566_v52  ;;  %1569 = vst [vmem:[%s2257_s26 + $0x104] sm:$0xf] %v1568_v53  ;;  %v1570_v54 = vld [vmem:[%s2252_s25 + $0x1d0] sm:$0xf] }
  0x2f   : > { %v1572_v55 = vld [vmem:[%s2252_s25 + $0x1dc] sm:$0xf]  ;;  %v1574_v56 = vld [vmem:[%s2252_s25 + $0x248] sm:$0xf]  ;;  %1571 = vst [vmem:[%s2257_s26 + $0x110] sm:$0xf] %v1570_v54 }
  0x30   : > { %1573 = vst [vmem:[%s2257_s26 + $0x11c] sm:$0xf] %v1572_v55  ;;  %1575 = vst [vmem:[%s2257_s26 + $0x128] sm:$0xf] %v1574_v56  ;;  %v1576_v57 = vld [vmem:[%s2252_s25 + $0x254] sm:$0xf] }
  0x31   : > { %v1578_v58 = vld [vmem:[%s2252_s25 + $0x260] sm:$0xf]  ;;  %v1580_v59 = vld [vmem:[%s2252_s25 + $0x26c] sm:$0xf]  ;;  %1577 = vst [vmem:[%s2257_s26 + $0x134] sm:$0xf] %v1576_v57 }
  0x32   : > { %1579 = vst [vmem:[%s2257_s26 + $0x140] sm:$0xf] %v1578_v58  ;;  %1581 = vst [vmem:[%s2257_s26 + $0x14c] sm:$0xf] %v1580_v59  ;;  %v1582_v60 = vld [vmem:[%s2252_s25 + $0x278] sm:$0xf] }
  0x33   : > { %v1584_v61 = vld [vmem:[%s2252_s25 + $0x284] sm:$0xf]  ;;  %v1586_v62 = vld [vmem:[%s2252_s25 + $0x290] sm:$0xf]  ;;  %1583 = vst [vmem:[%s2257_s26 + $0x158] sm:$0xf] %v1582_v60 }
  0x34   : > { %1585 = vst [vmem:[%s2257_s26 + $0x164] sm:$0xf] %v1584_v61  ;;  %1587 = vst [vmem:[%s2257_s26 + $0x170] sm:$0xf] %v1586_v62  ;;  %v1588_v63 = vld [vmem:[%s2252_s25 + $0x29c] sm:$0xf] }
  0x35   : > { %1589 = vst [vmem:[%s2257_s26 + $0x17c] sm:$0xf] %v1588_v63 }
  0x36 PF: > { %p1590_p5 = scmp.ge.s32.totalorder %s2196_s14, 1  ;;  %p293_p6 = scmp.lt.s32.totalorder %s2196_s14, 3 }
  0x38   : > { %p294_p7 = pnand %p1590_p5, %p293_p6 }
  0x3a   : > { %297 = sbr.rel (%p294_p7) target bundleno = 428 (0x1ac), region = 54 }
  0x3f   : > { %v2389_v0 = vld [vmem:[%s2837_s1 + $0x78] sm:$0xff]   ;;  %v2406_v3 = vld [vmem:[%s2837_s1 + $0x70] sm:$0xff]   ;;  %v2424_v6 = vld [vmem:[%s2837_s1 + $0x68] sm:$0xff]   ;;  %s300_s9 = sand.u32 1, %s2188_s12   ;;  %s1591_s8 = sshll.u32 %s1519_s15, 3 }
  0x40   : > { %v2394_v1 = vld [vmem:[%s2837_s1 + $0x38] sm:$0xff]   ;;  %1755 = vmatprep.subr.bf16.mxu0 %v2389_v0  ;;  %v2412_v4 = vld [vmem:[%s2837_s1 + $0x30] sm:$0xff]   ;;  %v2431_v7 = vld [vmem:[%s2837_s1 + $0x28] sm:$0xff]   ;;  %s2061_s20 = smul.u32 384, %s300_s9  ;;  %p325_p8 = scmp.lt.s32.totalorder %s1591_s8, 15 }
  0x41   : > { %v2400_v2 = vld [vmem:[%s2837_s1 + $0xb8] sm:$0xff]   ;;  %1756 = vmatpush3.bf16.msra.mxu0 %v2394_v1  ;;  %v2419_v5 = vld [vmem:[%s2837_s1 + $0xb0] sm:$0xff]   ;;  %v2437_v8 = vld [vmem:[%s2837_s1 + $0xa8] sm:$0xff]  }
  0x42   : > { %1963 = vmatprep.subr.bf16.mxu1 %v2400_v2  ;;  %1757 = vmatprep.subr.bf16.mxu0 %v2406_v3  ;;  %v2443_v9 = vld [vmem:[%s2837_s1 + $0x60] sm:$0xff]   ;;  %v2461_v12 = vld [vmem:[%s2837_s1 + $0x58] sm:$0xff]   ;;  %v2481_v15 = vld [vmem:[%s2837_s1 + $0x50] sm:$0xff]   ;;  %s2526_s5 = scalar_lea.vmem [#allocation2], %s2061_s20  ;;  %s2850_s8 = smov (!%p325_p8, %s1591_s8), 15 }
  0x43   : > { %1964 = vmatpush3.bf16.msra.mxu1 %v2400_v2  ;;  %v2449_v10 = vld [vmem:[%s2837_s1 + $0x20] sm:$0xff]   ;;  %v2468_v13 = vld [vmem:[%s2837_s1 + $0x98] sm:$0xff]   ;;  %v2488_v16 = vld [vmem:[%s2837_s1 + $0x90] sm:$0xff]   ;;  %s1592_s9 = sshll.u32 %s2850_s8, 2 }
  0x44   : > { %1965 = vmatprep.subr.bf16.mxu1 %v2419_v5  ;;  %v2455_v11 = vld [vmem:[%s2837_s1 + $0xa0] sm:$0xff]   ;;  %v2474_v14 = vld [vmem:[%s2837_s1 + $0x18] sm:$0xff]   ;;  %v2494_v17 = vld [vmem:[%s2837_s1 + $0x10] sm:$0xff]   ;;  %s2791_s17 = scalar_lea.vmem %s2839_s3, %s1592_s9 }
  0x45   : > { %1758 = vmatpush3.bf16.msra.mxu0 %v2412_v4  ;;  %v2500_v18 = vld [vmem:[%s2837_s1 + $0x48] sm:$0xff]   ;;  %v2518_v21 = vld [vmem:[%s2837_s1 + $0x40] sm:$0xff]   ;;  %v2122_v32 = vld [vmem:[%s2526_s5 + $0x50] ss:$12 sps:$4 sm:$0xff]  }
  0x46   : > { %1759 = vmatprep.subr.bf16.mxu0 %v2424_v6  ;;  %v2506_v19 = vld [vmem:[%s2837_s1 + $0x8] sm:$0xff]   ;;  %v2524_v22 = vld [vmem:[%s2837_s1 + $0x80] sm:$0xff]   ;;  %v2120_v34 = vld [vmem:[%s2526_s5 + $0x30] ss:$12 sps:$4 sm:$0xff]  }
  0x47   : > { %1966 = vmatpush3.bf16.msra.mxu1 %v2419_v5  ;;  %v2512_v20 = vld [vmem:[%s2837_s1 + $0x88] sm:$0xff]   ;;  %v2112_v23 = vld [vmem:[%s2526_s5 + $0x4] ss:$12 sps:$4 sm:$0xff]   ;;  %v2118_v31 = vld [vmem:[%s2526_s5 + $0x34] ss:$12 sps:$4 sm:$0xff]  }
  0x48   : > { %1967 = vmatprep.subr.bf16.mxu1 %v2437_v8  ;;  %v2113_v24 = vld [vmem:[%s2526_s5 + $0x8] ss:$12 sps:$4 sm:$0xff]   ;;  %v2536_v25 = vld [vmem:[%s2837_s1] sm:$0xff]   ;;  %635 = vmatprep.mubr.bf16.mxu0 %v2112_v23  ;;  %v2123_v35 = vld [vmem:[%s2526_s5 + $0x4c] ss:$12 sps:$4 sm:$0xff]  }
  0x49   : > { %1760 = vmatpush3.bf16.msra.mxu0 %v2431_v7  ;;  %1979 = vmatprep.mubr.bf16.mxu1 %v2113_v24  ;;  %v2110_v26 = vld [vmem:[%s2526_s5] ss:$12 sps:$4 sm:$0xff]   ;;  %v2115_v27 = vld [vmem:[%s2526_s5 + $0x1c] ss:$12 sps:$4 sm:$0xff]   ;;  %v2121_v29 = vld [vmem:[%s2526_s5 + $0x38] ss:$12 sps:$4 sm:$0xff]  }
  0x4a   : > { %1761 = vmatprep.subr.bf16.mxu0 %v2443_v9  ;;  %v2114_v28 = vld [vmem:[%s2526_s5 + $0x20] ss:$12 sps:$4 sm:$0xff]   ;;  %v2117_v30 = vld [vmem:[%s2526_s5 + $0x18] ss:$12 sps:$4 sm:$0xff]   ;;  %v2129_v33 = vld [vmem:[%s2526_s5 + $0x68] ss:$12 sps:$4 sm:$0xff]  }
  0x4b   : > { %1968 = vmatpush3.bf16.msra.mxu1 %v2437_v8  ;;  %v2125_v36 = vld [vmem:[%s2526_s5 + $0x48] ss:$12 sps:$4 sm:$0xff]   ;;  %v2128_v37 = vld [vmem:[%s2526_s5 + $0x64] ss:$12 sps:$4 sm:$0xff]   ;;  %v2126_v38 = vld [vmem:[%s2526_s5 + $0x60] ss:$12 sps:$4 sm:$0xff]  }
  0x4c   : > { %1969 = vmatprep.subr.bf16.mxu1 %v2455_v11  ;;  %v2131_v39 = vld [vmem:[%s2526_s5 + $0x7c] ss:$12 sps:$4 sm:$0xff]   ;;  %v2130_v40 = vld [vmem:[%s2526_s5 + $0x80] ss:$12 sps:$4 sm:$0xff]   ;;  %v2137_v41 = vld [vmem:[%s2526_s5 + $0x98] ss:$12 sps:$4 sm:$0xff]  }
  0x4d   : > { %1762 = vmatpush3.bf16.msra.mxu0 %v2449_v10  ;;  %v2133_v42 = vld [vmem:[%s2526_s5 + $0x78] ss:$12 sps:$4 sm:$0xff]   ;;  %v2134_v43 = vld [vmem:[%s2526_s5 + $0x94] ss:$12 sps:$4 sm:$0xff]   ;;  %v2138_v44 = vld [vmem:[%s2526_s5 + $0xb0] ss:$12 sps:$4 sm:$0xff]  }
  0x4e   : > { %1763 = vmatprep.subr.bf16.mxu0 %v2461_v12  ;;  %v2145_v45 = vld [vmem:[%s2526_s5 + $0xc8] ss:$12 sps:$4 sm:$0xff]   ;;  %v2136_v46 = vld [vmem:[%s2526_s5 + $0x90] ss:$12 sps:$4 sm:$0xff]   ;;  %v2139_v47 = vld [vmem:[%s2526_s5 + $0xac] ss:$12 sps:$4 sm:$0xff]  }
  0x4f   : > { %1970 = vmatpush3.bf16.msra.mxu1 %v2455_v11  ;;  %v2141_v48 = vld [vmem:[%s2526_s5 + $0xa8] ss:$12 sps:$4 sm:$0xff]   ;;  %v2144_v49 = vld [vmem:[%s2526_s5 + $0xc4] ss:$12 sps:$4 sm:$0xff]   ;;  %v2142_v50 = vld [vmem:[%s2526_s5 + $0xc0] ss:$12 sps:$4 sm:$0xff]  }
  0x50   : > { %1971 = vmatprep.subr.bf16.mxu1 %v2468_v13  ;;  %v2147_v51 = vld [vmem:[%s2526_s5 + $0xdc] ss:$12 sps:$4 sm:$0xff]   ;;  %v2146_v52 = vld [vmem:[%s2526_s5 + $0xe0] ss:$12 sps:$4 sm:$0xff]   ;;  %v2153_v53 = vld [vmem:[%s2526_s5 + $0xf8] ss:$12 sps:$4 sm:$0xff]  }
  0x51   : > { %1764 = vmatpush3.bf16.msra.mxu0 %v2474_v14  ;;  %v2149_v54 = vld [vmem:[%s2526_s5 + $0xd8] ss:$12 sps:$4 sm:$0xff]   ;;  %v2150_v55 = vld [vmem:[%s2526_s5 + $0xf4] ss:$12 sps:$4 sm:$0xff]   ;;  %v2154_v56 = vld [vmem:[%s2526_s5 + $0x110] ss:$12 sps:$4 sm:$0xff]  }
  0x52   : > { %1765 = vmatprep.subr.bf16.mxu0 %v2481_v15  ;;  %v2161_v57 = vld [vmem:[%s2526_s5 + $0x128] ss:$12 sps:$4 sm:$0xff]   ;;  %v2152_v58 = vld [vmem:[%s2526_s5 + $0xf0] ss:$12 sps:$4 sm:$0xff]   ;;  %v2155_v59 = vld [vmem:[%s2526_s5 + $0x10c] ss:$12 sps:$4 sm:$0xff]  }
  0x53   : > { %1972 = vmatpush3.bf16.msra.mxu1 %v2468_v13  ;;  %v2157_v60 = vld [vmem:[%s2526_s5 + $0x108] ss:$12 sps:$4 sm:$0xff]   ;;  %v2160_v61 = vld [vmem:[%s2526_s5 + $0x124] ss:$12 sps:$4 sm:$0xff]   ;;  %v2158_v62 = vld [vmem:[%s2526_s5 + $0x120] ss:$12 sps:$4 sm:$0xff]  }
  0x54   : > { %1973 = vmatprep.subr.bf16.mxu1 %v2488_v16  ;;  %v2163_v63 = vld [vmem:[%s2526_s5 + $0x13c] ss:$12 sps:$4 sm:$0xff]  }
  0x55   : > { %1766 = vmatpush3.bf16.msra.mxu0 %v2494_v17 }
  0x56   : > { %1767 = vmatprep.subr.bf16.mxu0 %v2500_v18 }
  0x57   : > { %1974 = vmatpush3.bf16.msra.mxu1 %v2488_v16 }
  0x58   : > { %1975 = vmatprep.subr.bf16.mxu1 %v2512_v20 }
  0x59   : > { %1768 = vmatpush3.bf16.msra.mxu0 %v2506_v19 }
  0x5a   : > { %1769 = vmatprep.subr.bf16.mxu0 %v2518_v21 }
  0x5b   : > { %1976 = vmatpush3.bf16.msra.mxu1 %v2512_v20 }
  0x5c   : > { %1977 = vmatprep.subr.bf16.mxu1 %v2524_v22 }
  0x5d   : > { %1770 = vmatpush3.bf16.msra.mxu0 %v2536_v25 }
  0x5e   : > { %1807 = vmatprep.subr.bf16.mxu0 %v2389_v0 }
  0x5f   : > { %1978 = vmatpush3.bf16.msra.mxu1 %v2524_v22 }
  0x60   : > { %636 = vmatmul.mubr.bf16.vlgmr.msra.gmra.mxu0 %v2110_v26  ;;  %1987 = vmatprep.subr.bf16.mxu1 %v2400_v2 }
  0x61   : > { %1808 = vmatpush3.bf16.msra.mxu0 %v2394_v1  ;;  %643 = vmatprep.mubr.bf16.mxu0 %v2115_v27 }
  0x62   : > { %1980 = vmatmul.mubr.bf16.vlgmr.msra.gmra.mxu1 %v2114_v28  ;;  %1809 = vmatprep.subr.bf16.mxu0 %v2406_v3 }
  0x63   : > { %1988 = vmatpush3.bf16.msra.mxu1 %v2400_v2  ;;  %1983 = vmatprep.mubr.bf16.mxu1 %v2121_v29 }
  0x64   : > { %1989 = vmatprep.subr.bf16.mxu1 %v2419_v5 }
  0x65   : > { %1810 = vmatpush3.bf16.msra.mxu0 %v2412_v4 }
  0x66   : > { %1811 = vmatprep.subr.bf16.mxu0 %v2424_v6 }
  0x67   : > { %1990 = vmatpush3.bf16.msra.mxu1 %v2419_v5 }
  0x68   : > { %644 = vmatmul.mubr.bf16.gmra.mxu0 %v2117_v30  ;;  %1991 = vmatprep.subr.bf16.mxu1 %v2437_v8 }
  0x69   : > { %1812 = vmatpush3.bf16.msra.mxu0 %v2431_v7  ;;  %651 = vmatprep.mubr.bf16.mxu0 %v2118_v31 }
  0x6a   : > { %1813 = vmatprep.subr.bf16.mxu0 %v2443_v9  ;;  %1984 = vmatmul.mubr.bf16.gmra.mxu1 %v2122_v32 }
  0x6b   : > { %1992 = vmatpush3.bf16.msra.mxu1 %v2437_v8  ;;  %2003 = vmatprep.mubr.bf16.mxu1 %v2129_v33 }
  0x6c   : > { %1993 = vmatprep.subr.bf16.mxu1 %v2455_v11 }
  0x6d   : > { %1814 = vmatpush3.bf16.msra.mxu0 %v2449_v10 }
  0x6e   : > { %1815 = vmatprep.subr.bf16.mxu0 %v2461_v12 }
  0x6f   : > { %1994 = vmatpush3.bf16.msra.mxu1 %v2455_v11 }
  0x70   : > { %652 = vmatmul.mubr.bf16.gmra.mxu0 %v2120_v34  ;;  %1995 = vmatprep.subr.bf16.mxu1 %v2468_v13 }
  0x71   : > { %1816 = vmatpush3.bf16.msra.mxu0 %v2474_v14  ;;  %659 = vmatprep.mubr.bf16.mxu0 %v2123_v35 }
  0x72   : > { %1817 = vmatprep.subr.bf16.mxu0 %v2481_v15 }
  0x73   : > { %1996 = vmatpush3.bf16.msra.mxu1 %v2468_v13 }
  0x74   : > { %1997 = vmatprep.subr.bf16.mxu1 %v2488_v16 }
  0x75   : > { %1818 = vmatpush3.bf16.msra.mxu0 %v2494_v17 }
  0x76   : > { %1819 = vmatprep.subr.bf16.mxu0 %v2500_v18 }
  0x77   : > { %1998 = vmatpush3.bf16.msra.mxu1 %v2488_v16 }
  0x78   : > { %660 = vmatmul.mubr.bf16.gmra.mxu0 %v2125_v36  ;;  %1999 = vmatprep.subr.bf16.mxu1 %v2512_v20 }
  0x79   : > { %1820 = vmatpush3.bf16.msra.mxu0 %v2506_v19  ;;  %846 = vmatprep.mubr.bf16.mxu0 %v2128_v37 }
  0x7a   : > { %1821 = vmatprep.subr.bf16.mxu0 %v2518_v21 }
  0x7b   : > { %2000 = vmatpush3.bf16.msra.mxu1 %v2512_v20 }
  0x7c   : > { %2001 = vmatprep.subr.bf16.mxu1 %v2524_v22 }
  0x7d   : > { %1822 = vmatpush3.bf16.msra.mxu0 %v2536_v25 }
  0x7e   : > { %1859 = vmatprep.subr.bf16.mxu0 %v2389_v0 }
  0x7f   : > { %2002 = vmatpush3.bf16.msra.mxu1 %v2524_v22 }
  0x80   : > { %847 = vmatmul.mubr.bf16.vlgmr.msra.gmra.mxu0 %v2126_v38  ;;  %2011 = vmatprep.subr.bf16.mxu1 %v2400_v2 }
  0x81   : > { %1860 = vmatpush3.bf16.msra.mxu0 %v2394_v1  ;;  %854 = vmatprep.mubr.bf16.mxu0 %v2131_v39 }
  0x82   : > { %2004 = vmatmul.mubr.bf16.vlgmr.msra.gmra.mxu1 %v2130_v40  ;;  %1861 = vmatprep.subr.bf16.mxu0 %v2406_v3 }
  0x83   : > { %2012 = vmatpush3.bf16.msra.mxu1 %v2400_v2  ;;  %2007 = vmatprep.mubr.bf16.mxu1 %v2137_v41 }
  0x84   : > { %2013 = vmatprep.subr.bf16.mxu1 %v2419_v5 }
  0x85   : > { %1862 = vmatpush3.bf16.msra.mxu0 %v2412_v4 }
  0x86   : > { %1863 = vmatprep.subr.bf16.mxu0 %v2424_v6 }
  0x87   : > { %2014 = vmatpush3.bf16.msra.mxu1 %v2419_v5 }
  0x88   : > { %855 = vmatmul.mubr.bf16.gmra.mxu0 %v2133_v42  ;;  %2015 = vmatprep.subr.bf16.mxu1 %v2437_v8 }
  0x89   : > { %1864 = vmatpush3.bf16.msra.mxu0 %v2431_v7  ;;  %862 = vmatprep.mubr.bf16.mxu0 %v2134_v43 }
  0x8a   : > { %1865 = vmatprep.subr.bf16.mxu0 %v2443_v9  ;;  %2008 = vmatmul.mubr.bf16.gmra.mxu1 %v2138_v44 }
  0x8b   : > { %2016 = vmatpush3.bf16.msra.mxu1 %v2437_v8  ;;  %2027 = vmatprep.mubr.bf16.mxu1 %v2145_v45 }
  0x8c   : > { %2017 = vmatprep.subr.bf16.mxu1 %v2455_v11 }
  0x8d   : > { %1866 = vmatpush3.bf16.msra.mxu0 %v2449_v10 }
  0x8e   : > { %1867 = vmatprep.subr.bf16.mxu0 %v2461_v12 }
  0x8f   : > { %2018 = vmatpush3.bf16.msra.mxu1 %v2455_v11 }
  0x90   : > { %863 = vmatmul.mubr.bf16.gmra.mxu0 %v2136_v46  ;;  %2019 = vmatprep.subr.bf16.mxu1 %v2468_v13 }
  0x91   : > { %1868 = vmatpush3.bf16.msra.mxu0 %v2474_v14  ;;  %870 = vmatprep.mubr.bf16.mxu0 %v2139_v47 }
  0x92   : > { %1869 = vmatprep.subr.bf16.mxu0 %v2481_v15 }
  0x93   : > { %2020 = vmatpush3.bf16.msra.mxu1 %v2468_v13 }
  0x94   : > { %2021 = vmatprep.subr.bf16.mxu1 %v2488_v16 }
  0x95   : > { %1870 = vmatpush3.bf16.msra.mxu0 %v2494_v17 }
  0x96   : > { %1871 = vmatprep.subr.bf16.mxu0 %v2500_v18 }
  0x97   : > { %2022 = vmatpush3.bf16.msra.mxu1 %v2488_v16 }
  0x98   : > { %871 = vmatmul.mubr.bf16.gmra.mxu0 %v2141_v48  ;;  %2023 = vmatprep.subr.bf16.mxu1 %v2512_v20 }
  0x99   : > { %1872 = vmatpush3.bf16.msra.mxu0 %v2506_v19  ;;  %1065 = vmatprep.mubr.bf16.mxu0 %v2144_v49 }
  0x9a   : > { %1873 = vmatprep.subr.bf16.mxu0 %v2518_v21 }
  0x9b   : > { %2024 = vmatpush3.bf16.msra.mxu1 %v2512_v20 }
  0x9c   : > { %2025 = vmatprep.subr.bf16.mxu1 %v2524_v22 }
  0x9d   : > { %1874 = vmatpush3.bf16.msra.mxu0 %v2536_v25 }
  0x9e   : > { %1911 = vmatprep.subr.bf16.mxu0 %v2389_v0  ;;  %v2162_v0 = vld [vmem:[%s2526_s5 + $0x140] ss:$12 sps:$4 sm:$0xff]  }
  0x9f   : > { %2026 = vmatpush3.bf16.msra.mxu1 %v2524_v22 }
  0xa0   : > { %1066 = vmatmul.mubr.bf16.vlgmr.msra.gmra.mxu0 %v2142_v50  ;;  %2035 = vmatprep.subr.bf16.mxu1 %v2400_v2 }
  0xa1   : > { %1912 = vmatpush3.bf16.msra.mxu0 %v2394_v1  ;;  %1073 = vmatprep.mubr.bf16.mxu0 %v2147_v51  ;;  %v2169_v1 = vld [vmem:[%s2526_s5 + $0x158] ss:$12 sps:$4 sm:$0xff]  }
  0xa2   : > { %2028 = vmatmul.mubr.bf16.vlgmr.msra.gmra.mxu1 %v2146_v52  ;;  %1913 = vmatprep.subr.bf16.mxu0 %v2406_v3  ;;  %v2166_v3 = vld [vmem:[%s2526_s5 + $0x154] ss:$12 sps:$4 sm:$0xff]  }
  0xa3   : > { %2036 = vmatpush3.bf16.msra.mxu1 %v2400_v2  ;;  %2031 = vmatprep.mubr.bf16.mxu1 %v2153_v53  ;;  %v2165_v2 = vld [vmem:[%s2526_s5 + $0x138] ss:$12 sps:$4 sm:$0xff]  }
  0xa4   : > { %2037 = vmatprep.subr.bf16.mxu1 %v2419_v5 }
  0xa5   : > { %1914 = vmatpush3.bf16.msra.mxu0 %v2412_v4  ;;  %v2170_v4 = vld [vmem:[%s2526_s5 + $0x170] ss:$12 sps:$4 sm:$0xff]  }
  0xa6   : > { %1915 = vmatprep.subr.bf16.mxu0 %v2424_v6  ;;  %v2171_v6 = vld [vmem:[%s2526_s5 + $0x16c] ss:$12 sps:$4 sm:$0xff]  }
  0xa7   : > { %2038 = vmatpush3.bf16.msra.mxu1 %v2419_v5  ;;  %v2168_v5 = vld [vmem:[%s2526_s5 + $0x150] ss:$12 sps:$4 sm:$0xff]  }
  0xa8   : > { %1074 = vmatmul.mubr.bf16.gmra.mxu0 %v2149_v54  ;;  %2039 = vmatprep.subr.bf16.mxu1 %v2437_v8 }
  0xa9   : > { %1916 = vmatpush3.bf16.msra.mxu0 %v2431_v7  ;;  %1081 = vmatprep.mubr.bf16.mxu0 %v2150_v55  ;;  %v2173_v7 = vld [vmem:[%s2526_s5 + $0x168] ss:$12 sps:$4 sm:$0xff]  }
  0xaa   : > { %1917 = vmatprep.subr.bf16.mxu0 %v2443_v9  ;;  %2032 = vmatmul.mubr.bf16.gmra.mxu1 %v2154_v56 }
  0xab   : > { %2040 = vmatpush3.bf16.msra.mxu1 %v2437_v8  ;;  %2051 = vmatprep.mubr.bf16.mxu1 %v2161_v57 }
  0xac   : > { %2041 = vmatprep.subr.bf16.mxu1 %v2455_v11 }
  0xad   : > { %1918 = vmatpush3.bf16.msra.mxu0 %v2449_v10 }
  0xae   : > { %1919 = vmatprep.subr.bf16.mxu0 %v2461_v12 }
  0xaf   : > { %2042 = vmatpush3.bf16.msra.mxu1 %v2455_v11 }
  0xb0   : > { %1082 = vmatmul.mubr.bf16.gmra.mxu0 %v2152_v58  ;;  %2043 = vmatprep.subr.bf16.mxu1 %v2468_v13 }
  0xb1   : > { %1920 = vmatpush3.bf16.msra.mxu0 %v2474_v14  ;;  %1089 = vmatprep.mubr.bf16.mxu0 %v2155_v59 }
  0xb2   : > { %1921 = vmatprep.subr.bf16.mxu0 %v2481_v15 }
  0xb3   : > { %2044 = vmatpush3.bf16.msra.mxu1 %v2468_v13 }
  0xb4   : > { %2045 = vmatprep.subr.bf16.mxu1 %v2488_v16 }
  0xb5   : > { %1922 = vmatpush3.bf16.msra.mxu0 %v2494_v17 }
  0xb6   : > { %1923 = vmatprep.subr.bf16.mxu0 %v2500_v18 }
  0xb7   : > { %2046 = vmatpush3.bf16.msra.mxu1 %v2488_v16 }
  0xb8   : > { %1090 = vmatmul.mubr.bf16.gmra.mxu0 %v2157_v60  ;;  %2047 = vmatprep.subr.bf16.mxu1 %v2512_v20 }
  0xb9   : > { %1924 = vmatpush3.bf16.msra.mxu0 %v2506_v19  ;;  %1284 = vmatprep.mubr.bf16.mxu0 %v2160_v61 }
  0xba   : > { %1925 = vmatprep.subr.bf16.mxu0 %v2518_v21 }
  0xbb   : > { %2048 = vmatpush3.bf16.msra.mxu1 %v2512_v20 }
  0xbc   : > { %2049 = vmatprep.subr.bf16.mxu1 %v2524_v22 }
  0xbd   : > { %1926 = vmatpush3.bf16.msra.mxu0 %v2536_v25 }
  0xbf   : > { %2050 = vmatpush3.bf16.msra.mxu1 %v2524_v22 }
  0xc0   : > { %1285 = vmatmul.mubr.bf16.vlgmr.msra.gmra.mxu0 %v2158_v62 }
  0xc1   : > { %1292 = vmatprep.mubr.bf16.mxu0 %v2163_v63 }
  0xc2   : > { %2052 = vmatmul.mubr.bf16.vlgmr.msra.gmra.mxu1 %v2162_v0 }
  0xc3   : > { %2055 = vmatprep.mubr.bf16.mxu1 %v2169_v1 }
  0xc8   : > { %1293 = vmatmul.mubr.bf16.gmra.mxu0 %v2165_v2 }
  0xc9   : > { %1300 = vmatprep.mubr.bf16.mxu0 %v2166_v3 }
  0xca   : > { %2056 = vmatmul.mubr.bf16.gmra.mxu1 %v2170_v4 }
  0xd0   : > { %1301 = vmatmul.mubr.bf16.gmra.mxu0 %v2168_v5 }
  0xd1   : > { %1308 = vmatprep.mubr.bf16.mxu0 %v2171_v6 }
  0xd8   : > { %1309 = vmatmul.mubr.bf16.gmra.mxu0 %v2173_v7 }
 0x120   : > { %v1771_v8 = vpop.f32.mrf.mxu0 }
 0x122   : > { %v1772_v9 = vpop.f32.mrf.mxu0  ;;  %v1981_v12 = vpop.f32.mrf.mxu1 }
 0x123   : > { %v1773_v10 = vadd.f32 %v1772_v9, %v1771_v8 }
 0x124   : > { %v1774_v11 = vpop.f32.mrf.mxu0  ;;  %v702_v16 = vpop.f32.mrf.mxu1 }
 0x125   : > { %v2703_v47 = vadd.f32 %v1773_v10, %v702_v16 }
 0x126   : > { %v1775_v13 = vpop.f32.mrf.mxu0  ;;  %v2687_v20 = vpop.f32.mrf.mxu1 }
 0x127   : > { %v2685_v14 = vadd.f32 %v1775_v13, %v1774_v11 }
 0x128   : > { %v1777_v15 = vpop.f32.mrf.mxu0  ;;  %v2691_v24 = vpop.f32.mrf.mxu1 }
 0x12a   : > { %v1778_v17 = vpop.f32.mrf.mxu0  ;;  %v1985_v27 = vpop.f32.mrf.mxu1 }
 0x12b   : > { %v1779_v18 = vadd.f32 %v1778_v17, %v1777_v15 }
 0x12c   : > { %v1780_v19 = vpop.f32.mrf.mxu0  ;;  %v718_v31 = vpop.f32.mrf.mxu1 }
 0x12d   : > { %v2713_v57 = vadd.f32 %v1981_v12, %v1779_v18 }
 0x12e   : > { %v1781_v21 = vpop.f32.mrf.mxu0  ;;  %v2695_v35 = vpop.f32.mrf.mxu1 }
 0x12f   : > { %v2689_v22 = vadd.f32 %v1781_v21, %v1780_v19 }
 0x130   : > { %v1783_v23 = vpop.f32.mrf.mxu0  ;;  %v2701_v40 = vpop.f32.mrf.mxu1 }
 0x132   : > { %v1784_v25 = vpop.f32.mrf.mxu0 }
 0x133   : > { %v1785_v26 = vadd.f32 %v1784_v25, %v1783_v23 }
 0x134   : > { %v1786_v28 = vpop.f32.mrf.mxu0 }
 0x135   : > { %v2723_v3 = vadd.f32 %v1785_v26, %v718_v31 }
 0x136   : > { %v1787_v29 = vpop.f32.mrf.mxu0 }
 0x137   : > { %v2693_v30 = vadd.f32 %v1787_v29, %v1786_v28 }
 0x138   : > { %v1789_v32 = vpop.f32.mrf.mxu0 }
 0x13a   : > { %v1790_v33 = vpop.f32.mrf.mxu0 }
 0x13b   : > { %v1791_v34 = vadd.f32 %v1790_v33, %v1789_v32 }
 0x13c   : > { %v1792_v36 = vpop.f32.mrf.mxu0 }
 0x13d   : > { %v2697_v37 = vadd.f32 %v1985_v27, %v1791_v34 }
 0x13e   : > { %v1793_v38 = vpop.f32.mrf.mxu0 }
 0x13f   : > { %v2699_v39 = vadd.f32 %v1793_v38, %v1792_v36 }
 0x140   : > { %v1823_v41 = vpop.f32.mrf.mxu0 }
 0x142   : > { %v1824_v42 = vpop.f32.mrf.mxu0  ;;  %v2005_v43 = vpop.f32.mrf.mxu1 }
 0x143   : > { %v1825_v44 = vadd.f32 %v1824_v42, %v1823_v41 }
 0x144   : > { %v1826_v45 = vpop.f32.mrf.mxu0  ;;  %v913_v46 = vpop.f32.mrf.mxu1 }
 0x145   : > { %v2705_v48 = vadd.f32 %v1825_v44, %v913_v46 }
 0x146   : > { %v1827_v49 = vpop.f32.mrf.mxu0  ;;  %v2709_v51 = vpop.f32.mrf.mxu1 }
 0x148   : > { %v1829_v52 = vpop.f32.mrf.mxu0  ;;  %v916_v55 = vpop.f32.mrf.mxu1 }
 0x14a   : > { %v1830_v53 = vpop.f32.mrf.mxu0  ;;  %v2009_v60 = vpop.f32.mrf.mxu1 }
 0x14b   : > { %v1831_v54 = vadd.f32 %v1830_v53, %v1829_v52 }
 0x14c   : > { %v2711_v56 = vpop.f32.mrf.mxu0  ;;  %v929_v0 = vpop.f32.mrf.mxu1 }
 0x14d   : > { %v2715_v58 = vadd.f32 %v2005_v43, %v1831_v54 }
 0x14e   : > { %v2717_v59 = vpop.f32.mrf.mxu0  ;;  %v2739_v15 = vpop.f32.mrf.mxu1 }
 0x150   : > { %v1835_v62 = vpop.f32.mrf.mxu0  ;;  %v2741_v18 = vpop.f32.mrf.mxu1 }
 0x152   : > { %v1836_v63 = vpop.f32.mrf.mxu0 }
 0x153   : > { %v1837_v1 = vadd.f32 %v1836_v63, %v1835_v62 }
 0x154   : > { %v2721_v2 = vpop.f32.mrf.mxu0 }
 0x155   : > { %v2725_v4 = vadd.f32 %v1837_v1, %v929_v0 }
 0x156   : > { %v2727_v5 = vpop.f32.mrf.mxu0 }
 0x158   : > { %v1841_v7 = vpop.f32.mrf.mxu0 }
 0x15a   : > { %v1842_v8 = vpop.f32.mrf.mxu0 }
 0x15b   : > { %v1843_v9 = vadd.f32 %v1842_v8, %v1841_v7 }
 0x15c   : > { %v2731_v10 = vpop.f32.mrf.mxu0 }
 0x15d   : > { %v2733_v11 = vadd.f32 %v2009_v60, %v1843_v9  ;;  %v1828_v60 = vadd.f32 %v1827_v49, %v1826_v45  ;;  %v2841_v45 = vmax.f32 %v2703_v47, %v2705_v48 }
 0x15e   : > { %v2735_v12 = vpop.f32.mrf.mxu0 }
 0x15f   : > { %v917_v9 = vadd.f32 %v1828_v60, %v916_v55  ;;  %v2842_v60 = vmax.f32 %v2713_v57, %v2715_v58 }
 0x160   : > { %v1875_v16 = vpop.f32.mrf.mxu0 }
 0x162   : > { %v1876_v17 = vpop.f32.mrf.mxu0  ;;  %v2029_v21 = vpop.f32.mrf.mxu1 }
 0x163   : > { %v1877_v53 = vadd.f32 %v1876_v17, %v1875_v16  ;;  %v706_v16 = vadd.f32 %v2685_v14, %v2691_v24  ;;  %v2773_v14 = vld [vmem:[%s2838_s2] ss:$0 sm:$0xff] }
 0x164   : > { %v1878_v19 = vpop.f32.mrf.mxu0  ;;  %v1132_v26 = vpop.f32.mrf.mxu1 }
 0x165   : > { %v1133_v0 = vadd.f32 %v1877_v53, %v1132_v26  ;;  %v945_v55 = vmax.f32 %v706_v16, %v917_v9  ;;  %v1840_v9 = vadd.f32 %v2727_v5, %v2721_v2 }
 0x166   : > { %v1879_v23 = vpop.f32.mrf.mxu0  ;;  %v2030_v29 = vpop.f32.mrf.mxu1 }
 0x167   : > { %v1880_v1 = vadd.f32 %v1879_v23, %v1878_v19  ;;  %v1163_v49 = vmax.f32 %v2841_v45, %v1133_v0  ;;  %v1834_v19 = vadd.f32 %v2717_v59, %v2711_v56  ;;  %v933_v5 = vadd.f32 %v1840_v9, %v2741_v18 }
 0x168   : > { %v1881_v25 = vpop.f32.mrf.mxu0  ;;  %v1135_v33 = vpop.f32.mrf.mxu1 }
 0x169   : > { %v1136_v17 = vadd.f32 %v1880_v1, %v1135_v33 }
 0x16a   : > { %v1882_v27 = vpop.f32.mrf.mxu0  ;;  %v2743_v36 = vpop.f32.mrf.mxu1 }
 0x16b   : > { %v1883_v6 = vadd.f32 %v1882_v27, %v1881_v25  ;;  %v1164_v48 = vmax.f32 %v945_v55, %v1136_v17  ;;  %v722_v55 = vadd.f32 %v2693_v30, %v2701_v40 }
 0x16c   : > { %v1884_v28 = vpop.f32.mrf.mxu0  ;;  %v2747_v42 = vpop.f32.mrf.mxu1 }
 0x16d   : > { %v1141_v27 = vadd.f32 %v2029_v21, %v1883_v6  ;;  %v714_v21 = vadd.f32 %v2687_v20, %v2689_v22 }
 0x16e   : > { %v1885_v31 = vpop.f32.mrf.mxu0  ;;  %v2753_v46 = vpop.f32.mrf.mxu1 }
 0x16f   : > { %2840 = vst [vmem:[#allocation3_spill] sm:$0xff] %v2753_v46  ;;  %v1886_v33 = vadd.f32 %v1885_v31, %v1884_v28 }
 0x170   : > { %v1887_v32 = vpop.f32.mrf.mxu0  ;;  %v2759_v62 = vpop.f32.mrf.mxu1 }
 0x171   : > { %v1144_v28 = vadd.f32 %v2030_v29, %v1886_v33 }
 0x172   : > { %v1888_v34 = vpop.f32.mrf.mxu0 }
 0x173   : > { %v1889_v31 = vadd.f32 %v1888_v34, %v1887_v32 }
 0x174   : > { %v2745_v38 = vpop.f32.mrf.mxu0 }
 0x175   : > { %v1149_v32 = vadd.f32 %v1889_v31, %v2747_v42  ;;  %v2843_v42 = vmax.f32 %v2723_v3, %v2725_v4 }
 0x176   : > { %v1891_v41 = vpop.f32.mrf.mxu0 }
 0x177   : > { %v1892_v57 = vadd.f32 %v1891_v41, %v2745_v38 }
 0x178   : > { %v2749_v43 = vpop.f32.mrf.mxu0 }
 0x17a   : > { %v2751_v44 = vpop.f32.mrf.mxu0 }
 0x17b   : > { %v1895_v18 = vadd.f32 %v2751_v44, %v2749_v43 }
 0x17c   : > { %v2755_v52 = vpop.f32.mrf.mxu0 }
 0x17d   : > { %v1157_v4 = vadd.f32 %v2743_v36, %v1895_v18  ;;  %v2844_v36 = vmax.f32 %v2697_v37, %v2733_v11 }
 0x17e   : > { %v2757_v54 = vpop.f32.mrf.mxu0 }
 0x17f   : > { %v1898_v43 = vadd.f32 %v2757_v54, %v2755_v52  ;;  %v2845_v52 = vld [vmem:[#allocation3_spill] sm:$0xff] }
 0x180   : > { %v1927_v63 = vpop.f32.mrf.mxu0 }
 0x181   : > { %v1160_v54 = vadd.f32 %v2845_v52, %v1898_v43 }
 0x182   : > { %v1928_v7 = vpop.f32.mrf.mxu0  ;;  %v2053_v8 = vpop.f32.mrf.mxu1 }
 0x183   : > { %v1929_v13 = vadd.f32 %v1928_v7, %v1927_v63  ;;  %v1165_v63 = vmax.f32 %v2842_v60, %v1141_v27  ;;  %v1167_v27 = vmax.f32 %v2843_v42, %v1149_v32  ;;  %v730_v60 = vadd.f32 %v2695_v35, %v2699_v39 }
 0x184   : > { %v1930_v61 = vpop.f32.mrf.mxu0  ;;  %v1351_v50 = vpop.f32.mrf.mxu1 }
 0x185   : > { %v1352_v46 = vadd.f32 %v1929_v13, %v1351_v50  ;;  %v925_v13 = vadd.f32 %v2709_v51, %v1834_v19 }
 0x186   : > { %v1931_v23 = vpop.f32.mrf.mxu0  ;;  %v2054_v26 = vpop.f32.mrf.mxu1 }
 0x187   : > { %v1382_v53 = vmax.f32 %v1163_v49, %v1352_v46  ;;  %v1932_v25 = vadd.f32 %v1931_v23, %v1930_v61  ;;  %v947_v7 = vmax.f32 %v714_v21, %v925_v13 }
 0x188   : > { %v1933_v24 = vpop.f32.mrf.mxu0  ;;  %v1354_v47 = vpop.f32.mrf.mxu1 }
 0x189   : > { %v1355_v50 = vadd.f32 %v1932_v25, %v1354_v47  ;;  %v1397_v46 = vadd.f32 %v2773_v14, %v1382_v53  ;;  %v1166_v29 = vmax.f32 %v947_v7, %v1144_v28  ;;  %v1152_v53 = vadd.f32 %v1892_v57, %v2759_v62 }
 0x18a   : > { %v1934_v56 = vpop.f32.mrf.mxu0  ;;  %v2776_v59 = vpop.f32.mrf.mxu1  ;;  %v949_v47 = vmax.f32 %v722_v55, %v933_v5 }
 0x18b   : > { %v1383_v61 = vmax.f32 %v1164_v48, %v1355_v50  ;;  %v1935_v6 = vadd.f32 %v1934_v56, %v1933_v24  ;;  %v1405_v49 = vmax.f32 %v1397_v46, 0.0  ;;  %v1846_v48 = vadd.f32 %v2735_v12, %v2731_v10 }
 0x18c   : > { %v1936_v0 = vpop.f32.mrf.mxu0  ;;  %v1367_v45 = vpop.f32.mrf.mxu1  ;;  %v1168_v56 = vmax.f32 %v949_v47, %v1152_v53 }
 0x18d   : > { %v1398_v51 = vadd.f32 %v2773_v14, %v1383_v61  ;;  %v1360_v1 = vadd.f32 %v2053_v8, %v1935_v6  ;;  %v941_v61 = vadd.f32 %v2739_v15, %v1846_v48 }
 0x18e   : > { %v1937_v16 = vpop.f32.mrf.mxu0  ;;  %v2058_v19 = vpop.f32.mrf.mxu1 }
 0x18f   : > { %v1406_v17 = vmax.f32 %v1398_v51, 0.0  ;;  %v1384_v20 = vmax.f32 %v1165_v63, %v1360_v1  ;;  %v1938_v22 = vadd.f32 %v1937_v16, %v1936_v0  ;;  %v1169_v0 = vmax.f32 %v2844_v36, %v1157_v4 }
 0x190   : > { %v1939_v58 = vpop.f32.mrf.mxu0  ;;  %v1370_v30 = vpop.f32.mrf.mxu1  ;;  %v951_v31 = vmax.f32 %v730_v60, %v941_v61 }
 0x191   : > { %v1735_v34 = vpack.c.bf16 %v1406_v17, %v1405_v49  ;;  %v1363_v2 = vadd.f32 %v2054_v26, %v1938_v22  ;;  %v1399_v23 = vadd.f32 %v2773_v14, %v1384_v20 }
 0x192   : > { %v1940_v8 = vpop.f32.mrf.mxu0 }
 0x193   : > { %1736 = vst [vmem:[%s2791_s17] sm:$0xff] %v1735_v34   ;;  %v1385_v38 = vmax.f32 %v1166_v29, %v1363_v2  ;;  %v1941_v41 = vadd.f32 %v1940_v8, %v1939_v58  ;;  %v1407_v40 = vmax.f32 %v1399_v23, 0.0 }
 0x194   : > { %v1942_v25 = vpop.f32.mrf.mxu0 }
 0x195   : > { %v1400_v26 = vadd.f32 %v2773_v14, %v1385_v38  ;;  %v1368_v24 = vadd.f32 %v1941_v41, %v1367_v45  ;;  %v1170_v45 = vmax.f32 %v951_v31, %v1160_v54 }
 0x196   : > { %v1943_v33 = vpop.f32.mrf.mxu0 }
 0x197   : > { %v1408_v62 = vmax.f32 %v1400_v26, 0.0  ;;  %v1386_v50 = vmax.f32 %v1167_v27, %v1368_v24  ;;  %v1944_v13 = vadd.f32 %v1943_v33, %v1942_v25 }
 0x198   : > { %v1945_v3 = vpop.f32.mrf.mxu0 }
 0x199   : > { %v1740_v44 = vpack.c.bf16 %v1408_v62, %v1407_v40  ;;  %v1371_v46 = vadd.f32 %v1944_v13, %v1370_v30  ;;  %v1401_v10 = vadd.f32 %v2773_v14, %v1386_v50 }
 0x19a   : > { %v1946_v6 = vpop.f32.mrf.mxu0 }
 0x19b   : > { %1752 = vst [vmem:[%s2791_s17 + $0x8] sm:$0xff] %v1740_v44   ;;  %v1387_v12 = vmax.f32 %v1168_v56, %v1371_v46  ;;  %v1947_v21 = vadd.f32 %v1946_v6, %v1945_v3  ;;  %v1409_v1 = vmax.f32 %v1401_v10, 0.0 }
 0x19c   : > { %v1948_v63 = vpop.f32.mrf.mxu0 }
 0x19d   : > { %v1402_v28 = vadd.f32 %v2773_v14, %v1387_v12  ;;  %v1376_v15 = vadd.f32 %v2776_v59, %v1947_v21 }
 0x19e   : > { %v1949_v51 = vpop.f32.mrf.mxu0 }
 0x19f   : > { %v1410_v7 = vmax.f32 %v1402_v28, 0.0  ;;  %v1388_v9 = vmax.f32 %v1169_v0, %v1376_v15  ;;  %v1950_v16 = vadd.f32 %v1949_v51, %v1948_v63 }
 0x1a1   : > { %v1745_v35 = vpack.c.bf16 %v1410_v7, %v1409_v1  ;;  %v1379_v39 = vadd.f32 %v2058_v19, %v1950_v16  ;;  %v1403_v37 = vadd.f32 %v2773_v14, %v1388_v9 }
 0x1a3   : > { %1753 = vst [vmem:[%s2791_s17 + $0x10] sm:$0xff] %v1745_v35   ;;  %v1389_v11 = vmax.f32 %v1170_v45, %v1379_v39  ;;  %v1411_v17 = vmax.f32 %v1403_v37, 0.0 }
 0x1a5   : > { %v1404_v49 = vadd.f32 %v2773_v14, %v1389_v11 }
 0x1a7   : > { %v1412_v20 = vmax.f32 %v1404_v49, 0.0 }
 0x1a9   : > { %v1750_v22 = vpack.c.bf16 %v1412_v20, %v1411_v17 }
 0x1ab   : > { %1754 = vst [vmem:[%s2791_s17 + $0x18] sm:$0xff] %v1750_v22  }
 0x1ac PF: > { %p10_p9 = scmp.ge.s32.totalorder %s2235_s16, 4   ;;  %s2846_s12 = smov %s2192_s13 }
 0x1ad   : > { %s2847_s13 = smov %s2244_s19  ;;  %s2848_s14 = smov %s2235_s16 }
 0x1ae   :  { %12 = sbr.rel (!%p10_p9) target bundleno = 2 (0x2), region = 102 }

// kernel: font_cnn_forward.7
= control target key start
LH: loop header
LB: loop body
LE: loop exit
PB: predicated region body
PF: predicated region fallthrough
CT: control target
= control target key end

     0   :  { %s1838_s12 = smov 0   ;;  %s1840_s13 = smov 0   ;;  %s2370_s0 = inlined_call_operand.vmem [shape: bf16[4,32,640], index: 0, kind: input, shape index: {}]   ;;  %s2371_s1 = inlined_call_operand.vmem [shape: bf16[640,128], index: 1, kind: input, shape index: {}]   ;;  %s2372_s2 = inlined_call_operand.vmem [shape: f32[1,128], index: 2, kind: input, shape index: {}]   ;;  %s2373_s3 = inlined_call_operand.vmem [shape: bf16[32,128], index: 3, kind: output, shape index: {}]  }
   0x1   :  { %s1842_s14 = smov 0  }
   0x2 LB: > { %s1287_s15 = sadd.s32 4294967295, %s1814_s14   ;;  %s1855_s16 = sadd.s32 1, %s1814_s14   ;;  %s1814_s14 = sphi %s1842_s14, %s2376_s14   ;;  %s1810_s13 = sphi %s1840_s13, %s2375_s13   ;;  %s1806_s12 = sphi %s1838_s12, %s2374_s12  }
   0x3   : > { %s17_s17 = ssub.s32 %s1814_s14, %s1855_s16  ;;  %s20_s18 = sadd.s32 1, %s1810_s13 }
   0x4   : > { %p18_p0 = scmp.eq.s32.totalorder %s17_s17, 0  ;;  %p27_p1 = scmp.ne.s32.totalorder %s1810_s13, %s1806_s12 }
   0x5   : > { %p28_p2 = scmp.eq.s32.totalorder %s1814_s14, 0  ;;  %p1290_p4 = scmp.ge.s32.totalorder %s1814_s14, 2 }
   0x6   : > { %s1864_s19 = scalar_select %p18_p0, %s1810_s13, %s20_s18  }
   0x7   : > { %p29_p3 = por %p28_p2, %p27_p1  ;;  %127 = sbr.rel (%p1290_p4) target bundleno = 30 (0x1e), region = 24 }
   0xc   : > { %130 = sbr.rel (!%p29_p3) target bundleno = 30 (0x1e), region = 28  ;;  %s132_s20 = sand.u32 (%p29_p3), 1, %s1810_s13  }
   0xd   : > { %s1696_s21 = smul.u32 (%p29_p3), 40, %s1814_s14 }
   0xe   : > { %s1695_s22 = smul.u32 (%p29_p3), 160, %s132_s20 }
   0xf   : > { %s1872_s25 = scalar_lea.vmem (%p29_p3), %s2370_s0, %s1696_s21 }
  0x10   : > { %v153_v0 = vld [vmem:[%s1872_s25] sm:$0xff] (%p29_p3)  ;;  %v155_v1 = vld [vmem:[%s1872_s25 + $0x8] sm:$0xff] (%p29_p3)  ;;  %v157_v2 = vld [vmem:[%s1872_s25 + $0x14] sm:$0xff] (%p29_p3)  ;;  %s1877_s26 = scalar_lea.vmem (%p29_p3), [#allocation2], %s1695_s22 }
  0x11   : > { %154 = vst [vmem:[%s1877_s26] sm:$0xff] %v153_v0  ;;  %156 = vst [vmem:[%s1877_s26 + $0x8] sm:$0xff] %v155_v1  ;;  %v159_v3 = vld [vmem:[%s1872_s25 + $0x1c] sm:$0xff]  ;;  %v161_v4 = vld [vmem:[%s1872_s25 + $0x50] sm:$0xff] }
  0x12   : > { %158 = vst [vmem:[%s1877_s26 + $0x14] sm:$0xff] %v157_v2  ;;  %v163_v5 = vld [vmem:[%s1872_s25 + $0x58] sm:$0xff]  ;;  %160 = vst [vmem:[%s1877_s26 + $0x1c] sm:$0xff] %v159_v3  ;;  %v165_v6 = vld [vmem:[%s1872_s25 + $0x64] sm:$0xff] }
  0x13   : > { %162 = vst [vmem:[%s1877_s26 + $0x28] sm:$0xff] %v161_v4  ;;  %164 = vst [vmem:[%s1877_s26 + $0x30] sm:$0xff] %v163_v5  ;;  %v167_v7 = vld [vmem:[%s1872_s25 + $0x6c] sm:$0xff]  ;;  %v169_v8 = vld [vmem:[%s1872_s25 + $0xa0] sm:$0xff] }
  0x14   : > { %166 = vst [vmem:[%s1877_s26 + $0x3c] sm:$0xff] %v165_v6  ;;  %168 = vst [vmem:[%s1877_s26 + $0x44] sm:$0xff] %v167_v7  ;;  %v171_v9 = vld [vmem:[%s1872_s25 + $0xa8] sm:$0xff]  ;;  %v173_v10 = vld [vmem:[%s1872_s25 + $0xb4] sm:$0xff] }
  0x15   : > { %170 = vst [vmem:[%s1877_s26 + $0x50] sm:$0xff] %v169_v8  ;;  %v175_v11 = vld [vmem:[%s1872_s25 + $0xbc] sm:$0xff]  ;;  %172 = vst [vmem:[%s1877_s26 + $0x58] sm:$0xff] %v171_v9  ;;  %v177_v12 = vld [vmem:[%s1872_s25 + $0xf0] sm:$0xff] }
  0x16   : > { %174 = vst [vmem:[%s1877_s26 + $0x64] sm:$0xff] %v173_v10  ;;  %176 = vst [vmem:[%s1877_s26 + $0x6c] sm:$0xff] %v175_v11  ;;  %v179_v13 = vld [vmem:[%s1872_s25 + $0xf8] sm:$0xff]  ;;  %v181_v14 = vld [vmem:[%s1872_s25 + $0x104] sm:$0xff] }
  0x17   : > { %178 = vst [vmem:[%s1877_s26 + $0x78] sm:$0xff] %v177_v12  ;;  %180 = vst [vmem:[%s1877_s26 + $0x80] sm:$0xff] %v179_v13  ;;  %v183_v15 = vld [vmem:[%s1872_s25 + $0x10c] sm:$0xff]  ;;  %v1296_v17 = vld [vmem:[%s1872_s25 + $0x24] sm:$0xf] }
  0x18   : > { %182 = vst [vmem:[%s1877_s26 + $0x8c] sm:$0xff] %v181_v14  ;;  %v1294_v16 = vld [vmem:[%s1872_s25 + $0x10] sm:$0xf]  ;;  %184 = vst [vmem:[%s1877_s26 + $0x94] sm:$0xff] %v183_v15  ;;  %v1298_v18 = vld [vmem:[%s1872_s25 + $0x60] sm:$0xf] }
  0x19   : > { %1295 = vst [vmem:[%s1877_s26 + $0x10] sm:$0xf] %v1294_v16  ;;  %1297 = vst [vmem:[%s1877_s26 + $0x24] sm:$0xf] %v1296_v17  ;;  %v1300_v19 = vld [vmem:[%s1872_s25 + $0x74] sm:$0xf] }
  0x1a   : > { %v1302_v20 = vld [vmem:[%s1872_s25 + $0xb0] sm:$0xf]  ;;  %1299 = vst [vmem:[%s1877_s26 + $0x38] sm:$0xf] %v1298_v18  ;;  %1301 = vst [vmem:[%s1877_s26 + $0x4c] sm:$0xf] %v1300_v19 }
  0x1b   : > { %1303 = vst [vmem:[%s1877_s26 + $0x60] sm:$0xf] %v1302_v20  ;;  %v1304_v21 = vld [vmem:[%s1872_s25 + $0xc4] sm:$0xf]  ;;  %v1306_v22 = vld [vmem:[%s1872_s25 + $0x100] sm:$0xf] }
  0x1c   : > { %v1308_v23 = vld [vmem:[%s1872_s25 + $0x114] sm:$0xf]  ;;  %1305 = vst [vmem:[%s1877_s26 + $0x74] sm:$0xf] %v1304_v21  ;;  %1307 = vst [vmem:[%s1877_s26 + $0x88] sm:$0xf] %v1306_v22 }
  0x1d   : > { %1309 = vst [vmem:[%s1877_s26 + $0x9c] sm:$0xf] %v1308_v23 }
  0x1e PF: > { %p1310_p5 = scmp.ge.s32.totalorder %s1814_s14, 1  ;;  %p213_p6 = scmp.lt.s32.totalorder %s1814_s14, 3 }
  0x20   : > { %p214_p7 = pnand %p1310_p5, %p213_p6 }
  0x21   : > { %s220_s4 = sand.u32 (!%p214_p7), 1, %s1806_s12   ;;  %s1311_s24 = sshll.u32 (!%p214_p7), %s1287_s15, 1 }
  0x22   : > { %217 = sbr.rel (%p214_p7) target bundleno = 447 (0x1bf), region = 54  ;;  %p245_p8 = scmp.lt.s32.totalorder (!%p214_p7), %s1311_s24, 3 }
  0x23   : > { %s1697_s12 = smul.u32 (!%p214_p7), 160, %s220_s4 }
  0x25   : > { %s2118_s29 = scalar_lea.vmem (!%p214_p7), [#allocation2], %s1697_s12 }
  0x27   : > { %v1929_v24 = vld [vmem:[%s2371_s1 + $0x78] sm:$0xff]   ;;  %v1952_v28 = vld [vmem:[%s2371_s1 + $0x70] sm:$0xff]   ;;  %v1976_v32 = vld [vmem:[%s2371_s1 + $0x68] sm:$0xff]   ;;  %v1816_v58 = vmov 0.0   ;;  %vm1817_vm0 = vmmov 0   ;;  %s2378_s24 = smov (!%p245_p8, %s1311_s24), 3 }
  0x28   : > { %v1934_v25 = vld [vmem:[%s2371_s1 + $0xf8] sm:$0xff]   ;;  %1403 = vmatprep.subr.bf16.mxu0 %v1929_v24  ;;  %v1958_v29 = vld [vmem:[%s2371_s1 + $0xf0] sm:$0xff]   ;;  %v1982_v33 = vld [vmem:[%s2371_s1 + $0xe8] sm:$0xff]   ;;  %s1312_s14 = sshll.u32 %s2378_s24, 2 }
  0x29   : > { %v1940_v26 = vld [vmem:[%s2371_s1 + $0x38] sm:$0xff]   ;;  %1425 = vmatprep.subr.bf16.mxu1 %v1934_v25  ;;  %v1964_v30 = vld [vmem:[%s2371_s1 + $0x30] sm:$0xff]   ;;  %v1988_v34 = vld [vmem:[%s2371_s1 + $0x28] sm:$0xff]   ;;  %s248_s28 = scalar_lea.vmem %s2373_s3, %s1312_s14 }
  0x2a   : > { %v1946_v27 = vld [vmem:[%s2371_s1 + $0xb8] sm:$0xff]   ;;  %1404 = vmatpush3.bf16.msra.mxu0 %v1940_v26  ;;  %v1970_v31 = vld [vmem:[%s2371_s1 + $0xb0] sm:$0xff]   ;;  %v1994_v35 = vld [vmem:[%s2371_s1 + $0xa8] sm:$0xff]  }
  0x2b   : > { %1426 = vmatpush3.bf16.msra.mxu1 %v1946_v27  ;;  %1405 = vmatprep.subr.bf16.mxu0 %v1952_v28  ;;  %v2000_v36 = vld [vmem:[%s2371_s1 + $0x60] sm:$0xff]   ;;  %v2024_v40 = vld [vmem:[%s2371_s1 + $0x58] sm:$0xff]   ;;  %v2048_v44 = vld [vmem:[%s2371_s1 + $0x50] sm:$0xff]  }
  0x2c   : > { %1427 = vmatprep.subr.bf16.mxu1 %v1958_v29  ;;  %v2006_v37 = vld [vmem:[%s2371_s1 + $0xe0] sm:$0xff]   ;;  %v2030_v41 = vld [vmem:[%s2371_s1 + $0xd8] sm:$0xff]   ;;  %v2054_v45 = vld [vmem:[%s2371_s1 + $0xd0] sm:$0xff]  }
  0x2d   : > { %v2012_v38 = vld [vmem:[%s2371_s1 + $0x20] sm:$0xff]   ;;  %v2036_v42 = vld [vmem:[%s2371_s1 + $0x18] sm:$0xff]   ;;  %v2060_v46 = vld [vmem:[%s2371_s1 + $0x10] sm:$0xff]  }
  0x2e   : > { %1406 = vmatpush3.bf16.msra.mxu0 %v1964_v30  ;;  %v2018_v39 = vld [vmem:[%s2371_s1 + $0xa0] sm:$0xff]   ;;  %v2042_v43 = vld [vmem:[%s2371_s1 + $0x98] sm:$0xff]   ;;  %v2067_v47 = vld [vmem:[%s2371_s1 + $0x90] sm:$0xff]  }
  0x2f   : > { %1428 = vmatpush3.bf16.msra.mxu1 %v1970_v31  ;;  %1407 = vmatprep.subr.bf16.mxu0 %v1976_v32  ;;  %v2073_v48 = vld [vmem:[%s2371_s1 + $0x48] sm:$0xff]   ;;  %v2097_v52 = vld [vmem:[%s2371_s1 + $0x40] sm:$0xff]   ;;  %v2130_v61 = vld [vmem:[%s2371_s1 + $0x138] sm:$0xff]  }
  0x30   : > { %1429 = vmatprep.subr.bf16.mxu1 %v1982_v33  ;;  %v2079_v49 = vld [vmem:[%s2371_s1 + $0xc8] sm:$0xff]   ;;  %v2103_v53 = vld [vmem:[%s2371_s1 + $0xc0] sm:$0xff]   ;;  %v2136_v62 = vld [vmem:[%s2371_s1 + $0x130] sm:$0xff]  }
  0x31   : > { %v2085_v50 = vld [vmem:[%s2371_s1 + $0x8] sm:$0xff]   ;;  %v2109_v54 = vld [vmem:[%s2371_s1] sm:$0xff]   ;;  %v2166_v2 = vld [vmem:[%s2371_s1 + $0x118] sm:$0xff]  }
  0x32   : > { %1408 = vmatpush3.bf16.msra.mxu0 %v1988_v34  ;;  %v2091_v51 = vld [vmem:[%s2371_s1 + $0x88] sm:$0xff]   ;;  %v2115_v55 = vld [vmem:[%s2371_s1 + $0x80] sm:$0xff]   ;;  %v2175_v3 = vld [vmem:[%s2371_s1 + $0x110] sm:$0xff]  }
  0x33   : > { %1430 = vmatpush3.bf16.msra.mxu1 %v1994_v35  ;;  %1409 = vmatprep.subr.bf16.mxu0 %v2000_v36  ;;  %v1756_v56 = vld [vmem:[%s2118_s29] ss:$20 sps:$4 sm:$0xff]   ;;  %v1758_v57 = vld [vmem:[%s2118_s29 + $0x4] ss:$20 sps:$4 sm:$0xff]   ;;  %v1759_v59 = vld [vmem:[%s2118_s29 + $0x8] ss:$20 sps:$4 sm:$0xff]  }
  0x34   : > { %1431 = vmatprep.subr.bf16.mxu1 %v2006_v37  ;;  %v1761_v60 = vld [vmem:[%s2118_s29 + $0xc] ss:$20 sps:$4 sm:$0xff]   ;;  %635 = vmatprep.mubr.bf16.mxu0 %v1758_v57  ;;  %v1770_v6 = vld [vmem:[%s2118_s29 + $0x10] ss:$20 sps:$4 sm:$0xff]   ;;  %v1771_v7 = vld [vmem:[%s2118_s29 + $0x28] ss:$20 sps:$4 sm:$0xff]  }
  0x35   : > { %676 = vmatprep.mubr.bf16.mxu1 %v1761_v60  ;;  %v2147_v63 = vld [vmem:[%s2371_s1 + $0x128] sm:$0xff]   ;;  %v2157_v1 = vld [vmem:[%s2371_s1 + $0x120] sm:$0xff]   ;;  %v1783_v12 = vld [vmem:[%s2118_s29 + $0x5c] ss:$20 sps:$4 sm:$0xff]  }
  0x36   : > { %1410 = vmatpush3.bf16.msra.mxu0 %v2012_v38  ;;  %v1773_v0 = vld [vmem:[%s2118_s29 + $0x2c] ss:$20 sps:$4 sm:$0xff]   ;;  %v1776_v8 = vld [vmem:[%s2118_s29 + $0x34] ss:$20 sps:$4 sm:$0xff]   ;;  %v1774_v9 = vld [vmem:[%s2118_s29 + $0x30] ss:$20 sps:$4 sm:$0xff]  }
  0x37   : > { %1432 = vmatpush3.bf16.msra.mxu1 %v2018_v39  ;;  %1411 = vmatprep.subr.bf16.mxu0 %v2024_v40  ;;  %v2184_v4 = vld [vmem:[%s2371_s1 + $0x108] sm:$0xff]   ;;  %v2193_v5 = vld [vmem:[%s2371_s1 + $0x100] sm:$0xff]   ;;  %v1787_v15 = vld [vmem:[%s2118_s29 + $0x7c] ss:$20 sps:$4 sm:$0xff]  }
  0x38   : > { %1433 = vmatprep.subr.bf16.mxu1 %v2030_v41  ;;  %v1777_v10 = vld [vmem:[%s2118_s29 + $0x38] ss:$20 sps:$4 sm:$0xff]   ;;  %v1780_v11 = vld [vmem:[%s2118_s29 + $0x54] ss:$20 sps:$4 sm:$0xff]   ;;  %v1778_v13 = vld [vmem:[%s2118_s29 + $0x50] ss:$20 sps:$4 sm:$0xff]  }
  0x39   : > { %v1781_v14 = vld [vmem:[%s2118_s29 + $0x58] ss:$20 sps:$4 sm:$0xff]   ;;  %v1784_v16 = vld [vmem:[%s2118_s29 + $0x60] ss:$20 sps:$4 sm:$0xff]   ;;  %v1791_v20 = vld [vmem:[%s2118_s29 + $0x88] ss:$20 sps:$4 sm:$0xff]  }
  0x3a   : > { %1412 = vmatpush3.bf16.msra.mxu0 %v2036_v42  ;;  %v1785_v17 = vld [vmem:[%s2118_s29 + $0x78] ss:$20 sps:$4 sm:$0xff]   ;;  %v1788_v19 = vld [vmem:[%s2118_s29 + $0x80] ss:$20 sps:$4 sm:$0xff]  }
  0x3b   : > { %1434 = vmatpush3.bf16.msra.mxu1 %v2042_v43  ;;  %1413 = vmatprep.subr.bf16.mxu0 %v2048_v44  ;;  %v1790_v18 = vld [vmem:[%s2118_s29 + $0x84] ss:$20 sps:$4 sm:$0xff]  }
  0x3c   : > { %1435 = vmatprep.subr.bf16.mxu1 %v2054_v45 }
  0x3e   : > { %1414 = vmatpush3.bf16.msra.mxu0 %v2060_v46 }
  0x3f   : > { %1436 = vmatpush3.bf16.msra.mxu1 %v2067_v47  ;;  %1415 = vmatprep.subr.bf16.mxu0 %v2073_v48 }
  0x40   : > { %1437 = vmatprep.subr.bf16.mxu1 %v2079_v49 }
  0x42   : > { %1416 = vmatpush3.bf16.msra.mxu0 %v2085_v50 }
  0x43   : > { %1438 = vmatpush3.bf16.msra.mxu1 %v2091_v51  ;;  %1417 = vmatprep.subr.bf16.mxu0 %v2097_v52 }
  0x44   : > { %1439 = vmatprep.subr.bf16.mxu1 %v2103_v53 }
  0x46   : > { %1418 = vmatpush3.bf16.msra.mxu0 %v2109_v54 }
  0x47   : > { %1440 = vmatpush3.bf16.msra.mxu1 %v2115_v55  ;;  %1615 = vmatprep.subr.bf16.mxu0 %v1816_v58 }
  0x48   : > { %1456 = vmatprep.subr.bf16.mxu1 %v1929_v24 }
  0x49   : > { %636 = vmatmul.mubr.bf16.vlgmr.msra.gmra.mxu0 %v1756_v56 }
  0x4a   : > { %677 = vmatmul.mubr.bf16.vlgmr.msra.gmra.mxu1 %v1759_v59  ;;  %1616 = vmatpush3.bf16.msra.mxu0 %v2130_v61 }
  0x4b   : > { %1457 = vmatpush3.bf16.msra.mxu1 %v1940_v26  ;;  %1617 = vmatprep.subr.bf16.mxu0 %v1816_v58 }
  0x4c   : > { %1458 = vmatprep.subr.bf16.mxu1 %v1952_v28  ;;  %1631 = vmatprep.mubr.msk.bf16.mxu0 %vm1817_vm0, %v1816_v58 }
  0x4d   : > { %791 = vmatprep.mubr.bf16.mxu1 %v1773_v0 }
  0x4e   : > { %1618 = vmatpush3.bf16.msra.mxu0 %v2136_v62 }
  0x4f   : > { %1459 = vmatpush3.bf16.msra.mxu1 %v1964_v30  ;;  %1619 = vmatprep.subr.bf16.mxu0 %v1816_v58 }
  0x50   : > { %1460 = vmatprep.subr.bf16.mxu1 %v1976_v32 }
  0x52   : > { %1620 = vmatpush3.bf16.msra.mxu0 %v2147_v63 }
  0x53   : > { %1461 = vmatpush3.bf16.msra.mxu1 %v1988_v34  ;;  %1621 = vmatprep.subr.bf16.mxu0 %v1816_v58 }
  0x54   : > { %1462 = vmatprep.subr.bf16.mxu1 %v2000_v36 }
  0x56   : > { %1622 = vmatpush3.bf16.msra.mxu0 %v2157_v1 }
  0x57   : > { %1463 = vmatpush3.bf16.msra.mxu1 %v2012_v38  ;;  %1623 = vmatprep.subr.bf16.mxu0 %v1816_v58 }
  0x58   : > { %1464 = vmatprep.subr.bf16.mxu1 %v2024_v40 }
  0x5a   : > { %1624 = vmatpush3.bf16.msra.mxu0 %v2166_v2 }
  0x5b   : > { %1465 = vmatpush3.bf16.msra.mxu1 %v2036_v42  ;;  %1625 = vmatprep.subr.bf16.mxu0 %v1816_v58 }
  0x5c   : > { %1466 = vmatprep.subr.bf16.mxu1 %v2048_v44 }
  0x5e   : > { %1626 = vmatpush3.bf16.msra.mxu0 %v2175_v3 }
  0x5f   : > { %1467 = vmatpush3.bf16.msra.mxu1 %v2060_v46  ;;  %1627 = vmatprep.subr.bf16.mxu0 %v1816_v58 }
  0x60   : > { %1468 = vmatprep.subr.bf16.mxu1 %v2073_v48 }
  0x62   : > { %1628 = vmatpush3.bf16.msra.mxu0 %v2184_v4 }
  0x63   : > { %1469 = vmatpush3.bf16.msra.mxu1 %v2085_v50  ;;  %1629 = vmatprep.subr.bf16.mxu0 %v1816_v58 }
  0x64   : > { %1470 = vmatprep.subr.bf16.mxu1 %v2097_v52 }
  0x66   : > { %1630 = vmatpush3.bf16.msra.mxu0 %v2193_v5 }
  0x67   : > { %1471 = vmatpush3.bf16.msra.mxu1 %v2109_v54  ;;  %1478 = vmatprep.subr.bf16.mxu0 %v1934_v25 }
  0x68   : > { %1635 = vmatprep.subr.bf16.mxu1 %v1816_v58 }
  0x69   : > { %1632 = vmatmul.mubr.bf16.vlgmr.msra.gmra.mxu0 %v1770_v6 }
  0x6a   : > { %792 = vmatmul.mubr.bf16.vlgmr.msra.gmra.mxu1 %v1771_v7  ;;  %1479 = vmatpush3.bf16.msra.mxu0 %v1946_v27 }
  0x6b   : > { %1636 = vmatpush3.bf16.msra.mxu1 %v2130_v61  ;;  %1480 = vmatprep.subr.bf16.mxu0 %v1958_v29 }
  0x6c   : > { %1637 = vmatprep.subr.bf16.mxu1 %v1816_v58  ;;  %832 = vmatprep.mubr.bf16.mxu0 %v1776_v8 }
  0x6d   : > { %1651 = vmatprep.mubr.msk.bf16.mxu1 %vm1817_vm0, %v1816_v58 }
  0x6e   : > { %1481 = vmatpush3.bf16.msra.mxu0 %v1970_v31 }
  0x6f   : > { %1638 = vmatpush3.bf16.msra.mxu1 %v2136_v62  ;;  %1482 = vmatprep.subr.bf16.mxu0 %v1982_v33 }
  0x70   : > { %1639 = vmatprep.subr.bf16.mxu1 %v1816_v58 }
  0x72   : > { %1483 = vmatpush3.bf16.msra.mxu0 %v1994_v35 }
  0x73   : > { %1640 = vmatpush3.bf16.msra.mxu1 %v2147_v63  ;;  %1484 = vmatprep.subr.bf16.mxu0 %v2006_v37 }
  0x74   : > { %1641 = vmatprep.subr.bf16.mxu1 %v1816_v58 }
  0x76   : > { %1485 = vmatpush3.bf16.msra.mxu0 %v2018_v39 }
  0x77   : > { %1642 = vmatpush3.bf16.msra.mxu1 %v2157_v1  ;;  %1486 = vmatprep.subr.bf16.mxu0 %v2030_v41 }
  0x78   : > { %1643 = vmatprep.subr.bf16.mxu1 %v1816_v58 }
  0x7a   : > { %1487 = vmatpush3.bf16.msra.mxu0 %v2042_v43 }
  0x7b   : > { %1644 = vmatpush3.bf16.msra.mxu1 %v2166_v2  ;;  %1488 = vmatprep.subr.bf16.mxu0 %v2054_v45 }
  0x7c   : > { %1645 = vmatprep.subr.bf16.mxu1 %v1816_v58 }
  0x7e   : > { %1489 = vmatpush3.bf16.msra.mxu0 %v2067_v47 }
  0x7f   : > { %1646 = vmatpush3.bf16.msra.mxu1 %v2175_v3  ;;  %1490 = vmatprep.subr.bf16.mxu0 %v2079_v49 }
  0x80   : > { %1647 = vmatprep.subr.bf16.mxu1 %v1816_v58 }
  0x82   : > { %1491 = vmatpush3.bf16.msra.mxu0 %v2091_v51 }
  0x83   : > { %1648 = vmatpush3.bf16.msra.mxu1 %v2184_v4  ;;  %1492 = vmatprep.subr.bf16.mxu0 %v2103_v53 }
  0x84   : > { %1649 = vmatprep.subr.bf16.mxu1 %v1816_v58 }
  0x86   : > { %1493 = vmatpush3.bf16.msra.mxu0 %v2115_v55 }
  0x87   : > { %1650 = vmatpush3.bf16.msra.mxu1 %v2193_v5  ;;  %1509 = vmatprep.subr.bf16.mxu0 %v1929_v24 }
  0x88   : > { %1531 = vmatprep.subr.bf16.mxu1 %v1934_v25 }
  0x89   : > { %833 = vmatmul.mubr.bf16.vlgmr.msra.gmra.mxu0 %v1774_v9 }
  0x8a   : > { %1652 = vmatmul.mubr.bf16.vlgmr.msra.gmra.mxu1 %v1777_v10  ;;  %1510 = vmatpush3.bf16.msra.mxu0 %v1940_v26 }
  0x8b   : > { %1532 = vmatpush3.bf16.msra.mxu1 %v1946_v27  ;;  %1511 = vmatprep.subr.bf16.mxu0 %v1952_v28 }
  0x8c   : > { %1533 = vmatprep.subr.bf16.mxu1 %v1958_v29  ;;  %949 = vmatprep.mubr.bf16.mxu0 %v1780_v11 }
  0x8d   : > { %990 = vmatprep.mubr.bf16.mxu1 %v1783_v12 }
  0x8e   : > { %1512 = vmatpush3.bf16.msra.mxu0 %v1964_v30 }
  0x8f   : > { %1534 = vmatpush3.bf16.msra.mxu1 %v1970_v31  ;;  %1513 = vmatprep.subr.bf16.mxu0 %v1976_v32 }
  0x90   : > { %1535 = vmatprep.subr.bf16.mxu1 %v1982_v33 }
  0x92   : > { %1514 = vmatpush3.bf16.msra.mxu0 %v1988_v34 }
  0x93   : > { %1536 = vmatpush3.bf16.msra.mxu1 %v1994_v35  ;;  %1515 = vmatprep.subr.bf16.mxu0 %v2000_v36 }
  0x94   : > { %1537 = vmatprep.subr.bf16.mxu1 %v2006_v37 }
  0x96   : > { %1516 = vmatpush3.bf16.msra.mxu0 %v2012_v38 }
  0x97   : > { %1538 = vmatpush3.bf16.msra.mxu1 %v2018_v39  ;;  %1517 = vmatprep.subr.bf16.mxu0 %v2024_v40 }
  0x98   : > { %1539 = vmatprep.subr.bf16.mxu1 %v2030_v41 }
  0x9a   : > { %1518 = vmatpush3.bf16.msra.mxu0 %v2036_v42 }
  0x9b   : > { %1540 = vmatpush3.bf16.msra.mxu1 %v2042_v43  ;;  %1519 = vmatprep.subr.bf16.mxu0 %v2048_v44 }
  0x9c   : > { %1541 = vmatprep.subr.bf16.mxu1 %v2054_v45 }
  0x9e   : > { %1520 = vmatpush3.bf16.msra.mxu0 %v2060_v46 }
  0x9f   : > { %1542 = vmatpush3.bf16.msra.mxu1 %v2067_v47  ;;  %1521 = vmatprep.subr.bf16.mxu0 %v2073_v48 }
  0xa0   : > { %1543 = vmatprep.subr.bf16.mxu1 %v2079_v49 }
  0xa2   : > { %1522 = vmatpush3.bf16.msra.mxu0 %v2085_v50 }
  0xa3   : > { %1544 = vmatpush3.bf16.msra.mxu1 %v2091_v51  ;;  %1523 = vmatprep.subr.bf16.mxu0 %v2097_v52 }
  0xa4   : > { %1545 = vmatprep.subr.bf16.mxu1 %v2103_v53 }
  0xa6   : > { %1524 = vmatpush3.bf16.msra.mxu0 %v2109_v54 }
  0xa7   : > { %1546 = vmatpush3.bf16.msra.mxu1 %v2115_v55  ;;  %1655 = vmatprep.subr.bf16.mxu0 %v1816_v58 }
  0xa8   : > { %1562 = vmatprep.subr.bf16.mxu1 %v1929_v24 }
  0xa9   : > { %950 = vmatmul.mubr.bf16.vlgmr.msra.gmra.mxu0 %v1778_v13 }
  0xaa   : > { %991 = vmatmul.mubr.bf16.vlgmr.msra.gmra.mxu1 %v1781_v14  ;;  %1656 = vmatpush3.bf16.msra.mxu0 %v2130_v61 }
  0xab   : > { %1563 = vmatpush3.bf16.msra.mxu1 %v1940_v26  ;;  %1657 = vmatprep.subr.bf16.mxu0 %v1816_v58 }
  0xac   : > { %1564 = vmatprep.subr.bf16.mxu1 %v1952_v28  ;;  %1671 = vmatprep.mubr.msk.bf16.mxu0 %vm1817_vm0, %v1816_v58 }
  0xad   : > { %1107 = vmatprep.mubr.bf16.mxu1 %v1787_v15 }
  0xae   : > { %1658 = vmatpush3.bf16.msra.mxu0 %v2136_v62 }
  0xaf   : > { %1565 = vmatpush3.bf16.msra.mxu1 %v1964_v30  ;;  %1659 = vmatprep.subr.bf16.mxu0 %v1816_v58 }
  0xb0   : > { %1566 = vmatprep.subr.bf16.mxu1 %v1976_v32 }
  0xb2   : > { %1660 = vmatpush3.bf16.msra.mxu0 %v2147_v63 }
  0xb3   : > { %1567 = vmatpush3.bf16.msra.mxu1 %v1988_v34  ;;  %1661 = vmatprep.subr.bf16.mxu0 %v1816_v58 }
  0xb4   : > { %1568 = vmatprep.subr.bf16.mxu1 %v2000_v36 }
  0xb6   : > { %1662 = vmatpush3.bf16.msra.mxu0 %v2157_v1 }
  0xb7   : > { %1569 = vmatpush3.bf16.msra.mxu1 %v2012_v38  ;;  %1663 = vmatprep.subr.bf16.mxu0 %v1816_v58 }
  0xb8   : > { %1570 = vmatprep.subr.bf16.mxu1 %v2024_v40 }
  0xba   : > { %1664 = vmatpush3.bf16.msra.mxu0 %v2166_v2 }
  0xbb   : > { %1571 = vmatpush3.bf16.msra.mxu1 %v2036_v42  ;;  %1665 = vmatprep.subr.bf16.mxu0 %v1816_v58 }
  0xbc   : > { %1572 = vmatprep.subr.bf16.mxu1 %v2048_v44 }
  0xbe   : > { %1666 = vmatpush3.bf16.msra.mxu0 %v2175_v3 }
  0xbf   : > { %1573 = vmatpush3.bf16.msra.mxu1 %v2060_v46  ;;  %1667 = vmatprep.subr.bf16.mxu0 %v1816_v58 }
  0xc0   : > { %1574 = vmatprep.subr.bf16.mxu1 %v2073_v48 }
  0xc2   : > { %1668 = vmatpush3.bf16.msra.mxu0 %v2184_v4 }
  0xc3   : > { %1575 = vmatpush3.bf16.msra.mxu1 %v2085_v50  ;;  %1669 = vmatprep.subr.bf16.mxu0 %v1816_v58 }
  0xc4   : > { %1576 = vmatprep.subr.bf16.mxu1 %v2097_v52 }
  0xc6   : > { %1670 = vmatpush3.bf16.msra.mxu0 %v2193_v5 }
  0xc7   : > { %1577 = vmatpush3.bf16.msra.mxu1 %v2109_v54  ;;  %1584 = vmatprep.subr.bf16.mxu0 %v1934_v25 }
  0xc8   : > { %1675 = vmatprep.subr.bf16.mxu1 %v1816_v58 }
  0xc9   : > { %1672 = vmatmul.mubr.bf16.vlgmr.msra.gmra.mxu0 %v1784_v16 }
  0xca   : > { %1108 = vmatmul.mubr.bf16.vlgmr.msra.gmra.mxu1 %v1785_v17  ;;  %1585 = vmatpush3.bf16.msra.mxu0 %v1946_v27 }
  0xcb   : > { %1676 = vmatpush3.bf16.msra.mxu1 %v2130_v61  ;;  %1586 = vmatprep.subr.bf16.mxu0 %v1958_v29 }
  0xcc   : > { %1677 = vmatprep.subr.bf16.mxu1 %v1816_v58  ;;  %1148 = vmatprep.mubr.bf16.mxu0 %v1790_v18 }
  0xcd   : > { %1691 = vmatprep.mubr.msk.bf16.mxu1 %vm1817_vm0, %v1816_v58 }
  0xce   : > { %1587 = vmatpush3.bf16.msra.mxu0 %v1970_v31 }
  0xcf   : > { %1678 = vmatpush3.bf16.msra.mxu1 %v2136_v62  ;;  %1588 = vmatprep.subr.bf16.mxu0 %v1982_v33 }
  0xd0   : > { %1679 = vmatprep.subr.bf16.mxu1 %v1816_v58 }
  0xd2   : > { %1589 = vmatpush3.bf16.msra.mxu0 %v1994_v35 }
  0xd3   : > { %1680 = vmatpush3.bf16.msra.mxu1 %v2147_v63  ;;  %1590 = vmatprep.subr.bf16.mxu0 %v2006_v37 }
  0xd4   : > { %1681 = vmatprep.subr.bf16.mxu1 %v1816_v58 }
  0xd6   : > { %1591 = vmatpush3.bf16.msra.mxu0 %v2018_v39 }
  0xd7   : > { %1682 = vmatpush3.bf16.msra.mxu1 %v2157_v1  ;;  %1592 = vmatprep.subr.bf16.mxu0 %v2030_v41 }
  0xd8   : > { %1683 = vmatprep.subr.bf16.mxu1 %v1816_v58 }
  0xda   : > { %1593 = vmatpush3.bf16.msra.mxu0 %v2042_v43 }
  0xdb   : > { %1684 = vmatpush3.bf16.msra.mxu1 %v2166_v2  ;;  %1594 = vmatprep.subr.bf16.mxu0 %v2054_v45 }
  0xdc   : > { %1685 = vmatprep.subr.bf16.mxu1 %v1816_v58 }
  0xde   : > { %1595 = vmatpush3.bf16.msra.mxu0 %v2067_v47 }
  0xdf   : > { %1686 = vmatpush3.bf16.msra.mxu1 %v2175_v3  ;;  %1596 = vmatprep.subr.bf16.mxu0 %v2079_v49 }
  0xe0   : > { %1687 = vmatprep.subr.bf16.mxu1 %v1816_v58 }
  0xe2   : > { %1597 = vmatpush3.bf16.msra.mxu0 %v2091_v51 }
  0xe3   : > { %1688 = vmatpush3.bf16.msra.mxu1 %v2184_v4  ;;  %1598 = vmatprep.subr.bf16.mxu0 %v2103_v53 }
  0xe4   : > { %1689 = vmatprep.subr.bf16.mxu1 %v1816_v58 }
  0xe6   : > { %1599 = vmatpush3.bf16.msra.mxu0 %v2115_v55 }
  0xe7   : > { %1690 = vmatpush3.bf16.msra.mxu1 %v2193_v5 }
  0xe9   : > { %1149 = vmatmul.mubr.bf16.vlgmr.msra.gmra.mxu0 %v1788_v19 }
  0xea   : > { %1692 = vmatmul.mubr.bf16.vlgmr.msra.gmra.mxu1 %v1791_v20 }
 0x109   : > { %v1419_v21 = vpop.f32.mrf.mxu0 }
 0x10a   : > { %v1441_v22 = vpop.f32.mrf.mxu1 }
 0x10b   : > { %v1420_v23 = vpop.f32.mrf.mxu0 }
 0x10c   : > { %v1421_v24 = vadd.f32 %v1420_v23, %v1419_v21  ;;  %v1442_v25 = vpop.f32.mrf.mxu1 }
 0x10d   : > { %v1443_v26 = vadd.f32 %v1442_v25, %v1441_v22  ;;  %v1422_v27 = vpop.f32.mrf.mxu0 }
 0x10e   : > { %v1444_v28 = vpop.f32.mrf.mxu1 }
 0x10f   : > { %v1423_v29 = vpop.f32.mrf.mxu0  ;;  %v679_v30 = vadd.f32 %v1443_v26, %v1421_v24 }
 0x110   : > { %v1424_v31 = vadd.f32 %v1423_v29, %v1422_v27  ;;  %v1445_v32 = vpop.f32.mrf.mxu1 }
 0x111   : > { %v1446_v33 = vadd.f32 %v1445_v32, %v1444_v28 }
 0x113   : > { %v682_v34 = vadd.f32 %v1446_v33, %v1424_v31 }
 0x129   : > { %v719_v35 = vpop.f32.mrf.mxu0 }
 0x12a   : > { %v720_v36 = vadd.f32 %v719_v35, %v679_v30  ;;  %v1472_v37 = vpop.f32.mrf.mxu1 }
 0x12b   : > { %v1633_v38 = vpop.f32.mrf.mxu0 }
 0x12c   : > { %v1473_v39 = vpop.f32.mrf.mxu1 }
 0x12d   : > { %v1474_v40 = vadd.f32 %v1473_v39, %v1472_v37  ;;  %v722_v41 = vpop.f32.mrf.mxu0 }
 0x12e   : > { %v2349_v42 = vadd.f32 %v722_v41, %v682_v34  ;;  %v1475_v43 = vpop.f32.mrf.mxu1 }
 0x12f   : > { %v1634_v44 = vpop.f32.mrf.mxu0 }
 0x130   : > { %v1476_v45 = vpop.f32.mrf.mxu1 }
 0x131   : > { %v1477_v46 = vadd.f32 %v1476_v45, %v1475_v43 }
 0x149   : > { %v1494_v47 = vpop.f32.mrf.mxu0 }
 0x14a   : > { %v875_v48 = vpop.f32.mrf.mxu1 }
 0x14b   : > { %v1495_v49 = vpop.f32.mrf.mxu0 }
 0x14c   : > { %v1496_v50 = vadd.f32 %v1495_v49, %v1494_v47  ;;  %v1653_v51 = vpop.f32.mrf.mxu1 }
 0x14d   : > { %v1497_v52 = vpop.f32.mrf.mxu0 }
 0x14e   : > { %v835_v53 = vadd.f32 %v1496_v50, %v1474_v40  ;;  %v878_v54 = vpop.f32.mrf.mxu1  ;;  %v1391_v40 = vld [vmem:[%s2372_s2] ss:$0 sm:$0xff] }
 0x14f   : > { %v1498_v55 = vpop.f32.mrf.mxu0 }
 0x150   : > { %v876_v56 = vadd.f32 %v875_v48, %v835_v53  ;;  %v1499_v57 = vadd.f32 %v1498_v55, %v1497_v52  ;;  %v1654_v58 = vpop.f32.mrf.mxu1 }
 0x152   : > { %v838_v59 = vadd.f32 %v1499_v57, %v1477_v46  ;;  %v882_v60 = vmax.f32 %v720_v36, %v876_v56 }
 0x154   : > { %v879_v61 = vadd.f32 %v878_v54, %v838_v59 }
 0x156   : > { %v883_v62 = vmax.f32 %v2349_v42, %v879_v61 }
 0x169   : > { %v1525_v63 = vpop.f32.mrf.mxu0 }
 0x16a   : > { %v1547_v6 = vpop.f32.mrf.mxu1 }
 0x16b   : > { %v1526_v0 = vpop.f32.mrf.mxu0 }
 0x16c   : > { %v1548_v8 = vpop.f32.mrf.mxu1  ;;  %v1527_v14 = vadd.f32 %v1526_v0, %v1525_v63 }
 0x16d   : > { %v1528_v1 = vpop.f32.mrf.mxu0  ;;  %v1549_v15 = vadd.f32 %v1548_v8, %v1547_v6 }
 0x16e   : > { %v1550_v9 = vpop.f32.mrf.mxu1 }
 0x16f   : > { %v1529_v2 = vpop.f32.mrf.mxu0  ;;  %v993_v17 = vadd.f32 %v1549_v15, %v1527_v14 }
 0x170   : > { %v1551_v10 = vpop.f32.mrf.mxu1  ;;  %v1530_v19 = vadd.f32 %v1529_v2, %v1528_v1 }
 0x171   : > { %v1552_v20 = vadd.f32 %v1551_v10, %v1550_v9 }
 0x173   : > { %v996_v28 = vadd.f32 %v1552_v20, %v1530_v19 }
 0x189   : > { %v1033_v3 = vpop.f32.mrf.mxu0 }
 0x18a   : > { %v1578_v11 = vpop.f32.mrf.mxu1  ;;  %v1034_v22 = vadd.f32 %v1033_v3, %v993_v17 }
 0x18b   : > { %v1673_v4 = vpop.f32.mrf.mxu0 }
 0x18c   : > { %v1579_v12 = vpop.f32.mrf.mxu1  ;;  %v1040_v31 = vmax.f32 %v882_v60, %v1034_v22 }
 0x18d   : > { %v1036_v5 = vpop.f32.mrf.mxu0  ;;  %v1580_v24 = vadd.f32 %v1579_v12, %v1578_v11 }
 0x18e   : > { %v1581_v13 = vpop.f32.mrf.mxu1  ;;  %v1037_v33 = vadd.f32 %v1036_v5, %v996_v28 }
 0x18f   : > { %v1674_v7 = vpop.f32.mrf.mxu0 }
 0x190   : > { %v1582_v16 = vpop.f32.mrf.mxu1  ;;  %v1041_v41 = vmax.f32 %v883_v62, %v1037_v33 }
 0x191   : > { %v1583_v34 = vadd.f32 %v1582_v16, %v1581_v13 }
 0x1a9   : > { %v1600_v18 = vpop.f32.mrf.mxu0 }
 0x1aa   : > { %v1191_v21 = vpop.f32.mrf.mxu1 }
 0x1ab   : > { %v1601_v23 = vpop.f32.mrf.mxu0 }
 0x1ac   : > { %v1602_v25 = vadd.f32 %v1601_v23, %v1600_v18  ;;  %v1693_v26 = vpop.f32.mrf.mxu1 }
 0x1ad   : > { %v1603_v27 = vpop.f32.mrf.mxu0 }
 0x1ae   : > { %v1151_v29 = vadd.f32 %v1602_v25, %v1580_v24  ;;  %v1194_v30 = vpop.f32.mrf.mxu1 }
 0x1af   : > { %v1604_v32 = vpop.f32.mrf.mxu0 }
 0x1b0   : > { %v1192_v35 = vadd.f32 %v1191_v21, %v1151_v29  ;;  %v1605_v36 = vadd.f32 %v1604_v32, %v1603_v27  ;;  %v1694_v37 = vpop.f32.mrf.mxu1 }
 0x1b2   : > { %v1198_v38 = vmax.f32 %v1040_v31, %v1192_v35  ;;  %v1154_v39 = vadd.f32 %v1605_v36, %v1583_v34 }
 0x1b4   : > { %v1195_v42 = vadd.f32 %v1194_v30, %v1154_v39  ;;  %v1207_v43 = vadd.f32 %v1391_v40, %v1198_v38 }
 0x1b6   : > { %v1199_v44 = vmax.f32 %v1041_v41, %v1195_v42  ;;  %v1209_v46 = vmax.f32 %v1207_v43, 0.0 }
 0x1b8   : > { %v1208_v45 = vadd.f32 %v1391_v40, %v1199_v44 }
 0x1ba   : > { %v1210_v47 = vmax.f32 %v1208_v45, 0.0 }
 0x1bc   : > { %v1401_v48 = vpack.c.bf16 %v1210_v47, %v1209_v46 }
 0x1be   : > { %1402 = vst [vmem:[%s248_s28] sm:$0xff] %v1401_v48  }
 0x1bf PF: > { %p10_p9 = scmp.ge.s32.totalorder %s1855_s16, 4   ;;  %s2374_s12 = smov %s1810_s13 }
 0x1c0   : > { %s2375_s13 = smov %s1864_s19  ;;  %s2376_s14 = smov %s1855_s16 }
 0x1c1   :  { %12 = sbr.rel (!%p10_p9) target bundleno = 2 (0x2), region = 102 }

// kernel: font_cnn_forward.8
= control target key start
LH: loop header
LB: loop body
LE: loop exit
PB: predicated region body
PF: predicated region fallthrough
CT: control target
= control target key end

     0   :  { %s4168_s12 = smov 0   ;;  %s4170_s13 = smov 0   ;;  %s5070_s0 = inlined_call_operand.vmem [shape: bf16[2,2048], index: 0, kind: input, shape index: {}]   ;;  %s5071_s1 = inlined_call_operand.vmem [shape: bf16[2048,512], index: 1, kind: input, shape index: {}]   ;;  %s5072_s2 = inlined_call_operand.vmem [shape: f32[1,512], index: 2, kind: input, shape index: {}]   ;;  %s5073_s3 = inlined_call_operand.vmem [shape: bf16[2,512], index: 3, kind: output, shape index: {}]  }
   0x1   :  { %s4172_s14 = smov 0   ;;  %s4174_s15 = smov 0  }
   0x2   :  { %s4176_s16 = smov 0  }
   0x3 LB: > { %s22_s17 = sadd.s32 1, %s4141_s15  ;;  %p65_p1 = scmp.ne.s32.totalorder %s4133_s13, %s4129_s12  ;;  %s4145_s16 = sphi %s4176_s16, %s13_s16   ;;  %s4141_s15 = sphi %s4174_s15, %s5077_s15   ;;  %s4137_s14 = sphi %s4172_s14, %s5076_s14   ;;  %s4133_s13 = sphi %s4170_s13, %s5075_s13   ;;  %s4129_s12 = sphi %s4168_s12, %s5074_s12  }
   0x4   : > { %p23_p0 = scmp.ge.s32.totalorder %s22_s17, 2  ;;  %p66_p2 = scmp.eq.s32.totalorder %s4145_s16, 0 }
   0x5   : > { %s58_s19 = sadd.s32 1, %s4133_s13  ;;  %p3411_p5 = scmp.ge.s32.totalorder %s4145_s16, 2 }
   0x6   : > { %s5079_s17 = smov (%p23_p0, %s22_s17), 0  ;;  %p67_p3 = por %p66_p2, %p65_p1 }
   0x7   : > { %s55_s18 = ssub.s32 %s4141_s15, %s5079_s17  ;;  %152 = sbr.rel (%p3411_p5) target bundleno = 144 (0x90), region = 20 }
   0x8   : > { %p56_p4 = scmp.eq.s32.totalorder %s55_s18, 0 }
   0xa   : > { %s4203_s20 = scalar_select %p56_p4, %s4133_s13, %s58_s19  }
   0xc   : > { %155 = sbr.rel (!%p67_p3) target bundleno = 144 (0x90), region = 24  ;;  %s157_s21 = sand.u32 (%p67_p3), 1, %s4133_s13  }
   0xd   : > { %s3679_s22 = sshll.u32 (%p67_p3), %s4141_s15, 3  ;;  %s3412_s23 = sshll.u32 (%p67_p3), %s157_s21, 11 }
   0xe   : > { %s4211_s26 = scalar_lea.vmem (%p67_p3), %s5071_s1, %s3679_s22  ;;  %s4216_s27 = scalar_lea.vmem (%p67_p3), [#allocation2], %s3412_s23 }
   0xf   : > { %v701_v0 = vld [vmem:[%s4211_s26] sm:$0xff] (%p67_p3)  ;;  %v703_v1 = vld [vmem:[%s4211_s26 + $0x10] sm:$0xff] (%p67_p3) }
  0x10   : > { %v705_v2 = vld [vmem:[%s4211_s26 + $0x20] sm:$0xff] (%p67_p3)  ;;  %702 = vst [vmem:[%s4216_s27] sm:$0xff] (%p67_p3), %v701_v0  ;;  %704 = vst [vmem:[%s4216_s27 + $0x8] sm:$0xff] (%p67_p3), %v703_v1  ;;  %v707_v3 = vld [vmem:[%s4211_s26 + $0x30] sm:$0xff] (%p67_p3) }
  0x11   : > { %706 = vst [vmem:[%s4216_s27 + $0x10] sm:$0xff] %v705_v2  ;;  %v709_v4 = vld [vmem:[%s4211_s26 + $0x40] sm:$0xff]  ;;  %v711_v5 = vld [vmem:[%s4211_s26 + $0x50] sm:$0xff]  ;;  %708 = vst [vmem:[%s4216_s27 + $0x18] sm:$0xff] %v707_v3 }
  0x12   : > { %710 = vst [vmem:[%s4216_s27 + $0x20] sm:$0xff] %v709_v4  ;;  %712 = vst [vmem:[%s4216_s27 + $0x28] sm:$0xff] %v711_v5  ;;  %v713_v6 = vld [vmem:[%s4211_s26 + $0x60] sm:$0xff]  ;;  %v715_v7 = vld [vmem:[%s4211_s26 + $0x70] sm:$0xff] }
  0x13   : > { %v717_v8 = vld [vmem:[%s4211_s26 + $0x80] sm:$0xff]  ;;  %714 = vst [vmem:[%s4216_s27 + $0x30] sm:$0xff] %v713_v6  ;;  %716 = vst [vmem:[%s4216_s27 + $0x38] sm:$0xff] %v715_v7  ;;  %v719_v9 = vld [vmem:[%s4211_s26 + $0x90] sm:$0xff] }
  0x14   : > { %718 = vst [vmem:[%s4216_s27 + $0x40] sm:$0xff] %v717_v8  ;;  %v721_v10 = vld [vmem:[%s4211_s26 + $0xa0] sm:$0xff]  ;;  %v723_v11 = vld [vmem:[%s4211_s26 + $0xb0] sm:$0xff]  ;;  %720 = vst [vmem:[%s4216_s27 + $0x48] sm:$0xff] %v719_v9 }
  0x15   : > { %722 = vst [vmem:[%s4216_s27 + $0x50] sm:$0xff] %v721_v10  ;;  %724 = vst [vmem:[%s4216_s27 + $0x58] sm:$0xff] %v723_v11  ;;  %v725_v12 = vld [vmem:[%s4211_s26 + $0xc0] sm:$0xff]  ;;  %v727_v13 = vld [vmem:[%s4211_s26 + $0xd0] sm:$0xff] }
  0x16   : > { %v729_v14 = vld [vmem:[%s4211_s26 + $0xe0] sm:$0xff]  ;;  %726 = vst [vmem:[%s4216_s27 + $0x60] sm:$0xff] %v725_v12  ;;  %728 = vst [vmem:[%s4216_s27 + $0x68] sm:$0xff] %v727_v13  ;;  %v731_v15 = vld [vmem:[%s4211_s26 + $0xf0] sm:$0xff] }
  0x17   : > { %730 = vst [vmem:[%s4216_s27 + $0x70] sm:$0xff] %v729_v14  ;;  %v733_v16 = vld [vmem:[%s4211_s26 + $0x100] sm:$0xff]  ;;  %v735_v17 = vld [vmem:[%s4211_s26 + $0x110] sm:$0xff]  ;;  %732 = vst [vmem:[%s4216_s27 + $0x78] sm:$0xff] %v731_v15 }
  0x18   : > { %734 = vst [vmem:[%s4216_s27 + $0x80] sm:$0xff] %v733_v16  ;;  %736 = vst [vmem:[%s4216_s27 + $0x88] sm:$0xff] %v735_v17  ;;  %v737_v18 = vld [vmem:[%s4211_s26 + $0x120] sm:$0xff]  ;;  %v739_v19 = vld [vmem:[%s4211_s26 + $0x130] sm:$0xff] }
  0x19   : > { %v741_v20 = vld [vmem:[%s4211_s26 + $0x140] sm:$0xff]  ;;  %738 = vst [vmem:[%s4216_s27 + $0x90] sm:$0xff] %v737_v18  ;;  %740 = vst [vmem:[%s4216_s27 + $0x98] sm:$0xff] %v739_v19  ;;  %v743_v21 = vld [vmem:[%s4211_s26 + $0x150] sm:$0xff] }
  0x1a   : > { %742 = vst [vmem:[%s4216_s27 + $0xa0] sm:$0xff] %v741_v20  ;;  %v745_v22 = vld [vmem:[%s4211_s26 + $0x160] sm:$0xff]  ;;  %v747_v23 = vld [vmem:[%s4211_s26 + $0x170] sm:$0xff]  ;;  %744 = vst [vmem:[%s4216_s27 + $0xa8] sm:$0xff] %v743_v21 }
  0x1b   : > { %746 = vst [vmem:[%s4216_s27 + $0xb0] sm:$0xff] %v745_v22  ;;  %748 = vst [vmem:[%s4216_s27 + $0xb8] sm:$0xff] %v747_v23  ;;  %v749_v24 = vld [vmem:[%s4211_s26 + $0x180] sm:$0xff]  ;;  %v751_v25 = vld [vmem:[%s4211_s26 + $0x190] sm:$0xff] }
  0x1c   : > { %v753_v26 = vld [vmem:[%s4211_s26 + $0x1a0] sm:$0xff]  ;;  %750 = vst [vmem:[%s4216_s27 + $0xc0] sm:$0xff] %v749_v24  ;;  %752 = vst [vmem:[%s4216_s27 + $0xc8] sm:$0xff] %v751_v25  ;;  %v755_v27 = vld [vmem:[%s4211_s26 + $0x1b0] sm:$0xff] }
  0x1d   : > { %754 = vst [vmem:[%s4216_s27 + $0xd0] sm:$0xff] %v753_v26  ;;  %v757_v28 = vld [vmem:[%s4211_s26 + $0x1c0] sm:$0xff]  ;;  %v759_v29 = vld [vmem:[%s4211_s26 + $0x1d0] sm:$0xff]  ;;  %756 = vst [vmem:[%s4216_s27 + $0xd8] sm:$0xff] %v755_v27 }
  0x1e   : > { %758 = vst [vmem:[%s4216_s27 + $0xe0] sm:$0xff] %v757_v28  ;;  %760 = vst [vmem:[%s4216_s27 + $0xe8] sm:$0xff] %v759_v29  ;;  %v761_v30 = vld [vmem:[%s4211_s26 + $0x1e0] sm:$0xff]  ;;  %v763_v31 = vld [vmem:[%s4211_s26 + $0x1f0] sm:$0xff] }
  0x1f   : > { %v765_v32 = vld [vmem:[%s4211_s26 + $0x200] sm:$0xff]  ;;  %762 = vst [vmem:[%s4216_s27 + $0xf0] sm:$0xff] %v761_v30  ;;  %764 = vst [vmem:[%s4216_s27 + $0xf8] sm:$0xff] %v763_v31  ;;  %v767_v33 = vld [vmem:[%s4211_s26 + $0x210] sm:$0xff] }
  0x20   : > { %766 = vst [vmem:[%s4216_s27 + $0x100] sm:$0xff] %v765_v32  ;;  %v769_v34 = vld [vmem:[%s4211_s26 + $0x220] sm:$0xff]  ;;  %v771_v35 = vld [vmem:[%s4211_s26 + $0x230] sm:$0xff]  ;;  %768 = vst [vmem:[%s4216_s27 + $0x108] sm:$0xff] %v767_v33 }
  0x21   : > { %770 = vst [vmem:[%s4216_s27 + $0x110] sm:$0xff] %v769_v34  ;;  %772 = vst [vmem:[%s4216_s27 + $0x118] sm:$0xff] %v771_v35  ;;  %v773_v36 = vld [vmem:[%s4211_s26 + $0x240] sm:$0xff]  ;;  %v775_v37 = vld [vmem:[%s4211_s26 + $0x250] sm:$0xff] }
  0x22   : > { %v777_v38 = vld [vmem:[%s4211_s26 + $0x260] sm:$0xff]  ;;  %774 = vst [vmem:[%s4216_s27 + $0x120] sm:$0xff] %v773_v36  ;;  %776 = vst [vmem:[%s4216_s27 + $0x128] sm:$0xff] %v775_v37  ;;  %v779_v39 = vld [vmem:[%s4211_s26 + $0x270] sm:$0xff] }
  0x23   : > { %778 = vst [vmem:[%s4216_s27 + $0x130] sm:$0xff] %v777_v38  ;;  %v781_v40 = vld [vmem:[%s4211_s26 + $0x280] sm:$0xff]  ;;  %v783_v41 = vld [vmem:[%s4211_s26 + $0x290] sm:$0xff]  ;;  %780 = vst [vmem:[%s4216_s27 + $0x138] sm:$0xff] %v779_v39 }
  0x24   : > { %782 = vst [vmem:[%s4216_s27 + $0x140] sm:$0xff] %v781_v40  ;;  %784 = vst [vmem:[%s4216_s27 + $0x148] sm:$0xff] %v783_v41  ;;  %v785_v42 = vld [vmem:[%s4211_s26 + $0x2a0] sm:$0xff]  ;;  %v787_v43 = vld [vmem:[%s4211_s26 + $0x2b0] sm:$0xff] }
  0x25   : > { %v789_v44 = vld [vmem:[%s4211_s26 + $0x2c0] sm:$0xff]  ;;  %786 = vst [vmem:[%s4216_s27 + $0x150] sm:$0xff] %v785_v42  ;;  %788 = vst [vmem:[%s4216_s27 + $0x158] sm:$0xff] %v787_v43  ;;  %v791_v45 = vld [vmem:[%s4211_s26 + $0x2d0] sm:$0xff] }
  0x26   : > { %790 = vst [vmem:[%s4216_s27 + $0x160] sm:$0xff] %v789_v44  ;;  %v793_v46 = vld [vmem:[%s4211_s26 + $0x2e0] sm:$0xff]  ;;  %v795_v47 = vld [vmem:[%s4211_s26 + $0x2f0] sm:$0xff]  ;;  %792 = vst [vmem:[%s4216_s27 + $0x168] sm:$0xff] %v791_v45 }
  0x27   : > { %794 = vst [vmem:[%s4216_s27 + $0x170] sm:$0xff] %v793_v46  ;;  %796 = vst [vmem:[%s4216_s27 + $0x178] sm:$0xff] %v795_v47  ;;  %v797_v48 = vld [vmem:[%s4211_s26 + $0x300] sm:$0xff]  ;;  %v799_v49 = vld [vmem:[%s4211_s26 + $0x310] sm:$0xff] }
  0x28   : > { %v801_v50 = vld [vmem:[%s4211_s26 + $0x320] sm:$0xff]  ;;  %798 = vst [vmem:[%s4216_s27 + $0x180] sm:$0xff] %v797_v48  ;;  %800 = vst [vmem:[%s4216_s27 + $0x188] sm:$0xff] %v799_v49  ;;  %v803_v51 = vld [vmem:[%s4211_s26 + $0x330] sm:$0xff] }
  0x29   : > { %802 = vst [vmem:[%s4216_s27 + $0x190] sm:$0xff] %v801_v50  ;;  %v805_v52 = vld [vmem:[%s4211_s26 + $0x340] sm:$0xff]  ;;  %v807_v53 = vld [vmem:[%s4211_s26 + $0x350] sm:$0xff]  ;;  %804 = vst [vmem:[%s4216_s27 + $0x198] sm:$0xff] %v803_v51 }
  0x2a   : > { %806 = vst [vmem:[%s4216_s27 + $0x1a0] sm:$0xff] %v805_v52  ;;  %808 = vst [vmem:[%s4216_s27 + $0x1a8] sm:$0xff] %v807_v53  ;;  %v809_v54 = vld [vmem:[%s4211_s26 + $0x360] sm:$0xff]  ;;  %v811_v55 = vld [vmem:[%s4211_s26 + $0x370] sm:$0xff] }
  0x2b   : > { %v813_v56 = vld [vmem:[%s4211_s26 + $0x380] sm:$0xff]  ;;  %810 = vst [vmem:[%s4216_s27 + $0x1b0] sm:$0xff] %v809_v54  ;;  %812 = vst [vmem:[%s4216_s27 + $0x1b8] sm:$0xff] %v811_v55  ;;  %v815_v57 = vld [vmem:[%s4211_s26 + $0x390] sm:$0xff] }
  0x2c   : > { %814 = vst [vmem:[%s4216_s27 + $0x1c0] sm:$0xff] %v813_v56  ;;  %v817_v58 = vld [vmem:[%s4211_s26 + $0x3a0] sm:$0xff]  ;;  %v819_v59 = vld [vmem:[%s4211_s26 + $0x3b0] sm:$0xff]  ;;  %816 = vst [vmem:[%s4216_s27 + $0x1c8] sm:$0xff] %v815_v57 }
  0x2d   : > { %818 = vst [vmem:[%s4216_s27 + $0x1d0] sm:$0xff] %v817_v58  ;;  %820 = vst [vmem:[%s4216_s27 + $0x1d8] sm:$0xff] %v819_v59  ;;  %v821_v60 = vld [vmem:[%s4211_s26 + $0x3c0] sm:$0xff]  ;;  %v823_v61 = vld [vmem:[%s4211_s26 + $0x3d0] sm:$0xff] }
  0x2e   : > { %v825_v62 = vld [vmem:[%s4211_s26 + $0x3e0] sm:$0xff]  ;;  %822 = vst [vmem:[%s4216_s27 + $0x1e0] sm:$0xff] %v821_v60  ;;  %824 = vst [vmem:[%s4216_s27 + $0x1e8] sm:$0xff] %v823_v61  ;;  %v827_v63 = vld [vmem:[%s4211_s26 + $0x3f0] sm:$0xff] }
  0x2f   : > { %826 = vst [vmem:[%s4216_s27 + $0x1f0] sm:$0xff] %v825_v62  ;;  %v829_v0 = vld [vmem:[%s4211_s26 + $0x400] sm:$0xff]  ;;  %v831_v1 = vld [vmem:[%s4211_s26 + $0x410] sm:$0xff]  ;;  %828 = vst [vmem:[%s4216_s27 + $0x1f8] sm:$0xff] %v827_v63 }
  0x30   : > { %830 = vst [vmem:[%s4216_s27 + $0x200] sm:$0xff] %v829_v0  ;;  %832 = vst [vmem:[%s4216_s27 + $0x208] sm:$0xff] %v831_v1  ;;  %v833_v2 = vld [vmem:[%s4211_s26 + $0x420] sm:$0xff]  ;;  %v835_v3 = vld [vmem:[%s4211_s26 + $0x430] sm:$0xff] }
  0x31   : > { %v837_v4 = vld [vmem:[%s4211_s26 + $0x440] sm:$0xff]  ;;  %834 = vst [vmem:[%s4216_s27 + $0x210] sm:$0xff] %v833_v2  ;;  %836 = vst [vmem:[%s4216_s27 + $0x218] sm:$0xff] %v835_v3  ;;  %v839_v5 = vld [vmem:[%s4211_s26 + $0x450] sm:$0xff] }
  0x32   : > { %838 = vst [vmem:[%s4216_s27 + $0x220] sm:$0xff] %v837_v4  ;;  %v841_v6 = vld [vmem:[%s4211_s26 + $0x460] sm:$0xff]  ;;  %v843_v7 = vld [vmem:[%s4211_s26 + $0x470] sm:$0xff]  ;;  %840 = vst [vmem:[%s4216_s27 + $0x228] sm:$0xff] %v839_v5 }
  0x33   : > { %842 = vst [vmem:[%s4216_s27 + $0x230] sm:$0xff] %v841_v6  ;;  %844 = vst [vmem:[%s4216_s27 + $0x238] sm:$0xff] %v843_v7  ;;  %v845_v8 = vld [vmem:[%s4211_s26 + $0x480] sm:$0xff]  ;;  %v847_v9 = vld [vmem:[%s4211_s26 + $0x490] sm:$0xff] }
  0x34   : > { %v849_v10 = vld [vmem:[%s4211_s26 + $0x4a0] sm:$0xff]  ;;  %846 = vst [vmem:[%s4216_s27 + $0x240] sm:$0xff] %v845_v8  ;;  %848 = vst [vmem:[%s4216_s27 + $0x248] sm:$0xff] %v847_v9  ;;  %v851_v11 = vld [vmem:[%s4211_s26 + $0x4b0] sm:$0xff] }
  0x35   : > { %850 = vst [vmem:[%s4216_s27 + $0x250] sm:$0xff] %v849_v10  ;;  %v853_v12 = vld [vmem:[%s4211_s26 + $0x4c0] sm:$0xff]  ;;  %v855_v13 = vld [vmem:[%s4211_s26 + $0x4d0] sm:$0xff]  ;;  %852 = vst [vmem:[%s4216_s27 + $0x258] sm:$0xff] %v851_v11 }
  0x36   : > { %854 = vst [vmem:[%s4216_s27 + $0x260] sm:$0xff] %v853_v12  ;;  %856 = vst [vmem:[%s4216_s27 + $0x268] sm:$0xff] %v855_v13  ;;  %v857_v14 = vld [vmem:[%s4211_s26 + $0x4e0] sm:$0xff]  ;;  %v859_v15 = vld [vmem:[%s4211_s26 + $0x4f0] sm:$0xff] }
  0x37   : > { %v861_v16 = vld [vmem:[%s4211_s26 + $0x500] sm:$0xff]  ;;  %858 = vst [vmem:[%s4216_s27 + $0x270] sm:$0xff] %v857_v14  ;;  %860 = vst [vmem:[%s4216_s27 + $0x278] sm:$0xff] %v859_v15  ;;  %v863_v17 = vld [vmem:[%s4211_s26 + $0x510] sm:$0xff] }
  0x38   : > { %862 = vst [vmem:[%s4216_s27 + $0x280] sm:$0xff] %v861_v16  ;;  %v865_v18 = vld [vmem:[%s4211_s26 + $0x520] sm:$0xff]  ;;  %v867_v19 = vld [vmem:[%s4211_s26 + $0x530] sm:$0xff]  ;;  %864 = vst [vmem:[%s4216_s27 + $0x288] sm:$0xff] %v863_v17 }
  0x39   : > { %866 = vst [vmem:[%s4216_s27 + $0x290] sm:$0xff] %v865_v18  ;;  %868 = vst [vmem:[%s4216_s27 + $0x298] sm:$0xff] %v867_v19  ;;  %v869_v20 = vld [vmem:[%s4211_s26 + $0x540] sm:$0xff]  ;;  %v871_v21 = vld [vmem:[%s4211_s26 + $0x550] sm:$0xff] }
  0x3a   : > { %v873_v22 = vld [vmem:[%s4211_s26 + $0x560] sm:$0xff]  ;;  %870 = vst [vmem:[%s4216_s27 + $0x2a0] sm:$0xff] %v869_v20  ;;  %872 = vst [vmem:[%s4216_s27 + $0x2a8] sm:$0xff] %v871_v21  ;;  %v875_v23 = vld [vmem:[%s4211_s26 + $0x570] sm:$0xff] }
  0x3b   : > { %874 = vst [vmem:[%s4216_s27 + $0x2b0] sm:$0xff] %v873_v22  ;;  %v877_v24 = vld [vmem:[%s4211_s26 + $0x580] sm:$0xff]  ;;  %v879_v25 = vld [vmem:[%s4211_s26 + $0x590] sm:$0xff]  ;;  %876 = vst [vmem:[%s4216_s27 + $0x2b8] sm:$0xff] %v875_v23 }
  0x3c   : > { %878 = vst [vmem:[%s4216_s27 + $0x2c0] sm:$0xff] %v877_v24  ;;  %880 = vst [vmem:[%s4216_s27 + $0x2c8] sm:$0xff] %v879_v25  ;;  %v881_v26 = vld [vmem:[%s4211_s26 + $0x5a0] sm:$0xff]  ;;  %v883_v27 = vld [vmem:[%s4211_s26 + $0x5b0] sm:$0xff] }
  0x3d   : > { %v885_v28 = vld [vmem:[%s4211_s26 + $0x5c0] sm:$0xff]  ;;  %882 = vst [vmem:[%s4216_s27 + $0x2d0] sm:$0xff] %v881_v26  ;;  %884 = vst [vmem:[%s4216_s27 + $0x2d8] sm:$0xff] %v883_v27  ;;  %v887_v29 = vld [vmem:[%s4211_s26 + $0x5d0] sm:$0xff] }
  0x3e   : > { %886 = vst [vmem:[%s4216_s27 + $0x2e0] sm:$0xff] %v885_v28  ;;  %v889_v30 = vld [vmem:[%s4211_s26 + $0x5e0] sm:$0xff]  ;;  %v891_v31 = vld [vmem:[%s4211_s26 + $0x5f0] sm:$0xff]  ;;  %888 = vst [vmem:[%s4216_s27 + $0x2e8] sm:$0xff] %v887_v29 }
  0x3f   : > { %890 = vst [vmem:[%s4216_s27 + $0x2f0] sm:$0xff] %v889_v30  ;;  %892 = vst [vmem:[%s4216_s27 + $0x2f8] sm:$0xff] %v891_v31  ;;  %v893_v32 = vld [vmem:[%s4211_s26 + $0x600] sm:$0xff]  ;;  %v895_v33 = vld [vmem:[%s4211_s26 + $0x610] sm:$0xff] }
  0x40   : > { %v897_v34 = vld [vmem:[%s4211_s26 + $0x620] sm:$0xff]  ;;  %894 = vst [vmem:[%s4216_s27 + $0x300] sm:$0xff] %v893_v32  ;;  %896 = vst [vmem:[%s4216_s27 + $0x308] sm:$0xff] %v895_v33  ;;  %v899_v35 = vld [vmem:[%s4211_s26 + $0x630] sm:$0xff] }
  0x41   : > { %898 = vst [vmem:[%s4216_s27 + $0x310] sm:$0xff] %v897_v34  ;;  %v901_v36 = vld [vmem:[%s4211_s26 + $0x640] sm:$0xff]  ;;  %v903_v37 = vld [vmem:[%s4211_s26 + $0x650] sm:$0xff]  ;;  %900 = vst [vmem:[%s4216_s27 + $0x318] sm:$0xff] %v899_v35 }
  0x42   : > { %902 = vst [vmem:[%s4216_s27 + $0x320] sm:$0xff] %v901_v36  ;;  %904 = vst [vmem:[%s4216_s27 + $0x328] sm:$0xff] %v903_v37  ;;  %v905_v38 = vld [vmem:[%s4211_s26 + $0x660] sm:$0xff]  ;;  %v907_v39 = vld [vmem:[%s4211_s26 + $0x670] sm:$0xff] }
  0x43   : > { %v909_v40 = vld [vmem:[%s4211_s26 + $0x680] sm:$0xff]  ;;  %906 = vst [vmem:[%s4216_s27 + $0x330] sm:$0xff] %v905_v38  ;;  %908 = vst [vmem:[%s4216_s27 + $0x338] sm:$0xff] %v907_v39  ;;  %v911_v41 = vld [vmem:[%s4211_s26 + $0x690] sm:$0xff] }
  0x44   : > { %910 = vst [vmem:[%s4216_s27 + $0x340] sm:$0xff] %v909_v40  ;;  %v913_v42 = vld [vmem:[%s4211_s26 + $0x6a0] sm:$0xff]  ;;  %v915_v43 = vld [vmem:[%s4211_s26 + $0x6b0] sm:$0xff]  ;;  %912 = vst [vmem:[%s4216_s27 + $0x348] sm:$0xff] %v911_v41 }
  0x45   : > { %914 = vst [vmem:[%s4216_s27 + $0x350] sm:$0xff] %v913_v42  ;;  %916 = vst [vmem:[%s4216_s27 + $0x358] sm:$0xff] %v915_v43  ;;  %v917_v44 = vld [vmem:[%s4211_s26 + $0x6c0] sm:$0xff]  ;;  %v919_v45 = vld [vmem:[%s4211_s26 + $0x6d0] sm:$0xff] }
  0x46   : > { %v921_v46 = vld [vmem:[%s4211_s26 + $0x6e0] sm:$0xff]  ;;  %918 = vst [vmem:[%s4216_s27 + $0x360] sm:$0xff] %v917_v44  ;;  %920 = vst [vmem:[%s4216_s27 + $0x368] sm:$0xff] %v919_v45  ;;  %v923_v47 = vld [vmem:[%s4211_s26 + $0x6f0] sm:$0xff] }
  0x47   : > { %922 = vst [vmem:[%s4216_s27 + $0x370] sm:$0xff] %v921_v46  ;;  %v925_v48 = vld [vmem:[%s4211_s26 + $0x700] sm:$0xff]  ;;  %v927_v49 = vld [vmem:[%s4211_s26 + $0x710] sm:$0xff]  ;;  %924 = vst [vmem:[%s4216_s27 + $0x378] sm:$0xff] %v923_v47 }
  0x48   : > { %926 = vst [vmem:[%s4216_s27 + $0x380] sm:$0xff] %v925_v48  ;;  %928 = vst [vmem:[%s4216_s27 + $0x388] sm:$0xff] %v927_v49  ;;  %v929_v50 = vld [vmem:[%s4211_s26 + $0x720] sm:$0xff]  ;;  %v931_v51 = vld [vmem:[%s4211_s26 + $0x730] sm:$0xff] }
  0x49   : > { %v933_v52 = vld [vmem:[%s4211_s26 + $0x740] sm:$0xff]  ;;  %930 = vst [vmem:[%s4216_s27 + $0x390] sm:$0xff] %v929_v50  ;;  %932 = vst [vmem:[%s4216_s27 + $0x398] sm:$0xff] %v931_v51  ;;  %v935_v53 = vld [vmem:[%s4211_s26 + $0x750] sm:$0xff] }
  0x4a   : > { %934 = vst [vmem:[%s4216_s27 + $0x3a0] sm:$0xff] %v933_v52  ;;  %v937_v54 = vld [vmem:[%s4211_s26 + $0x760] sm:$0xff]  ;;  %v939_v55 = vld [vmem:[%s4211_s26 + $0x770] sm:$0xff]  ;;  %936 = vst [vmem:[%s4216_s27 + $0x3a8] sm:$0xff] %v935_v53 }
  0x4b   : > { %938 = vst [vmem:[%s4216_s27 + $0x3b0] sm:$0xff] %v937_v54  ;;  %940 = vst [vmem:[%s4216_s27 + $0x3b8] sm:$0xff] %v939_v55  ;;  %v941_v56 = vld [vmem:[%s4211_s26 + $0x780] sm:$0xff]  ;;  %v943_v57 = vld [vmem:[%s4211_s26 + $0x790] sm:$0xff] }
  0x4c   : > { %v945_v58 = vld [vmem:[%s4211_s26 + $0x7a0] sm:$0xff]  ;;  %942 = vst [vmem:[%s4216_s27 + $0x3c0] sm:$0xff] %v941_v56  ;;  %944 = vst [vmem:[%s4216_s27 + $0x3c8] sm:$0xff] %v943_v57  ;;  %v947_v59 = vld [vmem:[%s4211_s26 + $0x7b0] sm:$0xff] }
  0x4d   : > { %946 = vst [vmem:[%s4216_s27 + $0x3d0] sm:$0xff] %v945_v58  ;;  %v949_v60 = vld [vmem:[%s4211_s26 + $0x7c0] sm:$0xff]  ;;  %v951_v61 = vld [vmem:[%s4211_s26 + $0x7d0] sm:$0xff]  ;;  %948 = vst [vmem:[%s4216_s27 + $0x3d8] sm:$0xff] %v947_v59 }
  0x4e   : > { %950 = vst [vmem:[%s4216_s27 + $0x3e0] sm:$0xff] %v949_v60  ;;  %952 = vst [vmem:[%s4216_s27 + $0x3e8] sm:$0xff] %v951_v61  ;;  %v953_v62 = vld [vmem:[%s4211_s26 + $0x7e0] sm:$0xff]  ;;  %v955_v63 = vld [vmem:[%s4211_s26 + $0x7f0] sm:$0xff] }
  0x4f   : > { %v957_v0 = vld [vmem:[%s4211_s26 + $0x800] sm:$0xff]  ;;  %954 = vst [vmem:[%s4216_s27 + $0x3f0] sm:$0xff] %v953_v62  ;;  %956 = vst [vmem:[%s4216_s27 + $0x3f8] sm:$0xff] %v955_v63  ;;  %v959_v1 = vld [vmem:[%s4211_s26 + $0x810] sm:$0xff] }
  0x50   : > { %958 = vst [vmem:[%s4216_s27 + $0x400] sm:$0xff] %v957_v0  ;;  %v961_v2 = vld [vmem:[%s4211_s26 + $0x820] sm:$0xff]  ;;  %v963_v3 = vld [vmem:[%s4211_s26 + $0x830] sm:$0xff]  ;;  %960 = vst [vmem:[%s4216_s27 + $0x408] sm:$0xff] %v959_v1 }
  0x51   : > { %962 = vst [vmem:[%s4216_s27 + $0x410] sm:$0xff] %v961_v2  ;;  %964 = vst [vmem:[%s4216_s27 + $0x418] sm:$0xff] %v963_v3  ;;  %v965_v4 = vld [vmem:[%s4211_s26 + $0x840] sm:$0xff]  ;;  %v967_v5 = vld [vmem:[%s4211_s26 + $0x850] sm:$0xff] }
  0x52   : > { %v969_v6 = vld [vmem:[%s4211_s26 + $0x860] sm:$0xff]  ;;  %966 = vst [vmem:[%s4216_s27 + $0x420] sm:$0xff] %v965_v4  ;;  %968 = vst [vmem:[%s4216_s27 + $0x428] sm:$0xff] %v967_v5  ;;  %v971_v7 = vld [vmem:[%s4211_s26 + $0x870] sm:$0xff] }
  0x53   : > { %970 = vst [vmem:[%s4216_s27 + $0x430] sm:$0xff] %v969_v6  ;;  %v973_v8 = vld [vmem:[%s4211_s26 + $0x880] sm:$0xff]  ;;  %v975_v9 = vld [vmem:[%s4211_s26 + $0x890] sm:$0xff]  ;;  %972 = vst [vmem:[%s4216_s27 + $0x438] sm:$0xff] %v971_v7 }
  0x54   : > { %974 = vst [vmem:[%s4216_s27 + $0x440] sm:$0xff] %v973_v8  ;;  %976 = vst [vmem:[%s4216_s27 + $0x448] sm:$0xff] %v975_v9  ;;  %v977_v10 = vld [vmem:[%s4211_s26 + $0x8a0] sm:$0xff]  ;;  %v979_v11 = vld [vmem:[%s4211_s26 + $0x8b0] sm:$0xff] }
  0x55   : > { %v981_v12 = vld [vmem:[%s4211_s26 + $0x8c0] sm:$0xff]  ;;  %978 = vst [vmem:[%s4216_s27 + $0x450] sm:$0xff] %v977_v10  ;;  %980 = vst [vmem:[%s4216_s27 + $0x458] sm:$0xff] %v979_v11  ;;  %v983_v13 = vld [vmem:[%s4211_s26 + $0x8d0] sm:$0xff] }
  0x56   : > { %982 = vst [vmem:[%s4216_s27 + $0x460] sm:$0xff] %v981_v12  ;;  %v985_v14 = vld [vmem:[%s4211_s26 + $0x8e0] sm:$0xff]  ;;  %v987_v15 = vld [vmem:[%s4211_s26 + $0x8f0] sm:$0xff]  ;;  %984 = vst [vmem:[%s4216_s27 + $0x468] sm:$0xff] %v983_v13 }
  0x57   : > { %986 = vst [vmem:[%s4216_s27 + $0x470] sm:$0xff] %v985_v14  ;;  %988 = vst [vmem:[%s4216_s27 + $0x478] sm:$0xff] %v987_v15  ;;  %v989_v16 = vld [vmem:[%s4211_s26 + $0x900] sm:$0xff]  ;;  %v991_v17 = vld [vmem:[%s4211_s26 + $0x910] sm:$0xff] }
  0x58   : > { %v993_v18 = vld [vmem:[%s4211_s26 + $0x920] sm:$0xff]  ;;  %990 = vst [vmem:[%s4216_s27 + $0x480] sm:$0xff] %v989_v16  ;;  %992 = vst [vmem:[%s4216_s27 + $0x488] sm:$0xff] %v991_v17  ;;  %v995_v19 = vld [vmem:[%s4211_s26 + $0x930] sm:$0xff] }
  0x59   : > { %994 = vst [vmem:[%s4216_s27 + $0x490] sm:$0xff] %v993_v18  ;;  %v997_v20 = vld [vmem:[%s4211_s26 + $0x940] sm:$0xff]  ;;  %v999_v21 = vld [vmem:[%s4211_s26 + $0x950] sm:$0xff]  ;;  %996 = vst [vmem:[%s4216_s27 + $0x498] sm:$0xff] %v995_v19 }
  0x5a   : > { %998 = vst [vmem:[%s4216_s27 + $0x4a0] sm:$0xff] %v997_v20  ;;  %1000 = vst [vmem:[%s4216_s27 + $0x4a8] sm:$0xff] %v999_v21  ;;  %v1001_v22 = vld [vmem:[%s4211_s26 + $0x960] sm:$0xff]  ;;  %v1003_v23 = vld [vmem:[%s4211_s26 + $0x970] sm:$0xff] }
  0x5b   : > { %v1005_v24 = vld [vmem:[%s4211_s26 + $0x980] sm:$0xff]  ;;  %1002 = vst [vmem:[%s4216_s27 + $0x4b0] sm:$0xff] %v1001_v22  ;;  %1004 = vst [vmem:[%s4216_s27 + $0x4b8] sm:$0xff] %v1003_v23  ;;  %v1007_v25 = vld [vmem:[%s4211_s26 + $0x990] sm:$0xff] }
  0x5c   : > { %1006 = vst [vmem:[%s4216_s27 + $0x4c0] sm:$0xff] %v1005_v24  ;;  %v1009_v26 = vld [vmem:[%s4211_s26 + $0x9a0] sm:$0xff]  ;;  %v1011_v27 = vld [vmem:[%s4211_s26 + $0x9b0] sm:$0xff]  ;;  %1008 = vst [vmem:[%s4216_s27 + $0x4c8] sm:$0xff] %v1007_v25 }
  0x5d   : > { %1010 = vst [vmem:[%s4216_s27 + $0x4d0] sm:$0xff] %v1009_v26  ;;  %1012 = vst [vmem:[%s4216_s27 + $0x4d8] sm:$0xff] %v1011_v27  ;;  %v1013_v28 = vld [vmem:[%s4211_s26 + $0x9c0] sm:$0xff]  ;;  %v1015_v29 = vld [vmem:[%s4211_s26 + $0x9d0] sm:$0xff] }
  0x5e   : > { %v1017_v30 = vld [vmem:[%s4211_s26 + $0x9e0] sm:$0xff]  ;;  %1014 = vst [vmem:[%s4216_s27 + $0x4e0] sm:$0xff] %v1013_v28  ;;  %1016 = vst [vmem:[%s4216_s27 + $0x4e8] sm:$0xff] %v1015_v29  ;;  %v1019_v31 = vld [vmem:[%s4211_s26 + $0x9f0] sm:$0xff] }
  0x5f   : > { %1018 = vst [vmem:[%s4216_s27 + $0x4f0] sm:$0xff] %v1017_v30  ;;  %v1021_v32 = vld [vmem:[%s4211_s26 + $0xa00] sm:$0xff]  ;;  %v1023_v33 = vld [vmem:[%s4211_s26 + $0xa10] sm:$0xff]  ;;  %1020 = vst [vmem:[%s4216_s27 + $0x4f8] sm:$0xff] %v1019_v31 }
  0x60   : > { %1022 = vst [vmem:[%s4216_s27 + $0x500] sm:$0xff] %v1021_v32  ;;  %1024 = vst [vmem:[%s4216_s27 + $0x508] sm:$0xff] %v1023_v33  ;;  %v1025_v34 = vld [vmem:[%s4211_s26 + $0xa20] sm:$0xff]  ;;  %v1027_v35 = vld [vmem:[%s4211_s26 + $0xa30] sm:$0xff] }
  0x61   : > { %v1029_v36 = vld [vmem:[%s4211_s26 + $0xa40] sm:$0xff]  ;;  %1026 = vst [vmem:[%s4216_s27 + $0x510] sm:$0xff] %v1025_v34  ;;  %1028 = vst [vmem:[%s4216_s27 + $0x518] sm:$0xff] %v1027_v35  ;;  %v1031_v37 = vld [vmem:[%s4211_s26 + $0xa50] sm:$0xff] }
  0x62   : > { %1030 = vst [vmem:[%s4216_s27 + $0x520] sm:$0xff] %v1029_v36  ;;  %v1033_v38 = vld [vmem:[%s4211_s26 + $0xa60] sm:$0xff]  ;;  %v1035_v39 = vld [vmem:[%s4211_s26 + $0xa70] sm:$0xff]  ;;  %1032 = vst [vmem:[%s4216_s27 + $0x528] sm:$0xff] %v1031_v37 }
  0x63   : > { %1034 = vst [vmem:[%s4216_s27 + $0x530] sm:$0xff] %v1033_v38  ;;  %1036 = vst [vmem:[%s4216_s27 + $0x538] sm:$0xff] %v1035_v39  ;;  %v1037_v40 = vld [vmem:[%s4211_s26 + $0xa80] sm:$0xff]  ;;  %v1039_v41 = vld [vmem:[%s4211_s26 + $0xa90] sm:$0xff] }
  0x64   : > { %v1041_v42 = vld [vmem:[%s4211_s26 + $0xaa0] sm:$0xff]  ;;  %1038 = vst [vmem:[%s4216_s27 + $0x540] sm:$0xff] %v1037_v40  ;;  %1040 = vst [vmem:[%s4216_s27 + $0x548] sm:$0xff] %v1039_v41  ;;  %v1043_v43 = vld [vmem:[%s4211_s26 + $0xab0] sm:$0xff] }
  0x65   : > { %1042 = vst [vmem:[%s4216_s27 + $0x550] sm:$0xff] %v1041_v42  ;;  %v1045_v44 = vld [vmem:[%s4211_s26 + $0xac0] sm:$0xff]  ;;  %v1047_v45 = vld [vmem:[%s4211_s26 + $0xad0] sm:$0xff]  ;;  %1044 = vst [vmem:[%s4216_s27 + $0x558] sm:$0xff] %v1043_v43 }
  0x66   : > { %1046 = vst [vmem:[%s4216_s27 + $0x560] sm:$0xff] %v1045_v44  ;;  %1048 = vst [vmem:[%s4216_s27 + $0x568] sm:$0xff] %v1047_v45  ;;  %v1049_v46 = vld [vmem:[%s4211_s26 + $0xae0] sm:$0xff]  ;;  %v1051_v47 = vld [vmem:[%s4211_s26 + $0xaf0] sm:$0xff] }
  0x67   : > { %v1053_v48 = vld [vmem:[%s4211_s26 + $0xb00] sm:$0xff]  ;;  %1050 = vst [vmem:[%s4216_s27 + $0x570] sm:$0xff] %v1049_v46  ;;  %1052 = vst [vmem:[%s4216_s27 + $0x578] sm:$0xff] %v1051_v47  ;;  %v1055_v49 = vld [vmem:[%s4211_s26 + $0xb10] sm:$0xff] }
  0x68   : > { %1054 = vst [vmem:[%s4216_s27 + $0x580] sm:$0xff] %v1053_v48  ;;  %v1057_v50 = vld [vmem:[%s4211_s26 + $0xb20] sm:$0xff]  ;;  %v1059_v51 = vld [vmem:[%s4211_s26 + $0xb30] sm:$0xff]  ;;  %1056 = vst [vmem:[%s4216_s27 + $0x588] sm:$0xff] %v1055_v49 }
  0x69   : > { %1058 = vst [vmem:[%s4216_s27 + $0x590] sm:$0xff] %v1057_v50  ;;  %1060 = vst [vmem:[%s4216_s27 + $0x598] sm:$0xff] %v1059_v51  ;;  %v1061_v52 = vld [vmem:[%s4211_s26 + $0xb40] sm:$0xff]  ;;  %v1063_v53 = vld [vmem:[%s4211_s26 + $0xb50] sm:$0xff] }
  0x6a   : > { %v1065_v54 = vld [vmem:[%s4211_s26 + $0xb60] sm:$0xff]  ;;  %1062 = vst [vmem:[%s4216_s27 + $0x5a0] sm:$0xff] %v1061_v52  ;;  %1064 = vst [vmem:[%s4216_s27 + $0x5a8] sm:$0xff] %v1063_v53  ;;  %v1067_v55 = vld [vmem:[%s4211_s26 + $0xb70] sm:$0xff] }
  0x6b   : > { %1066 = vst [vmem:[%s4216_s27 + $0x5b0] sm:$0xff] %v1065_v54  ;;  %v1069_v56 = vld [vmem:[%s4211_s26 + $0xb80] sm:$0xff]  ;;  %v1071_v57 = vld [vmem:[%s4211_s26 + $0xb90] sm:$0xff]  ;;  %1068 = vst [vmem:[%s4216_s27 + $0x5b8] sm:$0xff] %v1067_v55 }
  0x6c   : > { %1070 = vst [vmem:[%s4216_s27 + $0x5c0] sm:$0xff] %v1069_v56  ;;  %1072 = vst [vmem:[%s4216_s27 + $0x5c8] sm:$0xff] %v1071_v57  ;;  %v1073_v58 = vld [vmem:[%s4211_s26 + $0xba0] sm:$0xff]  ;;  %v1075_v59 = vld [vmem:[%s4211_s26 + $0xbb0] sm:$0xff] }
  0x6d   : > { %v1077_v60 = vld [vmem:[%s4211_s26 + $0xbc0] sm:$0xff]  ;;  %1074 = vst [vmem:[%s4216_s27 + $0x5d0] sm:$0xff] %v1073_v58  ;;  %1076 = vst [vmem:[%s4216_s27 + $0x5d8] sm:$0xff] %v1075_v59  ;;  %v1079_v61 = vld [vmem:[%s4211_s26 + $0xbd0] sm:$0xff] }
  0x6e   : > { %1078 = vst [vmem:[%s4216_s27 + $0x5e0] sm:$0xff] %v1077_v60  ;;  %v1081_v62 = vld [vmem:[%s4211_s26 + $0xbe0] sm:$0xff]  ;;  %v1083_v63 = vld [vmem:[%s4211_s26 + $0xbf0] sm:$0xff]  ;;  %1080 = vst [vmem:[%s4216_s27 + $0x5e8] sm:$0xff] %v1079_v61 }
  0x6f   : > { %1082 = vst [vmem:[%s4216_s27 + $0x5f0] sm:$0xff] %v1081_v62  ;;  %1084 = vst [vmem:[%s4216_s27 + $0x5f8] sm:$0xff] %v1083_v63  ;;  %v1085_v0 = vld [vmem:[%s4211_s26 + $0xc00] sm:$0xff]  ;;  %v1087_v1 = vld [vmem:[%s4211_s26 + $0xc10] sm:$0xff] }
  0x70   : > { %v1089_v2 = vld [vmem:[%s4211_s26 + $0xc20] sm:$0xff]  ;;  %1086 = vst [vmem:[%s4216_s27 + $0x600] sm:$0xff] %v1085_v0  ;;  %1088 = vst [vmem:[%s4216_s27 + $0x608] sm:$0xff] %v1087_v1  ;;  %v1091_v3 = vld [vmem:[%s4211_s26 + $0xc30] sm:$0xff] }
  0x71   : > { %1090 = vst [vmem:[%s4216_s27 + $0x610] sm:$0xff] %v1089_v2  ;;  %v1093_v4 = vld [vmem:[%s4211_s26 + $0xc40] sm:$0xff]  ;;  %v1095_v5 = vld [vmem:[%s4211_s26 + $0xc50] sm:$0xff]  ;;  %1092 = vst [vmem:[%s4216_s27 + $0x618] sm:$0xff] %v1091_v3 }
  0x72   : > { %1094 = vst [vmem:[%s4216_s27 + $0x620] sm:$0xff] %v1093_v4  ;;  %1096 = vst [vmem:[%s4216_s27 + $0x628] sm:$0xff] %v1095_v5  ;;  %v1097_v6 = vld [vmem:[%s4211_s26 + $0xc60] sm:$0xff]  ;;  %v1099_v7 = vld [vmem:[%s4211_s26 + $0xc70] sm:$0xff] }
  0x73   : > { %v1101_v8 = vld [vmem:[%s4211_s26 + $0xc80] sm:$0xff]  ;;  %1098 = vst [vmem:[%s4216_s27 + $0x630] sm:$0xff] %v1097_v6  ;;  %1100 = vst [vmem:[%s4216_s27 + $0x638] sm:$0xff] %v1099_v7  ;;  %v1103_v9 = vld [vmem:[%s4211_s26 + $0xc90] sm:$0xff] }
  0x74   : > { %1102 = vst [vmem:[%s4216_s27 + $0x640] sm:$0xff] %v1101_v8  ;;  %v1105_v10 = vld [vmem:[%s4211_s26 + $0xca0] sm:$0xff]  ;;  %v1107_v11 = vld [vmem:[%s4211_s26 + $0xcb0] sm:$0xff]  ;;  %1104 = vst [vmem:[%s4216_s27 + $0x648] sm:$0xff] %v1103_v9 }
  0x75   : > { %1106 = vst [vmem:[%s4216_s27 + $0x650] sm:$0xff] %v1105_v10  ;;  %1108 = vst [vmem:[%s4216_s27 + $0x658] sm:$0xff] %v1107_v11  ;;  %v1109_v12 = vld [vmem:[%s4211_s26 + $0xcc0] sm:$0xff]  ;;  %v1111_v13 = vld [vmem:[%s4211_s26 + $0xcd0] sm:$0xff] }
  0x76   : > { %v1113_v14 = vld [vmem:[%s4211_s26 + $0xce0] sm:$0xff]  ;;  %1110 = vst [vmem:[%s4216_s27 + $0x660] sm:$0xff] %v1109_v12  ;;  %1112 = vst [vmem:[%s4216_s27 + $0x668] sm:$0xff] %v1111_v13  ;;  %v1115_v15 = vld [vmem:[%s4211_s26 + $0xcf0] sm:$0xff] }
  0x77   : > { %1114 = vst [vmem:[%s4216_s27 + $0x670] sm:$0xff] %v1113_v14  ;;  %v1117_v16 = vld [vmem:[%s4211_s26 + $0xd00] sm:$0xff]  ;;  %v1119_v17 = vld [vmem:[%s4211_s26 + $0xd10] sm:$0xff]  ;;  %1116 = vst [vmem:[%s4216_s27 + $0x678] sm:$0xff] %v1115_v15 }
  0x78   : > { %1118 = vst [vmem:[%s4216_s27 + $0x680] sm:$0xff] %v1117_v16  ;;  %1120 = vst [vmem:[%s4216_s27 + $0x688] sm:$0xff] %v1119_v17  ;;  %v1121_v18 = vld [vmem:[%s4211_s26 + $0xd20] sm:$0xff]  ;;  %v1123_v19 = vld [vmem:[%s4211_s26 + $0xd30] sm:$0xff] }
  0x79   : > { %v1125_v20 = vld [vmem:[%s4211_s26 + $0xd40] sm:$0xff]  ;;  %1122 = vst [vmem:[%s4216_s27 + $0x690] sm:$0xff] %v1121_v18  ;;  %1124 = vst [vmem:[%s4216_s27 + $0x698] sm:$0xff] %v1123_v19  ;;  %v1127_v21 = vld [vmem:[%s4211_s26 + $0xd50] sm:$0xff] }
  0x7a   : > { %1126 = vst [vmem:[%s4216_s27 + $0x6a0] sm:$0xff] %v1125_v20  ;;  %v1129_v22 = vld [vmem:[%s4211_s26 + $0xd60] sm:$0xff]  ;;  %v1131_v23 = vld [vmem:[%s4211_s26 + $0xd70] sm:$0xff]  ;;  %1128 = vst [vmem:[%s4216_s27 + $0x6a8] sm:$0xff] %v1127_v21 }
  0x7b   : > { %1130 = vst [vmem:[%s4216_s27 + $0x6b0] sm:$0xff] %v1129_v22  ;;  %1132 = vst [vmem:[%s4216_s27 + $0x6b8] sm:$0xff] %v1131_v23  ;;  %v1133_v24 = vld [vmem:[%s4211_s26 + $0xd80] sm:$0xff]  ;;  %v1135_v25 = vld [vmem:[%s4211_s26 + $0xd90] sm:$0xff] }
  0x7c   : > { %v1137_v26 = vld [vmem:[%s4211_s26 + $0xda0] sm:$0xff]  ;;  %1134 = vst [vmem:[%s4216_s27 + $0x6c0] sm:$0xff] %v1133_v24  ;;  %1136 = vst [vmem:[%s4216_s27 + $0x6c8] sm:$0xff] %v1135_v25  ;;  %v1139_v27 = vld [vmem:[%s4211_s26 + $0xdb0] sm:$0xff] }
  0x7d   : > { %1138 = vst [vmem:[%s4216_s27 + $0x6d0] sm:$0xff] %v1137_v26  ;;  %v1141_v28 = vld [vmem:[%s4211_s26 + $0xdc0] sm:$0xff]  ;;  %v1143_v29 = vld [vmem:[%s4211_s26 + $0xdd0] sm:$0xff]  ;;  %1140 = vst [vmem:[%s4216_s27 + $0x6d8] sm:$0xff] %v1139_v27 }
  0x7e   : > { %1142 = vst [vmem:[%s4216_s27 + $0x6e0] sm:$0xff] %v1141_v28  ;;  %1144 = vst [vmem:[%s4216_s27 + $0x6e8] sm:$0xff] %v1143_v29  ;;  %v1145_v30 = vld [vmem:[%s4211_s26 + $0xde0] sm:$0xff]  ;;  %v1147_v31 = vld [vmem:[%s4211_s26 + $0xdf0] sm:$0xff] }
  0x7f   : > { %v1149_v32 = vld [vmem:[%s4211_s26 + $0xe00] sm:$0xff]  ;;  %1146 = vst [vmem:[%s4216_s27 + $0x6f0] sm:$0xff] %v1145_v30  ;;  %1148 = vst [vmem:[%s4216_s27 + $0x6f8] sm:$0xff] %v1147_v31  ;;  %v1151_v33 = vld [vmem:[%s4211_s26 + $0xe10] sm:$0xff] }
  0x80   : > { %1150 = vst [vmem:[%s4216_s27 + $0x700] sm:$0xff] %v1149_v32  ;;  %v1153_v34 = vld [vmem:[%s4211_s26 + $0xe20] sm:$0xff]  ;;  %v1155_v35 = vld [vmem:[%s4211_s26 + $0xe30] sm:$0xff]  ;;  %1152 = vst [vmem:[%s4216_s27 + $0x708] sm:$0xff] %v1151_v33 }
  0x81   : > { %1154 = vst [vmem:[%s4216_s27 + $0x710] sm:$0xff] %v1153_v34  ;;  %1156 = vst [vmem:[%s4216_s27 + $0x718] sm:$0xff] %v1155_v35  ;;  %v1157_v36 = vld [vmem:[%s4211_s26 + $0xe40] sm:$0xff]  ;;  %v1159_v37 = vld [vmem:[%s4211_s26 + $0xe50] sm:$0xff] }
  0x82   : > { %v1161_v38 = vld [vmem:[%s4211_s26 + $0xe60] sm:$0xff]  ;;  %1158 = vst [vmem:[%s4216_s27 + $0x720] sm:$0xff] %v1157_v36  ;;  %1160 = vst [vmem:[%s4216_s27 + $0x728] sm:$0xff] %v1159_v37  ;;  %v1163_v39 = vld [vmem:[%s4211_s26 + $0xe70] sm:$0xff] }
  0x83   : > { %1162 = vst [vmem:[%s4216_s27 + $0x730] sm:$0xff] %v1161_v38  ;;  %v1165_v40 = vld [vmem:[%s4211_s26 + $0xe80] sm:$0xff]  ;;  %v1167_v41 = vld [vmem:[%s4211_s26 + $0xe90] sm:$0xff]  ;;  %1164 = vst [vmem:[%s4216_s27 + $0x738] sm:$0xff] %v1163_v39 }
  0x84   : > { %1166 = vst [vmem:[%s4216_s27 + $0x740] sm:$0xff] %v1165_v40  ;;  %1168 = vst [vmem:[%s4216_s27 + $0x748] sm:$0xff] %v1167_v41  ;;  %v1169_v42 = vld [vmem:[%s4211_s26 + $0xea0] sm:$0xff]  ;;  %v1171_v43 = vld [vmem:[%s4211_s26 + $0xeb0] sm:$0xff] }
  0x85   : > { %v1173_v44 = vld [vmem:[%s4211_s26 + $0xec0] sm:$0xff]  ;;  %1170 = vst [vmem:[%s4216_s27 + $0x750] sm:$0xff] %v1169_v42  ;;  %1172 = vst [vmem:[%s4216_s27 + $0x758] sm:$0xff] %v1171_v43  ;;  %v1175_v45 = vld [vmem:[%s4211_s26 + $0xed0] sm:$0xff] }
  0x86   : > { %1174 = vst [vmem:[%s4216_s27 + $0x760] sm:$0xff] %v1173_v44  ;;  %v1177_v46 = vld [vmem:[%s4211_s26 + $0xee0] sm:$0xff]  ;;  %v1179_v47 = vld [vmem:[%s4211_s26 + $0xef0] sm:$0xff]  ;;  %1176 = vst [vmem:[%s4216_s27 + $0x768] sm:$0xff] %v1175_v45 }
  0x87   : > { %1178 = vst [vmem:[%s4216_s27 + $0x770] sm:$0xff] %v1177_v46  ;;  %1180 = vst [vmem:[%s4216_s27 + $0x778] sm:$0xff] %v1179_v47  ;;  %v1181_v48 = vld [vmem:[%s4211_s26 + $0xf00] sm:$0xff]  ;;  %v1183_v49 = vld [vmem:[%s4211_s26 + $0xf10] sm:$0xff] }
  0x88   : > { %v1185_v50 = vld [vmem:[%s4211_s26 + $0xf20] sm:$0xff]  ;;  %1182 = vst [vmem:[%s4216_s27 + $0x780] sm:$0xff] %v1181_v48  ;;  %1184 = vst [vmem:[%s4216_s27 + $0x788] sm:$0xff] %v1183_v49  ;;  %v1187_v51 = vld [vmem:[%s4211_s26 + $0xf30] sm:$0xff] }
  0x89   : > { %1186 = vst [vmem:[%s4216_s27 + $0x790] sm:$0xff] %v1185_v50  ;;  %v1189_v52 = vld [vmem:[%s4211_s26 + $0xf40] sm:$0xff]  ;;  %v1191_v53 = vld [vmem:[%s4211_s26 + $0xf50] sm:$0xff]  ;;  %1188 = vst [vmem:[%s4216_s27 + $0x798] sm:$0xff] %v1187_v51 }
  0x8a   : > { %1190 = vst [vmem:[%s4216_s27 + $0x7a0] sm:$0xff] %v1189_v52  ;;  %1192 = vst [vmem:[%s4216_s27 + $0x7a8] sm:$0xff] %v1191_v53  ;;  %v1193_v54 = vld [vmem:[%s4211_s26 + $0xf60] sm:$0xff]  ;;  %v1195_v55 = vld [vmem:[%s4211_s26 + $0xf70] sm:$0xff] }
  0x8b   : > { %v1197_v56 = vld [vmem:[%s4211_s26 + $0xf80] sm:$0xff]  ;;  %1194 = vst [vmem:[%s4216_s27 + $0x7b0] sm:$0xff] %v1193_v54  ;;  %1196 = vst [vmem:[%s4216_s27 + $0x7b8] sm:$0xff] %v1195_v55  ;;  %v1199_v57 = vld [vmem:[%s4211_s26 + $0xf90] sm:$0xff] }
  0x8c   : > { %1198 = vst [vmem:[%s4216_s27 + $0x7c0] sm:$0xff] %v1197_v56  ;;  %v1201_v58 = vld [vmem:[%s4211_s26 + $0xfa0] sm:$0xff]  ;;  %v1203_v59 = vld [vmem:[%s4211_s26 + $0xfb0] sm:$0xff]  ;;  %1200 = vst [vmem:[%s4216_s27 + $0x7c8] sm:$0xff] %v1199_v57 }
  0x8d   : > { %1202 = vst [vmem:[%s4216_s27 + $0x7d0] sm:$0xff] %v1201_v58  ;;  %1204 = vst [vmem:[%s4216_s27 + $0x7d8] sm:$0xff] %v1203_v59  ;;  %v1205_v60 = vld [vmem:[%s4211_s26 + $0xfc0] sm:$0xff]  ;;  %v1207_v61 = vld [vmem:[%s4211_s26 + $0xfd0] sm:$0xff] }
  0x8e   : > { %v1209_v62 = vld [vmem:[%s4211_s26 + $0xfe0] sm:$0xff]  ;;  %1206 = vst [vmem:[%s4216_s27 + $0x7e0] sm:$0xff] %v1205_v60  ;;  %1208 = vst [vmem:[%s4216_s27 + $0x7e8] sm:$0xff] %v1207_v61  ;;  %v1211_v63 = vld [vmem:[%s4211_s26 + $0xff0] sm:$0xff] }
  0x8f   : > { %1210 = vst [vmem:[%s4216_s27 + $0x7f0] sm:$0xff] %v1209_v62  ;;  %1212 = vst [vmem:[%s4216_s27 + $0x7f8] sm:$0xff] %v1211_v63 }
  0x90 PF: > { %p3415_p6 = scmp.ge.s32.totalorder %s4145_s16, 1  ;;  %p1225_p7 = scmp.lt.s32.totalorder %s4145_s16, 3 }
  0x92   : > { %p1226_p8 = pnand %p3415_p6, %p1225_p7 }
  0x93   : > { %s1232_s28 = sand.u32 (!%p1226_p8), 1, %s4129_s12   ;;  %s3417_s8 = sshll.u32 (!%p1226_p8), %s4137_s14, 1 }
  0x94   : > { %1229 = sbr.rel (%p1226_p8) target bundleno = 616 (0x268), region = 66  ;;  %s3416_s29 = sshll.u32 (!%p1226_p8), %s1232_s28, 11 }
  0x95   : > { %s4737_s5 = scalar_lea.vmem (!%p1226_p8), [#allocation2], %s3416_s29  ;;  %p1272_p9 = scmp.lt.s32.totalorder (!%p1226_p8), %s3417_s8, 3 }
  0x99   : > { %v1545_v0 = vlaneseq  ;;  %v4147_v1 = vmov 1966171168   ;;  %v4733_v3 = vld [vmem:[%s5070_s0] sm:$0xff]  ;;  %v3721_v5 = vld [vmem:[%s4737_s5 + $0x74] ss:$8 sps:$4 sm:$0xff]   ;;  %s5081_s8 = smov (!%p1272_p9, %s3417_s8), 3 }
  0x9a   : > { %v1559_v2 = vunpack.c.l.s4 %v4147_v1  ;;  %v3723_v7 = vld [vmem:[%s4737_s5 + $0x174] ss:$8 sps:$4 sm:$0xff]   ;;  %2951 = vmatprep.subr.bf16.mxu0 %v3721_v5  ;;  %v3725_v8 = vld [vmem:[%s4737_s5 + $0x70] ss:$8 sps:$4 sm:$0xff]   ;;  %v3727_v11 = vld [vmem:[%s4737_s5 + $0x64] ss:$8 sps:$4 sm:$0xff]   ;;  %v1557_v1 = vcombine.high %v4733_v3, %v4733_v3  ;;  %s1274_s11 = scalar_lea.vmem %s5072_s2, %s5081_s8  ;;  %s1283_s18 = scalar_lea.vmem %s5073_s3, %s5081_s8 }
  0x9b   : > { %v4735_v4 = vshrl.u32 %v1545_v0, 7  ;;  %v3726_v9 = vld [vmem:[%s4737_s5 + $0x170] ss:$8 sps:$4 sm:$0xff]   ;;  %2992 = vmatprep.subr.bf16.mxu1 %v3723_v7  ;;  %2952 = vmatpush1.bf16.msra.mxu0 %v3725_v8  ;;  %v3729_v12 = vld [vmem:[%s4737_s5 + $0x164] ss:$8 sps:$4 sm:$0xff]  }
  0x9c   : > { %v1560_v6 = vunpack.c.0.s8 %v1559_v2  ;;  %2993 = vmatpush1.bf16.msra.mxu1 %v3726_v9  ;;  %v3731_v13 = vld [vmem:[%s4737_s5 + $0x60] ss:$8 sps:$4 sm:$0xff]   ;;  %2953 = vmatprep.subr.bf16.mxu0 %v3727_v11  ;;  %v3733_v16 = vld [vmem:[%s4737_s5 + $0x54] ss:$8 sps:$4 sm:$0xff]   ;;  %v3737_v19 = vld [vmem:[%s4737_s5 + $0x50] ss:$8 sps:$4 sm:$0xff]  }
  0x9d   : > { %v3732_v15 = vld [vmem:[%s4737_s5 + $0x160] ss:$8 sps:$4 sm:$0xff]   ;;  %2994 = vmatprep.subr.bf16.mxu1 %v3729_v12  ;;  %v3735_v18 = vld [vmem:[%s4737_s5 + $0x154] ss:$8 sps:$4 sm:$0xff]   ;;  %v3738_v20 = vld [vmem:[%s4737_s5 + $0x150] ss:$8 sps:$4 sm:$0xff]  }
  0x9e   : > { %v4744_v10 = vsub.s32 %v1560_v6, %v4735_v4  ;;  %v3739_v21 = vld [vmem:[%s4737_s5 + $0x44] ss:$8 sps:$4 sm:$0xff]   ;;  %v3743_v25 = vld [vmem:[%s4737_s5 + $0x40] ss:$8 sps:$4 sm:$0xff]   ;;  %v3745_v27 = vld [vmem:[%s4737_s5 + $0x34] ss:$8 sps:$4 sm:$0xff]  }
  0x9f   : > { %2954 = vmatpush1.bf16.msra.mxu0 %v3731_v13  ;;  %v3741_v23 = vld [vmem:[%s4737_s5 + $0x144] ss:$8 sps:$4 sm:$0xff]   ;;  %v3744_v26 = vld [vmem:[%s4737_s5 + $0x140] ss:$8 sps:$4 sm:$0xff]   ;;  %v3747_v28 = vld [vmem:[%s4737_s5 + $0x134] ss:$8 sps:$4 sm:$0xff]  }
  0xa0   : > { %v4751_v14 = vrot.slane %v4733_v3, %v4744_v10  ;;  %2995 = vmatpush1.bf16.msra.mxu1 %v3732_v15  ;;  %2955 = vmatprep.subr.bf16.mxu0 %v3733_v16  ;;  %v3749_v29 = vld [vmem:[%s4737_s5 + $0x30] ss:$8 sps:$4 sm:$0xff]   ;;  %v3751_v31 = vld [vmem:[%s4737_s5 + $0x24] ss:$8 sps:$4 sm:$0xff]   ;;  %v3755_v33 = vld [vmem:[%s4737_s5 + $0x20] ss:$8 sps:$4 sm:$0xff]   ;;  %v4810_v8 = vrot.slane %v1557_v1, %v4744_v10 }
  0xa1   : > { %2996 = vmatprep.subr.bf16.mxu1 %v3735_v18  ;;  %v3750_v30 = vld [vmem:[%s4737_s5 + $0x130] ss:$8 sps:$4 sm:$0xff]   ;;  %v3753_v32 = vld [vmem:[%s4737_s5 + $0x124] ss:$8 sps:$4 sm:$0xff]   ;;  %v3756_v34 = vld [vmem:[%s4737_s5 + $0x120] ss:$8 sps:$4 sm:$0xff]  }
  0xa2   : > { %v1572_v17 = vcombine.high %v4751_v14, %v4751_v14  ;;  %v3757_v35 = vld [vmem:[%s4737_s5 + $0x14] ss:$8 sps:$4 sm:$0xff]   ;;  %v3761_v37 = vld [vmem:[%s4737_s5 + $0x10] ss:$8 sps:$4 sm:$0xff]   ;;  %v3763_v39 = vld [vmem:[%s4737_s5 + $0x4] ss:$8 sps:$4 sm:$0xff]   ;;  %v1573_v13 = vcombine.high %v4810_v8, %v4810_v8 }
  0xa3   : > { %2956 = vmatpush1.bf16.msra.mxu0 %v3737_v19  ;;  %v3759_v36 = vld [vmem:[%s4737_s5 + $0x114] ss:$8 sps:$4 sm:$0xff]   ;;  %v3762_v38 = vld [vmem:[%s4737_s5 + $0x110] ss:$8 sps:$4 sm:$0xff]   ;;  %v3765_v40 = vld [vmem:[%s4737_s5 + $0x104] ss:$8 sps:$4 sm:$0xff]  }
  0xa4   : > { %v1594_v22 = vrot.slane %v1572_v17, %v4744_v10  ;;  %2997 = vmatpush1.bf16.msra.mxu1 %v3738_v20  ;;  %2957 = vmatprep.subr.bf16.mxu0 %v3739_v21  ;;  %v3767_v41 = vld [vmem:[%s4737_s5] ss:$8 sps:$4 sm:$0xff]   ;;  %v3769_v43 = vld [vmem:[%s4737_s5 + $0xf4] ss:$8 sps:$4 sm:$0xff]   ;;  %v3773_v45 = vld [vmem:[%s4737_s5 + $0xf0] ss:$8 sps:$4 sm:$0xff]   ;;  %v1580_v17 = vrot.slane %v4751_v14, %v4744_v10  ;;  %v1601_v20 = vrot.slane %v1573_v13, %v4744_v10 }
  0xa5   : > { %2998 = vmatprep.subr.bf16.mxu1 %v3741_v23  ;;  %v3768_v42 = vld [vmem:[%s4737_s5 + $0x100] ss:$8 sps:$4 sm:$0xff]   ;;  %v3771_v44 = vld [vmem:[%s4737_s5 + $0x1f4] ss:$8 sps:$4 sm:$0xff]   ;;  %v3774_v46 = vld [vmem:[%s4737_s5 + $0x1f0] ss:$8 sps:$4 sm:$0xff]  }
  0xa6   : > { %2983 = vmatprep.mubr.bf16.mxu0 %v1594_v22  ;;  %v1604_v24 = vcombine.high %v1594_v22, %v1594_v22  ;;  %v3775_v47 = vld [vmem:[%s4737_s5 + $0xe4] ss:$8 sps:$4 sm:$0xff]   ;;  %v3779_v49 = vld [vmem:[%s4737_s5 + $0xe0] ss:$8 sps:$4 sm:$0xff]   ;;  %v3781_v51 = vld [vmem:[%s4737_s5 + $0xd4] ss:$8 sps:$4 sm:$0xff]   ;;  %v1602_v21 = vcombine.high %v1580_v17, %v1580_v17 }
  0xa7   : > { %2958 = vmatpush1.bf16.msra.mxu0 %v3743_v25  ;;  %v3777_v48 = vld [vmem:[%s4737_s5 + $0x1e4] ss:$8 sps:$4 sm:$0xff]   ;;  %v3780_v50 = vld [vmem:[%s4737_s5 + $0x1e0] ss:$8 sps:$4 sm:$0xff]   ;;  %v3783_v52 = vld [vmem:[%s4737_s5 + $0x1d4] ss:$8 sps:$4 sm:$0xff]   ;;  %v1605_v25 = vcombine.high %v1601_v20, %v1601_v20 }
  0xa8   : > { %3024 = vmatprep.mubr.bf16.mxu1 %v1604_v24  ;;  %2999 = vmatpush1.bf16.msra.mxu1 %v3744_v26  ;;  %v3785_v53 = vld [vmem:[%s4737_s5 + $0xd0] ss:$8 sps:$4 sm:$0xff]   ;;  %v3787_v55 = vld [vmem:[%s4737_s5 + $0xc4] ss:$8 sps:$4 sm:$0xff]   ;;  %v3791_v57 = vld [vmem:[%s4737_s5 + $0xc0] ss:$8 sps:$4 sm:$0xff]  }
  0xa9   : > { %2959 = vmatprep.subr.bf16.mxu0 %v3745_v27  ;;  %3000 = vmatprep.subr.bf16.mxu1 %v3747_v28  ;;  %v3786_v54 = vld [vmem:[%s4737_s5 + $0x1d0] ss:$8 sps:$4 sm:$0xff]   ;;  %v3789_v56 = vld [vmem:[%s4737_s5 + $0x1c4] ss:$8 sps:$4 sm:$0xff]   ;;  %v3792_v58 = vld [vmem:[%s4737_s5 + $0x1c0] ss:$8 sps:$4 sm:$0xff]  }
  0xaa   : > { %v3793_v59 = vld [vmem:[%s4737_s5 + $0xb4] ss:$8 sps:$4 sm:$0xff]   ;;  %v3797_v61 = vld [vmem:[%s4737_s5 + $0xb0] ss:$8 sps:$4 sm:$0xff]   ;;  %v3799_v63 = vld [vmem:[%s4737_s5 + $0xa4] ss:$8 sps:$4 sm:$0xff]  }
  0xab   : > { %2960 = vmatpush1.bf16.msra.mxu0 %v3749_v29  ;;  %v3795_v60 = vld [vmem:[%s4737_s5 + $0x1b4] ss:$8 sps:$4 sm:$0xff]   ;;  %v3798_v62 = vld [vmem:[%s4737_s5 + $0x1b0] ss:$8 sps:$4 sm:$0xff]   ;;  %v3801_v0 = vld [vmem:[%s4737_s5 + $0x1a4] ss:$8 sps:$4 sm:$0xff]  }
  0xac   : > { %3001 = vmatpush1.bf16.msra.mxu1 %v3750_v30  ;;  %2961 = vmatprep.subr.bf16.mxu0 %v3751_v31  ;;  %v3803_v2 = vld [vmem:[%s4737_s5 + $0xa0] ss:$8 sps:$4 sm:$0xff]   ;;  %v3805_v6 = vld [vmem:[%s4737_s5 + $0x94] ss:$8 sps:$4 sm:$0xff]   ;;  %v3809_v9 = vld [vmem:[%s4737_s5 + $0x90] ss:$8 sps:$4 sm:$0xff]  }
  0xad   : > { %3002 = vmatprep.subr.bf16.mxu1 %v3753_v32  ;;  %v3804_v5 = vld [vmem:[%s4737_s5 + $0x1a0] ss:$8 sps:$4 sm:$0xff]   ;;  %v3807_v7 = vld [vmem:[%s4737_s5 + $0x194] ss:$8 sps:$4 sm:$0xff]   ;;  %v3810_v11 = vld [vmem:[%s4737_s5 + $0x190] ss:$8 sps:$4 sm:$0xff]  }
  0xae   : > { %v3811_v3 = vld [vmem:[%s4737_s5 + $0x84] ss:$8 sps:$4 sm:$0xff]   ;;  %v3815_v15 = vld [vmem:[%s4737_s5 + $0x80] ss:$8 sps:$4 sm:$0xff]   ;;  %v3820_v18 = vld [vmem:[%s4737_s5 + $0x274] ss:$8 sps:$4 sm:$0xff]  }
  0xaf   : > { %2962 = vmatpush1.bf16.msra.mxu0 %v3755_v33  ;;  %v3813_v12 = vld [vmem:[%s4737_s5 + $0x184] ss:$8 sps:$4 sm:$0xff]   ;;  %v3816_v16 = vld [vmem:[%s4737_s5 + $0x180] ss:$8 sps:$4 sm:$0xff]   ;;  %v3823_v19 = vld [vmem:[%s4737_s5 + $0x374] ss:$8 sps:$4 sm:$0xff]  }
  0xb0   : > { %3003 = vmatpush1.bf16.msra.mxu1 %v3756_v34  ;;  %2963 = vmatprep.subr.bf16.mxu0 %v3757_v35  ;;  %v3818_v22 = vld [vmem:[%s4737_s5 + $0x270] ss:$8 sps:$4 sm:$0xff]   ;;  %v3826_v24 = vld [vmem:[%s4737_s5 + $0x264] ss:$8 sps:$4 sm:$0xff]   ;;  %v3824_v26 = vld [vmem:[%s4737_s5 + $0x260] ss:$8 sps:$4 sm:$0xff]  }
  0xb1   : > { %3004 = vmatprep.subr.bf16.mxu1 %v3759_v36  ;;  %v3821_v23 = vld [vmem:[%s4737_s5 + $0x370] ss:$8 sps:$4 sm:$0xff]   ;;  %v3829_v14 = vld [vmem:[%s4737_s5 + $0x364] ss:$8 sps:$4 sm:$0xff]   ;;  %v3827_v27 = vld [vmem:[%s4737_s5 + $0x360] ss:$8 sps:$4 sm:$0xff]  }
  0xb2   : > { %v3832_v28 = vld [vmem:[%s4737_s5 + $0x254] ss:$8 sps:$4 sm:$0xff]   ;;  %v3830_v30 = vld [vmem:[%s4737_s5 + $0x250] ss:$8 sps:$4 sm:$0xff]   ;;  %v3838_v32 = vld [vmem:[%s4737_s5 + $0x244] ss:$8 sps:$4 sm:$0xff]  }
  0xb3   : > { %2964 = vmatpush1.bf16.msra.mxu0 %v3761_v37  ;;  %v3835_v29 = vld [vmem:[%s4737_s5 + $0x354] ss:$8 sps:$4 sm:$0xff]   ;;  %v3833_v31 = vld [vmem:[%s4737_s5 + $0x350] ss:$8 sps:$4 sm:$0xff]   ;;  %v3841_v33 = vld [vmem:[%s4737_s5 + $0x344] ss:$8 sps:$4 sm:$0xff]  }
  0xb4   : > { %3005 = vmatpush1.bf16.msra.mxu1 %v3762_v38  ;;  %2965 = vmatprep.subr.bf16.mxu0 %v3763_v39  ;;  %v3836_v34 = vld [vmem:[%s4737_s5 + $0x240] ss:$8 sps:$4 sm:$0xff]   ;;  %v3844_v36 = vld [vmem:[%s4737_s5 + $0x234] ss:$8 sps:$4 sm:$0xff]   ;;  %v3842_v38 = vld [vmem:[%s4737_s5 + $0x230] ss:$8 sps:$4 sm:$0xff]  }
  0xb5   : > { %3006 = vmatprep.subr.bf16.mxu1 %v3765_v40  ;;  %v3839_v35 = vld [vmem:[%s4737_s5 + $0x340] ss:$8 sps:$4 sm:$0xff]   ;;  %v3847_v37 = vld [vmem:[%s4737_s5 + $0x334] ss:$8 sps:$4 sm:$0xff]   ;;  %v3845_v39 = vld [vmem:[%s4737_s5 + $0x330] ss:$8 sps:$4 sm:$0xff]  }
  0xb6   : > { %v3850_v40 = vld [vmem:[%s4737_s5 + $0x224] ss:$8 sps:$4 sm:$0xff]   ;;  %v3896_v13 = vld [vmem:[%s4737_s5 + $0x2a0] ss:$8 sps:$4 sm:$0xff]  }
  0xb7   : > { %2966 = vmatpush1.bf16.msra.mxu0 %v3767_v41  ;;  %v3853_v41 = vld [vmem:[%s4737_s5 + $0x324] ss:$8 sps:$4 sm:$0xff]  }
  0xb8   : > { %3007 = vmatpush1.bf16.msra.mxu1 %v3768_v42  ;;  %2967 = vmatprep.subr.bf16.mxu0 %v3769_v43  ;;  %v3848_v42 = vld [vmem:[%s4737_s5 + $0x220] ss:$8 sps:$4 sm:$0xff]   ;;  %v3889_v1 = vld [vmem:[%s4737_s5 + $0x3c4] ss:$8 sps:$4 sm:$0xff]  }
  0xb9   : > { %3008 = vmatprep.subr.bf16.mxu1 %v3771_v44  ;;  %v3851_v43 = vld [vmem:[%s4737_s5 + $0x320] ss:$8 sps:$4 sm:$0xff]   ;;  %v3856_v44 = vld [vmem:[%s4737_s5 + $0x214] ss:$8 sps:$4 sm:$0xff]  }
  0xbb   : > { %2968 = vmatpush2.bf16.msra.mxu0 %v3773_v45  ;;  %v3859_v45 = vld [vmem:[%s4737_s5 + $0x314] ss:$8 sps:$4 sm:$0xff]  }
  0xbc   : > { %3009 = vmatpush2.bf16.msra.mxu1 %v3774_v46  ;;  %2969 = vmatprep.subr.bf16.mxu0 %v3775_v47  ;;  %v3854_v46 = vld [vmem:[%s4737_s5 + $0x210] ss:$8 sps:$4 sm:$0xff]  }
  0xbd   : > { %3010 = vmatprep.subr.bf16.mxu1 %v3777_v48  ;;  %v3857_v47 = vld [vmem:[%s4737_s5 + $0x310] ss:$8 sps:$4 sm:$0xff]   ;;  %v3862_v48 = vld [vmem:[%s4737_s5 + $0x204] ss:$8 sps:$4 sm:$0xff]  }
  0xbf   : > { %2970 = vmatpush2.bf16.msra.mxu0 %v3779_v49  ;;  %v3865_v49 = vld [vmem:[%s4737_s5 + $0x304] ss:$8 sps:$4 sm:$0xff]  }
  0xc0   : > { %3011 = vmatpush2.bf16.msra.mxu1 %v3780_v50  ;;  %2971 = vmatprep.subr.bf16.mxu0 %v3781_v51  ;;  %v3860_v50 = vld [vmem:[%s4737_s5 + $0x200] ss:$8 sps:$4 sm:$0xff]  }
  0xc1   : > { %3012 = vmatprep.subr.bf16.mxu1 %v3783_v52  ;;  %v3863_v51 = vld [vmem:[%s4737_s5 + $0x300] ss:$8 sps:$4 sm:$0xff]   ;;  %v3868_v52 = vld [vmem:[%s4737_s5 + $0x2f4] ss:$8 sps:$4 sm:$0xff]  }
  0xc3   : > { %2972 = vmatpush2.bf16.msra.mxu0 %v3785_v53  ;;  %v3871_v53 = vld [vmem:[%s4737_s5 + $0x3f4] ss:$8 sps:$4 sm:$0xff]  }
  0xc4   : > { %3013 = vmatpush2.bf16.msra.mxu1 %v3786_v54  ;;  %2973 = vmatprep.subr.bf16.mxu0 %v3787_v55  ;;  %v3866_v54 = vld [vmem:[%s4737_s5 + $0x2f0] ss:$8 sps:$4 sm:$0xff]  }
  0xc5   : > { %3014 = vmatprep.subr.bf16.mxu1 %v3789_v56  ;;  %v3869_v55 = vld [vmem:[%s4737_s5 + $0x3f0] ss:$8 sps:$4 sm:$0xff]   ;;  %v3874_v56 = vld [vmem:[%s4737_s5 + $0x2e4] ss:$8 sps:$4 sm:$0xff]  }
  0xc7   : > { %2974 = vmatpush2.bf16.msra.mxu0 %v3791_v57  ;;  %v3877_v57 = vld [vmem:[%s4737_s5 + $0x3e4] ss:$8 sps:$4 sm:$0xff]  }
  0xc8   : > { %3015 = vmatpush2.bf16.msra.mxu1 %v3792_v58  ;;  %2975 = vmatprep.subr.bf16.mxu0 %v3793_v59  ;;  %v3872_v58 = vld [vmem:[%s4737_s5 + $0x2e0] ss:$8 sps:$4 sm:$0xff]  }
  0xc9   : > { %3016 = vmatprep.subr.bf16.mxu1 %v3795_v60  ;;  %v3875_v59 = vld [vmem:[%s4737_s5 + $0x3e0] ss:$8 sps:$4 sm:$0xff]   ;;  %v3880_v60 = vld [vmem:[%s4737_s5 + $0x2d4] ss:$8 sps:$4 sm:$0xff]  }
  0xcb   : > { %2976 = vmatpush2.bf16.msra.mxu0 %v3797_v61  ;;  %v3883_v61 = vld [vmem:[%s4737_s5 + $0x3d4] ss:$8 sps:$4 sm:$0xff]  }
  0xcc   : > { %3017 = vmatpush2.bf16.msra.mxu1 %v3798_v62  ;;  %2977 = vmatprep.subr.bf16.mxu0 %v3799_v63  ;;  %v3878_v62 = vld [vmem:[%s4737_s5 + $0x2d0] ss:$8 sps:$4 sm:$0xff]  }
  0xcd   : > { %3018 = vmatprep.subr.bf16.mxu1 %v3801_v0  ;;  %v3881_v63 = vld [vmem:[%s4737_s5 + $0x3d0] ss:$8 sps:$4 sm:$0xff]   ;;  %v3886_v0 = vld [vmem:[%s4737_s5 + $0x2c4] ss:$8 sps:$4 sm:$0xff]  }
  0xcf   : > { %2978 = vmatpush2.bf16.msra.mxu0 %v3803_v2  ;;  %v3884_v2 = vld [vmem:[%s4737_s5 + $0x2c0] ss:$8 sps:$4 sm:$0xff]  }
  0xd0   : > { %3019 = vmatpush2.bf16.msra.mxu1 %v3804_v5  ;;  %2979 = vmatprep.subr.bf16.mxu0 %v3805_v6  ;;  %v3887_v5 = vld [vmem:[%s4737_s5 + $0x3c0] ss:$8 sps:$4 sm:$0xff]   ;;  %v3892_v6 = vld [vmem:[%s4737_s5 + $0x2b4] ss:$8 sps:$4 sm:$0xff]  }
  0xd1   : > { %3020 = vmatprep.subr.bf16.mxu1 %v3807_v7  ;;  %v3895_v7 = vld [vmem:[%s4737_s5 + $0x3b4] ss:$8 sps:$4 sm:$0xff]  }
  0xd3   : > { %2980 = vmatpush2.bf16.msra.mxu0 %v3809_v9  ;;  %v3890_v9 = vld [vmem:[%s4737_s5 + $0x2b0] ss:$8 sps:$4 sm:$0xff]  }
  0xd4   : > { %3021 = vmatpush2.bf16.msra.mxu1 %v3810_v11  ;;  %2981 = vmatprep.subr.bf16.mxu0 %v3811_v3  ;;  %v3893_v11 = vld [vmem:[%s4737_s5 + $0x3b0] ss:$8 sps:$4 sm:$0xff]   ;;  %v3898_v3 = vld [vmem:[%s4737_s5 + $0x2a4] ss:$8 sps:$4 sm:$0xff]  }
  0xd5   : > { %3022 = vmatprep.subr.bf16.mxu1 %v3813_v12  ;;  %v3901_v12 = vld [vmem:[%s4737_s5 + $0x3a4] ss:$8 sps:$4 sm:$0xff]  }
  0xd7   : > { %2982 = vmatpush2.bf16.msra.mxu0 %v3815_v15  ;;  %v3899_v15 = vld [vmem:[%s4737_s5 + $0x3a0] ss:$8 sps:$4 sm:$0xff]  }
  0xd8   : > { %3023 = vmatpush2.bf16.msra.mxu1 %v3816_v16  ;;  %3033 = vmatprep.subr.bf16.mxu0 %v3820_v18  ;;  %v3904_v16 = vld [vmem:[%s4737_s5 + $0x294] ss:$8 sps:$4 sm:$0xff]   ;;  %v3902_v18 = vld [vmem:[%s4737_s5 + $0x290] ss:$8 sps:$4 sm:$0xff]  }
  0xd9   : > { %3074 = vmatprep.subr.bf16.mxu1 %v3823_v19  ;;  %v3905_v19 = vld [vmem:[%s4737_s5 + $0x390] ss:$8 sps:$4 sm:$0xff]  }
  0xda   : > { %2984 = vmatmul.mubr.bf16.vlgmr.msra.gmra.mxu0 %v1580_v17  ;;  %v3907_v17 = vld [vmem:[%s4737_s5 + $0x394] ss:$8 sps:$4 sm:$0xff]  }
  0xdb   : > { %3025 = vmatmul.mubr.bf16.vlgmr.msra.gmra.mxu1 %v1602_v21  ;;  %3034 = vmatpush1.bf16.msra.mxu0 %v3818_v22  ;;  %v3913_v21 = vld [vmem:[%s4737_s5 + $0x384] ss:$8 sps:$4 sm:$0xff]   ;;  %v3908_v22 = vld [vmem:[%s4737_s5 + $0x280] ss:$8 sps:$4 sm:$0xff]  }
  0xdc   : > { %3075 = vmatpush1.bf16.msra.mxu1 %v3821_v23  ;;  %3035 = vmatprep.subr.bf16.mxu0 %v3826_v24  ;;  %v3911_v23 = vld [vmem:[%s4737_s5 + $0x380] ss:$8 sps:$4 sm:$0xff]   ;;  %v1587_v24 = vrot.slane %v4810_v8, %v4744_v10  ;;  %v3922_v8 = vld [vmem:[%s4737_s5 + $0x464] ss:$8 sps:$4 sm:$0xff]  }
  0xdd   : > { %3076 = vmatprep.subr.bf16.mxu1 %v3829_v14  ;;  %3065 = vmatprep.mubr.bf16.mxu0 %v1601_v20  ;;  %v3910_v20 = vld [vmem:[%s4737_s5 + $0x284] ss:$8 sps:$4 sm:$0xff]   ;;  %v3916_v14 = vld [vmem:[%s4737_s5 + $0x474] ss:$8 sps:$4 sm:$0xff]  }
  0xde   : > { %3106 = vmatprep.mubr.bf16.mxu1 %v1605_v25  ;;  %v3919_v25 = vld [vmem:[%s4737_s5 + $0x574] ss:$8 sps:$4 sm:$0xff]  }
  0xdf   : > { %3036 = vmatpush1.bf16.msra.mxu0 %v3824_v26  ;;  %v1603_v26 = vcombine.high %v1587_v24, %v1587_v24 }
  0xe0   : > { %3077 = vmatpush1.bf16.msra.mxu1 %v3827_v27  ;;  %3037 = vmatprep.subr.bf16.mxu0 %v3832_v28  ;;  %v3914_v27 = vld [vmem:[%s4737_s5 + $0x470] ss:$8 sps:$4 sm:$0xff]  }
  0xe1   : > { %3078 = vmatprep.subr.bf16.mxu1 %v3835_v29  ;;  %v3917_v28 = vld [vmem:[%s4737_s5 + $0x570] ss:$8 sps:$4 sm:$0xff]   ;;  %v4896_v29 = vld [vmem:[%s5070_s0 + $0x8] sm:$0xff] }
  0xe3   : > { %3038 = vmatpush1.bf16.msra.mxu0 %v3830_v30  ;;  %v3925_v30 = vld [vmem:[%s4737_s5 + $0x564] ss:$8 sps:$4 sm:$0xff]  }
  0xe4   : > { %3079 = vmatpush1.bf16.msra.mxu1 %v3833_v31  ;;  %3039 = vmatprep.subr.bf16.mxu0 %v3838_v32  ;;  %v4902_v31 = vrot.slane %v4896_v29, %v4744_v10  ;;  %v3920_v32 = vld [vmem:[%s4737_s5 + $0x460] ss:$8 sps:$4 sm:$0xff]  }
  0xe5   : > { %3080 = vmatprep.subr.bf16.mxu1 %v3841_v33 }
  0xe6   : > { %v1621_v33 = vcombine.high %v4902_v31, %v4902_v31 }
  0xe7   : > { %3040 = vmatpush1.bf16.msra.mxu0 %v3836_v34  ;;  %v3923_v34 = vld [vmem:[%s4737_s5 + $0x560] ss:$8 sps:$4 sm:$0xff]  }
  0xe8   : > { %3081 = vmatpush1.bf16.msra.mxu1 %v3839_v35  ;;  %3041 = vmatprep.subr.bf16.mxu0 %v3844_v36  ;;  %v3928_v35 = vld [vmem:[%s4737_s5 + $0x454] ss:$8 sps:$4 sm:$0xff]  }
  0xe9   : > { %3082 = vmatprep.subr.bf16.mxu1 %v3847_v37  ;;  %v3931_v36 = vld [vmem:[%s4737_s5 + $0x554] ss:$8 sps:$4 sm:$0xff]   ;;  %v1643_v37 = vrot.slane %v1621_v33, %v4744_v10  ;;  %v1629_v33 = vrot.slane %v4902_v31, %v4744_v10  ;;  %v4013_v31 = vld [vmem:[%s4737_s5 + $0x770] ss:$8 sps:$4 sm:$0xff]  }
  0xeb   : > { %3042 = vmatpush1.bf16.msra.mxu0 %v3842_v38  ;;  %v3926_v38 = vld [vmem:[%s4737_s5 + $0x450] ss:$8 sps:$4 sm:$0xff]  }
  0xec   : > { %3083 = vmatpush1.bf16.msra.mxu1 %v3845_v39  ;;  %3043 = vmatprep.subr.bf16.mxu0 %v3850_v40  ;;  %v1653_v39 = vcombine.high %v1643_v37, %v1643_v37  ;;  %v3929_v40 = vld [vmem:[%s4737_s5 + $0x550] ss:$8 sps:$4 sm:$0xff]  }
  0xed   : > { %3084 = vmatprep.subr.bf16.mxu1 %v3853_v41  ;;  %v3934_v41 = vld [vmem:[%s4737_s5 + $0x444] ss:$8 sps:$4 sm:$0xff]  }
  0xef   : > { %3044 = vmatpush1.bf16.msra.mxu0 %v3848_v42  ;;  %v3937_v42 = vld [vmem:[%s4737_s5 + $0x544] ss:$8 sps:$4 sm:$0xff]  }
  0xf0   : > { %3085 = vmatpush1.bf16.msra.mxu1 %v3851_v43  ;;  %3045 = vmatprep.subr.bf16.mxu0 %v3856_v44  ;;  %v3932_v43 = vld [vmem:[%s4737_s5 + $0x440] ss:$8 sps:$4 sm:$0xff]  }
  0xf1   : > { %3086 = vmatprep.subr.bf16.mxu1 %v3859_v45  ;;  %v3935_v44 = vld [vmem:[%s4737_s5 + $0x540] ss:$8 sps:$4 sm:$0xff]   ;;  %v3940_v45 = vld [vmem:[%s4737_s5 + $0x434] ss:$8 sps:$4 sm:$0xff]  }
  0xf3   : > { %3046 = vmatpush1.bf16.msra.mxu0 %v3854_v46  ;;  %v3943_v46 = vld [vmem:[%s4737_s5 + $0x534] ss:$8 sps:$4 sm:$0xff]  }
  0xf4   : > { %3087 = vmatpush1.bf16.msra.mxu1 %v3857_v47  ;;  %3047 = vmatprep.subr.bf16.mxu0 %v3862_v48  ;;  %v3938_v47 = vld [vmem:[%s4737_s5 + $0x430] ss:$8 sps:$4 sm:$0xff]  }
  0xf5   : > { %3088 = vmatprep.subr.bf16.mxu1 %v3865_v49  ;;  %v3941_v48 = vld [vmem:[%s4737_s5 + $0x530] ss:$8 sps:$4 sm:$0xff]   ;;  %v3946_v49 = vld [vmem:[%s4737_s5 + $0x424] ss:$8 sps:$4 sm:$0xff]  }
  0xf7   : > { %3048 = vmatpush1.bf16.msra.mxu0 %v3860_v50  ;;  %v3949_v50 = vld [vmem:[%s4737_s5 + $0x524] ss:$8 sps:$4 sm:$0xff]  }
  0xf8   : > { %3089 = vmatpush1.bf16.msra.mxu1 %v3863_v51  ;;  %3049 = vmatprep.subr.bf16.mxu0 %v3868_v52  ;;  %v3944_v51 = vld [vmem:[%s4737_s5 + $0x420] ss:$8 sps:$4 sm:$0xff]  }
  0xf9   : > { %3090 = vmatprep.subr.bf16.mxu1 %v3871_v53  ;;  %v3947_v52 = vld [vmem:[%s4737_s5 + $0x520] ss:$8 sps:$4 sm:$0xff]   ;;  %v3952_v53 = vld [vmem:[%s4737_s5 + $0x414] ss:$8 sps:$4 sm:$0xff]  }
  0xfb   : > { %3050 = vmatpush2.bf16.msra.mxu0 %v3866_v54  ;;  %v3955_v54 = vld [vmem:[%s4737_s5 + $0x514] ss:$8 sps:$4 sm:$0xff]  }
  0xfc   : > { %3091 = vmatpush2.bf16.msra.mxu1 %v3869_v55  ;;  %3051 = vmatprep.subr.bf16.mxu0 %v3874_v56  ;;  %v3950_v55 = vld [vmem:[%s4737_s5 + $0x410] ss:$8 sps:$4 sm:$0xff]  }
  0xfd   : > { %3092 = vmatprep.subr.bf16.mxu1 %v3877_v57  ;;  %v3953_v56 = vld [vmem:[%s4737_s5 + $0x510] ss:$8 sps:$4 sm:$0xff]   ;;  %v3958_v57 = vld [vmem:[%s4737_s5 + $0x404] ss:$8 sps:$4 sm:$0xff]  }
  0xff   : > { %3052 = vmatpush2.bf16.msra.mxu0 %v3872_v58  ;;  %v3961_v58 = vld [vmem:[%s4737_s5 + $0x504] ss:$8 sps:$4 sm:$0xff]  }
 0x100   : > { %3093 = vmatpush2.bf16.msra.mxu1 %v3875_v59  ;;  %3053 = vmatprep.subr.bf16.mxu0 %v3880_v60  ;;  %v3956_v59 = vld [vmem:[%s4737_s5 + $0x400] ss:$8 sps:$4 sm:$0xff]  }
 0x101   : > { %3094 = vmatprep.subr.bf16.mxu1 %v3883_v61  ;;  %v3959_v60 = vld [vmem:[%s4737_s5 + $0x500] ss:$8 sps:$4 sm:$0xff]   ;;  %v3964_v61 = vld [vmem:[%s4737_s5 + $0x4f4] ss:$8 sps:$4 sm:$0xff]  }
 0x103   : > { %3054 = vmatpush2.bf16.msra.mxu0 %v3878_v62  ;;  %v3967_v62 = vld [vmem:[%s4737_s5 + $0x5f4] ss:$8 sps:$4 sm:$0xff]  }
 0x104   : > { %3095 = vmatpush2.bf16.msra.mxu1 %v3881_v63  ;;  %3055 = vmatprep.subr.bf16.mxu0 %v3886_v0  ;;  %v3962_v63 = vld [vmem:[%s4737_s5 + $0x4f0] ss:$8 sps:$4 sm:$0xff]  }
 0x105   : > { %3096 = vmatprep.subr.bf16.mxu1 %v3889_v1  ;;  %v3965_v0 = vld [vmem:[%s4737_s5 + $0x5f0] ss:$8 sps:$4 sm:$0xff]   ;;  %v3970_v1 = vld [vmem:[%s4737_s5 + $0x4e4] ss:$8 sps:$4 sm:$0xff]  }
 0x107   : > { %3056 = vmatpush2.bf16.msra.mxu0 %v3884_v2  ;;  %v3973_v2 = vld [vmem:[%s4737_s5 + $0x5e4] ss:$8 sps:$4 sm:$0xff]  }
 0x108   : > { %3097 = vmatpush2.bf16.msra.mxu1 %v3887_v5  ;;  %3057 = vmatprep.subr.bf16.mxu0 %v3892_v6  ;;  %v3968_v5 = vld [vmem:[%s4737_s5 + $0x4e0] ss:$8 sps:$4 sm:$0xff]  }
 0x109   : > { %3098 = vmatprep.subr.bf16.mxu1 %v3895_v7  ;;  %v3971_v6 = vld [vmem:[%s4737_s5 + $0x5e0] ss:$8 sps:$4 sm:$0xff]   ;;  %v3976_v7 = vld [vmem:[%s4737_s5 + $0x4d4] ss:$8 sps:$4 sm:$0xff]  }
 0x10b   : > { %3058 = vmatpush2.bf16.msra.mxu0 %v3890_v9  ;;  %v3979_v9 = vld [vmem:[%s4737_s5 + $0x5d4] ss:$8 sps:$4 sm:$0xff]  }
 0x10c   : > { %3099 = vmatpush2.bf16.msra.mxu1 %v3893_v11  ;;  %3059 = vmatprep.subr.bf16.mxu0 %v3898_v3  ;;  %v3974_v11 = vld [vmem:[%s4737_s5 + $0x4d0] ss:$8 sps:$4 sm:$0xff]  }
 0x10d   : > { %3100 = vmatprep.subr.bf16.mxu1 %v3901_v12  ;;  %v3977_v3 = vld [vmem:[%s4737_s5 + $0x5d0] ss:$8 sps:$4 sm:$0xff]   ;;  %v3982_v12 = vld [vmem:[%s4737_s5 + $0x4c4] ss:$8 sps:$4 sm:$0xff]  }
 0x10f   : > { %3060 = vmatpush2.bf16.msra.mxu0 %v3896_v13  ;;  %v3985_v13 = vld [vmem:[%s4737_s5 + $0x5c4] ss:$8 sps:$4 sm:$0xff]  }
 0x110   : > { %3101 = vmatpush2.bf16.msra.mxu1 %v3899_v15  ;;  %3061 = vmatprep.subr.bf16.mxu0 %v3904_v16  ;;  %v3980_v15 = vld [vmem:[%s4737_s5 + $0x4c0] ss:$8 sps:$4 sm:$0xff]  }
 0x111   : > { %3102 = vmatprep.subr.bf16.mxu1 %v3907_v17  ;;  %v3983_v16 = vld [vmem:[%s4737_s5 + $0x5c0] ss:$8 sps:$4 sm:$0xff]   ;;  %v3988_v17 = vld [vmem:[%s4737_s5 + $0x4b4] ss:$8 sps:$4 sm:$0xff]  }
 0x113   : > { %3062 = vmatpush2.bf16.msra.mxu0 %v3902_v18  ;;  %v3991_v18 = vld [vmem:[%s4737_s5 + $0x5b4] ss:$8 sps:$4 sm:$0xff]  }
 0x114   : > { %3103 = vmatpush2.bf16.msra.mxu1 %v3905_v19  ;;  %3063 = vmatprep.subr.bf16.mxu0 %v3910_v20  ;;  %v3986_v19 = vld [vmem:[%s4737_s5 + $0x4b0] ss:$8 sps:$4 sm:$0xff]  }
 0x115   : > { %3104 = vmatprep.subr.bf16.mxu1 %v3913_v21  ;;  %v3989_v20 = vld [vmem:[%s4737_s5 + $0x5b0] ss:$8 sps:$4 sm:$0xff]   ;;  %v3994_v21 = vld [vmem:[%s4737_s5 + $0x4a4] ss:$8 sps:$4 sm:$0xff]  }
 0x117   : > { %3064 = vmatpush2.bf16.msra.mxu0 %v3908_v22  ;;  %v3997_v22 = vld [vmem:[%s4737_s5 + $0x5a4] ss:$8 sps:$4 sm:$0xff]  }
 0x118   : > { %3105 = vmatpush2.bf16.msra.mxu1 %v3911_v23  ;;  %3115 = vmatprep.subr.bf16.mxu0 %v3916_v14  ;;  %v1606_v23 = vcombine.high %v4896_v29, %v4896_v29  ;;  %v3995_v14 = vld [vmem:[%s4737_s5 + $0x5a0] ss:$8 sps:$4 sm:$0xff]   ;;  %v4001_v29 = vld [vmem:[%s4737_s5 + $0x590] ss:$8 sps:$4 sm:$0xff]  }
 0x119   : > { %3156 = vmatprep.subr.bf16.mxu1 %v3919_v25  ;;  %v4000_v25 = vld [vmem:[%s4737_s5 + $0x494] ss:$8 sps:$4 sm:$0xff]  }
 0x11a   : > { %3066 = vmatmul.mubr.bf16.vlgmr.msra.gmra.mxu0 %v1587_v24  ;;  %v3992_v24 = vld [vmem:[%s4737_s5 + $0x4a0] ss:$8 sps:$4 sm:$0xff]  }
 0x11b   : > { %3107 = vmatmul.mubr.bf16.vlgmr.msra.gmra.mxu1 %v1603_v26  ;;  %3116 = vmatpush1.bf16.msra.mxu0 %v3914_v27  ;;  %v4003_v26 = vld [vmem:[%s4737_s5 + $0x594] ss:$8 sps:$4 sm:$0xff]   ;;  %v4962_v27 = vrot.slane %v1606_v23, %v4744_v10  ;;  %v4081_v23 = vld [vmem:[%s4737_s5 + $0x7c4] ss:$8 sps:$4 sm:$0xff]  }
 0x11c   : > { %3157 = vmatpush1.bf16.msra.mxu1 %v3917_v28  ;;  %3117 = vmatprep.subr.bf16.mxu0 %v3922_v8  ;;  %v3998_v28 = vld [vmem:[%s4737_s5 + $0x490] ss:$8 sps:$4 sm:$0xff]   ;;  %v4006_v8 = vld [vmem:[%s4737_s5 + $0x484] ss:$8 sps:$4 sm:$0xff]  }
 0x11d   : > { %3158 = vmatprep.subr.bf16.mxu1 %v3925_v30  ;;  %3147 = vmatprep.mubr.bf16.mxu0 %v1643_v37  ;;  %v4009_v30 = vld [vmem:[%s4737_s5 + $0x584] ss:$8 sps:$4 sm:$0xff]   ;;  %v4015_v37 = vld [vmem:[%s4737_s5 + $0x774] ss:$8 sps:$4 sm:$0xff]  }
 0x11e   : > { %3188 = vmatprep.mubr.bf16.mxu1 %v1653_v39  ;;  %v1651_v39 = vcombine.high %v1629_v33, %v1629_v33 }
 0x11f   : > { %3118 = vmatpush1.bf16.msra.mxu0 %v3920_v32  ;;  %v1622_v32 = vcombine.high %v4962_v27, %v4962_v27 }
 0x120   : > { %3159 = vmatpush1.bf16.msra.mxu1 %v3923_v34  ;;  %3119 = vmatprep.subr.bf16.mxu0 %v3928_v35  ;;  %v4004_v34 = vld [vmem:[%s4737_s5 + $0x480] ss:$8 sps:$4 sm:$0xff]  }
 0x121   : > { %3160 = vmatprep.subr.bf16.mxu1 %v3931_v36  ;;  %v4007_v35 = vld [vmem:[%s4737_s5 + $0x580] ss:$8 sps:$4 sm:$0xff]   ;;  %v4012_v36 = vld [vmem:[%s4737_s5 + $0x674] ss:$8 sps:$4 sm:$0xff]  }
 0x123   : > { %3120 = vmatpush1.bf16.msra.mxu0 %v3926_v38  ;;  %v1650_v38 = vrot.slane %v1622_v32, %v4744_v10  ;;  %v4088_v32 = vld [vmem:[%s4737_s5 + $0x6a0] ss:$8 sps:$4 sm:$0xff]  }
 0x124   : > { %3161 = vmatpush1.bf16.msra.mxu1 %v3929_v40  ;;  %3121 = vmatprep.subr.bf16.mxu0 %v3934_v41  ;;  %v4010_v40 = vld [vmem:[%s4737_s5 + $0x670] ss:$8 sps:$4 sm:$0xff]   ;;  %v4018_v41 = vld [vmem:[%s4737_s5 + $0x664] ss:$8 sps:$4 sm:$0xff]  }
 0x125   : > { %3162 = vmatprep.subr.bf16.mxu1 %v3937_v42  ;;  %v4021_v42 = vld [vmem:[%s4737_s5 + $0x764] ss:$8 sps:$4 sm:$0xff]  }
 0x127   : > { %3122 = vmatpush1.bf16.msra.mxu0 %v3932_v43  ;;  %v1654_v43 = vcombine.high %v1650_v38, %v1650_v38 }
 0x128   : > { %3163 = vmatpush1.bf16.msra.mxu1 %v3935_v44  ;;  %3123 = vmatprep.subr.bf16.mxu0 %v3940_v45  ;;  %v4016_v44 = vld [vmem:[%s4737_s5 + $0x660] ss:$8 sps:$4 sm:$0xff]  }
 0x129   : > { %3164 = vmatprep.subr.bf16.mxu1 %v3943_v46  ;;  %v4019_v45 = vld [vmem:[%s4737_s5 + $0x760] ss:$8 sps:$4 sm:$0xff]   ;;  %v4024_v46 = vld [vmem:[%s4737_s5 + $0x654] ss:$8 sps:$4 sm:$0xff]  }
 0x12b   : > { %3124 = vmatpush1.bf16.msra.mxu0 %v3938_v47  ;;  %v4027_v47 = vld [vmem:[%s4737_s5 + $0x754] ss:$8 sps:$4 sm:$0xff]  }
 0x12c   : > { %3165 = vmatpush1.bf16.msra.mxu1 %v3941_v48  ;;  %3125 = vmatprep.subr.bf16.mxu0 %v3946_v49  ;;  %v4022_v48 = vld [vmem:[%s4737_s5 + $0x650] ss:$8 sps:$4 sm:$0xff]  }
 0x12d   : > { %3166 = vmatprep.subr.bf16.mxu1 %v3949_v50  ;;  %v4025_v49 = vld [vmem:[%s4737_s5 + $0x750] ss:$8 sps:$4 sm:$0xff]   ;;  %v4030_v50 = vld [vmem:[%s4737_s5 + $0x644] ss:$8 sps:$4 sm:$0xff]  }
 0x12f   : > { %3126 = vmatpush1.bf16.msra.mxu0 %v3944_v51  ;;  %v4033_v51 = vld [vmem:[%s4737_s5 + $0x744] ss:$8 sps:$4 sm:$0xff]  }
 0x130   : > { %3167 = vmatpush1.bf16.msra.mxu1 %v3947_v52  ;;  %3127 = vmatprep.subr.bf16.mxu0 %v3952_v53  ;;  %v4028_v52 = vld [vmem:[%s4737_s5 + $0x640] ss:$8 sps:$4 sm:$0xff]  }
 0x131   : > { %3168 = vmatprep.subr.bf16.mxu1 %v3955_v54  ;;  %v4031_v53 = vld [vmem:[%s4737_s5 + $0x740] ss:$8 sps:$4 sm:$0xff]   ;;  %v4036_v54 = vld [vmem:[%s4737_s5 + $0x634] ss:$8 sps:$4 sm:$0xff]  }
 0x133   : > { %3128 = vmatpush1.bf16.msra.mxu0 %v3950_v55  ;;  %v4039_v55 = vld [vmem:[%s4737_s5 + $0x734] ss:$8 sps:$4 sm:$0xff]  }
 0x134   : > { %3169 = vmatpush1.bf16.msra.mxu1 %v3953_v56  ;;  %3129 = vmatprep.subr.bf16.mxu0 %v3958_v57  ;;  %v4034_v56 = vld [vmem:[%s4737_s5 + $0x630] ss:$8 sps:$4 sm:$0xff]  }
 0x135   : > { %3170 = vmatprep.subr.bf16.mxu1 %v3961_v58  ;;  %v4037_v57 = vld [vmem:[%s4737_s5 + $0x730] ss:$8 sps:$4 sm:$0xff]   ;;  %v4042_v58 = vld [vmem:[%s4737_s5 + $0x624] ss:$8 sps:$4 sm:$0xff]  }
 0x137   : > { %3130 = vmatpush1.bf16.msra.mxu0 %v3956_v59  ;;  %v4045_v59 = vld [vmem:[%s4737_s5 + $0x724] ss:$8 sps:$4 sm:$0xff]  }
 0x138   : > { %3171 = vmatpush1.bf16.msra.mxu1 %v3959_v60  ;;  %3131 = vmatprep.subr.bf16.mxu0 %v3964_v61  ;;  %v4040_v60 = vld [vmem:[%s4737_s5 + $0x620] ss:$8 sps:$4 sm:$0xff]  }
 0x139   : > { %3172 = vmatprep.subr.bf16.mxu1 %v3967_v62  ;;  %v4043_v61 = vld [vmem:[%s4737_s5 + $0x720] ss:$8 sps:$4 sm:$0xff]   ;;  %v4048_v62 = vld [vmem:[%s4737_s5 + $0x614] ss:$8 sps:$4 sm:$0xff]  }
 0x13b   : > { %3132 = vmatpush2.bf16.msra.mxu0 %v3962_v63  ;;  %v4051_v63 = vld [vmem:[%s4737_s5 + $0x714] ss:$8 sps:$4 sm:$0xff]  }
 0x13c   : > { %3173 = vmatpush2.bf16.msra.mxu1 %v3965_v0  ;;  %3133 = vmatprep.subr.bf16.mxu0 %v3970_v1  ;;  %v4046_v0 = vld [vmem:[%s4737_s5 + $0x610] ss:$8 sps:$4 sm:$0xff]  }
 0x13d   : > { %3174 = vmatprep.subr.bf16.mxu1 %v3973_v2  ;;  %v4049_v1 = vld [vmem:[%s4737_s5 + $0x710] ss:$8 sps:$4 sm:$0xff]   ;;  %v4054_v2 = vld [vmem:[%s4737_s5 + $0x604] ss:$8 sps:$4 sm:$0xff]  }
 0x13f   : > { %3134 = vmatpush2.bf16.msra.mxu0 %v3968_v5  ;;  %v4057_v5 = vld [vmem:[%s4737_s5 + $0x704] ss:$8 sps:$4 sm:$0xff]  }
 0x140   : > { %3175 = vmatpush2.bf16.msra.mxu1 %v3971_v6  ;;  %3135 = vmatprep.subr.bf16.mxu0 %v3976_v7  ;;  %v4052_v6 = vld [vmem:[%s4737_s5 + $0x600] ss:$8 sps:$4 sm:$0xff]  }
 0x141   : > { %3176 = vmatprep.subr.bf16.mxu1 %v3979_v9  ;;  %v4055_v7 = vld [vmem:[%s4737_s5 + $0x700] ss:$8 sps:$4 sm:$0xff]   ;;  %v4060_v9 = vld [vmem:[%s4737_s5 + $0x6f4] ss:$8 sps:$4 sm:$0xff]  }
 0x143   : > { %3136 = vmatpush2.bf16.msra.mxu0 %v3974_v11  ;;  %v4063_v11 = vld [vmem:[%s4737_s5 + $0x7f4] ss:$8 sps:$4 sm:$0xff]  }
 0x144   : > { %3177 = vmatpush2.bf16.msra.mxu1 %v3977_v3  ;;  %3137 = vmatprep.subr.bf16.mxu0 %v3982_v12  ;;  %v4058_v3 = vld [vmem:[%s4737_s5 + $0x6f0] ss:$8 sps:$4 sm:$0xff]  }
 0x145   : > { %3178 = vmatprep.subr.bf16.mxu1 %v3985_v13  ;;  %v4061_v12 = vld [vmem:[%s4737_s5 + $0x7f0] ss:$8 sps:$4 sm:$0xff]   ;;  %v4066_v13 = vld [vmem:[%s4737_s5 + $0x6e4] ss:$8 sps:$4 sm:$0xff]  }
 0x147   : > { %3138 = vmatpush2.bf16.msra.mxu0 %v3980_v15  ;;  %v4069_v15 = vld [vmem:[%s4737_s5 + $0x7e4] ss:$8 sps:$4 sm:$0xff]  }
 0x148   : > { %3179 = vmatpush2.bf16.msra.mxu1 %v3983_v16  ;;  %3139 = vmatprep.subr.bf16.mxu0 %v3988_v17  ;;  %v4064_v16 = vld [vmem:[%s4737_s5 + $0x6e0] ss:$8 sps:$4 sm:$0xff]  }
 0x149   : > { %3180 = vmatprep.subr.bf16.mxu1 %v3991_v18  ;;  %v4067_v17 = vld [vmem:[%s4737_s5 + $0x7e0] ss:$8 sps:$4 sm:$0xff]   ;;  %v4072_v18 = vld [vmem:[%s4737_s5 + $0x6d4] ss:$8 sps:$4 sm:$0xff]  }
 0x14b   : > { %3140 = vmatpush2.bf16.msra.mxu0 %v3986_v19  ;;  %v4075_v19 = vld [vmem:[%s4737_s5 + $0x7d4] ss:$8 sps:$4 sm:$0xff]  }
 0x14c   : > { %3181 = vmatpush2.bf16.msra.mxu1 %v3989_v20  ;;  %3141 = vmatprep.subr.bf16.mxu0 %v3994_v21  ;;  %v4070_v20 = vld [vmem:[%s4737_s5 + $0x6d0] ss:$8 sps:$4 sm:$0xff]  }
 0x14d   : > { %3182 = vmatprep.subr.bf16.mxu1 %v3997_v22  ;;  %v4073_v21 = vld [vmem:[%s4737_s5 + $0x7d0] ss:$8 sps:$4 sm:$0xff]   ;;  %v4078_v22 = vld [vmem:[%s4737_s5 + $0x6c4] ss:$8 sps:$4 sm:$0xff]  }
 0x14f   : > { %3142 = vmatpush2.bf16.msra.mxu0 %v3992_v24  ;;  %v4076_v24 = vld [vmem:[%s4737_s5 + $0x6c0] ss:$8 sps:$4 sm:$0xff]  }
 0x150   : > { %3183 = vmatpush2.bf16.msra.mxu1 %v3995_v14  ;;  %3143 = vmatprep.subr.bf16.mxu0 %v4000_v25  ;;  %v4079_v14 = vld [vmem:[%s4737_s5 + $0x7c0] ss:$8 sps:$4 sm:$0xff]   ;;  %v4084_v25 = vld [vmem:[%s4737_s5 + $0x6b4] ss:$8 sps:$4 sm:$0xff]  }
 0x151   : > { %3184 = vmatprep.subr.bf16.mxu1 %v4003_v26  ;;  %v4087_v26 = vld [vmem:[%s4737_s5 + $0x7b4] ss:$8 sps:$4 sm:$0xff]  }
 0x153   : > { %3144 = vmatpush2.bf16.msra.mxu0 %v3998_v28  ;;  %v4082_v28 = vld [vmem:[%s4737_s5 + $0x6b0] ss:$8 sps:$4 sm:$0xff]  }
 0x154   : > { %3185 = vmatpush2.bf16.msra.mxu1 %v4001_v29  ;;  %3145 = vmatprep.subr.bf16.mxu0 %v4006_v8  ;;  %v4085_v29 = vld [vmem:[%s4737_s5 + $0x7b0] ss:$8 sps:$4 sm:$0xff]   ;;  %v4090_v8 = vld [vmem:[%s4737_s5 + $0x6a4] ss:$8 sps:$4 sm:$0xff]  }
 0x155   : > { %3186 = vmatprep.subr.bf16.mxu1 %v4009_v30  ;;  %v4093_v30 = vld [vmem:[%s4737_s5 + $0x7a4] ss:$8 sps:$4 sm:$0xff]  }
 0x157   : > { %3146 = vmatpush2.bf16.msra.mxu0 %v4004_v34  ;;  %v4096_v34 = vld [vmem:[%s4737_s5 + $0x694] ss:$8 sps:$4 sm:$0xff]  }
 0x158   : > { %3187 = vmatpush2.bf16.msra.mxu1 %v4007_v35  ;;  %3197 = vmatprep.subr.bf16.mxu0 %v4012_v36  ;;  %v4099_v35 = vld [vmem:[%s4737_s5 + $0x794] ss:$8 sps:$4 sm:$0xff]   ;;  %v4094_v36 = vld [vmem:[%s4737_s5 + $0x690] ss:$8 sps:$4 sm:$0xff]  }
 0x159   : > { %3238 = vmatprep.subr.bf16.mxu1 %v4015_v37  ;;  %v4097_v37 = vld [vmem:[%s4737_s5 + $0x790] ss:$8 sps:$4 sm:$0xff]  }
 0x15a   : > { %3148 = vmatmul.mubr.bf16.vlgmr.msra.gmra.mxu0 %v1629_v33  ;;  %v4091_v33 = vld [vmem:[%s4737_s5 + $0x7a0] ss:$8 sps:$4 sm:$0xff]  }
 0x15b   : > { %3189 = vmatmul.mubr.bf16.vlgmr.msra.gmra.mxu1 %v1651_v39  ;;  %3198 = vmatpush1.bf16.msra.mxu0 %v4010_v40  ;;  %v4105_v39 = vld [vmem:[%s4737_s5 + $0x784] ss:$8 sps:$4 sm:$0xff]   ;;  %v1636_v40 = vrot.slane %v4962_v27, %v4744_v10 }
 0x15c   : > { %3239 = vmatpush1.bf16.msra.mxu1 %v4013_v31  ;;  %3199 = vmatprep.subr.bf16.mxu0 %v4018_v41  ;;  %v4100_v31 = vld [vmem:[%s4737_s5 + $0x680] ss:$8 sps:$4 sm:$0xff]  }
 0x15d   : > { %3240 = vmatprep.subr.bf16.mxu1 %v4021_v42  ;;  %3229 = vmatprep.mubr.bf16.mxu0 %v1650_v38  ;;  %v4102_v38 = vld [vmem:[%s4737_s5 + $0x684] ss:$8 sps:$4 sm:$0xff]   ;;  %v4103_v41 = vld [vmem:[%s4737_s5 + $0x780] ss:$8 sps:$4 sm:$0xff]   ;;  %v1547_v42 = vsub.s32 0, %v4735_v4 }
 0x15e   : > { %3270 = vmatprep.mubr.bf16.mxu1 %v1654_v43  ;;  %v1543_v43 = vld [vmem:[%s1274_s11] sm:$0x3] }
 0x15f   : > { %3200 = vmatpush1.bf16.msra.mxu0 %v4016_v44  ;;  %v1551_v44 = vsub.s32 1, %v4735_v4 }
 0x160   : > { %3241 = vmatpush1.bf16.msra.mxu1 %v4019_v45  ;;  %3201 = vmatprep.subr.bf16.mxu0 %v4024_v46  ;;  %v1652_v45 = vcombine.high %v1636_v40, %v1636_v40  ;;  %v1548_v46 = vrot.slane %v1543_v43, %v1547_v42 }
 0x161   : > { %3242 = vmatprep.subr.bf16.mxu1 %v4027_v47  ;;  %v1552_v47 = vrot.slane %v1543_v43, %v1551_v44 }
 0x163   : > { %3202 = vmatpush1.bf16.msra.mxu0 %v4022_v48 }
 0x164   : > { %3243 = vmatpush1.bf16.msra.mxu1 %v4025_v49  ;;  %3203 = vmatprep.subr.bf16.mxu0 %v4030_v50 }
 0x165   : > { %3244 = vmatprep.subr.bf16.mxu1 %v4033_v51 }
 0x167   : > { %3204 = vmatpush1.bf16.msra.mxu0 %v4028_v52 }
 0x168   : > { %3245 = vmatpush1.bf16.msra.mxu1 %v4031_v53  ;;  %3205 = vmatprep.subr.bf16.mxu0 %v4036_v54 }
 0x169   : > { %3246 = vmatprep.subr.bf16.mxu1 %v4039_v55 }
 0x16b   : > { %3206 = vmatpush1.bf16.msra.mxu0 %v4034_v56 }
 0x16c   : > { %3247 = vmatpush1.bf16.msra.mxu1 %v4037_v57  ;;  %3207 = vmatprep.subr.bf16.mxu0 %v4042_v58 }
 0x16d   : > { %3248 = vmatprep.subr.bf16.mxu1 %v4045_v59 }
 0x16f   : > { %3208 = vmatpush1.bf16.msra.mxu0 %v4040_v60 }
 0x170   : > { %3249 = vmatpush1.bf16.msra.mxu1 %v4043_v61  ;;  %3209 = vmatprep.subr.bf16.mxu0 %v4048_v62 }
 0x171   : > { %3250 = vmatprep.subr.bf16.mxu1 %v4051_v63 }
 0x173   : > { %3210 = vmatpush1.bf16.msra.mxu0 %v4046_v0 }
 0x174   : > { %3251 = vmatpush1.bf16.msra.mxu1 %v4049_v1  ;;  %3211 = vmatprep.subr.bf16.mxu0 %v4054_v2 }
 0x175   : > { %3252 = vmatprep.subr.bf16.mxu1 %v4057_v5 }
 0x177   : > { %3212 = vmatpush1.bf16.msra.mxu0 %v4052_v6 }
 0x178   : > { %3253 = vmatpush1.bf16.msra.mxu1 %v4055_v7  ;;  %3213 = vmatprep.subr.bf16.mxu0 %v4060_v9 }
 0x179   : > { %3254 = vmatprep.subr.bf16.mxu1 %v4063_v11 }
 0x17b   : > { %3214 = vmatpush2.bf16.msra.mxu0 %v4058_v3 }
 0x17c   : > { %3255 = vmatpush2.bf16.msra.mxu1 %v4061_v12  ;;  %3215 = vmatprep.subr.bf16.mxu0 %v4066_v13 }
 0x17d   : > { %3256 = vmatprep.subr.bf16.mxu1 %v4069_v15 }
 0x17f   : > { %3216 = vmatpush2.bf16.msra.mxu0 %v4064_v16 }
 0x180   : > { %3257 = vmatpush2.bf16.msra.mxu1 %v4067_v17  ;;  %3217 = vmatprep.subr.bf16.mxu0 %v4072_v18 }
 0x181   : > { %3258 = vmatprep.subr.bf16.mxu1 %v4075_v19 }
 0x183   : > { %3218 = vmatpush2.bf16.msra.mxu0 %v4070_v20 }
 0x184   : > { %3259 = vmatpush2.bf16.msra.mxu1 %v4073_v21  ;;  %3219 = vmatprep.subr.bf16.mxu0 %v4078_v22 }
 0x185   : > { %3260 = vmatprep.subr.bf16.mxu1 %v4081_v23 }
 0x187   : > { %3220 = vmatpush2.bf16.msra.mxu0 %v4076_v24 }
 0x188   : > { %3261 = vmatpush2.bf16.msra.mxu1 %v4079_v14  ;;  %3221 = vmatprep.subr.bf16.mxu0 %v4084_v25 }
 0x189   : > { %3262 = vmatprep.subr.bf16.mxu1 %v4087_v26 }
 0x18b   : > { %3222 = vmatpush2.bf16.msra.mxu0 %v4082_v28 }
 0x18c   : > { %3263 = vmatpush2.bf16.msra.mxu1 %v4085_v29  ;;  %3223 = vmatprep.subr.bf16.mxu0 %v4090_v8 }
 0x18d   : > { %3264 = vmatprep.subr.bf16.mxu1 %v4093_v30 }
 0x18f   : > { %3224 = vmatpush2.bf16.msra.mxu0 %v4088_v32 }
 0x190   : > { %3265 = vmatpush2.bf16.msra.mxu1 %v4091_v33  ;;  %3225 = vmatprep.subr.bf16.mxu0 %v4096_v34 }
 0x191   : > { %3266 = vmatprep.subr.bf16.mxu1 %v4099_v35 }
 0x193   : > { %3226 = vmatpush2.bf16.msra.mxu0 %v4094_v36 }
 0x194   : > { %3267 = vmatpush2.bf16.msra.mxu1 %v4097_v37  ;;  %3227 = vmatprep.subr.bf16.mxu0 %v4102_v38 }
 0x195   : > { %3268 = vmatprep.subr.bf16.mxu1 %v4105_v39 }
 0x197   : > { %3228 = vmatpush2.bf16.msra.mxu0 %v4100_v31 }
 0x198   : > { %3269 = vmatpush2.bf16.msra.mxu1 %v4103_v41 }
 0x19a   : > { %v2985_v48 = vpop.f32.mrf.mxu0  ;;  %3230 = vmatmul.mubr.bf16.vlgmr.msra.gmra.mxu0 %v1636_v40 }
 0x19b   : > { %v3026_v49 = vpop.f32.mrf.mxu1  ;;  %3271 = vmatmul.mubr.bf16.vlgmr.msra.gmra.mxu1 %v1652_v45  ;;  %v2986_v27 = vadd.f32 %v2985_v48, %v1548_v46 }
 0x19c   : > { %v2987_v50 = vpop.f32.mrf.mxu0 }
 0x19d   : > { %v3028_v51 = vpop.f32.mrf.mxu1  ;;  %v3027_v52 = vadd.f32 %v3026_v49, %v2986_v27  ;;  %v2988_v53 = vadd.f32 %v2987_v50, %v1552_v47 }
 0x19e   : > { %v2989_v54 = vpop.f32.mrf.mxu0 }
 0x19f   : > { %v3030_v55 = vpop.f32.mrf.mxu1  ;;  %v3029_v56 = vadd.f32 %v3028_v51, %v2988_v53 }
 0x1a0   : > { %v2990_v57 = vpop.f32.mrf.mxu0 }
 0x1a1   : > { %v3031_v58 = vpop.f32.mrf.mxu1 }
 0x1da   : > { %v3067_v4 = vpop.f32.mrf.mxu0 }
 0x1db   : > { %v3108_v59 = vpop.f32.mrf.mxu1  ;;  %v3068_v60 = vadd.f32 %v3067_v4, %v3027_v52 }
 0x1dc   : > { %v3069_v61 = vpop.f32.mrf.mxu0 }
 0x1dd   : > { %v3110_v62 = vpop.f32.mrf.mxu1  ;;  %v3109_v63 = vadd.f32 %v3108_v59, %v3068_v60  ;;  %v3070_v0 = vadd.f32 %v3069_v61, %v3029_v56 }
 0x1de   : > { %v3071_v1 = vpop.f32.mrf.mxu0 }
 0x1df   : > { %v3112_v2 = vpop.f32.mrf.mxu1  ;;  %v3111_v5 = vadd.f32 %v3110_v62, %v3070_v0 }
 0x1e0   : > { %v3072_v6 = vpop.f32.mrf.mxu0 }
 0x1e1   : > { %v3113_v7 = vpop.f32.mrf.mxu1 }
 0x21a   : > { %v3149_v9 = vpop.f32.mrf.mxu0 }
 0x21b   : > { %v3190_v11 = vpop.f32.mrf.mxu1  ;;  %v3150_v3 = vadd.f32 %v3149_v9, %v3109_v63 }
 0x21c   : > { %v3151_v12 = vpop.f32.mrf.mxu0 }
 0x21d   : > { %v3192_v13 = vpop.f32.mrf.mxu1  ;;  %v3191_v15 = vadd.f32 %v3190_v11, %v3150_v3  ;;  %v3152_v20 = vadd.f32 %v3151_v12, %v3111_v5 }
 0x21e   : > { %v3153_v16 = vpop.f32.mrf.mxu0 }
 0x21f   : > { %v3194_v17 = vpop.f32.mrf.mxu1  ;;  %v3193_v23 = vadd.f32 %v3192_v13, %v3152_v20 }
 0x220   : > { %v3154_v18 = vpop.f32.mrf.mxu0 }
 0x221   : > { %v3195_v19 = vpop.f32.mrf.mxu1 }
 0x25a   : > { %v3231_v21 = vpop.f32.mrf.mxu0 }
 0x25b   : > { %v3272_v22 = vpop.f32.mrf.mxu1  ;;  %v3232_v24 = vadd.f32 %v3231_v21, %v3191_v15 }
 0x25c   : > { %v3233_v14 = vpop.f32.mrf.mxu0 }
 0x25d   : > { %v3274_v25 = vpop.f32.mrf.mxu1  ;;  %v3273_v26 = vadd.f32 %v3272_v22, %v3232_v24  ;;  %v3234_v28 = vadd.f32 %v3233_v14, %v3193_v23 }
 0x25e   : > { %v3235_v29 = vpop.f32.mrf.mxu0 }
 0x25f   : > { %v3276_v8 = vpop.f32.mrf.mxu1  ;;  %v3275_v30 = vadd.f32 %v3274_v25, %v3234_v28  ;;  %v3279_v34 = vmax.f32 %v3273_v26, 0.0 }
 0x260   : > { %v3236_v32 = vpop.f32.mrf.mxu0 }
 0x261   : > { %v3277_v33 = vpop.f32.mrf.mxu1  ;;  %v3280_v35 = vmax.f32 %v3275_v30, 0.0 }
 0x263   : > { %v3675_v36 = vpack.c.bf16 %v3280_v35, %v3279_v34 }
 0x265   : > { %v3292_v37 = vrot.slane %v3675_v36, %v4744_v10 }
 0x267   : > { %3676 = vst.sshfl [vmem:[%s1283_s18] sm:$0x5 pattern:$0x73625140] %v3292_v37 }
 0x268 PF: > { %s13_s16 = sadd.s32 1, %s4145_s16   ;;  %s5074_s12 = smov %s4133_s13 }
 0x269   : > { %p10_p10 = scmp.ge.s32.totalorder %s13_s16, 4   ;;  %s5075_s13 = smov %s4203_s20 }
 0x26a   : > { %s5076_s14 = smov %s4141_s15  ;;  %s5077_s15 = smov %s5079_s17 }
 0x26b   :  { %12 = sbr.rel (!%p10_p10) target bundleno = 3 (0x3), region = 111 }

// kernel: font_cnn_forward.9
= control target key start
LH: loop header
LB: loop body
LE: loop exit
PB: predicated region body
PF: predicated region fallthrough
CT: control target
= control target key end

     0   :  { %8 = vsyncpa [#allocation4], 0  ;;  %s6601_s0 = inlined_call_operand.vmem [shape: bf16[2,512], index: 0, kind: input, shape index: {}]   ;;  %s6602_s1 = inlined_call_operand.vmem [shape: bf16[512,3072], index: 1, kind: input, shape index: {}]   ;;  %s6603_s2 = inlined_call_operand.vmem [shape: f32[1,3072], index: 2, kind: input, shape index: {}]   ;;  %s6604_s3 = inlined_call_operand.hbm [shape: f32[2,3072], index: 3, kind: output, shape index: {}]  }
   0x1   :  { %10 = vsyncpa [#allocation4 + $0x1], 0  ;;  %s5217_s12 = smov 0   ;;  %s5219_s13 = smov 0  }
   0x2   :  { %s5221_s14 = smov 0   ;;  %s5223_s15 = smov 0  }
   0x3   :  { %s5225_s16 = smov 0   ;;  %s5227_s17 = smov 0  }
   0x4 LB: > { %s4083_s18 = sadd.s32 4294967295, %s5192_s17   ;;  %s4084_s19 = sadd.s32 4294967294, %s5192_s17   ;;  %s5192_s17 = sphi %s5227_s17, %s16_s17   ;;  %s5188_s16 = sphi %s5225_s16, %s6613_s16   ;;  %s5184_s15 = sphi %s5223_s15, %s6612_s15   ;;  %s5180_s14 = sphi %s5221_s14, %s6611_s14   ;;  %s5176_s13 = sphi %s5219_s13, %s6610_s13   ;;  %s5172_s12 = sphi %s5217_s12, %s6609_s12  }
   0x5   : > { %s25_s20 = sadd.s32 1, %s5188_s16  ;;  %s61_s21 = sadd.s32 1, %s5180_s14 }
   0x6   : > { %p26_p0 = scmp.ge.s32.totalorder %s25_s20, 2  ;;  %p68_p1 = scmp.ne.s32.totalorder %s5180_s14, %s5176_s13 }
   0x7   : > { %p69_p2 = scmp.eq.s32.totalorder %s5192_s17, 0  ;;  %p126_p3 = scmp.eq.s32.totalorder %s4083_s18, 1 }
   0x8   : > { %s6615_s20 = smov (%p26_p0, %s25_s20), 0  ;;  %p131_p6 = scmp.ne.s32.totalorder %s5176_s13, %s5172_s12 }
   0x9   : > { %p70_p4 = por %p69_p2, %p68_p1  ;;  %p5256_p5 = por %p126_p3, %p68_p1 }
   0xa   : > { %s58_s23 = ssub.s32 %s5188_s16, %s6615_s20  ;;  %p132_p8 = scmp.eq.s32.totalorder %s4084_s19, 1 }
   0xb   : > { %p59_p7 = scmp.eq.s32.totalorder %s58_s23, 0  ;;  %p6605_p10 = scmp.ge.s32.totalorder %s5192_s17, 2 }
   0xc   : > { %p5267_p9 = por %p132_p8, %p131_p6 }
   0xd   : > { %s5265_s24 = scalar_select %p59_p7, %s5180_s14, %s61_s21  }
   0xe   : > { %155 = sbr.rel (%p6605_p10) target bundleno = 216 (0xd8), region = 20 }
  0x13   : > { %158 = sbr.rel (!%p70_p4) target bundleno = 216 (0xd8), region = 24  ;;  %s160_s26 = sand.u32 (%p70_p4), 1, %s5180_s14  }
  0x14   : > { %s4478_s27 = smul.u32 (%p70_p4), 48, %s5188_s16 }
  0x15   : > { %s4480_s28 = smul.u32 (%p70_p4), 3072, %s160_s26 }
  0x16   : > { %s5279_s4 = scalar_lea.vmem (%p70_p4), %s6602_s1, %s4478_s27 }
  0x17   : > { %v178_v0 = vld [vmem:[%s5279_s4] sm:$0xff] (%p70_p4)  ;;  %v180_v1 = vld [vmem:[%s5279_s4 + $0x8] sm:$0xff] (%p70_p4)  ;;  %v182_v2 = vld [vmem:[%s5279_s4 + $0x10] sm:$0xff] (%p70_p4)  ;;  %s5284_s5 = scalar_lea.vmem (%p70_p4), [#allocation2], %s4480_s28 }
  0x18   : > { %179 = vst [vmem:[%s5284_s5] sm:$0xff] %v178_v0  ;;  %181 = vst [vmem:[%s5284_s5 + $0x8] sm:$0xff] %v180_v1  ;;  %v184_v3 = vld [vmem:[%s5279_s4 + $0x18] sm:$0xff]  ;;  %v186_v4 = vld [vmem:[%s5279_s4 + $0x20] sm:$0xff] }
  0x19   : > { %183 = vst [vmem:[%s5284_s5 + $0x10] sm:$0xff] %v182_v2  ;;  %v188_v5 = vld [vmem:[%s5279_s4 + $0x28] sm:$0xff]  ;;  %185 = vst [vmem:[%s5284_s5 + $0x18] sm:$0xff] %v184_v3  ;;  %v190_v6 = vld [vmem:[%s5279_s4 + $0x60] sm:$0xff] }
  0x1a   : > { %187 = vst [vmem:[%s5284_s5 + $0x20] sm:$0xff] %v186_v4  ;;  %189 = vst [vmem:[%s5284_s5 + $0x28] sm:$0xff] %v188_v5  ;;  %v192_v7 = vld [vmem:[%s5279_s4 + $0x68] sm:$0xff]  ;;  %v194_v8 = vld [vmem:[%s5279_s4 + $0x70] sm:$0xff] }
  0x1b   : > { %191 = vst [vmem:[%s5284_s5 + $0x30] sm:$0xff] %v190_v6  ;;  %193 = vst [vmem:[%s5284_s5 + $0x38] sm:$0xff] %v192_v7  ;;  %v196_v9 = vld [vmem:[%s5279_s4 + $0x78] sm:$0xff]  ;;  %v198_v10 = vld [vmem:[%s5279_s4 + $0x80] sm:$0xff] }
  0x1c   : > { %195 = vst [vmem:[%s5284_s5 + $0x40] sm:$0xff] %v194_v8  ;;  %v200_v11 = vld [vmem:[%s5279_s4 + $0x88] sm:$0xff]  ;;  %197 = vst [vmem:[%s5284_s5 + $0x48] sm:$0xff] %v196_v9  ;;  %v202_v12 = vld [vmem:[%s5279_s4 + $0xc0] sm:$0xff] }
  0x1d   : > { %199 = vst [vmem:[%s5284_s5 + $0x50] sm:$0xff] %v198_v10  ;;  %201 = vst [vmem:[%s5284_s5 + $0x58] sm:$0xff] %v200_v11  ;;  %v204_v13 = vld [vmem:[%s5279_s4 + $0xc8] sm:$0xff]  ;;  %v206_v14 = vld [vmem:[%s5279_s4 + $0xd0] sm:$0xff] }
  0x1e   : > { %203 = vst [vmem:[%s5284_s5 + $0x60] sm:$0xff] %v202_v12  ;;  %205 = vst [vmem:[%s5284_s5 + $0x68] sm:$0xff] %v204_v13  ;;  %v208_v15 = vld [vmem:[%s5279_s4 + $0xd8] sm:$0xff]  ;;  %v210_v16 = vld [vmem:[%s5279_s4 + $0xe0] sm:$0xff] }
  0x1f   : > { %207 = vst [vmem:[%s5284_s5 + $0x70] sm:$0xff] %v206_v14  ;;  %v212_v17 = vld [vmem:[%s5279_s4 + $0xe8] sm:$0xff]  ;;  %209 = vst [vmem:[%s5284_s5 + $0x78] sm:$0xff] %v208_v15  ;;  %v214_v18 = vld [vmem:[%s5279_s4 + $0x120] sm:$0xff] }
  0x20   : > { %211 = vst [vmem:[%s5284_s5 + $0x80] sm:$0xff] %v210_v16  ;;  %213 = vst [vmem:[%s5284_s5 + $0x88] sm:$0xff] %v212_v17  ;;  %v216_v19 = vld [vmem:[%s5279_s4 + $0x128] sm:$0xff]  ;;  %v218_v20 = vld [vmem:[%s5279_s4 + $0x130] sm:$0xff] }
  0x21   : > { %215 = vst [vmem:[%s5284_s5 + $0x90] sm:$0xff] %v214_v18  ;;  %217 = vst [vmem:[%s5284_s5 + $0x98] sm:$0xff] %v216_v19  ;;  %v220_v21 = vld [vmem:[%s5279_s4 + $0x138] sm:$0xff]  ;;  %v222_v22 = vld [vmem:[%s5279_s4 + $0x140] sm:$0xff] }
  0x22   : > { %219 = vst [vmem:[%s5284_s5 + $0xa0] sm:$0xff] %v218_v20  ;;  %v224_v23 = vld [vmem:[%s5279_s4 + $0x148] sm:$0xff]  ;;  %221 = vst [vmem:[%s5284_s5 + $0xa8] sm:$0xff] %v220_v21  ;;  %v226_v24 = vld [vmem:[%s5279_s4 + $0x180] sm:$0xff] }
  0x23   : > { %223 = vst [vmem:[%s5284_s5 + $0xb0] sm:$0xff] %v222_v22  ;;  %225 = vst [vmem:[%s5284_s5 + $0xb8] sm:$0xff] %v224_v23  ;;  %v228_v25 = vld [vmem:[%s5279_s4 + $0x188] sm:$0xff]  ;;  %v230_v26 = vld [vmem:[%s5279_s4 + $0x190] sm:$0xff] }
  0x24   : > { %227 = vst [vmem:[%s5284_s5 + $0xc0] sm:$0xff] %v226_v24  ;;  %229 = vst [vmem:[%s5284_s5 + $0xc8] sm:$0xff] %v228_v25  ;;  %v232_v27 = vld [vmem:[%s5279_s4 + $0x198] sm:$0xff]  ;;  %v234_v28 = vld [vmem:[%s5279_s4 + $0x1a0] sm:$0xff] }
  0x25   : > { %231 = vst [vmem:[%s5284_s5 + $0xd0] sm:$0xff] %v230_v26  ;;  %v236_v29 = vld [vmem:[%s5279_s4 + $0x1a8] sm:$0xff]  ;;  %233 = vst [vmem:[%s5284_s5 + $0xd8] sm:$0xff] %v232_v27  ;;  %v238_v30 = vld [vmem:[%s5279_s4 + $0x1e0] sm:$0xff] }
  0x26   : > { %235 = vst [vmem:[%s5284_s5 + $0xe0] sm:$0xff] %v234_v28  ;;  %237 = vst [vmem:[%s5284_s5 + $0xe8] sm:$0xff] %v236_v29  ;;  %v240_v31 = vld [vmem:[%s5279_s4 + $0x1e8] sm:$0xff]  ;;  %v242_v32 = vld [vmem:[%s5279_s4 + $0x1f0] sm:$0xff] }
  0x27   : > { %239 = vst [vmem:[%s5284_s5 + $0xf0] sm:$0xff] %v238_v30  ;;  %241 = vst [vmem:[%s5284_s5 + $0xf8] sm:$0xff] %v240_v31  ;;  %v244_v33 = vld [vmem:[%s5279_s4 + $0x1f8] sm:$0xff]  ;;  %v246_v34 = vld [vmem:[%s5279_s4 + $0x200] sm:$0xff] }
  0x28   : > { %243 = vst [vmem:[%s5284_s5 + $0x100] sm:$0xff] %v242_v32  ;;  %v248_v35 = vld [vmem:[%s5279_s4 + $0x208] sm:$0xff]  ;;  %245 = vst [vmem:[%s5284_s5 + $0x108] sm:$0xff] %v244_v33  ;;  %v250_v36 = vld [vmem:[%s5279_s4 + $0x240] sm:$0xff] }
  0x29   : > { %247 = vst [vmem:[%s5284_s5 + $0x110] sm:$0xff] %v246_v34  ;;  %249 = vst [vmem:[%s5284_s5 + $0x118] sm:$0xff] %v248_v35  ;;  %v252_v37 = vld [vmem:[%s5279_s4 + $0x248] sm:$0xff]  ;;  %v254_v38 = vld [vmem:[%s5279_s4 + $0x250] sm:$0xff] }
  0x2a   : > { %251 = vst [vmem:[%s5284_s5 + $0x120] sm:$0xff] %v250_v36  ;;  %253 = vst [vmem:[%s5284_s5 + $0x128] sm:$0xff] %v252_v37  ;;  %v256_v39 = vld [vmem:[%s5279_s4 + $0x258] sm:$0xff]  ;;  %v258_v40 = vld [vmem:[%s5279_s4 + $0x260] sm:$0xff] }
  0x2b   : > { %255 = vst [vmem:[%s5284_s5 + $0x130] sm:$0xff] %v254_v38  ;;  %v260_v41 = vld [vmem:[%s5279_s4 + $0x268] sm:$0xff]  ;;  %257 = vst [vmem:[%s5284_s5 + $0x138] sm:$0xff] %v256_v39  ;;  %v262_v42 = vld [vmem:[%s5279_s4 + $0x2a0] sm:$0xff] }
  0x2c   : > { %259 = vst [vmem:[%s5284_s5 + $0x140] sm:$0xff] %v258_v40  ;;  %261 = vst [vmem:[%s5284_s5 + $0x148] sm:$0xff] %v260_v41  ;;  %v264_v43 = vld [vmem:[%s5279_s4 + $0x2a8] sm:$0xff]  ;;  %v266_v44 = vld [vmem:[%s5279_s4 + $0x2b0] sm:$0xff] }
  0x2d   : > { %263 = vst [vmem:[%s5284_s5 + $0x150] sm:$0xff] %v262_v42  ;;  %265 = vst [vmem:[%s5284_s5 + $0x158] sm:$0xff] %v264_v43  ;;  %v268_v45 = vld [vmem:[%s5279_s4 + $0x2b8] sm:$0xff]  ;;  %v270_v46 = vld [vmem:[%s5279_s4 + $0x2c0] sm:$0xff] }
  0x2e   : > { %267 = vst [vmem:[%s5284_s5 + $0x160] sm:$0xff] %v266_v44  ;;  %v272_v47 = vld [vmem:[%s5279_s4 + $0x2c8] sm:$0xff]  ;;  %269 = vst [vmem:[%s5284_s5 + $0x168] sm:$0xff] %v268_v45  ;;  %v274_v48 = vld [vmem:[%s5279_s4 + $0x300] sm:$0xff] }
  0x2f   : > { %271 = vst [vmem:[%s5284_s5 + $0x170] sm:$0xff] %v270_v46  ;;  %273 = vst [vmem:[%s5284_s5 + $0x178] sm:$0xff] %v272_v47  ;;  %v276_v49 = vld [vmem:[%s5279_s4 + $0x308] sm:$0xff]  ;;  %v278_v50 = vld [vmem:[%s5279_s4 + $0x310] sm:$0xff] }
  0x30   : > { %275 = vst [vmem:[%s5284_s5 + $0x180] sm:$0xff] %v274_v48  ;;  %277 = vst [vmem:[%s5284_s5 + $0x188] sm:$0xff] %v276_v49  ;;  %v280_v51 = vld [vmem:[%s5279_s4 + $0x318] sm:$0xff]  ;;  %v282_v52 = vld [vmem:[%s5279_s4 + $0x320] sm:$0xff] }
  0x31   : > { %279 = vst [vmem:[%s5284_s5 + $0x190] sm:$0xff] %v278_v50  ;;  %v284_v53 = vld [vmem:[%s5279_s4 + $0x328] sm:$0xff]  ;;  %281 = vst [vmem:[%s5284_s5 + $0x198] sm:$0xff] %v280_v51  ;;  %v286_v54 = vld [vmem:[%s5279_s4 + $0x360] sm:$0xff] }
  0x32   : > { %283 = vst [vmem:[%s5284_s5 + $0x1a0] sm:$0xff] %v282_v52  ;;  %285 = vst [vmem:[%s5284_s5 + $0x1a8] sm:$0xff] %v284_v53  ;;  %v288_v55 = vld [vmem:[%s5279_s4 + $0x368] sm:$0xff]  ;;  %v290_v56 = vld [vmem:[%s5279_s4 + $0x370] sm:$0xff] }
  0x33   : > { %287 = vst [vmem:[%s5284_s5 + $0x1b0] sm:$0xff] %v286_v54  ;;  %289 = vst [vmem:[%s5284_s5 + $0x1b8] sm:$0xff] %v288_v55  ;;  %v292_v57 = vld [vmem:[%s5279_s4 + $0x378] sm:$0xff]  ;;  %v294_v58 = vld [vmem:[%s5279_s4 + $0x380] sm:$0xff] }
  0x34   : > { %291 = vst [vmem:[%s5284_s5 + $0x1c0] sm:$0xff] %v290_v56  ;;  %v296_v59 = vld [vmem:[%s5279_s4 + $0x388] sm:$0xff]  ;;  %293 = vst [vmem:[%s5284_s5 + $0x1c8] sm:$0xff] %v292_v57  ;;  %v298_v60 = vld [vmem:[%s5279_s4 + $0x3c0] sm:$0xff] }
  0x35   : > { %295 = vst [vmem:[%s5284_s5 + $0x1d0] sm:$0xff] %v294_v58  ;;  %297 = vst [vmem:[%s5284_s5 + $0x1d8] sm:$0xff] %v296_v59  ;;  %v300_v61 = vld [vmem:[%s5279_s4 + $0x3c8] sm:$0xff]  ;;  %v302_v62 = vld [vmem:[%s5279_s4 + $0x3d0] sm:$0xff] }
  0x36   : > { %299 = vst [vmem:[%s5284_s5 + $0x1e0] sm:$0xff] %v298_v60  ;;  %301 = vst [vmem:[%s5284_s5 + $0x1e8] sm:$0xff] %v300_v61  ;;  %v304_v63 = vld [vmem:[%s5279_s4 + $0x3d8] sm:$0xff]  ;;  %v306_v0 = vld [vmem:[%s5279_s4 + $0x3e0] sm:$0xff] }
  0x37   : > { %303 = vst [vmem:[%s5284_s5 + $0x1f0] sm:$0xff] %v302_v62  ;;  %v308_v1 = vld [vmem:[%s5279_s4 + $0x3e8] sm:$0xff]  ;;  %305 = vst [vmem:[%s5284_s5 + $0x1f8] sm:$0xff] %v304_v63  ;;  %v310_v2 = vld [vmem:[%s5279_s4 + $0x420] sm:$0xff] }
  0x38   : > { %307 = vst [vmem:[%s5284_s5 + $0x200] sm:$0xff] %v306_v0  ;;  %309 = vst [vmem:[%s5284_s5 + $0x208] sm:$0xff] %v308_v1  ;;  %v312_v3 = vld [vmem:[%s5279_s4 + $0x428] sm:$0xff]  ;;  %v314_v4 = vld [vmem:[%s5279_s4 + $0x430] sm:$0xff] }
  0x39   : > { %311 = vst [vmem:[%s5284_s5 + $0x210] sm:$0xff] %v310_v2  ;;  %313 = vst [vmem:[%s5284_s5 + $0x218] sm:$0xff] %v312_v3  ;;  %v316_v5 = vld [vmem:[%s5279_s4 + $0x438] sm:$0xff]  ;;  %v318_v6 = vld [vmem:[%s5279_s4 + $0x440] sm:$0xff] }
  0x3a   : > { %315 = vst [vmem:[%s5284_s5 + $0x220] sm:$0xff] %v314_v4  ;;  %v320_v7 = vld [vmem:[%s5279_s4 + $0x448] sm:$0xff]  ;;  %317 = vst [vmem:[%s5284_s5 + $0x228] sm:$0xff] %v316_v5  ;;  %v322_v8 = vld [vmem:[%s5279_s4 + $0x480] sm:$0xff] }
  0x3b   : > { %319 = vst [vmem:[%s5284_s5 + $0x230] sm:$0xff] %v318_v6  ;;  %321 = vst [vmem:[%s5284_s5 + $0x238] sm:$0xff] %v320_v7  ;;  %v324_v9 = vld [vmem:[%s5279_s4 + $0x488] sm:$0xff]  ;;  %v326_v10 = vld [vmem:[%s5279_s4 + $0x490] sm:$0xff] }
  0x3c   : > { %323 = vst [vmem:[%s5284_s5 + $0x240] sm:$0xff] %v322_v8  ;;  %325 = vst [vmem:[%s5284_s5 + $0x248] sm:$0xff] %v324_v9  ;;  %v328_v11 = vld [vmem:[%s5279_s4 + $0x498] sm:$0xff]  ;;  %v330_v12 = vld [vmem:[%s5279_s4 + $0x4a0] sm:$0xff] }
  0x3d   : > { %327 = vst [vmem:[%s5284_s5 + $0x250] sm:$0xff] %v326_v10  ;;  %v332_v13 = vld [vmem:[%s5279_s4 + $0x4a8] sm:$0xff]  ;;  %329 = vst [vmem:[%s5284_s5 + $0x258] sm:$0xff] %v328_v11  ;;  %v334_v14 = vld [vmem:[%s5279_s4 + $0x4e0] sm:$0xff] }
  0x3e   : > { %331 = vst [vmem:[%s5284_s5 + $0x260] sm:$0xff] %v330_v12  ;;  %333 = vst [vmem:[%s5284_s5 + $0x268] sm:$0xff] %v332_v13  ;;  %v336_v15 = vld [vmem:[%s5279_s4 + $0x4e8] sm:$0xff]  ;;  %v338_v16 = vld [vmem:[%s5279_s4 + $0x4f0] sm:$0xff] }
  0x3f   : > { %335 = vst [vmem:[%s5284_s5 + $0x270] sm:$0xff] %v334_v14  ;;  %337 = vst [vmem:[%s5284_s5 + $0x278] sm:$0xff] %v336_v15  ;;  %v340_v17 = vld [vmem:[%s5279_s4 + $0x4f8] sm:$0xff]  ;;  %v342_v18 = vld [vmem:[%s5279_s4 + $0x500] sm:$0xff] }
  0x40   : > { %339 = vst [vmem:[%s5284_s5 + $0x280] sm:$0xff] %v338_v16  ;;  %v344_v19 = vld [vmem:[%s5279_s4 + $0x508] sm:$0xff]  ;;  %341 = vst [vmem:[%s5284_s5 + $0x288] sm:$0xff] %v340_v17  ;;  %v346_v20 = vld [vmem:[%s5279_s4 + $0x540] sm:$0xff] }
  0x41   : > { %343 = vst [vmem:[%s5284_s5 + $0x290] sm:$0xff] %v342_v18  ;;  %345 = vst [vmem:[%s5284_s5 + $0x298] sm:$0xff] %v344_v19  ;;  %v348_v21 = vld [vmem:[%s5279_s4 + $0x548] sm:$0xff]  ;;  %v350_v22 = vld [vmem:[%s5279_s4 + $0x550] sm:$0xff] }
  0x42   : > { %347 = vst [vmem:[%s5284_s5 + $0x2a0] sm:$0xff] %v346_v20  ;;  %349 = vst [vmem:[%s5284_s5 + $0x2a8] sm:$0xff] %v348_v21  ;;  %v352_v23 = vld [vmem:[%s5279_s4 + $0x558] sm:$0xff]  ;;  %v354_v24 = vld [vmem:[%s5279_s4 + $0x560] sm:$0xff] }
  0x43   : > { %351 = vst [vmem:[%s5284_s5 + $0x2b0] sm:$0xff] %v350_v22  ;;  %v356_v25 = vld [vmem:[%s5279_s4 + $0x568] sm:$0xff]  ;;  %353 = vst [vmem:[%s5284_s5 + $0x2b8] sm:$0xff] %v352_v23  ;;  %v358_v26 = vld [vmem:[%s5279_s4 + $0x5a0] sm:$0xff] }
  0x44   : > { %355 = vst [vmem:[%s5284_s5 + $0x2c0] sm:$0xff] %v354_v24  ;;  %357 = vst [vmem:[%s5284_s5 + $0x2c8] sm:$0xff] %v356_v25  ;;  %v360_v27 = vld [vmem:[%s5279_s4 + $0x5a8] sm:$0xff]  ;;  %v362_v28 = vld [vmem:[%s5279_s4 + $0x5b0] sm:$0xff] }
  0x45   : > { %359 = vst [vmem:[%s5284_s5 + $0x2d0] sm:$0xff] %v358_v26  ;;  %361 = vst [vmem:[%s5284_s5 + $0x2d8] sm:$0xff] %v360_v27  ;;  %v364_v29 = vld [vmem:[%s5279_s4 + $0x5b8] sm:$0xff]  ;;  %v366_v30 = vld [vmem:[%s5279_s4 + $0x5c0] sm:$0xff] }
  0x46   : > { %363 = vst [vmem:[%s5284_s5 + $0x2e0] sm:$0xff] %v362_v28  ;;  %v368_v31 = vld [vmem:[%s5279_s4 + $0x5c8] sm:$0xff]  ;;  %365 = vst [vmem:[%s5284_s5 + $0x2e8] sm:$0xff] %v364_v29  ;;  %v370_v32 = vld [vmem:[%s5279_s4 + $0x600] sm:$0xff] }
  0x47   : > { %367 = vst [vmem:[%s5284_s5 + $0x2f0] sm:$0xff] %v366_v30  ;;  %369 = vst [vmem:[%s5284_s5 + $0x2f8] sm:$0xff] %v368_v31  ;;  %v372_v33 = vld [vmem:[%s5279_s4 + $0x608] sm:$0xff]  ;;  %v374_v34 = vld [vmem:[%s5279_s4 + $0x610] sm:$0xff] }
  0x48   : > { %371 = vst [vmem:[%s5284_s5 + $0x300] sm:$0xff] %v370_v32  ;;  %373 = vst [vmem:[%s5284_s5 + $0x308] sm:$0xff] %v372_v33  ;;  %v376_v35 = vld [vmem:[%s5279_s4 + $0x618] sm:$0xff]  ;;  %v378_v36 = vld [vmem:[%s5279_s4 + $0x620] sm:$0xff] }
  0x49   : > { %375 = vst [vmem:[%s5284_s5 + $0x310] sm:$0xff] %v374_v34  ;;  %v380_v37 = vld [vmem:[%s5279_s4 + $0x628] sm:$0xff]  ;;  %377 = vst [vmem:[%s5284_s5 + $0x318] sm:$0xff] %v376_v35  ;;  %v382_v38 = vld [vmem:[%s5279_s4 + $0x660] sm:$0xff] }
  0x4a   : > { %379 = vst [vmem:[%s5284_s5 + $0x320] sm:$0xff] %v378_v36  ;;  %381 = vst [vmem:[%s5284_s5 + $0x328] sm:$0xff] %v380_v37  ;;  %v384_v39 = vld [vmem:[%s5279_s4 + $0x668] sm:$0xff]  ;;  %v386_v40 = vld [vmem:[%s5279_s4 + $0x670] sm:$0xff] }
  0x4b   : > { %383 = vst [vmem:[%s5284_s5 + $0x330] sm:$0xff] %v382_v38  ;;  %385 = vst [vmem:[%s5284_s5 + $0x338] sm:$0xff] %v384_v39  ;;  %v388_v41 = vld [vmem:[%s5279_s4 + $0x678] sm:$0xff]  ;;  %v390_v42 = vld [vmem:[%s5279_s4 + $0x680] sm:$0xff] }
  0x4c   : > { %387 = vst [vmem:[%s5284_s5 + $0x340] sm:$0xff] %v386_v40  ;;  %v392_v43 = vld [vmem:[%s5279_s4 + $0x688] sm:$0xff]  ;;  %389 = vst [vmem:[%s5284_s5 + $0x348] sm:$0xff] %v388_v41  ;;  %v394_v44 = vld [vmem:[%s5279_s4 + $0x6c0] sm:$0xff] }
  0x4d   : > { %391 = vst [vmem:[%s5284_s5 + $0x350] sm:$0xff] %v390_v42  ;;  %393 = vst [vmem:[%s5284_s5 + $0x358] sm:$0xff] %v392_v43  ;;  %v396_v45 = vld [vmem:[%s5279_s4 + $0x6c8] sm:$0xff]  ;;  %v398_v46 = vld [vmem:[%s5279_s4 + $0x6d0] sm:$0xff] }
  0x4e   : > { %395 = vst [vmem:[%s5284_s5 + $0x360] sm:$0xff] %v394_v44  ;;  %397 = vst [vmem:[%s5284_s5 + $0x368] sm:$0xff] %v396_v45  ;;  %v400_v47 = vld [vmem:[%s5279_s4 + $0x6d8] sm:$0xff]  ;;  %v402_v48 = vld [vmem:[%s5279_s4 + $0x6e0] sm:$0xff] }
  0x4f   : > { %399 = vst [vmem:[%s5284_s5 + $0x370] sm:$0xff] %v398_v46  ;;  %v404_v49 = vld [vmem:[%s5279_s4 + $0x6e8] sm:$0xff]  ;;  %401 = vst [vmem:[%s5284_s5 + $0x378] sm:$0xff] %v400_v47  ;;  %v406_v50 = vld [vmem:[%s5279_s4 + $0x720] sm:$0xff] }
  0x50   : > { %403 = vst [vmem:[%s5284_s5 + $0x380] sm:$0xff] %v402_v48  ;;  %405 = vst [vmem:[%s5284_s5 + $0x388] sm:$0xff] %v404_v49  ;;  %v408_v51 = vld [vmem:[%s5279_s4 + $0x728] sm:$0xff]  ;;  %v410_v52 = vld [vmem:[%s5279_s4 + $0x730] sm:$0xff] }
  0x51   : > { %407 = vst [vmem:[%s5284_s5 + $0x390] sm:$0xff] %v406_v50  ;;  %409 = vst [vmem:[%s5284_s5 + $0x398] sm:$0xff] %v408_v51  ;;  %v412_v53 = vld [vmem:[%s5279_s4 + $0x738] sm:$0xff]  ;;  %v414_v54 = vld [vmem:[%s5279_s4 + $0x740] sm:$0xff] }
  0x52   : > { %411 = vst [vmem:[%s5284_s5 + $0x3a0] sm:$0xff] %v410_v52  ;;  %v416_v55 = vld [vmem:[%s5279_s4 + $0x748] sm:$0xff]  ;;  %413 = vst [vmem:[%s5284_s5 + $0x3a8] sm:$0xff] %v412_v53  ;;  %v418_v56 = vld [vmem:[%s5279_s4 + $0x780] sm:$0xff] }
  0x53   : > { %415 = vst [vmem:[%s5284_s5 + $0x3b0] sm:$0xff] %v414_v54  ;;  %417 = vst [vmem:[%s5284_s5 + $0x3b8] sm:$0xff] %v416_v55  ;;  %v420_v57 = vld [vmem:[%s5279_s4 + $0x788] sm:$0xff]  ;;  %v422_v58 = vld [vmem:[%s5279_s4 + $0x790] sm:$0xff] }
  0x54   : > { %419 = vst [vmem:[%s5284_s5 + $0x3c0] sm:$0xff] %v418_v56  ;;  %421 = vst [vmem:[%s5284_s5 + $0x3c8] sm:$0xff] %v420_v57  ;;  %v424_v59 = vld [vmem:[%s5279_s4 + $0x798] sm:$0xff]  ;;  %v426_v60 = vld [vmem:[%s5279_s4 + $0x7a0] sm:$0xff] }
  0x55   : > { %423 = vst [vmem:[%s5284_s5 + $0x3d0] sm:$0xff] %v422_v58  ;;  %v428_v61 = vld [vmem:[%s5279_s4 + $0x7a8] sm:$0xff]  ;;  %425 = vst [vmem:[%s5284_s5 + $0x3d8] sm:$0xff] %v424_v59  ;;  %v430_v62 = vld [vmem:[%s5279_s4 + $0x7e0] sm:$0xff] }
  0x56   : > { %427 = vst [vmem:[%s5284_s5 + $0x3e0] sm:$0xff] %v426_v60  ;;  %429 = vst [vmem:[%s5284_s5 + $0x3e8] sm:$0xff] %v428_v61  ;;  %v432_v63 = vld [vmem:[%s5279_s4 + $0x7e8] sm:$0xff]  ;;  %v434_v0 = vld [vmem:[%s5279_s4 + $0x7f0] sm:$0xff] }
  0x57   : > { %431 = vst [vmem:[%s5284_s5 + $0x3f0] sm:$0xff] %v430_v62  ;;  %433 = vst [vmem:[%s5284_s5 + $0x3f8] sm:$0xff] %v432_v63  ;;  %v436_v1 = vld [vmem:[%s5279_s4 + $0x7f8] sm:$0xff]  ;;  %v438_v2 = vld [vmem:[%s5279_s4 + $0x800] sm:$0xff] }
  0x58   : > { %435 = vst [vmem:[%s5284_s5 + $0x400] sm:$0xff] %v434_v0  ;;  %v440_v3 = vld [vmem:[%s5279_s4 + $0x808] sm:$0xff]  ;;  %437 = vst [vmem:[%s5284_s5 + $0x408] sm:$0xff] %v436_v1  ;;  %v442_v4 = vld [vmem:[%s5279_s4 + $0x840] sm:$0xff] }
  0x59   : > { %439 = vst [vmem:[%s5284_s5 + $0x410] sm:$0xff] %v438_v2  ;;  %441 = vst [vmem:[%s5284_s5 + $0x418] sm:$0xff] %v440_v3  ;;  %v444_v5 = vld [vmem:[%s5279_s4 + $0x848] sm:$0xff]  ;;  %v446_v6 = vld [vmem:[%s5279_s4 + $0x850] sm:$0xff] }
  0x5a   : > { %443 = vst [vmem:[%s5284_s5 + $0x420] sm:$0xff] %v442_v4  ;;  %445 = vst [vmem:[%s5284_s5 + $0x428] sm:$0xff] %v444_v5  ;;  %v448_v7 = vld [vmem:[%s5279_s4 + $0x858] sm:$0xff]  ;;  %v450_v8 = vld [vmem:[%s5279_s4 + $0x860] sm:$0xff] }
  0x5b   : > { %447 = vst [vmem:[%s5284_s5 + $0x430] sm:$0xff] %v446_v6  ;;  %v452_v9 = vld [vmem:[%s5279_s4 + $0x868] sm:$0xff]  ;;  %449 = vst [vmem:[%s5284_s5 + $0x438] sm:$0xff] %v448_v7  ;;  %v454_v10 = vld [vmem:[%s5279_s4 + $0x8a0] sm:$0xff] }
  0x5c   : > { %451 = vst [vmem:[%s5284_s5 + $0x440] sm:$0xff] %v450_v8  ;;  %453 = vst [vmem:[%s5284_s5 + $0x448] sm:$0xff] %v452_v9  ;;  %v456_v11 = vld [vmem:[%s5279_s4 + $0x8a8] sm:$0xff]  ;;  %v458_v12 = vld [vmem:[%s5279_s4 + $0x8b0] sm:$0xff] }
  0x5d   : > { %455 = vst [vmem:[%s5284_s5 + $0x450] sm:$0xff] %v454_v10  ;;  %457 = vst [vmem:[%s5284_s5 + $0x458] sm:$0xff] %v456_v11  ;;  %v460_v13 = vld [vmem:[%s5279_s4 + $0x8b8] sm:$0xff]  ;;  %v462_v14 = vld [vmem:[%s5279_s4 + $0x8c0] sm:$0xff] }
  0x5e   : > { %459 = vst [vmem:[%s5284_s5 + $0x460] sm:$0xff] %v458_v12  ;;  %v464_v15 = vld [vmem:[%s5279_s4 + $0x8c8] sm:$0xff]  ;;  %461 = vst [vmem:[%s5284_s5 + $0x468] sm:$0xff] %v460_v13  ;;  %v466_v16 = vld [vmem:[%s5279_s4 + $0x900] sm:$0xff] }
  0x5f   : > { %463 = vst [vmem:[%s5284_s5 + $0x470] sm:$0xff] %v462_v14  ;;  %465 = vst [vmem:[%s5284_s5 + $0x478] sm:$0xff] %v464_v15  ;;  %v468_v17 = vld [vmem:[%s5279_s4 + $0x908] sm:$0xff]  ;;  %v470_v18 = vld [vmem:[%s5279_s4 + $0x910] sm:$0xff] }
  0x60   : > { %467 = vst [vmem:[%s5284_s5 + $0x480] sm:$0xff] %v466_v16  ;;  %469 = vst [vmem:[%s5284_s5 + $0x488] sm:$0xff] %v468_v17  ;;  %v472_v19 = vld [vmem:[%s5279_s4 + $0x918] sm:$0xff]  ;;  %v474_v20 = vld [vmem:[%s5279_s4 + $0x920] sm:$0xff] }
  0x61   : > { %471 = vst [vmem:[%s5284_s5 + $0x490] sm:$0xff] %v470_v18  ;;  %v476_v21 = vld [vmem:[%s5279_s4 + $0x928] sm:$0xff]  ;;  %473 = vst [vmem:[%s5284_s5 + $0x498] sm:$0xff] %v472_v19  ;;  %v478_v22 = vld [vmem:[%s5279_s4 + $0x960] sm:$0xff] }
  0x62   : > { %475 = vst [vmem:[%s5284_s5 + $0x4a0] sm:$0xff] %v474_v20  ;;  %477 = vst [vmem:[%s5284_s5 + $0x4a8] sm:$0xff] %v476_v21  ;;  %v480_v23 = vld [vmem:[%s5279_s4 + $0x968] sm:$0xff]  ;;  %v482_v24 = vld [vmem:[%s5279_s4 + $0x970] sm:$0xff] }
  0x63   : > { %479 = vst [vmem:[%s5284_s5 + $0x4b0] sm:$0xff] %v478_v22  ;;  %481 = vst [vmem:[%s5284_s5 + $0x4b8] sm:$0xff] %v480_v23  ;;  %v484_v25 = vld [vmem:[%s5279_s4 + $0x978] sm:$0xff]  ;;  %v486_v26 = vld [vmem:[%s5279_s4 + $0x980] sm:$0xff] }
  0x64   : > { %483 = vst [vmem:[%s5284_s5 + $0x4c0] sm:$0xff] %v482_v24  ;;  %v488_v27 = vld [vmem:[%s5279_s4 + $0x988] sm:$0xff]  ;;  %485 = vst [vmem:[%s5284_s5 + $0x4c8] sm:$0xff] %v484_v25  ;;  %v490_v28 = vld [vmem:[%s5279_s4 + $0x9c0] sm:$0xff] }
  0x65   : > { %487 = vst [vmem:[%s5284_s5 + $0x4d0] sm:$0xff] %v486_v26  ;;  %489 = vst [vmem:[%s5284_s5 + $0x4d8] sm:$0xff] %v488_v27  ;;  %v492_v29 = vld [vmem:[%s5279_s4 + $0x9c8] sm:$0xff]  ;;  %v494_v30 = vld [vmem:[%s5279_s4 + $0x9d0] sm:$0xff] }
  0x66   : > { %491 = vst [vmem:[%s5284_s5 + $0x4e0] sm:$0xff] %v490_v28  ;;  %493 = vst [vmem:[%s5284_s5 + $0x4e8] sm:$0xff] %v492_v29  ;;  %v496_v31 = vld [vmem:[%s5279_s4 + $0x9d8] sm:$0xff]  ;;  %v498_v32 = vld [vmem:[%s5279_s4 + $0x9e0] sm:$0xff] }
  0x67   : > { %495 = vst [vmem:[%s5284_s5 + $0x4f0] sm:$0xff] %v494_v30  ;;  %v500_v33 = vld [vmem:[%s5279_s4 + $0x9e8] sm:$0xff]  ;;  %497 = vst [vmem:[%s5284_s5 + $0x4f8] sm:$0xff] %v496_v31  ;;  %v502_v34 = vld [vmem:[%s5279_s4 + $0xa20] sm:$0xff] }
  0x68   : > { %499 = vst [vmem:[%s5284_s5 + $0x500] sm:$0xff] %v498_v32  ;;  %501 = vst [vmem:[%s5284_s5 + $0x508] sm:$0xff] %v500_v33  ;;  %v504_v35 = vld [vmem:[%s5279_s4 + $0xa28] sm:$0xff]  ;;  %v506_v36 = vld [vmem:[%s5279_s4 + $0xa30] sm:$0xff] }
  0x69   : > { %503 = vst [vmem:[%s5284_s5 + $0x510] sm:$0xff] %v502_v34  ;;  %505 = vst [vmem:[%s5284_s5 + $0x518] sm:$0xff] %v504_v35  ;;  %v508_v37 = vld [vmem:[%s5279_s4 + $0xa38] sm:$0xff]  ;;  %v510_v38 = vld [vmem:[%s5279_s4 + $0xa40] sm:$0xff] }
  0x6a   : > { %507 = vst [vmem:[%s5284_s5 + $0x520] sm:$0xff] %v506_v36  ;;  %v512_v39 = vld [vmem:[%s5279_s4 + $0xa48] sm:$0xff]  ;;  %509 = vst [vmem:[%s5284_s5 + $0x528] sm:$0xff] %v508_v37  ;;  %v514_v40 = vld [vmem:[%s5279_s4 + $0xa80] sm:$0xff] }
  0x6b   : > { %511 = vst [vmem:[%s5284_s5 + $0x530] sm:$0xff] %v510_v38  ;;  %513 = vst [vmem:[%s5284_s5 + $0x538] sm:$0xff] %v512_v39  ;;  %v516_v41 = vld [vmem:[%s5279_s4 + $0xa88] sm:$0xff]  ;;  %v518_v42 = vld [vmem:[%s5279_s4 + $0xa90] sm:$0xff] }
  0x6c   : > { %515 = vst [vmem:[%s5284_s5 + $0x540] sm:$0xff] %v514_v40  ;;  %517 = vst [vmem:[%s5284_s5 + $0x548] sm:$0xff] %v516_v41  ;;  %v520_v43 = vld [vmem:[%s5279_s4 + $0xa98] sm:$0xff]  ;;  %v522_v44 = vld [vmem:[%s5279_s4 + $0xaa0] sm:$0xff] }
  0x6d   : > { %519 = vst [vmem:[%s5284_s5 + $0x550] sm:$0xff] %v518_v42  ;;  %v524_v45 = vld [vmem:[%s5279_s4 + $0xaa8] sm:$0xff]  ;;  %521 = vst [vmem:[%s5284_s5 + $0x558] sm:$0xff] %v520_v43  ;;  %v526_v46 = vld [vmem:[%s5279_s4 + $0xae0] sm:$0xff] }
  0x6e   : > { %523 = vst [vmem:[%s5284_s5 + $0x560] sm:$0xff] %v522_v44  ;;  %525 = vst [vmem:[%s5284_s5 + $0x568] sm:$0xff] %v524_v45  ;;  %v528_v47 = vld [vmem:[%s5279_s4 + $0xae8] sm:$0xff]  ;;  %v530_v48 = vld [vmem:[%s5279_s4 + $0xaf0] sm:$0xff] }
  0x6f   : > { %527 = vst [vmem:[%s5284_s5 + $0x570] sm:$0xff] %v526_v46  ;;  %529 = vst [vmem:[%s5284_s5 + $0x578] sm:$0xff] %v528_v47  ;;  %v532_v49 = vld [vmem:[%s5279_s4 + $0xaf8] sm:$0xff]  ;;  %v534_v50 = vld [vmem:[%s5279_s4 + $0xb00] sm:$0xff] }
  0x70   : > { %531 = vst [vmem:[%s5284_s5 + $0x580] sm:$0xff] %v530_v48  ;;  %v536_v51 = vld [vmem:[%s5279_s4 + $0xb08] sm:$0xff]  ;;  %533 = vst [vmem:[%s5284_s5 + $0x588] sm:$0xff] %v532_v49  ;;  %v538_v52 = vld [vmem:[%s5279_s4 + $0xb40] sm:$0xff] }
  0x71   : > { %535 = vst [vmem:[%s5284_s5 + $0x590] sm:$0xff] %v534_v50  ;;  %537 = vst [vmem:[%s5284_s5 + $0x598] sm:$0xff] %v536_v51  ;;  %v540_v53 = vld [vmem:[%s5279_s4 + $0xb48] sm:$0xff]  ;;  %v542_v54 = vld [vmem:[%s5279_s4 + $0xb50] sm:$0xff] }
  0x72   : > { %539 = vst [vmem:[%s5284_s5 + $0x5a0] sm:$0xff] %v538_v52  ;;  %541 = vst [vmem:[%s5284_s5 + $0x5a8] sm:$0xff] %v540_v53  ;;  %v544_v55 = vld [vmem:[%s5279_s4 + $0xb58] sm:$0xff]  ;;  %v546_v56 = vld [vmem:[%s5279_s4 + $0xb60] sm:$0xff] }
  0x73   : > { %543 = vst [vmem:[%s5284_s5 + $0x5b0] sm:$0xff] %v542_v54  ;;  %v548_v57 = vld [vmem:[%s5279_s4 + $0xb68] sm:$0xff]  ;;  %545 = vst [vmem:[%s5284_s5 + $0x5b8] sm:$0xff] %v544_v55  ;;  %v550_v58 = vld [vmem:[%s5279_s4 + $0xba0] sm:$0xff] }
  0x74   : > { %547 = vst [vmem:[%s5284_s5 + $0x5c0] sm:$0xff] %v546_v56  ;;  %549 = vst [vmem:[%s5284_s5 + $0x5c8] sm:$0xff] %v548_v57  ;;  %v552_v59 = vld [vmem:[%s5279_s4 + $0xba8] sm:$0xff]  ;;  %v554_v60 = vld [vmem:[%s5279_s4 + $0xbb0] sm:$0xff] }
  0x75   : > { %551 = vst [vmem:[%s5284_s5 + $0x5d0] sm:$0xff] %v550_v58  ;;  %553 = vst [vmem:[%s5284_s5 + $0x5d8] sm:$0xff] %v552_v59  ;;  %v556_v61 = vld [vmem:[%s5279_s4 + $0xbb8] sm:$0xff]  ;;  %v558_v62 = vld [vmem:[%s5279_s4 + $0xbc0] sm:$0xff] }
  0x76   : > { %555 = vst [vmem:[%s5284_s5 + $0x5e0] sm:$0xff] %v554_v60  ;;  %v560_v63 = vld [vmem:[%s5279_s4 + $0xbc8] sm:$0xff]  ;;  %557 = vst [vmem:[%s5284_s5 + $0x5e8] sm:$0xff] %v556_v61  ;;  %v562_v0 = vld [vmem:[%s5279_s4 + $0xc00] sm:$0xff] }
  0x77   : > { %559 = vst [vmem:[%s5284_s5 + $0x5f0] sm:$0xff] %v558_v62  ;;  %561 = vst [vmem:[%s5284_s5 + $0x5f8] sm:$0xff] %v560_v63  ;;  %v564_v1 = vld [vmem:[%s5279_s4 + $0xc08] sm:$0xff]  ;;  %v566_v2 = vld [vmem:[%s5279_s4 + $0xc10] sm:$0xff] }
  0x78   : > { %563 = vst [vmem:[%s5284_s5 + $0x600] sm:$0xff] %v562_v0  ;;  %565 = vst [vmem:[%s5284_s5 + $0x608] sm:$0xff] %v564_v1  ;;  %v568_v3 = vld [vmem:[%s5279_s4 + $0xc18] sm:$0xff]  ;;  %v570_v4 = vld [vmem:[%s5279_s4 + $0xc20] sm:$0xff] }
  0x79   : > { %567 = vst [vmem:[%s5284_s5 + $0x610] sm:$0xff] %v566_v2  ;;  %v572_v5 = vld [vmem:[%s5279_s4 + $0xc28] sm:$0xff]  ;;  %569 = vst [vmem:[%s5284_s5 + $0x618] sm:$0xff] %v568_v3  ;;  %v574_v6 = vld [vmem:[%s5279_s4 + $0xc60] sm:$0xff] }
  0x7a   : > { %571 = vst [vmem:[%s5284_s5 + $0x620] sm:$0xff] %v570_v4  ;;  %573 = vst [vmem:[%s5284_s5 + $0x628] sm:$0xff] %v572_v5  ;;  %v576_v7 = vld [vmem:[%s5279_s4 + $0xc68] sm:$0xff]  ;;  %v578_v8 = vld [vmem:[%s5279_s4 + $0xc70] sm:$0xff] }
  0x7b   : > { %575 = vst [vmem:[%s5284_s5 + $0x630] sm:$0xff] %v574_v6  ;;  %577 = vst [vmem:[%s5284_s5 + $0x638] sm:$0xff] %v576_v7  ;;  %v580_v9 = vld [vmem:[%s5279_s4 + $0xc78] sm:$0xff]  ;;  %v582_v10 = vld [vmem:[%s5279_s4 + $0xc80] sm:$0xff] }
  0x7c   : > { %579 = vst [vmem:[%s5284_s5 + $0x640] sm:$0xff] %v578_v8  ;;  %v584_v11 = vld [vmem:[%s5279_s4 + $0xc88] sm:$0xff]  ;;  %581 = vst [vmem:[%s5284_s5 + $0x648] sm:$0xff] %v580_v9  ;;  %v586_v12 = vld [vmem:[%s5279_s4 + $0xcc0] sm:$0xff] }
  0x7d   : > { %583 = vst [vmem:[%s5284_s5 + $0x650] sm:$0xff] %v582_v10  ;;  %585 = vst [vmem:[%s5284_s5 + $0x658] sm:$0xff] %v584_v11  ;;  %v588_v13 = vld [vmem:[%s5279_s4 + $0xcc8] sm:$0xff]  ;;  %v590_v14 = vld [vmem:[%s5279_s4 + $0xcd0] sm:$0xff] }
  0x7e   : > { %587 = vst [vmem:[%s5284_s5 + $0x660] sm:$0xff] %v586_v12  ;;  %589 = vst [vmem:[%s5284_s5 + $0x668] sm:$0xff] %v588_v13  ;;  %v592_v15 = vld [vmem:[%s5279_s4 + $0xcd8] sm:$0xff]  ;;  %v594_v16 = vld [vmem:[%s5279_s4 + $0xce0] sm:$0xff] }
  0x7f   : > { %591 = vst [vmem:[%s5284_s5 + $0x670] sm:$0xff] %v590_v14  ;;  %v596_v17 = vld [vmem:[%s5279_s4 + $0xce8] sm:$0xff]  ;;  %593 = vst [vmem:[%s5284_s5 + $0x678] sm:$0xff] %v592_v15  ;;  %v598_v18 = vld [vmem:[%s5279_s4 + $0xd20] sm:$0xff] }
  0x80   : > { %595 = vst [vmem:[%s5284_s5 + $0x680] sm:$0xff] %v594_v16  ;;  %597 = vst [vmem:[%s5284_s5 + $0x688] sm:$0xff] %v596_v17  ;;  %v600_v19 = vld [vmem:[%s5279_s4 + $0xd28] sm:$0xff]  ;;  %v602_v20 = vld [vmem:[%s5279_s4 + $0xd30] sm:$0xff] }
  0x81   : > { %599 = vst [vmem:[%s5284_s5 + $0x690] sm:$0xff] %v598_v18  ;;  %601 = vst [vmem:[%s5284_s5 + $0x698] sm:$0xff] %v600_v19  ;;  %v604_v21 = vld [vmem:[%s5279_s4 + $0xd38] sm:$0xff]  ;;  %v606_v22 = vld [vmem:[%s5279_s4 + $0xd40] sm:$0xff] }
  0x82   : > { %603 = vst [vmem:[%s5284_s5 + $0x6a0] sm:$0xff] %v602_v20  ;;  %v608_v23 = vld [vmem:[%s5279_s4 + $0xd48] sm:$0xff]  ;;  %605 = vst [vmem:[%s5284_s5 + $0x6a8] sm:$0xff] %v604_v21  ;;  %v610_v24 = vld [vmem:[%s5279_s4 + $0xd80] sm:$0xff] }
  0x83   : > { %607 = vst [vmem:[%s5284_s5 + $0x6b0] sm:$0xff] %v606_v22  ;;  %609 = vst [vmem:[%s5284_s5 + $0x6b8] sm:$0xff] %v608_v23  ;;  %v612_v25 = vld [vmem:[%s5279_s4 + $0xd88] sm:$0xff]  ;;  %v614_v26 = vld [vmem:[%s5279_s4 + $0xd90] sm:$0xff] }
  0x84   : > { %611 = vst [vmem:[%s5284_s5 + $0x6c0] sm:$0xff] %v610_v24  ;;  %613 = vst [vmem:[%s5284_s5 + $0x6c8] sm:$0xff] %v612_v25  ;;  %v616_v27 = vld [vmem:[%s5279_s4 + $0xd98] sm:$0xff]  ;;  %v618_v28 = vld [vmem:[%s5279_s4 + $0xda0] sm:$0xff] }
  0x85   : > { %615 = vst [vmem:[%s5284_s5 + $0x6d0] sm:$0xff] %v614_v26  ;;  %v620_v29 = vld [vmem:[%s5279_s4 + $0xda8] sm:$0xff]  ;;  %617 = vst [vmem:[%s5284_s5 + $0x6d8] sm:$0xff] %v616_v27  ;;  %v622_v30 = vld [vmem:[%s5279_s4 + $0xde0] sm:$0xff] }
  0x86   : > { %619 = vst [vmem:[%s5284_s5 + $0x6e0] sm:$0xff] %v618_v28  ;;  %621 = vst [vmem:[%s5284_s5 + $0x6e8] sm:$0xff] %v620_v29  ;;  %v624_v31 = vld [vmem:[%s5279_s4 + $0xde8] sm:$0xff]  ;;  %v626_v32 = vld [vmem:[%s5279_s4 + $0xdf0] sm:$0xff] }
  0x87   : > { %623 = vst [vmem:[%s5284_s5 + $0x6f0] sm:$0xff] %v622_v30  ;;  %625 = vst [vmem:[%s5284_s5 + $0x6f8] sm:$0xff] %v624_v31  ;;  %v628_v33 = vld [vmem:[%s5279_s4 + $0xdf8] sm:$0xff]  ;;  %v630_v34 = vld [vmem:[%s5279_s4 + $0xe00] sm:$0xff] }
  0x88   : > { %627 = vst [vmem:[%s5284_s5 + $0x700] sm:$0xff] %v626_v32  ;;  %v632_v35 = vld [vmem:[%s5279_s4 + $0xe08] sm:$0xff]  ;;  %629 = vst [vmem:[%s5284_s5 + $0x708] sm:$0xff] %v628_v33  ;;  %v634_v36 = vld [vmem:[%s5279_s4 + $0xe40] sm:$0xff] }
  0x89   : > { %631 = vst [vmem:[%s5284_s5 + $0x710] sm:$0xff] %v630_v34  ;;  %633 = vst [vmem:[%s5284_s5 + $0x718] sm:$0xff] %v632_v35  ;;  %v636_v37 = vld [vmem:[%s5279_s4 + $0xe48] sm:$0xff]  ;;  %v638_v38 = vld [vmem:[%s5279_s4 + $0xe50] sm:$0xff] }
  0x8a   : > { %635 = vst [vmem:[%s5284_s5 + $0x720] sm:$0xff] %v634_v36  ;;  %637 = vst [vmem:[%s5284_s5 + $0x728] sm:$0xff] %v636_v37  ;;  %v640_v39 = vld [vmem:[%s5279_s4 + $0xe58] sm:$0xff]  ;;  %v642_v40 = vld [vmem:[%s5279_s4 + $0xe60] sm:$0xff] }
  0x8b   : > { %639 = vst [vmem:[%s5284_s5 + $0x730] sm:$0xff] %v638_v38  ;;  %v644_v41 = vld [vmem:[%s5279_s4 + $0xe68] sm:$0xff]  ;;  %641 = vst [vmem:[%s5284_s5 + $0x738] sm:$0xff] %v640_v39  ;;  %v646_v42 = vld [vmem:[%s5279_s4 + $0xea0] sm:$0xff] }
  0x8c   : > { %643 = vst [vmem:[%s5284_s5 + $0x740] sm:$0xff] %v642_v40  ;;  %645 = vst [vmem:[%s5284_s5 + $0x748] sm:$0xff] %v644_v41  ;;  %v648_v43 = vld [vmem:[%s5279_s4 + $0xea8] sm:$0xff]  ;;  %v650_v44 = vld [vmem:[%s5279_s4 + $0xeb0] sm:$0xff] }
  0x8d   : > { %647 = vst [vmem:[%s5284_s5 + $0x750] sm:$0xff] %v646_v42  ;;  %649 = vst [vmem:[%s5284_s5 + $0x758] sm:$0xff] %v648_v43  ;;  %v652_v45 = vld [vmem:[%s5279_s4 + $0xeb8] sm:$0xff]  ;;  %v654_v46 = vld [vmem:[%s5279_s4 + $0xec0] sm:$0xff] }
  0x8e   : > { %651 = vst [vmem:[%s5284_s5 + $0x760] sm:$0xff] %v650_v44  ;;  %v656_v47 = vld [vmem:[%s5279_s4 + $0xec8] sm:$0xff]  ;;  %653 = vst [vmem:[%s5284_s5 + $0x768] sm:$0xff] %v652_v45  ;;  %v658_v48 = vld [vmem:[%s5279_s4 + $0xf00] sm:$0xff] }
  0x8f   : > { %655 = vst [vmem:[%s5284_s5 + $0x770] sm:$0xff] %v654_v46  ;;  %657 = vst [vmem:[%s5284_s5 + $0x778] sm:$0xff] %v656_v47  ;;  %v660_v49 = vld [vmem:[%s5279_s4 + $0xf08] sm:$0xff]  ;;  %v662_v50 = vld [vmem:[%s5279_s4 + $0xf10] sm:$0xff] }
  0x90   : > { %659 = vst [vmem:[%s5284_s5 + $0x780] sm:$0xff] %v658_v48  ;;  %661 = vst [vmem:[%s5284_s5 + $0x788] sm:$0xff] %v660_v49  ;;  %v664_v51 = vld [vmem:[%s5279_s4 + $0xf18] sm:$0xff]  ;;  %v666_v52 = vld [vmem:[%s5279_s4 + $0xf20] sm:$0xff] }
  0x91   : > { %663 = vst [vmem:[%s5284_s5 + $0x790] sm:$0xff] %v662_v50  ;;  %v668_v53 = vld [vmem:[%s5279_s4 + $0xf28] sm:$0xff]  ;;  %665 = vst [vmem:[%s5284_s5 + $0x798] sm:$0xff] %v664_v51  ;;  %v670_v54 = vld [vmem:[%s5279_s4 + $0xf60] sm:$0xff] }
  0x92   : > { %667 = vst [vmem:[%s5284_s5 + $0x7a0] sm:$0xff] %v666_v52  ;;  %669 = vst [vmem:[%s5284_s5 + $0x7a8] sm:$0xff] %v668_v53  ;;  %v672_v55 = vld [vmem:[%s5279_s4 + $0xf68] sm:$0xff]  ;;  %v674_v56 = vld [vmem:[%s5279_s4 + $0xf70] sm:$0xff] }
  0x93   : > { %671 = vst [vmem:[%s5284_s5 + $0x7b0] sm:$0xff] %v670_v54  ;;  %673 = vst [vmem:[%s5284_s5 + $0x7b8] sm:$0xff] %v672_v55  ;;  %v676_v57 = vld [vmem:[%s5279_s4 + $0xf78] sm:$0xff]  ;;  %v678_v58 = vld [vmem:[%s5279_s4 + $0xf80] sm:$0xff] }
  0x94   : > { %675 = vst [vmem:[%s5284_s5 + $0x7c0] sm:$0xff] %v674_v56  ;;  %v680_v59 = vld [vmem:[%s5279_s4 + $0xf88] sm:$0xff]  ;;  %677 = vst [vmem:[%s5284_s5 + $0x7c8] sm:$0xff] %v676_v57  ;;  %v682_v60 = vld [vmem:[%s5279_s4 + $0xfc0] sm:$0xff] }
  0x95   : > { %679 = vst [vmem:[%s5284_s5 + $0x7d0] sm:$0xff] %v678_v58  ;;  %681 = vst [vmem:[%s5284_s5 + $0x7d8] sm:$0xff] %v680_v59  ;;  %v684_v61 = vld [vmem:[%s5279_s4 + $0xfc8] sm:$0xff]  ;;  %v686_v62 = vld [vmem:[%s5279_s4 + $0xfd0] sm:$0xff] }
  0x96   : > { %683 = vst [vmem:[%s5284_s5 + $0x7e0] sm:$0xff] %v682_v60  ;;  %685 = vst [vmem:[%s5284_s5 + $0x7e8] sm:$0xff] %v684_v61  ;;  %v688_v63 = vld [vmem:[%s5279_s4 + $0xfd8] sm:$0xff]  ;;  %v690_v0 = vld [vmem:[%s5279_s4 + $0xfe0] sm:$0xff] }
  0x97   : > { %687 = vst [vmem:[%s5284_s5 + $0x7f0] sm:$0xff] %v686_v62  ;;  %v692_v1 = vld [vmem:[%s5279_s4 + $0xfe8] sm:$0xff]  ;;  %689 = vst [vmem:[%s5284_s5 + $0x7f8] sm:$0xff] %v688_v63  ;;  %v694_v2 = vld [vmem:[%s5279_s4 + $0x1020] sm:$0xff] }
  0x98   : > { %691 = vst [vmem:[%s5284_s5 + $0x800] sm:$0xff] %v690_v0  ;;  %693 = vst [vmem:[%s5284_s5 + $0x808] sm:$0xff] %v692_v1  ;;  %v696_v3 = vld [vmem:[%s5279_s4 + $0x1028] sm:$0xff]  ;;  %v698_v4 = vld [vmem:[%s5279_s4 + $0x1030] sm:$0xff] }
  0x99   : > { %695 = vst [vmem:[%s5284_s5 + $0x810] sm:$0xff] %v694_v2  ;;  %697 = vst [vmem:[%s5284_s5 + $0x818] sm:$0xff] %v696_v3  ;;  %v700_v5 = vld [vmem:[%s5279_s4 + $0x1038] sm:$0xff]  ;;  %v702_v6 = vld [vmem:[%s5279_s4 + $0x1040] sm:$0xff] }
  0x9a   : > { %699 = vst [vmem:[%s5284_s5 + $0x820] sm:$0xff] %v698_v4  ;;  %v704_v7 = vld [vmem:[%s5279_s4 + $0x1048] sm:$0xff]  ;;  %701 = vst [vmem:[%s5284_s5 + $0x828] sm:$0xff] %v700_v5  ;;  %v706_v8 = vld [vmem:[%s5279_s4 + $0x1080] sm:$0xff] }
  0x9b   : > { %703 = vst [vmem:[%s5284_s5 + $0x830] sm:$0xff] %v702_v6  ;;  %705 = vst [vmem:[%s5284_s5 + $0x838] sm:$0xff] %v704_v7  ;;  %v708_v9 = vld [vmem:[%s5279_s4 + $0x1088] sm:$0xff]  ;;  %v710_v10 = vld [vmem:[%s5279_s4 + $0x1090] sm:$0xff] }
  0x9c   : > { %707 = vst [vmem:[%s5284_s5 + $0x840] sm:$0xff] %v706_v8  ;;  %709 = vst [vmem:[%s5284_s5 + $0x848] sm:$0xff] %v708_v9  ;;  %v712_v11 = vld [vmem:[%s5279_s4 + $0x1098] sm:$0xff]  ;;  %v714_v12 = vld [vmem:[%s5279_s4 + $0x10a0] sm:$0xff] }
  0x9d   : > { %711 = vst [vmem:[%s5284_s5 + $0x850] sm:$0xff] %v710_v10  ;;  %v716_v13 = vld [vmem:[%s5279_s4 + $0x10a8] sm:$0xff]  ;;  %713 = vst [vmem:[%s5284_s5 + $0x858] sm:$0xff] %v712_v11  ;;  %v718_v14 = vld [vmem:[%s5279_s4 + $0x10e0] sm:$0xff] }
  0x9e   : > { %715 = vst [vmem:[%s5284_s5 + $0x860] sm:$0xff] %v714_v12  ;;  %717 = vst [vmem:[%s5284_s5 + $0x868] sm:$0xff] %v716_v13  ;;  %v720_v15 = vld [vmem:[%s5279_s4 + $0x10e8] sm:$0xff]  ;;  %v722_v16 = vld [vmem:[%s5279_s4 + $0x10f0] sm:$0xff] }
  0x9f   : > { %719 = vst [vmem:[%s5284_s5 + $0x870] sm:$0xff] %v718_v14  ;;  %721 = vst [vmem:[%s5284_s5 + $0x878] sm:$0xff] %v720_v15  ;;  %v724_v17 = vld [vmem:[%s5279_s4 + $0x10f8] sm:$0xff]  ;;  %v726_v18 = vld [vmem:[%s5279_s4 + $0x1100] sm:$0xff] }
  0xa0   : > { %723 = vst [vmem:[%s5284_s5 + $0x880] sm:$0xff] %v722_v16  ;;  %v728_v19 = vld [vmem:[%s5279_s4 + $0x1108] sm:$0xff]  ;;  %725 = vst [vmem:[%s5284_s5 + $0x888] sm:$0xff] %v724_v17  ;;  %v730_v20 = vld [vmem:[%s5279_s4 + $0x1140] sm:$0xff] }
  0xa1   : > { %727 = vst [vmem:[%s5284_s5 + $0x890] sm:$0xff] %v726_v18  ;;  %729 = vst [vmem:[%s5284_s5 + $0x898] sm:$0xff] %v728_v19  ;;  %v732_v21 = vld [vmem:[%s5279_s4 + $0x1148] sm:$0xff]  ;;  %v734_v22 = vld [vmem:[%s5279_s4 + $0x1150] sm:$0xff] }
  0xa2   : > { %731 = vst [vmem:[%s5284_s5 + $0x8a0] sm:$0xff] %v730_v20  ;;  %733 = vst [vmem:[%s5284_s5 + $0x8a8] sm:$0xff] %v732_v21  ;;  %v736_v23 = vld [vmem:[%s5279_s4 + $0x1158] sm:$0xff]  ;;  %v738_v24 = vld [vmem:[%s5279_s4 + $0x1160] sm:$0xff] }
  0xa3   : > { %735 = vst [vmem:[%s5284_s5 + $0x8b0] sm:$0xff] %v734_v22  ;;  %v740_v25 = vld [vmem:[%s5279_s4 + $0x1168] sm:$0xff]  ;;  %737 = vst [vmem:[%s5284_s5 + $0x8b8] sm:$0xff] %v736_v23  ;;  %v742_v26 = vld [vmem:[%s5279_s4 + $0x11a0] sm:$0xff] }
  0xa4   : > { %739 = vst [vmem:[%s5284_s5 + $0x8c0] sm:$0xff] %v738_v24  ;;  %741 = vst [vmem:[%s5284_s5 + $0x8c8] sm:$0xff] %v740_v25  ;;  %v744_v27 = vld [vmem:[%s5279_s4 + $0x11a8] sm:$0xff]  ;;  %v746_v28 = vld [vmem:[%s5279_s4 + $0x11b0] sm:$0xff] }
  0xa5   : > { %743 = vst [vmem:[%s5284_s5 + $0x8d0] sm:$0xff] %v742_v26  ;;  %745 = vst [vmem:[%s5284_s5 + $0x8d8] sm:$0xff] %v744_v27  ;;  %v748_v29 = vld [vmem:[%s5279_s4 + $0x11b8] sm:$0xff]  ;;  %v750_v30 = vld [vmem:[%s5279_s4 + $0x11c0] sm:$0xff] }
  0xa6   : > { %747 = vst [vmem:[%s5284_s5 + $0x8e0] sm:$0xff] %v746_v28  ;;  %v752_v31 = vld [vmem:[%s5279_s4 + $0x11c8] sm:$0xff]  ;;  %749 = vst [vmem:[%s5284_s5 + $0x8e8] sm:$0xff] %v748_v29  ;;  %v754_v32 = vld [vmem:[%s5279_s4 + $0x1200] sm:$0xff] }
  0xa7   : > { %751 = vst [vmem:[%s5284_s5 + $0x8f0] sm:$0xff] %v750_v30  ;;  %753 = vst [vmem:[%s5284_s5 + $0x8f8] sm:$0xff] %v752_v31  ;;  %v756_v33 = vld [vmem:[%s5279_s4 + $0x1208] sm:$0xff]  ;;  %v758_v34 = vld [vmem:[%s5279_s4 + $0x1210] sm:$0xff] }
  0xa8   : > { %755 = vst [vmem:[%s5284_s5 + $0x900] sm:$0xff] %v754_v32  ;;  %757 = vst [vmem:[%s5284_s5 + $0x908] sm:$0xff] %v756_v33  ;;  %v760_v35 = vld [vmem:[%s5279_s4 + $0x1218] sm:$0xff]  ;;  %v762_v36 = vld [vmem:[%s5279_s4 + $0x1220] sm:$0xff] }
  0xa9   : > { %759 = vst [vmem:[%s5284_s5 + $0x910] sm:$0xff] %v758_v34  ;;  %v764_v37 = vld [vmem:[%s5279_s4 + $0x1228] sm:$0xff]  ;;  %761 = vst [vmem:[%s5284_s5 + $0x918] sm:$0xff] %v760_v35  ;;  %v766_v38 = vld [vmem:[%s5279_s4 + $0x1260] sm:$0xff] }
  0xaa   : > { %763 = vst [vmem:[%s5284_s5 + $0x920] sm:$0xff] %v762_v36  ;;  %765 = vst [vmem:[%s5284_s5 + $0x928] sm:$0xff] %v764_v37  ;;  %v768_v39 = vld [vmem:[%s5279_s4 + $0x1268] sm:$0xff]  ;;  %v770_v40 = vld [vmem:[%s5279_s4 + $0x1270] sm:$0xff] }
  0xab   : > { %767 = vst [vmem:[%s5284_s5 + $0x930] sm:$0xff] %v766_v38  ;;  %769 = vst [vmem:[%s5284_s5 + $0x938] sm:$0xff] %v768_v39  ;;  %v772_v41 = vld [vmem:[%s5279_s4 + $0x1278] sm:$0xff]  ;;  %v774_v42 = vld [vmem:[%s5279_s4 + $0x1280] sm:$0xff] }
  0xac   : > { %771 = vst [vmem:[%s5284_s5 + $0x940] sm:$0xff] %v770_v40  ;;  %v776_v43 = vld [vmem:[%s5279_s4 + $0x1288] sm:$0xff]  ;;  %773 = vst [vmem:[%s5284_s5 + $0x948] sm:$0xff] %v772_v41  ;;  %v778_v44 = vld [vmem:[%s5279_s4 + $0x12c0] sm:$0xff] }
  0xad   : > { %775 = vst [vmem:[%s5284_s5 + $0x950] sm:$0xff] %v774_v42  ;;  %777 = vst [vmem:[%s5284_s5 + $0x958] sm:$0xff] %v776_v43  ;;  %v780_v45 = vld [vmem:[%s5279_s4 + $0x12c8] sm:$0xff]  ;;  %v782_v46 = vld [vmem:[%s5279_s4 + $0x12d0] sm:$0xff] }
  0xae   : > { %779 = vst [vmem:[%s5284_s5 + $0x960] sm:$0xff] %v778_v44  ;;  %781 = vst [vmem:[%s5284_s5 + $0x968] sm:$0xff] %v780_v45  ;;  %v784_v47 = vld [vmem:[%s5279_s4 + $0x12d8] sm:$0xff]  ;;  %v786_v48 = vld [vmem:[%s5279_s4 + $0x12e0] sm:$0xff] }
  0xaf   : > { %783 = vst [vmem:[%s5284_s5 + $0x970] sm:$0xff] %v782_v46  ;;  %v788_v49 = vld [vmem:[%s5279_s4 + $0x12e8] sm:$0xff]  ;;  %785 = vst [vmem:[%s5284_s5 + $0x978] sm:$0xff] %v784_v47  ;;  %v790_v50 = vld [vmem:[%s5279_s4 + $0x1320] sm:$0xff] }
  0xb0   : > { %787 = vst [vmem:[%s5284_s5 + $0x980] sm:$0xff] %v786_v48  ;;  %789 = vst [vmem:[%s5284_s5 + $0x988] sm:$0xff] %v788_v49  ;;  %v792_v51 = vld [vmem:[%s5279_s4 + $0x1328] sm:$0xff]  ;;  %v794_v52 = vld [vmem:[%s5279_s4 + $0x1330] sm:$0xff] }
  0xb1   : > { %791 = vst [vmem:[%s5284_s5 + $0x990] sm:$0xff] %v790_v50  ;;  %793 = vst [vmem:[%s5284_s5 + $0x998] sm:$0xff] %v792_v51  ;;  %v796_v53 = vld [vmem:[%s5279_s4 + $0x1338] sm:$0xff]  ;;  %v798_v54 = vld [vmem:[%s5279_s4 + $0x1340] sm:$0xff] }
  0xb2   : > { %795 = vst [vmem:[%s5284_s5 + $0x9a0] sm:$0xff] %v794_v52  ;;  %v800_v55 = vld [vmem:[%s5279_s4 + $0x1348] sm:$0xff]  ;;  %797 = vst [vmem:[%s5284_s5 + $0x9a8] sm:$0xff] %v796_v53  ;;  %v802_v56 = vld [vmem:[%s5279_s4 + $0x1380] sm:$0xff] }
  0xb3   : > { %799 = vst [vmem:[%s5284_s5 + $0x9b0] sm:$0xff] %v798_v54  ;;  %801 = vst [vmem:[%s5284_s5 + $0x9b8] sm:$0xff] %v800_v55  ;;  %v804_v57 = vld [vmem:[%s5279_s4 + $0x1388] sm:$0xff]  ;;  %v806_v58 = vld [vmem:[%s5279_s4 + $0x1390] sm:$0xff] }
  0xb4   : > { %803 = vst [vmem:[%s5284_s5 + $0x9c0] sm:$0xff] %v802_v56  ;;  %805 = vst [vmem:[%s5284_s5 + $0x9c8] sm:$0xff] %v804_v57  ;;  %v808_v59 = vld [vmem:[%s5279_s4 + $0x1398] sm:$0xff]  ;;  %v810_v60 = vld [vmem:[%s5279_s4 + $0x13a0] sm:$0xff] }
  0xb5   : > { %807 = vst [vmem:[%s5284_s5 + $0x9d0] sm:$0xff] %v806_v58  ;;  %v812_v61 = vld [vmem:[%s5279_s4 + $0x13a8] sm:$0xff]  ;;  %809 = vst [vmem:[%s5284_s5 + $0x9d8] sm:$0xff] %v808_v59  ;;  %v814_v62 = vld [vmem:[%s5279_s4 + $0x13e0] sm:$0xff] }
  0xb6   : > { %811 = vst [vmem:[%s5284_s5 + $0x9e0] sm:$0xff] %v810_v60  ;;  %813 = vst [vmem:[%s5284_s5 + $0x9e8] sm:$0xff] %v812_v61  ;;  %v816_v63 = vld [vmem:[%s5279_s4 + $0x13e8] sm:$0xff]  ;;  %v818_v0 = vld [vmem:[%s5279_s4 + $0x13f0] sm:$0xff] }
  0xb7   : > { %815 = vst [vmem:[%s5284_s5 + $0x9f0] sm:$0xff] %v814_v62  ;;  %817 = vst [vmem:[%s5284_s5 + $0x9f8] sm:$0xff] %v816_v63  ;;  %v820_v1 = vld [vmem:[%s5279_s4 + $0x13f8] sm:$0xff]  ;;  %v822_v2 = vld [vmem:[%s5279_s4 + $0x1400] sm:$0xff] }
  0xb8   : > { %819 = vst [vmem:[%s5284_s5 + $0xa00] sm:$0xff] %v818_v0  ;;  %v824_v3 = vld [vmem:[%s5279_s4 + $0x1408] sm:$0xff]  ;;  %821 = vst [vmem:[%s5284_s5 + $0xa08] sm:$0xff] %v820_v1  ;;  %v826_v4 = vld [vmem:[%s5279_s4 + $0x1440] sm:$0xff] }
  0xb9   : > { %823 = vst [vmem:[%s5284_s5 + $0xa10] sm:$0xff] %v822_v2  ;;  %825 = vst [vmem:[%s5284_s5 + $0xa18] sm:$0xff] %v824_v3  ;;  %v828_v5 = vld [vmem:[%s5279_s4 + $0x1448] sm:$0xff]  ;;  %v830_v6 = vld [vmem:[%s5279_s4 + $0x1450] sm:$0xff] }
  0xba   : > { %827 = vst [vmem:[%s5284_s5 + $0xa20] sm:$0xff] %v826_v4  ;;  %829 = vst [vmem:[%s5284_s5 + $0xa28] sm:$0xff] %v828_v5  ;;  %v832_v7 = vld [vmem:[%s5279_s4 + $0x1458] sm:$0xff]  ;;  %v834_v8 = vld [vmem:[%s5279_s4 + $0x1460] sm:$0xff] }
  0xbb   : > { %831 = vst [vmem:[%s5284_s5 + $0xa30] sm:$0xff] %v830_v6  ;;  %v836_v9 = vld [vmem:[%s5279_s4 + $0x1468] sm:$0xff]  ;;  %833 = vst [vmem:[%s5284_s5 + $0xa38] sm:$0xff] %v832_v7  ;;  %v838_v10 = vld [vmem:[%s5279_s4 + $0x14a0] sm:$0xff] }
  0xbc   : > { %835 = vst [vmem:[%s5284_s5 + $0xa40] sm:$0xff] %v834_v8  ;;  %837 = vst [vmem:[%s5284_s5 + $0xa48] sm:$0xff] %v836_v9  ;;  %v840_v11 = vld [vmem:[%s5279_s4 + $0x14a8] sm:$0xff]  ;;  %v842_v12 = vld [vmem:[%s5279_s4 + $0x14b0] sm:$0xff] }
  0xbd   : > { %839 = vst [vmem:[%s5284_s5 + $0xa50] sm:$0xff] %v838_v10  ;;  %841 = vst [vmem:[%s5284_s5 + $0xa58] sm:$0xff] %v840_v11  ;;  %v844_v13 = vld [vmem:[%s5279_s4 + $0x14b8] sm:$0xff]  ;;  %v846_v14 = vld [vmem:[%s5279_s4 + $0x14c0] sm:$0xff] }
  0xbe   : > { %843 = vst [vmem:[%s5284_s5 + $0xa60] sm:$0xff] %v842_v12  ;;  %v848_v15 = vld [vmem:[%s5279_s4 + $0x14c8] sm:$0xff]  ;;  %845 = vst [vmem:[%s5284_s5 + $0xa68] sm:$0xff] %v844_v13  ;;  %v850_v16 = vld [vmem:[%s5279_s4 + $0x1500] sm:$0xff] }
  0xbf   : > { %847 = vst [vmem:[%s5284_s5 + $0xa70] sm:$0xff] %v846_v14  ;;  %849 = vst [vmem:[%s5284_s5 + $0xa78] sm:$0xff] %v848_v15  ;;  %v852_v17 = vld [vmem:[%s5279_s4 + $0x1508] sm:$0xff]  ;;  %v854_v18 = vld [vmem:[%s5279_s4 + $0x1510] sm:$0xff] }
  0xc0   : > { %851 = vst [vmem:[%s5284_s5 + $0xa80] sm:$0xff] %v850_v16  ;;  %853 = vst [vmem:[%s5284_s5 + $0xa88] sm:$0xff] %v852_v17  ;;  %v856_v19 = vld [vmem:[%s5279_s4 + $0x1518] sm:$0xff]  ;;  %v858_v20 = vld [vmem:[%s5279_s4 + $0x1520] sm:$0xff] }
  0xc1   : > { %855 = vst [vmem:[%s5284_s5 + $0xa90] sm:$0xff] %v854_v18  ;;  %v860_v21 = vld [vmem:[%s5279_s4 + $0x1528] sm:$0xff]  ;;  %857 = vst [vmem:[%s5284_s5 + $0xa98] sm:$0xff] %v856_v19  ;;  %v862_v22 = vld [vmem:[%s5279_s4 + $0x1560] sm:$0xff] }
  0xc2   : > { %859 = vst [vmem:[%s5284_s5 + $0xaa0] sm:$0xff] %v858_v20  ;;  %861 = vst [vmem:[%s5284_s5 + $0xaa8] sm:$0xff] %v860_v21  ;;  %v864_v23 = vld [vmem:[%s5279_s4 + $0x1568] sm:$0xff]  ;;  %v866_v24 = vld [vmem:[%s5279_s4 + $0x1570] sm:$0xff] }
  0xc3   : > { %863 = vst [vmem:[%s5284_s5 + $0xab0] sm:$0xff] %v862_v22  ;;  %865 = vst [vmem:[%s5284_s5 + $0xab8] sm:$0xff] %v864_v23  ;;  %v868_v25 = vld [vmem:[%s5279_s4 + $0x1578] sm:$0xff]  ;;  %v870_v26 = vld [vmem:[%s5279_s4 + $0x1580] sm:$0xff] }
  0xc4   : > { %867 = vst [vmem:[%s5284_s5 + $0xac0] sm:$0xff] %v866_v24  ;;  %v872_v27 = vld [vmem:[%s5279_s4 + $0x1588] sm:$0xff]  ;;  %869 = vst [vmem:[%s5284_s5 + $0xac8] sm:$0xff] %v868_v25  ;;  %v874_v28 = vld [vmem:[%s5279_s4 + $0x15c0] sm:$0xff] }
  0xc5   : > { %871 = vst [vmem:[%s5284_s5 + $0xad0] sm:$0xff] %v870_v26  ;;  %873 = vst [vmem:[%s5284_s5 + $0xad8] sm:$0xff] %v872_v27  ;;  %v876_v29 = vld [vmem:[%s5279_s4 + $0x15c8] sm:$0xff]  ;;  %v878_v30 = vld [vmem:[%s5279_s4 + $0x15d0] sm:$0xff] }
  0xc6   : > { %875 = vst [vmem:[%s5284_s5 + $0xae0] sm:$0xff] %v874_v28  ;;  %877 = vst [vmem:[%s5284_s5 + $0xae8] sm:$0xff] %v876_v29  ;;  %v880_v31 = vld [vmem:[%s5279_s4 + $0x15d8] sm:$0xff]  ;;  %v882_v32 = vld [vmem:[%s5279_s4 + $0x15e0] sm:$0xff] }
  0xc7   : > { %879 = vst [vmem:[%s5284_s5 + $0xaf0] sm:$0xff] %v878_v30  ;;  %v884_v33 = vld [vmem:[%s5279_s4 + $0x15e8] sm:$0xff]  ;;  %881 = vst [vmem:[%s5284_s5 + $0xaf8] sm:$0xff] %v880_v31  ;;  %v886_v34 = vld [vmem:[%s5279_s4 + $0x1620] sm:$0xff] }
  0xc8   : > { %883 = vst [vmem:[%s5284_s5 + $0xb00] sm:$0xff] %v882_v32  ;;  %885 = vst [vmem:[%s5284_s5 + $0xb08] sm:$0xff] %v884_v33  ;;  %v888_v35 = vld [vmem:[%s5279_s4 + $0x1628] sm:$0xff]  ;;  %v890_v36 = vld [vmem:[%s5279_s4 + $0x1630] sm:$0xff] }
  0xc9   : > { %887 = vst [vmem:[%s5284_s5 + $0xb10] sm:$0xff] %v886_v34  ;;  %889 = vst [vmem:[%s5284_s5 + $0xb18] sm:$0xff] %v888_v35  ;;  %v892_v37 = vld [vmem:[%s5279_s4 + $0x1638] sm:$0xff]  ;;  %v894_v38 = vld [vmem:[%s5279_s4 + $0x1640] sm:$0xff] }
  0xca   : > { %891 = vst [vmem:[%s5284_s5 + $0xb20] sm:$0xff] %v890_v36  ;;  %v896_v39 = vld [vmem:[%s5279_s4 + $0x1648] sm:$0xff]  ;;  %893 = vst [vmem:[%s5284_s5 + $0xb28] sm:$0xff] %v892_v37  ;;  %v898_v40 = vld [vmem:[%s5279_s4 + $0x1680] sm:$0xff] }
  0xcb   : > { %895 = vst [vmem:[%s5284_s5 + $0xb30] sm:$0xff] %v894_v38  ;;  %897 = vst [vmem:[%s5284_s5 + $0xb38] sm:$0xff] %v896_v39  ;;  %v900_v41 = vld [vmem:[%s5279_s4 + $0x1688] sm:$0xff]  ;;  %v902_v42 = vld [vmem:[%s5279_s4 + $0x1690] sm:$0xff] }
  0xcc   : > { %899 = vst [vmem:[%s5284_s5 + $0xb40] sm:$0xff] %v898_v40  ;;  %901 = vst [vmem:[%s5284_s5 + $0xb48] sm:$0xff] %v900_v41  ;;  %v904_v43 = vld [vmem:[%s5279_s4 + $0x1698] sm:$0xff]  ;;  %v906_v44 = vld [vmem:[%s5279_s4 + $0x16a0] sm:$0xff] }
  0xcd   : > { %903 = vst [vmem:[%s5284_s5 + $0xb50] sm:$0xff] %v902_v42  ;;  %v908_v45 = vld [vmem:[%s5279_s4 + $0x16a8] sm:$0xff]  ;;  %905 = vst [vmem:[%s5284_s5 + $0xb58] sm:$0xff] %v904_v43  ;;  %v910_v46 = vld [vmem:[%s5279_s4 + $0x16e0] sm:$0xff] }
  0xce   : > { %907 = vst [vmem:[%s5284_s5 + $0xb60] sm:$0xff] %v906_v44  ;;  %909 = vst [vmem:[%s5284_s5 + $0xb68] sm:$0xff] %v908_v45  ;;  %v912_v47 = vld [vmem:[%s5279_s4 + $0x16e8] sm:$0xff]  ;;  %v914_v48 = vld [vmem:[%s5279_s4 + $0x16f0] sm:$0xff] }
  0xcf   : > { %911 = vst [vmem:[%s5284_s5 + $0xb70] sm:$0xff] %v910_v46  ;;  %913 = vst [vmem:[%s5284_s5 + $0xb78] sm:$0xff] %v912_v47  ;;  %v916_v49 = vld [vmem:[%s5279_s4 + $0x16f8] sm:$0xff]  ;;  %v918_v50 = vld [vmem:[%s5279_s4 + $0x1700] sm:$0xff] }
  0xd0   : > { %915 = vst [vmem:[%s5284_s5 + $0xb80] sm:$0xff] %v914_v48  ;;  %v920_v51 = vld [vmem:[%s5279_s4 + $0x1708] sm:$0xff]  ;;  %917 = vst [vmem:[%s5284_s5 + $0xb88] sm:$0xff] %v916_v49  ;;  %v922_v52 = vld [vmem:[%s5279_s4 + $0x1740] sm:$0xff] }
  0xd1   : > { %919 = vst [vmem:[%s5284_s5 + $0xb90] sm:$0xff] %v918_v50  ;;  %921 = vst [vmem:[%s5284_s5 + $0xb98] sm:$0xff] %v920_v51  ;;  %v924_v53 = vld [vmem:[%s5279_s4 + $0x1748] sm:$0xff]  ;;  %v926_v54 = vld [vmem:[%s5279_s4 + $0x1750] sm:$0xff] }
  0xd2   : > { %923 = vst [vmem:[%s5284_s5 + $0xba0] sm:$0xff] %v922_v52  ;;  %925 = vst [vmem:[%s5284_s5 + $0xba8] sm:$0xff] %v924_v53  ;;  %v928_v55 = vld [vmem:[%s5279_s4 + $0x1758] sm:$0xff]  ;;  %v930_v56 = vld [vmem:[%s5279_s4 + $0x1760] sm:$0xff] }
  0xd3   : > { %927 = vst [vmem:[%s5284_s5 + $0xbb0] sm:$0xff] %v926_v54  ;;  %v932_v57 = vld [vmem:[%s5279_s4 + $0x1768] sm:$0xff]  ;;  %929 = vst [vmem:[%s5284_s5 + $0xbb8] sm:$0xff] %v928_v55  ;;  %v934_v58 = vld [vmem:[%s5279_s4 + $0x17a0] sm:$0xff] }
  0xd4   : > { %931 = vst [vmem:[%s5284_s5 + $0xbc0] sm:$0xff] %v930_v56  ;;  %933 = vst [vmem:[%s5284_s5 + $0xbc8] sm:$0xff] %v932_v57  ;;  %v936_v59 = vld [vmem:[%s5279_s4 + $0x17a8] sm:$0xff]  ;;  %v938_v60 = vld [vmem:[%s5279_s4 + $0x17b0] sm:$0xff] }
  0xd5   : > { %935 = vst [vmem:[%s5284_s5 + $0xbd0] sm:$0xff] %v934_v58  ;;  %937 = vst [vmem:[%s5284_s5 + $0xbd8] sm:$0xff] %v936_v59  ;;  %v940_v61 = vld [vmem:[%s5279_s4 + $0x17b8] sm:$0xff]  ;;  %v942_v62 = vld [vmem:[%s5279_s4 + $0x17c0] sm:$0xff] }
  0xd6   : > { %939 = vst [vmem:[%s5284_s5 + $0xbe0] sm:$0xff] %v938_v60  ;;  %v944_v63 = vld [vmem:[%s5279_s4 + $0x17c8] sm:$0xff]  ;;  %941 = vst [vmem:[%s5284_s5 + $0xbe8] sm:$0xff] %v940_v61 }
  0xd7   : > { %943 = vst [vmem:[%s5284_s5 + $0xbf0] sm:$0xff] %v942_v62  ;;  %945 = vst [vmem:[%s5284_s5 + $0xbf8] sm:$0xff] %v944_v63 }
  0xd8 PF: > { %p4089_p11 = scmp.ge.s32.totalorder %s5192_s17, 1  ;;  %p958_p12 = scmp.lt.s32.totalorder %s5192_s17, 3 }
  0xda   : > { %p959_p13 = pnand %p4089_p11, %p958_p12 }
  0xdb   : > { %s6054_s6 = sand.u32 (!%p959_p13), 1, %s5176_s13   ;;  %s1001_s11 = smul.u32 (!%p959_p13), 12, %s5184_s15 }
  0xdc   : > { %962 = sbr.rel (%p959_p13) target bundleno = 829 (0x33d), region = 51  ;;  %s3967_s5 = scalar_lea.sflag (!%p959_p13), [#allocation4], %s6054_s6 }
  0xdd   : > { %s4481_s9 = smul.u32 (!%p959_p13), 3072, %s6054_s6  ;;  %p1002_p0 = scmp.lt.s32.totalorder (!%p959_p13), %s1001_s11, 23 }
  0xde   : > { %s4482_s23 = smul.u32 (!%p959_p13), 24, %s6054_s6  ;;  %s5196_s8 = smov (!%p959_p13), [#allocation3]  }
  0xdf   : > { %s6064_s10 = scalar_lea.vmem (!%p959_p13), [#allocation2], %s4481_s9  ;;  %s4479_s27 = smul.u32 (!%p959_p13), 384, %s5184_s15 }
  0xe0   : > { %s6488_s26 = scalar_lea.vmem (!%p959_p13), [#allocation3], %s4482_s23  ;;  %s5120_s15 = sshll.u32 (!%p959_p13), %s5196_s8, 4  ;;  %s5121_s15 = int_to_ptr.vmem [resolvable:$false] %s5120_s15 }
  0xe1   : > { %v6059_v0 = vld.sshfl [vmem:[%s6601_s0] sm:$0x33 pattern:$0x75316420]  ;;  %v1396_v1 = vlaneseq  ;;  %v5194_v3 = vmov 1966171168   ;;  %s3981_s4 = scalar_lea.hbm %s6604_s3, %s4479_s27 }
  0xe2   : > { %v1466_v4 = vunpack.c.l.s4 %v5194_v3  ;;  %v4540_v5 = vld [vmem:[%s6064_s10 + $0x2a4] ss:$48 sps:$4 sm:$0xff]   ;;  %v1464_v6 = vcombine.high %v6059_v0, %v6059_v0  ;;  %v4544_v9 = vld [vmem:[%s6064_s10 + $0x2a0] ss:$48 sps:$4 sm:$0xff]   ;;  %s6617_s11 = smov (!%p1002_p0, %s1001_s11), 23  ;;  %s3983_s28 = sshll.u32 %s6488_s26, 4  ;;  %s3984_s28 = int_to_ptr.vmem [resolvable:$true] %s3983_s28 }
  0xe3   : > { %v6062_v2 = vshrl.u32 %v1396_v1, 7  ;;  %v4542_v8 = vld [vmem:[%s6064_s10 + $0x8a4] ss:$48 sps:$4 sm:$0xff]   ;;  %3405 = vmatprep.subr.bf16.mxu0 %v4540_v5  ;;  %v4545_v10 = vld [vmem:[%s6064_s10 + $0x8a0] ss:$48 sps:$4 sm:$0xff]   ;;  %s6358_s21 = scalar_lea.vmem %s6603_s2, %s6617_s11  ;;  %s5116_s7 = scalar_lea.vmem %s3984_s28, 384 }
  0xe4   : > { %v1467_v7 = vunpack.c.0.s8 %v1466_v4  ;;  %3446 = vmatprep.subr.bf16.mxu1 %v4542_v8  ;;  %v4546_v12 = vld [vmem:[%s6064_s10 + $0x244] ss:$48 sps:$4 sm:$0xff]   ;;  %3406 = vmatpush1.bf16.msra.mxu0 %v4544_v9  ;;  %v4550_v14 = vld [vmem:[%s6064_s10 + $0x240] ss:$48 sps:$4 sm:$0xff]   ;;  %p5117_p1 = scmp.ne.s32.totalorder %s3984_s28, %s5116_s7  ;;  %s5122_s9 = scalar_lea.vmem %s5121_s15, 768 }
  0xe5   : > { %3447 = vmatpush1.bf16.msra.mxu1 %v4545_v10  ;;  %v4548_v13 = vld [vmem:[%s6064_s10 + $0x844] ss:$48 sps:$4 sm:$0xff]   ;;  %3407 = vmatprep.subr.bf16.mxu0 %v4546_v12  ;;  %v4551_v16 = vld [vmem:[%s6064_s10 + $0x840] ss:$48 sps:$4 sm:$0xff]   ;;  %p5123_p4 = scmp.lt.s32.totalorder %s3984_s28, %s5121_s15  ;;  %p5124_p6 = scmp.lt.s32.totalorder %s5122_s9, %s5116_s7 }
  0xe6   : > { %v6073_v11 = vsub.s32 %v1467_v7, %v6062_v2  ;;  %3448 = vmatprep.subr.bf16.mxu1 %v4548_v13  ;;  %v4552_v17 = vld [vmem:[%s6064_s10 + $0x1e4] ss:$48 sps:$4 sm:$0xff]   ;;  %v4556_v20 = vld [vmem:[%s6064_s10 + $0x1e0] ss:$48 sps:$4 sm:$0xff]   ;;  %p5118_p2 = pnand %p5117_p1, %p5256_p5 }
  0xe7   : > { %v4554_v19 = vld [vmem:[%s6064_s10 + $0x7e4] ss:$48 sps:$4 sm:$0xff]   ;;  %v4557_v21 = vld [vmem:[%s6064_s10 + $0x7e0] ss:$48 sps:$4 sm:$0xff]   ;;  %p5125_p7 = por %p5124_p6, %p5123_p4 }
  0xe8   : > { %v6079_v15 = vrot.slane %v1464_v6, %v6073_v11  ;;  %3408 = vmatpush1.bf16.msra.mxu0 %v4550_v14  ;;  %v4558_v22 = vld [vmem:[%s6064_s10 + $0x184] ss:$48 sps:$4 sm:$0xff]   ;;  %v4562_v24 = vld [vmem:[%s6064_s10 + $0x180] ss:$48 sps:$4 sm:$0xff]   ;;  %v6146_v13 = vrot.slane %v6059_v0, %v6073_v11  ;;  %v4638_v14 = vld [vmem:[%s6064_s10 + $0x2ac] ss:$48 sps:$4 sm:$0xff]   ;;  %p5119_p3 = pneg %p5118_p2 }
  0xe9   : > { %3449 = vmatpush1.bf16.msra.mxu1 %v4551_v16  ;;  %3409 = vmatprep.subr.bf16.mxu0 %v4552_v17  ;;  %v4560_v23 = vld [vmem:[%s6064_s10 + $0x784] ss:$48 sps:$4 sm:$0xff]   ;;  %v4563_v25 = vld [vmem:[%s6064_s10 + $0x780] ss:$48 sps:$4 sm:$0xff]   ;;  %v4641_v16 = vld [vmem:[%s6064_s10 + $0x8ac] ss:$48 sps:$4 sm:$0xff]  }
  0xea   : > { %3437 = vmatprep.mubr.bf16.mxu0 %v6079_v15  ;;  %v6086_v18 = vcombine.high %v6079_v15, %v6079_v15  ;;  %3450 = vmatprep.subr.bf16.mxu1 %v4554_v19  ;;  %v4564_v26 = vld [vmem:[%s6064_s10 + $0x124] ss:$48 sps:$4 sm:$0xff]   ;;  %v4568_v28 = vld [vmem:[%s6064_s10 + $0x120] ss:$48 sps:$4 sm:$0xff]   ;;  %v6152_v17 = vcombine.high %v6146_v13, %v6146_v13  ;;  %v4636_v19 = vld [vmem:[%s6064_s10 + $0x2a8] ss:$48 sps:$4 sm:$0xff]   ;;  %p5126_p8 = pnand %p5125_p7, %p5119_p3 }
  0xeb   : > { %v4566_v27 = vld [vmem:[%s6064_s10 + $0x724] ss:$48 sps:$4 sm:$0xff]   ;;  %v4569_v29 = vld [vmem:[%s6064_s10 + $0x720] ss:$48 sps:$4 sm:$0xff]   ;;  %v4644_v0 = vld [vmem:[%s6064_s10 + $0x24c] ss:$48 sps:$4 sm:$0xff]  }
  0xec   : > { %3478 = vmatprep.mubr.bf16.mxu1 %v6086_v18  ;;  %3410 = vmatpush1.bf16.msra.mxu0 %v4556_v20  ;;  %v4570_v30 = vld [vmem:[%s6064_s10 + $0xc4] ss:$48 sps:$4 sm:$0xff]   ;;  %v4574_v32 = vld [vmem:[%s6064_s10 + $0xc0] ss:$48 sps:$4 sm:$0xff]   ;;  %v4639_v20 = vld [vmem:[%s6064_s10 + $0x8a8] ss:$48 sps:$4 sm:$0xff]  }
  0xed   : > { %3451 = vmatpush1.bf16.msra.mxu1 %v4557_v21  ;;  %3411 = vmatprep.subr.bf16.mxu0 %v4558_v22  ;;  %v4572_v31 = vld [vmem:[%s6064_s10 + $0x6c4] ss:$48 sps:$4 sm:$0xff]   ;;  %v4575_v33 = vld [vmem:[%s6064_s10 + $0x6c0] ss:$48 sps:$4 sm:$0xff]   ;;  %v4647_v11 = vld [vmem:[%s6064_s10 + $0x84c] ss:$48 sps:$4 sm:$0xff]  }
  0xee   : > { %3452 = vmatprep.subr.bf16.mxu1 %v4560_v23  ;;  %v4576_v34 = vld [vmem:[%s6064_s10 + $0x64] ss:$48 sps:$4 sm:$0xff]   ;;  %v4580_v36 = vld [vmem:[%s6064_s10 + $0x60] ss:$48 sps:$4 sm:$0xff]   ;;  %v4642_v21 = vld [vmem:[%s6064_s10 + $0x248] ss:$48 sps:$4 sm:$0xff]  }
  0xef   : > { %v4578_v35 = vld [vmem:[%s6064_s10 + $0x664] ss:$48 sps:$4 sm:$0xff]   ;;  %v4581_v37 = vld [vmem:[%s6064_s10 + $0x660] ss:$48 sps:$4 sm:$0xff]   ;;  %v4645_v22 = vld [vmem:[%s6064_s10 + $0x848] ss:$48 sps:$4 sm:$0xff]  }
  0xf0   : > { %3412 = vmatpush1.bf16.msra.mxu0 %v4562_v24  ;;  %v4582_v38 = vld [vmem:[%s6064_s10 + $0x4] ss:$48 sps:$4 sm:$0xff]   ;;  %v4586_v40 = vld [vmem:[%s6064_s10] ss:$48 sps:$4 sm:$0xff]   ;;  %v4650_v23 = vld [vmem:[%s6064_s10 + $0x1ec] ss:$48 sps:$4 sm:$0xff]  }
  0xf1   : > { %3453 = vmatpush1.bf16.msra.mxu1 %v4563_v25  ;;  %3413 = vmatprep.subr.bf16.mxu0 %v4564_v26  ;;  %v4584_v39 = vld [vmem:[%s6064_s10 + $0x604] ss:$48 sps:$4 sm:$0xff]   ;;  %v4587_v41 = vld [vmem:[%s6064_s10 + $0x600] ss:$48 sps:$4 sm:$0xff]   ;;  %v4653_v24 = vld [vmem:[%s6064_s10 + $0x7ec] ss:$48 sps:$4 sm:$0xff]  }
  0xf2   : > { %3454 = vmatprep.subr.bf16.mxu1 %v4566_v27  ;;  %v4588_v42 = vld [vmem:[%s6064_s10 + $0x5a4] ss:$48 sps:$4 sm:$0xff]   ;;  %v4592_v44 = vld [vmem:[%s6064_s10 + $0x5a0] ss:$48 sps:$4 sm:$0xff]   ;;  %v4648_v25 = vld [vmem:[%s6064_s10 + $0x1e8] ss:$48 sps:$4 sm:$0xff]  }
  0xf3   : > { %v4590_v43 = vld [vmem:[%s6064_s10 + $0xba4] ss:$48 sps:$4 sm:$0xff]   ;;  %v4593_v45 = vld [vmem:[%s6064_s10 + $0xba0] ss:$48 sps:$4 sm:$0xff]   ;;  %v4651_v26 = vld [vmem:[%s6064_s10 + $0x7e8] ss:$48 sps:$4 sm:$0xff]  }
  0xf4   : > { %3414 = vmatpush1.bf16.msra.mxu0 %v4568_v28  ;;  %v4594_v46 = vld [vmem:[%s6064_s10 + $0x544] ss:$48 sps:$4 sm:$0xff]   ;;  %v4598_v48 = vld [vmem:[%s6064_s10 + $0x540] ss:$48 sps:$4 sm:$0xff]   ;;  %v4656_v27 = vld [vmem:[%s6064_s10 + $0x18c] ss:$48 sps:$4 sm:$0xff]  }
  0xf5   : > { %3455 = vmatpush1.bf16.msra.mxu1 %v4569_v29  ;;  %3415 = vmatprep.subr.bf16.mxu0 %v4570_v30  ;;  %v4596_v47 = vld [vmem:[%s6064_s10 + $0xb44] ss:$48 sps:$4 sm:$0xff]   ;;  %v4599_v49 = vld [vmem:[%s6064_s10 + $0xb40] ss:$48 sps:$4 sm:$0xff]   ;;  %v4659_v28 = vld [vmem:[%s6064_s10 + $0x78c] ss:$48 sps:$4 sm:$0xff]  }
  0xf6   : > { %3456 = vmatprep.subr.bf16.mxu1 %v4572_v31  ;;  %v4600_v50 = vld [vmem:[%s6064_s10 + $0x4e4] ss:$48 sps:$4 sm:$0xff]   ;;  %v4604_v52 = vld [vmem:[%s6064_s10 + $0x4e0] ss:$48 sps:$4 sm:$0xff]   ;;  %v4654_v29 = vld [vmem:[%s6064_s10 + $0x188] ss:$48 sps:$4 sm:$0xff]  }
  0xf7   : > { %v4602_v51 = vld [vmem:[%s6064_s10 + $0xae4] ss:$48 sps:$4 sm:$0xff]   ;;  %v4605_v53 = vld [vmem:[%s6064_s10 + $0xae0] ss:$48 sps:$4 sm:$0xff]   ;;  %v4657_v30 = vld [vmem:[%s6064_s10 + $0x788] ss:$48 sps:$4 sm:$0xff]  }
  0xf8   : > { %3416 = vmatpush1.bf16.msra.mxu0 %v4574_v32  ;;  %v4606_v54 = vld [vmem:[%s6064_s10 + $0x484] ss:$48 sps:$4 sm:$0xff]   ;;  %v4610_v56 = vld [vmem:[%s6064_s10 + $0x480] ss:$48 sps:$4 sm:$0xff]   ;;  %v4662_v31 = vld [vmem:[%s6064_s10 + $0x12c] ss:$48 sps:$4 sm:$0xff]  }
  0xf9   : > { %3457 = vmatpush1.bf16.msra.mxu1 %v4575_v33  ;;  %3417 = vmatprep.subr.bf16.mxu0 %v4576_v34  ;;  %v4608_v55 = vld [vmem:[%s6064_s10 + $0xa84] ss:$48 sps:$4 sm:$0xff]   ;;  %v4611_v57 = vld [vmem:[%s6064_s10 + $0xa80] ss:$48 sps:$4 sm:$0xff]   ;;  %v4665_v32 = vld [vmem:[%s6064_s10 + $0x72c] ss:$48 sps:$4 sm:$0xff]  }
  0xfa   : > { %3458 = vmatprep.subr.bf16.mxu1 %v4578_v35  ;;  %v4612_v58 = vld [vmem:[%s6064_s10 + $0x424] ss:$48 sps:$4 sm:$0xff]   ;;  %v4616_v60 = vld [vmem:[%s6064_s10 + $0x420] ss:$48 sps:$4 sm:$0xff]   ;;  %v4660_v33 = vld [vmem:[%s6064_s10 + $0x128] ss:$48 sps:$4 sm:$0xff]  }
  0xfb   : > { %v4614_v59 = vld [vmem:[%s6064_s10 + $0xa24] ss:$48 sps:$4 sm:$0xff]   ;;  %v4617_v61 = vld [vmem:[%s6064_s10 + $0xa20] ss:$48 sps:$4 sm:$0xff]   ;;  %v4663_v34 = vld [vmem:[%s6064_s10 + $0x728] ss:$48 sps:$4 sm:$0xff]  }
  0xfc   : > { %3418 = vmatpush1.bf16.msra.mxu0 %v4580_v36  ;;  %v4618_v62 = vld [vmem:[%s6064_s10 + $0x3c4] ss:$48 sps:$4 sm:$0xff]   ;;  %v4622_v1 = vld [vmem:[%s6064_s10 + $0x3c0] ss:$48 sps:$4 sm:$0xff]   ;;  %v4668_v35 = vld [vmem:[%s6064_s10 + $0xcc] ss:$48 sps:$4 sm:$0xff]  }
  0xfd   : > { %3459 = vmatpush1.bf16.msra.mxu1 %v4581_v37  ;;  %3419 = vmatprep.subr.bf16.mxu0 %v4582_v38  ;;  %v4620_v63 = vld [vmem:[%s6064_s10 + $0x9c4] ss:$48 sps:$4 sm:$0xff]   ;;  %v4623_v3 = vld [vmem:[%s6064_s10 + $0x9c0] ss:$48 sps:$4 sm:$0xff]   ;;  %v4671_v36 = vld [vmem:[%s6064_s10 + $0x6cc] ss:$48 sps:$4 sm:$0xff]  }
  0xfe   : > { %3460 = vmatprep.subr.bf16.mxu1 %v4584_v39  ;;  %v4624_v4 = vld [vmem:[%s6064_s10 + $0x364] ss:$48 sps:$4 sm:$0xff]   ;;  %v4628_v6 = vld [vmem:[%s6064_s10 + $0x360] ss:$48 sps:$4 sm:$0xff]   ;;  %v4666_v37 = vld [vmem:[%s6064_s10 + $0xc8] ss:$48 sps:$4 sm:$0xff]  }
  0xff   : > { %v4626_v5 = vld [vmem:[%s6064_s10 + $0x964] ss:$48 sps:$4 sm:$0xff]   ;;  %v4629_v7 = vld [vmem:[%s6064_s10 + $0x960] ss:$48 sps:$4 sm:$0xff]   ;;  %v4669_v38 = vld [vmem:[%s6064_s10 + $0x6c8] ss:$48 sps:$4 sm:$0xff]  }
 0x100   : > { %3420 = vmatpush1.bf16.msra.mxu0 %v4586_v40  ;;  %v4630_v8 = vld [vmem:[%s6064_s10 + $0x304] ss:$48 sps:$4 sm:$0xff]   ;;  %v4634_v10 = vld [vmem:[%s6064_s10 + $0x300] ss:$48 sps:$4 sm:$0xff]   ;;  %v4674_v39 = vld [vmem:[%s6064_s10 + $0x6c] ss:$48 sps:$4 sm:$0xff]  }
 0x101   : > { %3461 = vmatpush1.bf16.msra.mxu1 %v4587_v41  ;;  %3421 = vmatprep.subr.bf16.mxu0 %v4588_v42  ;;  %v4632_v9 = vld [vmem:[%s6064_s10 + $0x904] ss:$48 sps:$4 sm:$0xff]   ;;  %v4635_v12 = vld [vmem:[%s6064_s10 + $0x900] ss:$48 sps:$4 sm:$0xff]   ;;  %v4677_v40 = vld [vmem:[%s6064_s10 + $0x66c] ss:$48 sps:$4 sm:$0xff]  }
 0x102   : > { %3462 = vmatprep.subr.bf16.mxu1 %v4590_v43  ;;  %v4672_v41 = vld [vmem:[%s6064_s10 + $0x68] ss:$48 sps:$4 sm:$0xff]   ;;  %v4680_v43 = vld [vmem:[%s6064_s10 + $0xc] ss:$48 sps:$4 sm:$0xff]  }
 0x103   : > { %v4675_v42 = vld [vmem:[%s6064_s10 + $0x668] ss:$48 sps:$4 sm:$0xff]  }
 0x104   : > { %3422 = vmatpush2.bf16.msra.mxu0 %v4592_v44  ;;  %v4683_v44 = vld [vmem:[%s6064_s10 + $0x60c] ss:$48 sps:$4 sm:$0xff]  }
 0x105   : > { %3463 = vmatpush2.bf16.msra.mxu1 %v4593_v45  ;;  %3423 = vmatprep.subr.bf16.mxu0 %v4594_v46  ;;  %v4678_v45 = vld [vmem:[%s6064_s10 + $0x8] ss:$48 sps:$4 sm:$0xff]  }
 0x106   : > { %3464 = vmatprep.subr.bf16.mxu1 %v4596_v47  ;;  %v4681_v46 = vld [vmem:[%s6064_s10 + $0x608] ss:$48 sps:$4 sm:$0xff]   ;;  %v4686_v47 = vld [vmem:[%s6064_s10 + $0x5ac] ss:$48 sps:$4 sm:$0xff]  }
 0x108   : > { %3424 = vmatpush2.bf16.msra.mxu0 %v4598_v48  ;;  %v4689_v48 = vld [vmem:[%s6064_s10 + $0xbac] ss:$48 sps:$4 sm:$0xff]  }
 0x109   : > { %3465 = vmatpush2.bf16.msra.mxu1 %v4599_v49  ;;  %3425 = vmatprep.subr.bf16.mxu0 %v4600_v50  ;;  %v4684_v49 = vld [vmem:[%s6064_s10 + $0x5a8] ss:$48 sps:$4 sm:$0xff]  }
 0x10a   : > { %3466 = vmatprep.subr.bf16.mxu1 %v4602_v51  ;;  %v4687_v50 = vld [vmem:[%s6064_s10 + $0xba8] ss:$48 sps:$4 sm:$0xff]   ;;  %v4692_v51 = vld [vmem:[%s6064_s10 + $0x54c] ss:$48 sps:$4 sm:$0xff]  }
 0x10c   : > { %3426 = vmatpush2.bf16.msra.mxu0 %v4604_v52  ;;  %v4695_v52 = vld [vmem:[%s6064_s10 + $0xb4c] ss:$48 sps:$4 sm:$0xff]  }
 0x10d   : > { %3467 = vmatpush2.bf16.msra.mxu1 %v4605_v53  ;;  %3427 = vmatprep.subr.bf16.mxu0 %v4606_v54  ;;  %v4690_v53 = vld [vmem:[%s6064_s10 + $0x548] ss:$48 sps:$4 sm:$0xff]  }
 0x10e   : > { %3468 = vmatprep.subr.bf16.mxu1 %v4608_v55  ;;  %v4693_v54 = vld [vmem:[%s6064_s10 + $0xb48] ss:$48 sps:$4 sm:$0xff]   ;;  %v4698_v55 = vld [vmem:[%s6064_s10 + $0x4ec] ss:$48 sps:$4 sm:$0xff]  }
 0x110   : > { %3428 = vmatpush2.bf16.msra.mxu0 %v4610_v56  ;;  %v4701_v56 = vld [vmem:[%s6064_s10 + $0xaec] ss:$48 sps:$4 sm:$0xff]  }
 0x111   : > { %3469 = vmatpush2.bf16.msra.mxu1 %v4611_v57  ;;  %3429 = vmatprep.subr.bf16.mxu0 %v4612_v58  ;;  %v4696_v57 = vld [vmem:[%s6064_s10 + $0x4e8] ss:$48 sps:$4 sm:$0xff]  }
 0x112   : > { %3470 = vmatprep.subr.bf16.mxu1 %v4614_v59  ;;  %v4699_v58 = vld [vmem:[%s6064_s10 + $0xae8] ss:$48 sps:$4 sm:$0xff]   ;;  %v4704_v59 = vld [vmem:[%s6064_s10 + $0x48c] ss:$48 sps:$4 sm:$0xff]  }
 0x114   : > { %3430 = vmatpush2.bf16.msra.mxu0 %v4616_v60  ;;  %v4707_v60 = vld [vmem:[%s6064_s10 + $0xa8c] ss:$48 sps:$4 sm:$0xff]  }
 0x115   : > { %3471 = vmatpush2.bf16.msra.mxu1 %v4617_v61  ;;  %3431 = vmatprep.subr.bf16.mxu0 %v4618_v62  ;;  %v4702_v61 = vld [vmem:[%s6064_s10 + $0x488] ss:$48 sps:$4 sm:$0xff]  }
 0x116   : > { %3472 = vmatprep.subr.bf16.mxu1 %v4620_v63  ;;  %v4705_v62 = vld [vmem:[%s6064_s10 + $0xa88] ss:$48 sps:$4 sm:$0xff]   ;;  %v4710_v63 = vld [vmem:[%s6064_s10 + $0x42c] ss:$48 sps:$4 sm:$0xff]  }
 0x118   : > { %3432 = vmatpush2.bf16.msra.mxu0 %v4622_v1  ;;  %v4713_v1 = vld [vmem:[%s6064_s10 + $0xa2c] ss:$48 sps:$4 sm:$0xff]  }
 0x119   : > { %3473 = vmatpush2.bf16.msra.mxu1 %v4623_v3  ;;  %3433 = vmatprep.subr.bf16.mxu0 %v4624_v4  ;;  %v4708_v3 = vld [vmem:[%s6064_s10 + $0x428] ss:$48 sps:$4 sm:$0xff]  }
 0x11a   : > { %3474 = vmatprep.subr.bf16.mxu1 %v4626_v5  ;;  %v4711_v4 = vld [vmem:[%s6064_s10 + $0xa28] ss:$48 sps:$4 sm:$0xff]   ;;  %v4716_v5 = vld [vmem:[%s6064_s10 + $0x3cc] ss:$48 sps:$4 sm:$0xff]  }
 0x11c   : > { %3434 = vmatpush2.bf16.msra.mxu0 %v4628_v6  ;;  %v4719_v6 = vld [vmem:[%s6064_s10 + $0x9cc] ss:$48 sps:$4 sm:$0xff]  }
 0x11d   : > { %3475 = vmatpush2.bf16.msra.mxu1 %v4629_v7  ;;  %3435 = vmatprep.subr.bf16.mxu0 %v4630_v8  ;;  %v4714_v7 = vld [vmem:[%s6064_s10 + $0x3c8] ss:$48 sps:$4 sm:$0xff]  }
 0x11e   : > { %3476 = vmatprep.subr.bf16.mxu1 %v4632_v9  ;;  %v4717_v8 = vld [vmem:[%s6064_s10 + $0x9c8] ss:$48 sps:$4 sm:$0xff]   ;;  %v4722_v9 = vld [vmem:[%s6064_s10 + $0x36c] ss:$48 sps:$4 sm:$0xff]  }
 0x120   : > { %3436 = vmatpush2.bf16.msra.mxu0 %v4634_v10  ;;  %v4725_v10 = vld [vmem:[%s6064_s10 + $0x96c] ss:$48 sps:$4 sm:$0xff]  }
 0x121   : > { %3477 = vmatpush2.bf16.msra.mxu1 %v4635_v12  ;;  %3487 = vmatprep.subr.bf16.mxu0 %v4638_v14  ;;  %v4720_v12 = vld [vmem:[%s6064_s10 + $0x368] ss:$48 sps:$4 sm:$0xff]  }
 0x122   : > { %3528 = vmatprep.subr.bf16.mxu1 %v4641_v16  ;;  %v4723_v14 = vld [vmem:[%s6064_s10 + $0x968] ss:$48 sps:$4 sm:$0xff]   ;;  %v4728_v16 = vld [vmem:[%s6064_s10 + $0x30c] ss:$48 sps:$4 sm:$0xff]  }
 0x123   : > { %3438 = vmatmul.mubr.bf16.vlgmr.msra.gmra.mxu0 %v6146_v13 }
 0x124   : > { %3479 = vmatmul.mubr.bf16.vlgmr.msra.gmra.mxu1 %v6152_v17  ;;  %3488 = vmatpush1.bf16.msra.mxu0 %v4636_v19  ;;  %v4731_v19 = vld [vmem:[%s6064_s10 + $0x90c] ss:$48 sps:$4 sm:$0xff]  }
 0x125   : > { %3529 = vmatpush1.bf16.msra.mxu1 %v4639_v20  ;;  %3489 = vmatprep.subr.bf16.mxu0 %v4644_v0  ;;  %v4726_v20 = vld [vmem:[%s6064_s10 + $0x308] ss:$48 sps:$4 sm:$0xff]  }
 0x126   : > { %3530 = vmatprep.subr.bf16.mxu1 %v4647_v11  ;;  %3519 = vmatprep.mubr.bf16.mxu0 %v6079_v15  ;;  %v4729_v0 = vld [vmem:[%s6064_s10 + $0x908] ss:$48 sps:$4 sm:$0xff]   ;;  %v4734_v11 = vld [vmem:[%s6064_s10 + $0x2b4] ss:$48 sps:$4 sm:$0xff]  }
 0x127   : > { %3560 = vmatprep.mubr.bf16.mxu1 %v6086_v18 }
 0x128   : > { %3490 = vmatpush1.bf16.msra.mxu0 %v4642_v21  ;;  %v4737_v21 = vld [vmem:[%s6064_s10 + $0x8b4] ss:$48 sps:$4 sm:$0xff]  }
 0x129   : > { %3531 = vmatpush1.bf16.msra.mxu1 %v4645_v22  ;;  %3491 = vmatprep.subr.bf16.mxu0 %v4650_v23  ;;  %v4732_v22 = vld [vmem:[%s6064_s10 + $0x2b0] ss:$48 sps:$4 sm:$0xff]  }
 0x12a   : > { %3532 = vmatprep.subr.bf16.mxu1 %v4653_v24  ;;  %v4735_v23 = vld [vmem:[%s6064_s10 + $0x8b0] ss:$48 sps:$4 sm:$0xff]   ;;  %v4740_v24 = vld [vmem:[%s6064_s10 + $0x254] ss:$48 sps:$4 sm:$0xff]  }
 0x12c   : > { %3492 = vmatpush1.bf16.msra.mxu0 %v4648_v25  ;;  %v4743_v25 = vld [vmem:[%s6064_s10 + $0x854] ss:$48 sps:$4 sm:$0xff]  }
 0x12d   : > { %3533 = vmatpush1.bf16.msra.mxu1 %v4651_v26  ;;  %3493 = vmatprep.subr.bf16.mxu0 %v4656_v27  ;;  %v4738_v26 = vld [vmem:[%s6064_s10 + $0x250] ss:$48 sps:$4 sm:$0xff]  }
 0x12e   : > { %3534 = vmatprep.subr.bf16.mxu1 %v4659_v28  ;;  %v4741_v27 = vld [vmem:[%s6064_s10 + $0x850] ss:$48 sps:$4 sm:$0xff]   ;;  %v4746_v28 = vld [vmem:[%s6064_s10 + $0x1f4] ss:$48 sps:$4 sm:$0xff]  }
 0x130   : > { %3494 = vmatpush1.bf16.msra.mxu0 %v4654_v29  ;;  %v4749_v29 = vld [vmem:[%s6064_s10 + $0x7f4] ss:$48 sps:$4 sm:$0xff]  }
 0x131   : > { %3535 = vmatpush1.bf16.msra.mxu1 %v4657_v30  ;;  %3495 = vmatprep.subr.bf16.mxu0 %v4662_v31  ;;  %v4744_v30 = vld [vmem:[%s6064_s10 + $0x1f0] ss:$48 sps:$4 sm:$0xff]  }
 0x132   : > { %3536 = vmatprep.subr.bf16.mxu1 %v4665_v32  ;;  %v4747_v31 = vld [vmem:[%s6064_s10 + $0x7f0] ss:$48 sps:$4 sm:$0xff]   ;;  %v4752_v32 = vld [vmem:[%s6064_s10 + $0x194] ss:$48 sps:$4 sm:$0xff]  }
 0x134   : > { %3496 = vmatpush1.bf16.msra.mxu0 %v4660_v33  ;;  %v4755_v33 = vld [vmem:[%s6064_s10 + $0x794] ss:$48 sps:$4 sm:$0xff]  }
 0x135   : > { %3537 = vmatpush1.bf16.msra.mxu1 %v4663_v34  ;;  %3497 = vmatprep.subr.bf16.mxu0 %v4668_v35  ;;  %v4750_v34 = vld [vmem:[%s6064_s10 + $0x190] ss:$48 sps:$4 sm:$0xff]  }
 0x136   : > { %3538 = vmatprep.subr.bf16.mxu1 %v4671_v36  ;;  %v4753_v35 = vld [vmem:[%s6064_s10 + $0x790] ss:$48 sps:$4 sm:$0xff]   ;;  %v4758_v36 = vld [vmem:[%s6064_s10 + $0x134] ss:$48 sps:$4 sm:$0xff]  }
 0x138   : > { %3498 = vmatpush1.bf16.msra.mxu0 %v4666_v37  ;;  %v4761_v37 = vld [vmem:[%s6064_s10 + $0x734] ss:$48 sps:$4 sm:$0xff]  }
 0x139   : > { %3539 = vmatpush1.bf16.msra.mxu1 %v4669_v38  ;;  %3499 = vmatprep.subr.bf16.mxu0 %v4674_v39  ;;  %v4756_v38 = vld [vmem:[%s6064_s10 + $0x130] ss:$48 sps:$4 sm:$0xff]  }
 0x13a   : > { %3540 = vmatprep.subr.bf16.mxu1 %v4677_v40  ;;  %v4759_v39 = vld [vmem:[%s6064_s10 + $0x730] ss:$48 sps:$4 sm:$0xff]   ;;  %v4764_v40 = vld [vmem:[%s6064_s10 + $0xd4] ss:$48 sps:$4 sm:$0xff]  }
 0x13c   : > { %3500 = vmatpush1.bf16.msra.mxu0 %v4672_v41  ;;  %v4767_v41 = vld [vmem:[%s6064_s10 + $0x6d4] ss:$48 sps:$4 sm:$0xff]  }
 0x13d   : > { %3541 = vmatpush1.bf16.msra.mxu1 %v4675_v42  ;;  %3501 = vmatprep.subr.bf16.mxu0 %v4680_v43  ;;  %v4762_v42 = vld [vmem:[%s6064_s10 + $0xd0] ss:$48 sps:$4 sm:$0xff]  }
 0x13e   : > { %3542 = vmatprep.subr.bf16.mxu1 %v4683_v44  ;;  %v4765_v43 = vld [vmem:[%s6064_s10 + $0x6d0] ss:$48 sps:$4 sm:$0xff]   ;;  %v4770_v44 = vld [vmem:[%s6064_s10 + $0x74] ss:$48 sps:$4 sm:$0xff]  }
 0x140   : > { %3502 = vmatpush1.bf16.msra.mxu0 %v4678_v45  ;;  %v4773_v45 = vld [vmem:[%s6064_s10 + $0x674] ss:$48 sps:$4 sm:$0xff]  }
 0x141   : > { %3543 = vmatpush1.bf16.msra.mxu1 %v4681_v46  ;;  %3503 = vmatprep.subr.bf16.mxu0 %v4686_v47  ;;  %v4768_v46 = vld [vmem:[%s6064_s10 + $0x70] ss:$48 sps:$4 sm:$0xff]  }
 0x142   : > { %3544 = vmatprep.subr.bf16.mxu1 %v4689_v48  ;;  %v4771_v47 = vld [vmem:[%s6064_s10 + $0x670] ss:$48 sps:$4 sm:$0xff]   ;;  %v4776_v48 = vld [vmem:[%s6064_s10 + $0x14] ss:$48 sps:$4 sm:$0xff]  }
 0x144   : > { %3504 = vmatpush2.bf16.msra.mxu0 %v4684_v49  ;;  %v4779_v49 = vld [vmem:[%s6064_s10 + $0x614] ss:$48 sps:$4 sm:$0xff]  }
 0x145   : > { %3545 = vmatpush2.bf16.msra.mxu1 %v4687_v50  ;;  %3505 = vmatprep.subr.bf16.mxu0 %v4692_v51  ;;  %v4774_v50 = vld [vmem:[%s6064_s10 + $0x10] ss:$48 sps:$4 sm:$0xff]  }
 0x146   : > { %3546 = vmatprep.subr.bf16.mxu1 %v4695_v52  ;;  %v4777_v51 = vld [vmem:[%s6064_s10 + $0x610] ss:$48 sps:$4 sm:$0xff]   ;;  %v4782_v52 = vld [vmem:[%s6064_s10 + $0x5b4] ss:$48 sps:$4 sm:$0xff]  }
 0x148   : > { %3506 = vmatpush2.bf16.msra.mxu0 %v4690_v53  ;;  %v4785_v53 = vld [vmem:[%s6064_s10 + $0xbb4] ss:$48 sps:$4 sm:$0xff]  }
 0x149   : > { %3547 = vmatpush2.bf16.msra.mxu1 %v4693_v54  ;;  %3507 = vmatprep.subr.bf16.mxu0 %v4698_v55  ;;  %v4780_v54 = vld [vmem:[%s6064_s10 + $0x5b0] ss:$48 sps:$4 sm:$0xff]  }
 0x14a   : > { %3548 = vmatprep.subr.bf16.mxu1 %v4701_v56  ;;  %v4783_v55 = vld [vmem:[%s6064_s10 + $0xbb0] ss:$48 sps:$4 sm:$0xff]   ;;  %v4788_v56 = vld [vmem:[%s6064_s10 + $0x554] ss:$48 sps:$4 sm:$0xff]  }
 0x14c   : > { %3508 = vmatpush2.bf16.msra.mxu0 %v4696_v57  ;;  %v4791_v57 = vld [vmem:[%s6064_s10 + $0xb54] ss:$48 sps:$4 sm:$0xff]  }
 0x14d   : > { %3549 = vmatpush2.bf16.msra.mxu1 %v4699_v58  ;;  %3509 = vmatprep.subr.bf16.mxu0 %v4704_v59  ;;  %v4786_v58 = vld [vmem:[%s6064_s10 + $0x550] ss:$48 sps:$4 sm:$0xff]  }
 0x14e   : > { %3550 = vmatprep.subr.bf16.mxu1 %v4707_v60  ;;  %v4789_v59 = vld [vmem:[%s6064_s10 + $0xb50] ss:$48 sps:$4 sm:$0xff]   ;;  %v4794_v60 = vld [vmem:[%s6064_s10 + $0x4f4] ss:$48 sps:$4 sm:$0xff]  }
 0x150   : > { %3510 = vmatpush2.bf16.msra.mxu0 %v4702_v61  ;;  %v4797_v61 = vld [vmem:[%s6064_s10 + $0xaf4] ss:$48 sps:$4 sm:$0xff]  }
 0x151   : > { %3551 = vmatpush2.bf16.msra.mxu1 %v4705_v62  ;;  %3511 = vmatprep.subr.bf16.mxu0 %v4710_v63  ;;  %v4792_v62 = vld [vmem:[%s6064_s10 + $0x4f0] ss:$48 sps:$4 sm:$0xff]  }
 0x152   : > { %3552 = vmatprep.subr.bf16.mxu1 %v4713_v1  ;;  %v4795_v63 = vld [vmem:[%s6064_s10 + $0xaf0] ss:$48 sps:$4 sm:$0xff]   ;;  %v4800_v1 = vld [vmem:[%s6064_s10 + $0x494] ss:$48 sps:$4 sm:$0xff]  }
 0x154   : > { %3512 = vmatpush2.bf16.msra.mxu0 %v4708_v3  ;;  %v4803_v3 = vld [vmem:[%s6064_s10 + $0xa94] ss:$48 sps:$4 sm:$0xff]  }
 0x155   : > { %3553 = vmatpush2.bf16.msra.mxu1 %v4711_v4  ;;  %3513 = vmatprep.subr.bf16.mxu0 %v4716_v5  ;;  %v4798_v4 = vld [vmem:[%s6064_s10 + $0x490] ss:$48 sps:$4 sm:$0xff]  }
 0x156   : > { %3554 = vmatprep.subr.bf16.mxu1 %v4719_v6  ;;  %v4801_v5 = vld [vmem:[%s6064_s10 + $0xa90] ss:$48 sps:$4 sm:$0xff]   ;;  %v4806_v6 = vld [vmem:[%s6064_s10 + $0x434] ss:$48 sps:$4 sm:$0xff]  }
 0x158   : > { %3514 = vmatpush2.bf16.msra.mxu0 %v4714_v7  ;;  %v4809_v7 = vld [vmem:[%s6064_s10 + $0xa34] ss:$48 sps:$4 sm:$0xff]  }
 0x159   : > { %3555 = vmatpush2.bf16.msra.mxu1 %v4717_v8  ;;  %3515 = vmatprep.subr.bf16.mxu0 %v4722_v9  ;;  %v4804_v8 = vld [vmem:[%s6064_s10 + $0x430] ss:$48 sps:$4 sm:$0xff]  }
 0x15a   : > { %3556 = vmatprep.subr.bf16.mxu1 %v4725_v10  ;;  %v4807_v9 = vld [vmem:[%s6064_s10 + $0xa30] ss:$48 sps:$4 sm:$0xff]   ;;  %v4812_v10 = vld [vmem:[%s6064_s10 + $0x3d4] ss:$48 sps:$4 sm:$0xff]  }
 0x15c   : > { %3516 = vmatpush2.bf16.msra.mxu0 %v4720_v12  ;;  %v4815_v12 = vld [vmem:[%s6064_s10 + $0x9d4] ss:$48 sps:$4 sm:$0xff]  }
 0x15d   : > { %3557 = vmatpush2.bf16.msra.mxu1 %v4723_v14  ;;  %3517 = vmatprep.subr.bf16.mxu0 %v4728_v16  ;;  %v4810_v14 = vld [vmem:[%s6064_s10 + $0x3d0] ss:$48 sps:$4 sm:$0xff]  }
 0x15e   : > { %3558 = vmatprep.subr.bf16.mxu1 %v4731_v19  ;;  %v4813_v16 = vld [vmem:[%s6064_s10 + $0x9d0] ss:$48 sps:$4 sm:$0xff]   ;;  %v4818_v19 = vld [vmem:[%s6064_s10 + $0x374] ss:$48 sps:$4 sm:$0xff]  }
 0x160   : > { %3518 = vmatpush2.bf16.msra.mxu0 %v4726_v20  ;;  %v4821_v20 = vld [vmem:[%s6064_s10 + $0x974] ss:$48 sps:$4 sm:$0xff]  }
 0x161   : > { %3559 = vmatpush2.bf16.msra.mxu1 %v4729_v0  ;;  %3569 = vmatprep.subr.bf16.mxu0 %v4734_v11  ;;  %v4816_v0 = vld [vmem:[%s6064_s10 + $0x370] ss:$48 sps:$4 sm:$0xff]  }
 0x162   : > { %3610 = vmatprep.subr.bf16.mxu1 %v4737_v21  ;;  %v4819_v11 = vld [vmem:[%s6064_s10 + $0x970] ss:$48 sps:$4 sm:$0xff]   ;;  %v4824_v21 = vld [vmem:[%s6064_s10 + $0x314] ss:$48 sps:$4 sm:$0xff]  }
 0x163   : > { %3520 = vmatmul.mubr.bf16.vlgmr.msra.gmra.mxu0 %v6146_v13 }
 0x164   : > { %3561 = vmatmul.mubr.bf16.vlgmr.msra.gmra.mxu1 %v6152_v17  ;;  %3570 = vmatpush1.bf16.msra.mxu0 %v4732_v22  ;;  %v4827_v22 = vld [vmem:[%s6064_s10 + $0x914] ss:$48 sps:$4 sm:$0xff]  }
 0x165   : > { %3611 = vmatpush1.bf16.msra.mxu1 %v4735_v23  ;;  %3571 = vmatprep.subr.bf16.mxu0 %v4740_v24  ;;  %v4822_v23 = vld [vmem:[%s6064_s10 + $0x310] ss:$48 sps:$4 sm:$0xff]  }
 0x166   : > { %3612 = vmatprep.subr.bf16.mxu1 %v4743_v25  ;;  %3601 = vmatprep.mubr.bf16.mxu0 %v6079_v15  ;;  %v4825_v24 = vld [vmem:[%s6064_s10 + $0x910] ss:$48 sps:$4 sm:$0xff]   ;;  %v4830_v25 = vld [vmem:[%s6064_s10 + $0x2bc] ss:$48 sps:$4 sm:$0xff]  }
 0x167   : > { %3642 = vmatprep.mubr.bf16.mxu1 %v6086_v18 }
 0x168   : > { %3572 = vmatpush1.bf16.msra.mxu0 %v4738_v26  ;;  %v4833_v26 = vld [vmem:[%s6064_s10 + $0x8bc] ss:$48 sps:$4 sm:$0xff]  }
 0x169   : > { %3613 = vmatpush1.bf16.msra.mxu1 %v4741_v27  ;;  %3573 = vmatprep.subr.bf16.mxu0 %v4746_v28  ;;  %v4828_v27 = vld [vmem:[%s6064_s10 + $0x2b8] ss:$48 sps:$4 sm:$0xff]  }
 0x16a   : > { %3614 = vmatprep.subr.bf16.mxu1 %v4749_v29  ;;  %v4831_v28 = vld [vmem:[%s6064_s10 + $0x8b8] ss:$48 sps:$4 sm:$0xff]   ;;  %v4836_v29 = vld [vmem:[%s6064_s10 + $0x25c] ss:$48 sps:$4 sm:$0xff]  }
 0x16c   : > { %3574 = vmatpush1.bf16.msra.mxu0 %v4744_v30  ;;  %v4839_v30 = vld [vmem:[%s6064_s10 + $0x85c] ss:$48 sps:$4 sm:$0xff]  }
 0x16d   : > { %3615 = vmatpush1.bf16.msra.mxu1 %v4747_v31  ;;  %3575 = vmatprep.subr.bf16.mxu0 %v4752_v32  ;;  %v4834_v31 = vld [vmem:[%s6064_s10 + $0x258] ss:$48 sps:$4 sm:$0xff]  }
 0x16e   : > { %3616 = vmatprep.subr.bf16.mxu1 %v4755_v33  ;;  %v4837_v32 = vld [vmem:[%s6064_s10 + $0x858] ss:$48 sps:$4 sm:$0xff]   ;;  %v4842_v33 = vld [vmem:[%s6064_s10 + $0x1fc] ss:$48 sps:$4 sm:$0xff]  }
 0x170   : > { %3576 = vmatpush1.bf16.msra.mxu0 %v4750_v34  ;;  %v4845_v34 = vld [vmem:[%s6064_s10 + $0x7fc] ss:$48 sps:$4 sm:$0xff]  }
 0x171   : > { %3617 = vmatpush1.bf16.msra.mxu1 %v4753_v35  ;;  %3577 = vmatprep.subr.bf16.mxu0 %v4758_v36  ;;  %v4840_v35 = vld [vmem:[%s6064_s10 + $0x1f8] ss:$48 sps:$4 sm:$0xff]  }
 0x172   : > { %3618 = vmatprep.subr.bf16.mxu1 %v4761_v37  ;;  %v4843_v36 = vld [vmem:[%s6064_s10 + $0x7f8] ss:$48 sps:$4 sm:$0xff]   ;;  %v4848_v37 = vld [vmem:[%s6064_s10 + $0x19c] ss:$48 sps:$4 sm:$0xff]  }
 0x174   : > { %3578 = vmatpush1.bf16.msra.mxu0 %v4756_v38  ;;  %v4851_v38 = vld [vmem:[%s6064_s10 + $0x79c] ss:$48 sps:$4 sm:$0xff]  }
 0x175   : > { %3619 = vmatpush1.bf16.msra.mxu1 %v4759_v39  ;;  %3579 = vmatprep.subr.bf16.mxu0 %v4764_v40  ;;  %v4846_v39 = vld [vmem:[%s6064_s10 + $0x198] ss:$48 sps:$4 sm:$0xff]  }
 0x176   : > { %3620 = vmatprep.subr.bf16.mxu1 %v4767_v41  ;;  %v4849_v40 = vld [vmem:[%s6064_s10 + $0x798] ss:$48 sps:$4 sm:$0xff]   ;;  %v4854_v41 = vld [vmem:[%s6064_s10 + $0x13c] ss:$48 sps:$4 sm:$0xff]  }
 0x178   : > { %3580 = vmatpush1.bf16.msra.mxu0 %v4762_v42  ;;  %v4857_v42 = vld [vmem:[%s6064_s10 + $0x73c] ss:$48 sps:$4 sm:$0xff]  }
 0x179   : > { %3621 = vmatpush1.bf16.msra.mxu1 %v4765_v43  ;;  %3581 = vmatprep.subr.bf16.mxu0 %v4770_v44  ;;  %v4852_v43 = vld [vmem:[%s6064_s10 + $0x138] ss:$48 sps:$4 sm:$0xff]  }
 0x17a   : > { %3622 = vmatprep.subr.bf16.mxu1 %v4773_v45  ;;  %v4855_v44 = vld [vmem:[%s6064_s10 + $0x738] ss:$48 sps:$4 sm:$0xff]   ;;  %v4860_v45 = vld [vmem:[%s6064_s10 + $0xdc] ss:$48 sps:$4 sm:$0xff]  }
 0x17c   : > { %3582 = vmatpush1.bf16.msra.mxu0 %v4768_v46  ;;  %v4863_v46 = vld [vmem:[%s6064_s10 + $0x6dc] ss:$48 sps:$4 sm:$0xff]  }
 0x17d   : > { %3623 = vmatpush1.bf16.msra.mxu1 %v4771_v47  ;;  %3583 = vmatprep.subr.bf16.mxu0 %v4776_v48  ;;  %v4858_v47 = vld [vmem:[%s6064_s10 + $0xd8] ss:$48 sps:$4 sm:$0xff]  }
 0x17e   : > { %3624 = vmatprep.subr.bf16.mxu1 %v4779_v49  ;;  %v4861_v48 = vld [vmem:[%s6064_s10 + $0x6d8] ss:$48 sps:$4 sm:$0xff]   ;;  %v4866_v49 = vld [vmem:[%s6064_s10 + $0x7c] ss:$48 sps:$4 sm:$0xff]  }
 0x180   : > { %3584 = vmatpush1.bf16.msra.mxu0 %v4774_v50  ;;  %v4869_v50 = vld [vmem:[%s6064_s10 + $0x67c] ss:$48 sps:$4 sm:$0xff]  }
 0x181   : > { %3625 = vmatpush1.bf16.msra.mxu1 %v4777_v51  ;;  %3585 = vmatprep.subr.bf16.mxu0 %v4782_v52  ;;  %v4864_v51 = vld [vmem:[%s6064_s10 + $0x78] ss:$48 sps:$4 sm:$0xff]  }
 0x182   : > { %3626 = vmatprep.subr.bf16.mxu1 %v4785_v53  ;;  %v4867_v52 = vld [vmem:[%s6064_s10 + $0x678] ss:$48 sps:$4 sm:$0xff]   ;;  %v4872_v53 = vld [vmem:[%s6064_s10 + $0x1c] ss:$48 sps:$4 sm:$0xff]  }
 0x184   : > { %3586 = vmatpush2.bf16.msra.mxu0 %v4780_v54  ;;  %v4875_v54 = vld [vmem:[%s6064_s10 + $0x61c] ss:$48 sps:$4 sm:$0xff]  }
 0x185   : > { %3627 = vmatpush2.bf16.msra.mxu1 %v4783_v55  ;;  %3587 = vmatprep.subr.bf16.mxu0 %v4788_v56  ;;  %v4870_v55 = vld [vmem:[%s6064_s10 + $0x18] ss:$48 sps:$4 sm:$0xff]  }
 0x186   : > { %3628 = vmatprep.subr.bf16.mxu1 %v4791_v57  ;;  %v4873_v56 = vld [vmem:[%s6064_s10 + $0x618] ss:$48 sps:$4 sm:$0xff]   ;;  %v4878_v57 = vld [vmem:[%s6064_s10 + $0x5bc] ss:$48 sps:$4 sm:$0xff]  }
 0x188   : > { %3588 = vmatpush2.bf16.msra.mxu0 %v4786_v58  ;;  %v4881_v58 = vld [vmem:[%s6064_s10 + $0xbbc] ss:$48 sps:$4 sm:$0xff]  }
 0x189   : > { %3629 = vmatpush2.bf16.msra.mxu1 %v4789_v59  ;;  %3589 = vmatprep.subr.bf16.mxu0 %v4794_v60  ;;  %v4876_v59 = vld [vmem:[%s6064_s10 + $0x5b8] ss:$48 sps:$4 sm:$0xff]  }
 0x18a   : > { %3630 = vmatprep.subr.bf16.mxu1 %v4797_v61  ;;  %v4879_v60 = vld [vmem:[%s6064_s10 + $0xbb8] ss:$48 sps:$4 sm:$0xff]   ;;  %v4884_v61 = vld [vmem:[%s6064_s10 + $0x55c] ss:$48 sps:$4 sm:$0xff]  }
 0x18c   : > { %3590 = vmatpush2.bf16.msra.mxu0 %v4792_v62  ;;  %v4887_v62 = vld [vmem:[%s6064_s10 + $0xb5c] ss:$48 sps:$4 sm:$0xff]  }
 0x18d   : > { %3631 = vmatpush2.bf16.msra.mxu1 %v4795_v63  ;;  %3591 = vmatprep.subr.bf16.mxu0 %v4800_v1  ;;  %v4882_v63 = vld [vmem:[%s6064_s10 + $0x558] ss:$48 sps:$4 sm:$0xff]  }
 0x18e   : > { %3632 = vmatprep.subr.bf16.mxu1 %v4803_v3  ;;  %v4885_v1 = vld [vmem:[%s6064_s10 + $0xb58] ss:$48 sps:$4 sm:$0xff]   ;;  %v4890_v3 = vld [vmem:[%s6064_s10 + $0x4fc] ss:$48 sps:$4 sm:$0xff]  }
 0x190   : > { %3592 = vmatpush2.bf16.msra.mxu0 %v4798_v4  ;;  %v4893_v4 = vld [vmem:[%s6064_s10 + $0xafc] ss:$48 sps:$4 sm:$0xff]  }
 0x191   : > { %3633 = vmatpush2.bf16.msra.mxu1 %v4801_v5  ;;  %3593 = vmatprep.subr.bf16.mxu0 %v4806_v6  ;;  %v4888_v5 = vld [vmem:[%s6064_s10 + $0x4f8] ss:$48 sps:$4 sm:$0xff]  }
 0x192   : > { %3634 = vmatprep.subr.bf16.mxu1 %v4809_v7  ;;  %v4891_v6 = vld [vmem:[%s6064_s10 + $0xaf8] ss:$48 sps:$4 sm:$0xff]   ;;  %v4896_v7 = vld [vmem:[%s6064_s10 + $0x49c] ss:$48 sps:$4 sm:$0xff]  }
 0x194   : > { %3594 = vmatpush2.bf16.msra.mxu0 %v4804_v8  ;;  %v4899_v8 = vld [vmem:[%s6064_s10 + $0xa9c] ss:$48 sps:$4 sm:$0xff]  }
 0x195   : > { %3635 = vmatpush2.bf16.msra.mxu1 %v4807_v9  ;;  %3595 = vmatprep.subr.bf16.mxu0 %v4812_v10  ;;  %v4894_v9 = vld [vmem:[%s6064_s10 + $0x498] ss:$48 sps:$4 sm:$0xff]  }
 0x196   : > { %3636 = vmatprep.subr.bf16.mxu1 %v4815_v12  ;;  %v4897_v10 = vld [vmem:[%s6064_s10 + $0xa98] ss:$48 sps:$4 sm:$0xff]   ;;  %v4902_v12 = vld [vmem:[%s6064_s10 + $0x43c] ss:$48 sps:$4 sm:$0xff]  }
 0x198   : > { %3596 = vmatpush2.bf16.msra.mxu0 %v4810_v14  ;;  %v4905_v14 = vld [vmem:[%s6064_s10 + $0xa3c] ss:$48 sps:$4 sm:$0xff]  }
 0x199   : > { %3637 = vmatpush2.bf16.msra.mxu1 %v4813_v16  ;;  %3597 = vmatprep.subr.bf16.mxu0 %v4818_v19  ;;  %v4900_v16 = vld [vmem:[%s6064_s10 + $0x438] ss:$48 sps:$4 sm:$0xff]  }
 0x19a   : > { %3638 = vmatprep.subr.bf16.mxu1 %v4821_v20  ;;  %v4903_v19 = vld [vmem:[%s6064_s10 + $0xa38] ss:$48 sps:$4 sm:$0xff]   ;;  %v4908_v20 = vld [vmem:[%s6064_s10 + $0x3dc] ss:$48 sps:$4 sm:$0xff]  }
 0x19c   : > { %3598 = vmatpush2.bf16.msra.mxu0 %v4816_v0  ;;  %v4911_v0 = vld [vmem:[%s6064_s10 + $0x9dc] ss:$48 sps:$4 sm:$0xff]  }
 0x19d   : > { %3639 = vmatpush2.bf16.msra.mxu1 %v4819_v11  ;;  %3599 = vmatprep.subr.bf16.mxu0 %v4824_v21  ;;  %v4906_v11 = vld [vmem:[%s6064_s10 + $0x3d8] ss:$48 sps:$4 sm:$0xff]  }
 0x19e   : > { %3640 = vmatprep.subr.bf16.mxu1 %v4827_v22  ;;  %v4909_v21 = vld [vmem:[%s6064_s10 + $0x9d8] ss:$48 sps:$4 sm:$0xff]   ;;  %v4914_v22 = vld [vmem:[%s6064_s10 + $0x37c] ss:$48 sps:$4 sm:$0xff]  }
 0x1a0   : > { %3600 = vmatpush2.bf16.msra.mxu0 %v4822_v23  ;;  %v4917_v23 = vld [vmem:[%s6064_s10 + $0x97c] ss:$48 sps:$4 sm:$0xff]  }
 0x1a1   : > { %3641 = vmatpush2.bf16.msra.mxu1 %v4825_v24  ;;  %3651 = vmatprep.subr.bf16.mxu0 %v4830_v25  ;;  %v4912_v24 = vld [vmem:[%s6064_s10 + $0x378] ss:$48 sps:$4 sm:$0xff]  }
 0x1a2   : > { %3692 = vmatprep.subr.bf16.mxu1 %v4833_v26  ;;  %v4915_v25 = vld [vmem:[%s6064_s10 + $0x978] ss:$48 sps:$4 sm:$0xff]   ;;  %v4920_v26 = vld [vmem:[%s6064_s10 + $0x31c] ss:$48 sps:$4 sm:$0xff]  }
 0x1a3   : > { %3602 = vmatmul.mubr.bf16.vlgmr.msra.gmra.mxu0 %v6146_v13 }
 0x1a4   : > { %3643 = vmatmul.mubr.bf16.vlgmr.msra.gmra.mxu1 %v6152_v17  ;;  %3652 = vmatpush1.bf16.msra.mxu0 %v4828_v27  ;;  %v4923_v27 = vld [vmem:[%s6064_s10 + $0x91c] ss:$48 sps:$4 sm:$0xff]  }
 0x1a5   : > { %3693 = vmatpush1.bf16.msra.mxu1 %v4831_v28  ;;  %3653 = vmatprep.subr.bf16.mxu0 %v4836_v29  ;;  %v4918_v28 = vld [vmem:[%s6064_s10 + $0x318] ss:$48 sps:$4 sm:$0xff]  }
 0x1a6   : > { %3694 = vmatprep.subr.bf16.mxu1 %v4839_v30  ;;  %3683 = vmatprep.mubr.bf16.mxu0 %v6079_v15  ;;  %v4921_v29 = vld [vmem:[%s6064_s10 + $0x918] ss:$48 sps:$4 sm:$0xff]   ;;  %v6363_v30 = vld [vmem:[%s6358_s21] sm:$0xff] }
 0x1a7   : > { %3724 = vmatprep.mubr.bf16.mxu1 %v6086_v18 }
 0x1a8   : > { %3654 = vmatpush1.bf16.msra.mxu0 %v4834_v31  ;;  %v1398_v31 = vsub.s32 0, %v6062_v2 }
 0x1a9   : > { %3695 = vmatpush1.bf16.msra.mxu1 %v4837_v32  ;;  %3655 = vmatprep.subr.bf16.mxu0 %v4842_v33  ;;  %v4926_v32 = vld [vmem:[%s6064_s10 + $0x2c4] ss:$48 sps:$4 sm:$0xff]  }
 0x1aa   : > { %3696 = vmatprep.subr.bf16.mxu1 %v4845_v34  ;;  %v4929_v33 = vld [vmem:[%s6064_s10 + $0x8c4] ss:$48 sps:$4 sm:$0xff]   ;;  %v1402_v34 = vsub.s32 1, %v6062_v2 }
 0x1ac   : > { %3656 = vmatpush1.bf16.msra.mxu0 %v4840_v35  ;;  %v1399_v35 = vrot.slane %v6363_v30, %v1398_v31 }
 0x1ad   : > { %3697 = vmatpush1.bf16.msra.mxu1 %v4843_v36  ;;  %3657 = vmatprep.subr.bf16.mxu0 %v4848_v37  ;;  %v4924_v36 = vld [vmem:[%s6064_s10 + $0x2c0] ss:$48 sps:$4 sm:$0xff]  }
 0x1ae   : > { %3698 = vmatprep.subr.bf16.mxu1 %v4851_v38  ;;  %v4927_v37 = vld [vmem:[%s6064_s10 + $0x8c0] ss:$48 sps:$4 sm:$0xff]   ;;  %v4932_v38 = vld [vmem:[%s6064_s10 + $0x264] ss:$48 sps:$4 sm:$0xff]  }
 0x1b0   : > { %3658 = vmatpush1.bf16.msra.mxu0 %v4846_v39  ;;  %v4935_v39 = vld [vmem:[%s6064_s10 + $0x864] ss:$48 sps:$4 sm:$0xff]  }
 0x1b1   : > { %3699 = vmatpush1.bf16.msra.mxu1 %v4849_v40  ;;  %3659 = vmatprep.subr.bf16.mxu0 %v4854_v41  ;;  %v1403_v40 = vrot.slane %v6363_v30, %v1402_v34 }
 0x1b2   : > { %3700 = vmatprep.subr.bf16.mxu1 %v4857_v42 }
 0x1b4   : > { %3660 = vmatpush1.bf16.msra.mxu0 %v4852_v43 }
 0x1b5   : > { %3701 = vmatpush1.bf16.msra.mxu1 %v4855_v44  ;;  %3661 = vmatprep.subr.bf16.mxu0 %v4860_v45  ;;  %v4930_v44 = vld [vmem:[%s6064_s10 + $0x260] ss:$48 sps:$4 sm:$0xff]  }
 0x1b6   : > { %3702 = vmatprep.subr.bf16.mxu1 %v4863_v46  ;;  %v4933_v45 = vld [vmem:[%s6064_s10 + $0x860] ss:$48 sps:$4 sm:$0xff]  }
 0x1b8   : > { %3662 = vmatpush1.bf16.msra.mxu0 %v4858_v47 }
 0x1b9   : > { %3703 = vmatpush1.bf16.msra.mxu1 %v4861_v48  ;;  %3663 = vmatprep.subr.bf16.mxu0 %v4866_v49  ;;  %v4938_v48 = vld [vmem:[%s6064_s10 + $0x204] ss:$48 sps:$4 sm:$0xff]  }
 0x1ba   : > { %3704 = vmatprep.subr.bf16.mxu1 %v4869_v50  ;;  %v4941_v49 = vld [vmem:[%s6064_s10 + $0x804] ss:$48 sps:$4 sm:$0xff]  }
 0x1bc   : > { %3664 = vmatpush1.bf16.msra.mxu0 %v4864_v51 }
 0x1bd   : > { %3705 = vmatpush1.bf16.msra.mxu1 %v4867_v52  ;;  %3665 = vmatprep.subr.bf16.mxu0 %v4872_v53 }
 0x1be   : > { %3706 = vmatprep.subr.bf16.mxu1 %v4875_v54 }
 0x1c0   : > { %3666 = vmatpush1.bf16.msra.mxu0 %v4870_v55  ;;  %v4936_v55 = vld [vmem:[%s6064_s10 + $0x200] ss:$48 sps:$4 sm:$0xff]  }
 0x1c1   : > { %3707 = vmatpush1.bf16.msra.mxu1 %v4873_v56  ;;  %3667 = vmatprep.subr.bf16.mxu0 %v4878_v57  ;;  %v4939_v56 = vld [vmem:[%s6064_s10 + $0x800] ss:$48 sps:$4 sm:$0xff]  }
 0x1c2   : > { %3708 = vmatprep.subr.bf16.mxu1 %v4881_v58 }
 0x1c4   : > { %3668 = vmatpush2.bf16.msra.mxu0 %v4876_v59  ;;  %v4944_v59 = vld [vmem:[%s6064_s10 + $0x1a4] ss:$48 sps:$4 sm:$0xff]  }
 0x1c5   : > { %3709 = vmatpush2.bf16.msra.mxu1 %v4879_v60  ;;  %3669 = vmatprep.subr.bf16.mxu0 %v4884_v61  ;;  %v4947_v60 = vld [vmem:[%s6064_s10 + $0x7a4] ss:$48 sps:$4 sm:$0xff]  }
 0x1c6   : > { %3710 = vmatprep.subr.bf16.mxu1 %v4887_v62  ;;  %v4942_v62 = vld [vmem:[%s6064_s10 + $0x1a0] ss:$48 sps:$4 sm:$0xff]  }
 0x1c8   : > { %3670 = vmatpush2.bf16.msra.mxu0 %v4882_v63  ;;  %v4945_v63 = vld [vmem:[%s6064_s10 + $0x7a0] ss:$48 sps:$4 sm:$0xff]  }
 0x1c9   : > { %3711 = vmatpush2.bf16.msra.mxu1 %v4885_v1  ;;  %3671 = vmatprep.subr.bf16.mxu0 %v4890_v3  ;;  %v4950_v1 = vld [vmem:[%s6064_s10 + $0x144] ss:$48 sps:$4 sm:$0xff]  }
 0x1ca   : > { %3712 = vmatprep.subr.bf16.mxu1 %v4893_v4  ;;  %v4953_v3 = vld [vmem:[%s6064_s10 + $0x744] ss:$48 sps:$4 sm:$0xff]   ;;  %v4948_v4 = vld [vmem:[%s6064_s10 + $0x140] ss:$48 sps:$4 sm:$0xff]  }
 0x1cc   : > { %3672 = vmatpush2.bf16.msra.mxu0 %v4888_v5  ;;  %v4951_v5 = vld [vmem:[%s6064_s10 + $0x740] ss:$48 sps:$4 sm:$0xff]  }
 0x1cd   : > { %3713 = vmatpush2.bf16.msra.mxu1 %v4891_v6  ;;  %3673 = vmatprep.subr.bf16.mxu0 %v4896_v7  ;;  %v4956_v6 = vld [vmem:[%s6064_s10 + $0xe4] ss:$48 sps:$4 sm:$0xff]  }
 0x1ce   : > { %3714 = vmatprep.subr.bf16.mxu1 %v4899_v8  ;;  %v4959_v7 = vld [vmem:[%s6064_s10 + $0x6e4] ss:$48 sps:$4 sm:$0xff]   ;;  %v4954_v8 = vld [vmem:[%s6064_s10 + $0xe0] ss:$48 sps:$4 sm:$0xff]  }
 0x1d0   : > { %3674 = vmatpush2.bf16.msra.mxu0 %v4894_v9  ;;  %v4957_v9 = vld [vmem:[%s6064_s10 + $0x6e0] ss:$48 sps:$4 sm:$0xff]  }
 0x1d1   : > { %3715 = vmatpush2.bf16.msra.mxu1 %v4897_v10  ;;  %3675 = vmatprep.subr.bf16.mxu0 %v4902_v12  ;;  %v4962_v10 = vld [vmem:[%s6064_s10 + $0x84] ss:$48 sps:$4 sm:$0xff]  }
 0x1d2   : > { %3716 = vmatprep.subr.bf16.mxu1 %v4905_v14  ;;  %v4965_v12 = vld [vmem:[%s6064_s10 + $0x684] ss:$48 sps:$4 sm:$0xff]   ;;  %v4960_v14 = vld [vmem:[%s6064_s10 + $0x80] ss:$48 sps:$4 sm:$0xff]  }
 0x1d4   : > { %3676 = vmatpush2.bf16.msra.mxu0 %v4900_v16  ;;  %v4963_v16 = vld [vmem:[%s6064_s10 + $0x680] ss:$48 sps:$4 sm:$0xff]  }
 0x1d5   : > { %3717 = vmatpush2.bf16.msra.mxu1 %v4903_v19  ;;  %3677 = vmatprep.subr.bf16.mxu0 %v4908_v20  ;;  %v4968_v19 = vld [vmem:[%s6064_s10 + $0x24] ss:$48 sps:$4 sm:$0xff]  }
 0x1d6   : > { %3718 = vmatprep.subr.bf16.mxu1 %v4911_v0  ;;  %v4971_v20 = vld [vmem:[%s6064_s10 + $0x624] ss:$48 sps:$4 sm:$0xff]   ;;  %v4966_v0 = vld [vmem:[%s6064_s10 + $0x20] ss:$48 sps:$4 sm:$0xff]  }
 0x1d8   : > { %3678 = vmatpush2.bf16.msra.mxu0 %v4906_v11  ;;  %v4969_v11 = vld [vmem:[%s6064_s10 + $0x620] ss:$48 sps:$4 sm:$0xff]  }
 0x1d9   : > { %3719 = vmatpush2.bf16.msra.mxu1 %v4909_v21  ;;  %3679 = vmatprep.subr.bf16.mxu0 %v4914_v22  ;;  %v4974_v21 = vld [vmem:[%s6064_s10 + $0x5c4] ss:$48 sps:$4 sm:$0xff]  }
 0x1da   : > { %3720 = vmatprep.subr.bf16.mxu1 %v4917_v23  ;;  %v4977_v22 = vld [vmem:[%s6064_s10 + $0xbc4] ss:$48 sps:$4 sm:$0xff]   ;;  %v4972_v23 = vld [vmem:[%s6064_s10 + $0x5c0] ss:$48 sps:$4 sm:$0xff]  }
 0x1dc   : > { %3680 = vmatpush2.bf16.msra.mxu0 %v4912_v24  ;;  %v4975_v24 = vld [vmem:[%s6064_s10 + $0xbc0] ss:$48 sps:$4 sm:$0xff]  }
 0x1dd   : > { %3721 = vmatpush2.bf16.msra.mxu1 %v4915_v25  ;;  %3681 = vmatprep.subr.bf16.mxu0 %v4920_v26  ;;  %v4980_v25 = vld [vmem:[%s6064_s10 + $0x564] ss:$48 sps:$4 sm:$0xff]  }
 0x1de   : > { %3722 = vmatprep.subr.bf16.mxu1 %v4923_v27  ;;  %v4983_v26 = vld [vmem:[%s6064_s10 + $0xb64] ss:$48 sps:$4 sm:$0xff]   ;;  %v4978_v27 = vld [vmem:[%s6064_s10 + $0x560] ss:$48 sps:$4 sm:$0xff]  }
 0x1e0   : > { %3682 = vmatpush2.bf16.msra.mxu0 %v4918_v28  ;;  %v4981_v28 = vld [vmem:[%s6064_s10 + $0xb60] ss:$48 sps:$4 sm:$0xff]  }
 0x1e1   : > { %3723 = vmatpush2.bf16.msra.mxu1 %v4921_v29  ;;  %3733 = vmatprep.subr.bf16.mxu0 %v4926_v32  ;;  %v4986_v29 = vld [vmem:[%s6064_s10 + $0x504] ss:$48 sps:$4 sm:$0xff]  }
 0x1e2   : > { %3774 = vmatprep.subr.bf16.mxu1 %v4929_v33  ;;  %v4989_v32 = vld [vmem:[%s6064_s10 + $0xb04] ss:$48 sps:$4 sm:$0xff]   ;;  %v4984_v33 = vld [vmem:[%s6064_s10 + $0x500] ss:$48 sps:$4 sm:$0xff]  }
 0x1e3   : > { %v3439_v41 = vpop.f32.mrf.mxu0  ;;  %3684 = vmatmul.mubr.bf16.vlgmr.msra.gmra.mxu0 %v6146_v13 }
 0x1e4   : > { %v3480_v42 = vpop.f32.mrf.mxu1  ;;  %3725 = vmatmul.mubr.bf16.vlgmr.msra.gmra.mxu1 %v6152_v17  ;;  %v3440_v43 = vadd.f32 %v3439_v41, %v1399_v35  ;;  %3734 = vmatpush1.bf16.msra.mxu0 %v4924_v36  ;;  %v4987_v35 = vld [vmem:[%s6064_s10 + $0xb00] ss:$48 sps:$4 sm:$0xff]   ;;  %v4992_v36 = vld [vmem:[%s6064_s10 + $0x4a4] ss:$48 sps:$4 sm:$0xff]  }
 0x1e5   : > { %3775 = vmatpush1.bf16.msra.mxu1 %v4927_v37  ;;  %v3441_v46 = vpop.f32.mrf.mxu0  ;;  %3735 = vmatprep.subr.bf16.mxu0 %v4932_v38  ;;  %v4995_v37 = vld [vmem:[%s6064_s10 + $0xaa4] ss:$48 sps:$4 sm:$0xff]   ;;  %v4990_v38 = vld [vmem:[%s6064_s10 + $0x4a0] ss:$48 sps:$4 sm:$0xff]  }
 0x1e6   : > { %v3482_v47 = vpop.f32.mrf.mxu1  ;;  %3776 = vmatprep.subr.bf16.mxu1 %v4935_v39  ;;  %v6385_v50 = vadd.f32 %v3480_v42, %v3440_v43  ;;  %v3442_v51 = vadd.f32 %v3441_v46, %v1403_v40  ;;  %3765 = vmatprep.mubr.bf16.mxu0 %v6079_v15  ;;  %v4993_v39 = vld [vmem:[%s6064_s10 + $0xaa0] ss:$48 sps:$4 sm:$0xff]   ;;  %v4998_v40 = vld [vmem:[%s6064_s10 + $0x444] ss:$48 sps:$4 sm:$0xff]  }
 0x1e7   : > { %3806 = vmatprep.mubr.bf16.mxu1 %v6086_v18  ;;  %v3443_v52 = vpop.f32.mrf.mxu0  ;;  %v5001_v41 = vld [vmem:[%s6064_s10 + $0xa44] ss:$48 sps:$4 sm:$0xff]   ;;  %v4996_v42 = vld [vmem:[%s6064_s10 + $0x440] ss:$48 sps:$4 sm:$0xff]  }
 0x1e8   : > { %v3484_v53 = vpop.f32.mrf.mxu1  ;;  %v6389_v54 = vadd.f32 %v3482_v47, %v3442_v51  ;;  %3736 = vmatpush1.bf16.msra.mxu0 %v4930_v44  ;;  %v4999_v43 = vld [vmem:[%s6064_s10 + $0xa40] ss:$48 sps:$4 sm:$0xff]   ;;  %v5004_v44 = vld [vmem:[%s6064_s10 + $0x3e4] ss:$48 sps:$4 sm:$0xff]  }
 0x1e9   : > { %3777 = vmatpush1.bf16.msra.mxu1 %v4933_v45  ;;  %v3444_v57 = vpop.f32.mrf.mxu0  ;;  %3737 = vmatprep.subr.bf16.mxu0 %v4938_v48  ;;  %v5007_v45 = vld [vmem:[%s6064_s10 + $0x9e4] ss:$48 sps:$4 sm:$0xff]   ;;  %v5002_v46 = vld [vmem:[%s6064_s10 + $0x3e0] ss:$48 sps:$4 sm:$0xff]  }
 0x1ea   : > { %v3485_v58 = vpop.f32.mrf.mxu1  ;;  %3778 = vmatprep.subr.bf16.mxu1 %v4941_v49  ;;  %v3909_v61 = vcombine.low %v6385_v50, %v6389_v54  ;;  %v5005_v47 = vld [vmem:[%s6064_s10 + $0x9e0] ss:$48 sps:$4 sm:$0xff]   ;;  %v5010_v48 = vld [vmem:[%s6064_s10 + $0x384] ss:$48 sps:$4 sm:$0xff]   ;;  %v5044_v50 = vld [vmem:[%s6064_s10 + $0x148] ss:$48 sps:$4 sm:$0xff]  }
 0x1eb   : > { %v5013_v49 = vld [vmem:[%s6064_s10 + $0x984] ss:$48 sps:$4 sm:$0xff]   ;;  %v5008_v51 = vld [vmem:[%s6064_s10 + $0x380] ss:$48 sps:$4 sm:$0xff]   ;;  %v1406_v58 = vsub.s32 2, %v6062_v2 }
 0x1ec   : > { %3738 = vmatpush1.bf16.msra.mxu0 %v4936_v55  ;;  %v5011_v52 = vld [vmem:[%s6064_s10 + $0x980] ss:$48 sps:$4 sm:$0xff]   ;;  %v5016_v53 = vld [vmem:[%s6064_s10 + $0x324] ss:$48 sps:$4 sm:$0xff]   ;;  %v5047_v54 = vld [vmem:[%s6064_s10 + $0x748] ss:$48 sps:$4 sm:$0xff]  }
 0x1ed   : > { %3779 = vmatpush1.bf16.msra.mxu1 %v4939_v56  ;;  %3739 = vmatprep.subr.bf16.mxu0 %v4944_v59  ;;  %v5019_v55 = vld [vmem:[%s6064_s10 + $0x924] ss:$48 sps:$4 sm:$0xff]   ;;  %v5014_v56 = vld [vmem:[%s6064_s10 + $0x320] ss:$48 sps:$4 sm:$0xff]   ;;  %v5022_v59 = vld [vmem:[%s6064_s10 + $0x2cc] ss:$48 sps:$4 sm:$0xff]  }
 0x1ee   : > { %3780 = vmatprep.subr.bf16.mxu1 %v4947_v60  ;;  %v5017_v57 = vld [vmem:[%s6064_s10 + $0x920] ss:$48 sps:$4 sm:$0xff]   ;;  %v5025_v60 = vld [vmem:[%s6064_s10 + $0x8cc] ss:$48 sps:$4 sm:$0xff]  }
 0x1f0   : > { %3740 = vmatpush1.bf16.msra.mxu0 %v4942_v62  ;;  %v1410_v62 = vsub.s32 3, %v6062_v2 }
 0x1f1   : > { %3781 = vmatpush1.bf16.msra.mxu1 %v4945_v63  ;;  %3741 = vmatprep.subr.bf16.mxu0 %v4950_v1  ;;  %v5195_v63 = vmov 1983009808  }
 0x1f2   : > { %3782 = vmatprep.subr.bf16.mxu1 %v4953_v3  ;;  %v3912_v1 = vunpack.c.l.s4 %v5195_v63  ;;  %v1407_v3 = vrot.slane %v6363_v30, %v1406_v58  ;;  %v5076_v63 = vld [vmem:[%s6064_s10 + $0x56c] ss:$48 sps:$4 sm:$0xff]  }
 0x1f4   : > { %3742 = vmatpush1.bf16.msra.mxu0 %v4948_v4  ;;  %v5020_v4 = vld [vmem:[%s6064_s10 + $0x2c8] ss:$48 sps:$4 sm:$0xff]  }
 0x1f5   : > { %3783 = vmatpush1.bf16.msra.mxu1 %v4951_v5  ;;  %3743 = vmatprep.subr.bf16.mxu0 %v4956_v6  ;;  %v5023_v5 = vld [vmem:[%s6064_s10 + $0x8c8] ss:$48 sps:$4 sm:$0xff]   ;;  %v5028_v6 = vld [vmem:[%s6064_s10 + $0x26c] ss:$48 sps:$4 sm:$0xff]  }
 0x1f6   : > { %3784 = vmatprep.subr.bf16.mxu1 %v4959_v7  ;;  %v5031_v7 = vld [vmem:[%s6064_s10 + $0x86c] ss:$48 sps:$4 sm:$0xff]  }
 0x1f8   : > { %3744 = vmatpush1.bf16.msra.mxu0 %v4954_v8  ;;  %v1411_v8 = vrot.slane %v6363_v30, %v1410_v62 }
 0x1f9   : > { %3785 = vmatpush1.bf16.msra.mxu1 %v4957_v9  ;;  %3745 = vmatprep.subr.bf16.mxu0 %v4962_v10 }
 0x1fa   : > { %3786 = vmatprep.subr.bf16.mxu1 %v4965_v12  ;;  %v3913_v12 = vunpack.c.0.s8 %v3912_v1  ;;  %v5079_v1 = vld [vmem:[%s6064_s10 + $0xb6c] ss:$48 sps:$4 sm:$0xff]  }
 0x1fc   : > { %3746 = vmatpush1.bf16.msra.mxu0 %v4960_v14 }
 0x1fd   : > { %3787 = vmatpush1.bf16.msra.mxu1 %v4963_v16  ;;  %3747 = vmatprep.subr.bf16.mxu0 %v4968_v19  ;;  %v5026_v16 = vld [vmem:[%s6064_s10 + $0x268] ss:$48 sps:$4 sm:$0xff]  }
 0x1fe   : > { %3788 = vmatprep.subr.bf16.mxu1 %v4971_v20  ;;  %v5029_v19 = vld [vmem:[%s6064_s10 + $0x868] ss:$48 sps:$4 sm:$0xff]  }
 0x200   : > { %3748 = vmatpush1.bf16.msra.mxu0 %v4966_v0 }
 0x201   : > { %3789 = vmatpush1.bf16.msra.mxu1 %v4969_v11  ;;  %3749 = vmatprep.subr.bf16.mxu0 %v4974_v21  ;;  %v5034_v11 = vld [vmem:[%s6064_s10 + $0x20c] ss:$48 sps:$4 sm:$0xff]  }
 0x202   : > { %3790 = vmatprep.subr.bf16.mxu1 %v4977_v22  ;;  %v5037_v21 = vld [vmem:[%s6064_s10 + $0x80c] ss:$48 sps:$4 sm:$0xff]  }
 0x204   : > { %3750 = vmatpush2.bf16.msra.mxu0 %v4972_v23 }
 0x205   : > { %3791 = vmatpush2.bf16.msra.mxu1 %v4975_v24  ;;  %3751 = vmatprep.subr.bf16.mxu0 %v4980_v25 }
 0x206   : > { %3792 = vmatprep.subr.bf16.mxu1 %v4983_v26  ;;  %v6470_v26 = vsub.s32 %v3913_v12, %v6062_v2  ;;  %v5086_v12 = vld [vmem:[%s6064_s10 + $0x4a8] ss:$48 sps:$4 sm:$0xff]  }
 0x208   : > { %3752 = vmatpush2.bf16.msra.mxu0 %v4978_v27 }
 0x209   : > { %3793 = vmatpush2.bf16.msra.mxu1 %v4981_v28  ;;  %3753 = vmatprep.subr.bf16.mxu0 %v4986_v29  ;;  %v5032_v28 = vld [vmem:[%s6064_s10 + $0x208] ss:$48 sps:$4 sm:$0xff]  }
 0x20a   : > { %3794 = vmatprep.subr.bf16.mxu1 %v4989_v32  ;;  %v5035_v29 = vld [vmem:[%s6064_s10 + $0x808] ss:$48 sps:$4 sm:$0xff]  }
 0x20c   : > { %3754 = vmatpush2.bf16.msra.mxu0 %v4984_v33 }
 0x20d   : > { %3795 = vmatpush2.bf16.msra.mxu1 %v4987_v35  ;;  %3755 = vmatprep.subr.bf16.mxu0 %v4992_v36  ;;  %v3917_v36 = vrot.slane %v3909_v61, %v6470_v26  ;;  %v5052_v61 = vld [vmem:[%s6064_s10 + $0xec] ss:$48 sps:$4 sm:$0xff]  }
 0x20e   : > { %3796 = vmatprep.subr.bf16.mxu1 %v4995_v37 }
 0x210   : > { %3756 = vmatpush2.bf16.msra.mxu0 %v4990_v38  ;;  %v5038_v38 = vld [vmem:[%s6064_s10 + $0x1a8] ss:$48 sps:$4 sm:$0xff]  }
 0x211   : > { %3797 = vmatpush2.bf16.msra.mxu1 %v4993_v39  ;;  %3757 = vmatprep.subr.bf16.mxu0 %v4998_v40  ;;  %v5041_v39 = vld [vmem:[%s6064_s10 + $0x7a8] ss:$48 sps:$4 sm:$0xff]   ;;  %v5046_v40 = vld [vmem:[%s6064_s10 + $0x14c] ss:$48 sps:$4 sm:$0xff]  }
 0x212   : > { %3798 = vmatprep.subr.bf16.mxu1 %v5001_v41  ;;  %v5049_v41 = vld [vmem:[%s6064_s10 + $0x74c] ss:$48 sps:$4 sm:$0xff]  }
 0x214   : > { %3758 = vmatpush2.bf16.msra.mxu0 %v4996_v42 }
 0x215   : > { %3799 = vmatpush2.bf16.msra.mxu1 %v4999_v43  ;;  %3759 = vmatprep.subr.bf16.mxu0 %v5004_v44  ;;  %v5055_v43 = vld [vmem:[%s6064_s10 + $0x6ec] ss:$48 sps:$4 sm:$0xff]   ;;  %v5050_v44 = vld [vmem:[%s6064_s10 + $0xe8] ss:$48 sps:$4 sm:$0xff]  }
 0x216   : > { %3800 = vmatprep.subr.bf16.mxu1 %v5007_v45  ;;  %v5053_v45 = vld [vmem:[%s6064_s10 + $0x6e8] ss:$48 sps:$4 sm:$0xff]  }
 0x218   : > { %3760 = vmatpush2.bf16.msra.mxu0 %v5002_v46  ;;  %v5058_v46 = vld [vmem:[%s6064_s10 + $0x8c] ss:$48 sps:$4 sm:$0xff]  }
 0x219   : > { %3801 = vmatpush2.bf16.msra.mxu1 %v5005_v47  ;;  %3761 = vmatprep.subr.bf16.mxu0 %v5010_v48  ;;  %v5061_v47 = vld [vmem:[%s6064_s10 + $0x68c] ss:$48 sps:$4 sm:$0xff]   ;;  %v5056_v48 = vld [vmem:[%s6064_s10 + $0x88] ss:$48 sps:$4 sm:$0xff]  }
 0x21a   : > { %3802 = vmatprep.subr.bf16.mxu1 %v5013_v49  ;;  %v5059_v49 = vld [vmem:[%s6064_s10 + $0x688] ss:$48 sps:$4 sm:$0xff]  }
 0x21c   : > { %3762 = vmatpush2.bf16.msra.mxu0 %v5008_v51  ;;  %v5064_v51 = vld [vmem:[%s6064_s10 + $0x2c] ss:$48 sps:$4 sm:$0xff]  }
 0x21d   : > { %3803 = vmatpush2.bf16.msra.mxu1 %v5011_v52  ;;  %3763 = vmatprep.subr.bf16.mxu0 %v5016_v53  ;;  %v5067_v52 = vld [vmem:[%s6064_s10 + $0x62c] ss:$48 sps:$4 sm:$0xff]   ;;  %v5062_v53 = vld [vmem:[%s6064_s10 + $0x28] ss:$48 sps:$4 sm:$0xff]  }
 0x21e   : > { %3804 = vmatprep.subr.bf16.mxu1 %v5019_v55  ;;  %v5065_v55 = vld [vmem:[%s6064_s10 + $0x628] ss:$48 sps:$4 sm:$0xff]  }
 0x220   : > { %3764 = vmatpush2.bf16.msra.mxu0 %v5014_v56  ;;  %v5070_v56 = vld [vmem:[%s6064_s10 + $0x5cc] ss:$48 sps:$4 sm:$0xff]  }
 0x221   : > { %3805 = vmatpush2.bf16.msra.mxu1 %v5017_v57  ;;  %3815 = vmatprep.subr.bf16.mxu0 %v5022_v59  ;;  %v5073_v57 = vld [vmem:[%s6064_s10 + $0xbcc] ss:$48 sps:$4 sm:$0xff]   ;;  %v5068_v59 = vld [vmem:[%s6064_s10 + $0x5c8] ss:$48 sps:$4 sm:$0xff]  }
 0x222   : > { %3856 = vmatprep.subr.bf16.mxu1 %v5025_v60  ;;  %v5071_v60 = vld [vmem:[%s6064_s10 + $0xbc8] ss:$48 sps:$4 sm:$0xff]  }
 0x223   : > { %v3521_v9 = vpop.f32.mrf.mxu0  ;;  %3766 = vmatmul.mubr.bf16.vlgmr.msra.gmra.mxu0 %v6146_v13 }
 0x224   : > { %v3562_v10 = vpop.f32.mrf.mxu1  ;;  %3807 = vmatmul.mubr.bf16.vlgmr.msra.gmra.mxu1 %v6152_v17  ;;  %v3522_v14 = vadd.f32 %v3521_v9, %v1407_v3  ;;  %3816 = vmatpush1.bf16.msra.mxu0 %v5020_v4  ;;  %v5074_v3 = vld [vmem:[%s6064_s10 + $0x568] ss:$48 sps:$4 sm:$0xff]   ;;  %v5088_v9 = vld [vmem:[%s6064_s10 + $0x4ac] ss:$48 sps:$4 sm:$0xff]  }
 0x225   : > { %3857 = vmatpush1.bf16.msra.mxu1 %v5023_v5  ;;  %v3523_v20 = vpop.f32.mrf.mxu0  ;;  %3817 = vmatprep.subr.bf16.mxu0 %v5028_v6  ;;  %v5077_v4 = vld [vmem:[%s6064_s10 + $0xb68] ss:$48 sps:$4 sm:$0xff]   ;;  %v5082_v5 = vld [vmem:[%s6064_s10 + $0x50c] ss:$48 sps:$4 sm:$0xff]  }
 0x226   : > { %v3564_v0 = vpop.f32.mrf.mxu1  ;;  %3858 = vmatprep.subr.bf16.mxu1 %v5031_v7  ;;  %v3563_v22 = vadd.f32 %v3562_v10, %v3522_v14  ;;  %v3524_v23 = vadd.f32 %v3523_v20, %v1411_v8  ;;  %3847 = vmatprep.mubr.bf16.mxu0 %v6079_v15  ;;  %v5040_v15 = vld [vmem:[%s6064_s10 + $0x1ac] ss:$48 sps:$4 sm:$0xff]   ;;  %v5080_v7 = vld [vmem:[%s6064_s10 + $0x508] ss:$48 sps:$4 sm:$0xff]  }
 0x227   : > { %3888 = vmatprep.mubr.bf16.mxu1 %v6086_v18  ;;  %v3525_v24 = vpop.f32.mrf.mxu0  ;;  %v5043_v18 = vld [vmem:[%s6064_s10 + $0x7ac] ss:$48 sps:$4 sm:$0xff]   ;;  %v5083_v8 = vld [vmem:[%s6064_s10 + $0xb08] ss:$48 sps:$4 sm:$0xff]  }
 0x228   : > { %v3566_v25 = vpop.f32.mrf.mxu1  ;;  %v3565_v27 = vadd.f32 %v3564_v0, %v3524_v23  ;;  %3818 = vmatpush1.bf16.msra.mxu0 %v5026_v16  ;;  %v5085_v6 = vld [vmem:[%s6064_s10 + $0xb0c] ss:$48 sps:$4 sm:$0xff]   ;;  %v5089_v14 = vld [vmem:[%s6064_s10 + $0xaa8] ss:$48 sps:$4 sm:$0xff]  }
 0x229   : > { %3859 = vmatpush1.bf16.msra.mxu1 %v5029_v19  ;;  %v3526_v32 = vpop.f32.mrf.mxu0  ;;  %3819 = vmatprep.subr.bf16.mxu0 %v5034_v11  ;;  %v5091_v10 = vld [vmem:[%s6064_s10 + $0xaac] ss:$48 sps:$4 sm:$0xff]   ;;  %v5092_v20 = vld [vmem:[%s6064_s10 + $0x448] ss:$48 sps:$4 sm:$0xff]  }
 0x22a   : > { %v3567_v33 = vpop.f32.mrf.mxu1  ;;  %3860 = vmatprep.subr.bf16.mxu1 %v5037_v21  ;;  %v3910_v35 = vcombine.low %v3563_v22, %v3565_v27  ;;  %v5094_v16 = vld [vmem:[%s6064_s10 + $0x44c] ss:$48 sps:$4 sm:$0xff]   ;;  %v5095_v0 = vld [vmem:[%s6064_s10 + $0xa48] ss:$48 sps:$4 sm:$0xff]  }
 0x22b   : > { %v5097_v19 = vld [vmem:[%s6064_s10 + $0xa4c] ss:$48 sps:$4 sm:$0xff]   ;;  %v5098_v22 = vld [vmem:[%s6064_s10 + $0x3e8] ss:$48 sps:$4 sm:$0xff]  }
 0x22c   : > { %v3924_v37 = vrot.slane %v3910_v35, %v6470_v26  ;;  %3820 = vmatpush1.bf16.msra.mxu0 %v5032_v28  ;;  %v5100_v11 = vld [vmem:[%s6064_s10 + $0x3ec] ss:$48 sps:$4 sm:$0xff]   ;;  %v5101_v23 = vld [vmem:[%s6064_s10 + $0x9e8] ss:$48 sps:$4 sm:$0xff]   ;;  %v1418_v35 = vsub.s32 5, %v6062_v2 }
 0x22d   : > { %3861 = vmatpush1.bf16.msra.mxu1 %v5035_v29  ;;  %3821 = vmatprep.subr.bf16.mxu0 %v5040_v15  ;;  %v5103_v21 = vld [vmem:[%s6064_s10 + $0x9ec] ss:$48 sps:$4 sm:$0xff]   ;;  %v5104_v27 = vld [vmem:[%s6064_s10 + $0x388] ss:$48 sps:$4 sm:$0xff]  }
 0x22e   : > { %3862 = vmatprep.subr.bf16.mxu1 %v5043_v18  ;;  %v3925_v42 = vcombine.low %v3917_v36, %v3924_v37  ;;  %v5106_v24 = vld [vmem:[%s6064_s10 + $0x38c] ss:$48 sps:$4 sm:$0xff]   ;;  %v5107_v28 = vld [vmem:[%s6064_s10 + $0x988] ss:$48 sps:$4 sm:$0xff]   ;;  %v1414_v18 = vsub.s32 4, %v6062_v2  ;;  %v1419_v37 = vrot.slane %v6363_v30, %v1418_v35 }
 0x22f   : > { %v5109_v25 = vld [vmem:[%s6064_s10 + $0x98c] ss:$48 sps:$4 sm:$0xff]   ;;  %v5110_v33 = vld [vmem:[%s6064_s10 + $0x328] ss:$48 sps:$4 sm:$0xff]  }
 0x230   : > { %3822 = vmatpush1.bf16.msra.mxu0 %v5038_v38  ;;  %3963 = vst [vmem:[%s6488_s26] sm:$0xff] %v3925_v42  ;;  %v5112_v29 = vld [vmem:[%s6064_s10 + $0x32c] ss:$48 sps:$4 sm:$0xff]   ;;  %v5113_v15 = vld [vmem:[%s6064_s10 + $0x928] ss:$48 sps:$4 sm:$0xff]   ;;  %v1415_v36 = vrot.slane %v6363_v30, %v1414_v18 }
 0x231   : > { %3863 = vmatpush1.bf16.msra.mxu1 %v5041_v39  ;;  %3823 = vmatprep.subr.bf16.mxu0 %v5046_v40  ;;  %v5115_v32 = vld [vmem:[%s6064_s10 + $0x92c] ss:$48 sps:$4 sm:$0xff]  }
 0x232   : > { %3864 = vmatprep.subr.bf16.mxu1 %v5049_v41 }
 0x234   : > { %3824 = vmatpush1.bf16.msra.mxu0 %v5044_v50 }
 0x235   : > { %3865 = vmatpush1.bf16.msra.mxu1 %v5047_v54  ;;  %3825 = vmatprep.subr.bf16.mxu0 %v5052_v61 }
 0x236   : > { %3866 = vmatprep.subr.bf16.mxu1 %v5055_v43 }
 0x238   : > { %3826 = vmatpush1.bf16.msra.mxu0 %v5050_v44 }
 0x239   : > { %3867 = vmatpush1.bf16.msra.mxu1 %v5053_v45  ;;  %3827 = vmatprep.subr.bf16.mxu0 %v5058_v46 }
 0x23a   : > { %3868 = vmatprep.subr.bf16.mxu1 %v5061_v47 }
 0x23c   : > { %3828 = vmatpush1.bf16.msra.mxu0 %v5056_v48  ;;  %v1422_v48 = vsub.s32 6, %v6062_v2 }
 0x23d   : > { %3869 = vmatpush1.bf16.msra.mxu1 %v5059_v49  ;;  %3829 = vmatprep.subr.bf16.mxu0 %v5064_v51  ;;  %v1426_v49 = vsub.s32 7, %v6062_v2 }
 0x23e   : > { %3870 = vmatprep.subr.bf16.mxu1 %v5067_v52  ;;  %v1423_v51 = vrot.slane %v6363_v30, %v1422_v48 }
 0x240   : > { %3830 = vmatpush1.bf16.msra.mxu0 %v5062_v53 }
 0x241   : > { %3871 = vmatpush1.bf16.msra.mxu1 %v5065_v55  ;;  %3831 = vmatprep.subr.bf16.mxu0 %v5070_v56 }
 0x242   : > { %3872 = vmatprep.subr.bf16.mxu1 %v5073_v57 }
 0x244   : > { %3832 = vmatpush2.bf16.msra.mxu0 %v5068_v59 }
 0x245   : > { %3873 = vmatpush2.bf16.msra.mxu1 %v5071_v60  ;;  %3833 = vmatprep.subr.bf16.mxu0 %v5076_v63 }
 0x246   : > { %3874 = vmatprep.subr.bf16.mxu1 %v5079_v1 }
 0x248   : > { %3834 = vmatpush2.bf16.msra.mxu0 %v5074_v3 }
 0x249   : > { %3875 = vmatpush2.bf16.msra.mxu1 %v5077_v4  ;;  %3835 = vmatprep.subr.bf16.mxu0 %v5082_v5 }
 0x24a   : > { %3876 = vmatprep.subr.bf16.mxu1 %v5085_v6 }
 0x24c   : > { %3836 = vmatpush2.bf16.msra.mxu0 %v5080_v7 }
 0x24d   : > { %3877 = vmatpush2.bf16.msra.mxu1 %v5083_v8  ;;  %3837 = vmatprep.subr.bf16.mxu0 %v5088_v9  ;;  %v1393_v8 = vld [vmem:[%s6358_s21 + $0x8] sm:$0xf] }
 0x24e   : > { %3878 = vmatprep.subr.bf16.mxu1 %v5091_v10  ;;  %v1431_v9 = vrot.slane %v1393_v8, %v1398_v31  ;;  %v1435_v10 = vrot.slane %v1393_v8, %v1402_v34  ;;  %v1439_v31 = vrot.slane %v1393_v8, %v1406_v58  ;;  %v1443_v34 = vrot.slane %v1393_v8, %v1410_v62 }
 0x250   : > { %3838 = vmatpush2.bf16.msra.mxu0 %v5086_v12 }
 0x251   : > { %3879 = vmatpush2.bf16.msra.mxu1 %v5089_v14  ;;  %3839 = vmatprep.subr.bf16.mxu0 %v5094_v16 }
 0x252   : > { %3880 = vmatprep.subr.bf16.mxu1 %v5097_v19 }
 0x254   : > { %3840 = vmatpush2.bf16.msra.mxu0 %v5092_v20 }
 0x255   : > { %3881 = vmatpush2.bf16.msra.mxu1 %v5095_v0  ;;  %3841 = vmatprep.subr.bf16.mxu0 %v5100_v11 }
 0x256   : > { %3882 = vmatprep.subr.bf16.mxu1 %v5103_v21 }
 0x258   : > { %3842 = vmatpush2.bf16.msra.mxu0 %v5098_v22 }
 0x259   : > { %3883 = vmatpush2.bf16.msra.mxu1 %v5101_v23  ;;  %3843 = vmatprep.subr.bf16.mxu0 %v5106_v24 }
 0x25a   : > { %3884 = vmatprep.subr.bf16.mxu1 %v5109_v25 }
 0x25c   : > { %3844 = vmatpush2.bf16.msra.mxu0 %v5104_v27 }
 0x25d   : > { %3885 = vmatpush2.bf16.msra.mxu1 %v5107_v28  ;;  %3845 = vmatprep.subr.bf16.mxu0 %v5112_v29 }
 0x25e   : > { %3886 = vmatprep.subr.bf16.mxu1 %v5115_v32 }
 0x260   : > { %3846 = vmatpush2.bf16.msra.mxu0 %v5110_v33 }
 0x261   : > { %3887 = vmatpush2.bf16.msra.mxu1 %v5113_v15 }
 0x263   : > { %v3603_v38 = vpop.f32.mrf.mxu0  ;;  %3848 = vmatmul.mubr.bf16.vlgmr.msra.gmra.mxu0 %v6146_v13  ;;  %v1427_v13 = vrot.slane %v6363_v30, %v1426_v49 }
 0x264   : > { %v3644_v39 = vpop.f32.mrf.mxu1  ;;  %3889 = vmatmul.mubr.bf16.vlgmr.msra.gmra.mxu1 %v6152_v17  ;;  %v3604_v40 = vadd.f32 %v3603_v38, %v1415_v36 }
 0x265   : > { %v3605_v41 = vpop.f32.mrf.mxu0 }
 0x266   : > { %v3646_v42 = vpop.f32.mrf.mxu1  ;;  %v3645_v50 = vadd.f32 %v3644_v39, %v3604_v40  ;;  %v3606_v54 = vadd.f32 %v3605_v41, %v1419_v37 }
 0x267   : > { %v3607_v61 = vpop.f32.mrf.mxu0 }
 0x268   : > { %v3648_v43 = vpop.f32.mrf.mxu1  ;;  %v3647_v44 = vadd.f32 %v3646_v42, %v3606_v54 }
 0x269   : > { %v3608_v45 = vpop.f32.mrf.mxu0 }
 0x26a   : > { %v3649_v46 = vpop.f32.mrf.mxu1  ;;  %v3926_v47 = vcombine.low %v3645_v50, %v3647_v44 }
 0x26c   : > { %v3934_v6 = vrot.slane %v3926_v47, %v6470_v26 }
 0x2a3   : > { %v3685_v17 = vpop.f32.mrf.mxu0 }
 0x2a4   : > { %v3726_v52 = vpop.f32.mrf.mxu1  ;;  %v3686_v53 = vadd.f32 %v3685_v17, %v1423_v51 }
 0x2a5   : > { %v3687_v55 = vpop.f32.mrf.mxu0 }
 0x2a6   : > { %v3728_v56 = vpop.f32.mrf.mxu1  ;;  %v3727_v57 = vadd.f32 %v3726_v52, %v3686_v53  ;;  %v3688_v59 = vadd.f32 %v3687_v55, %v1427_v13 }
 0x2a7   : > { %v3689_v60 = vpop.f32.mrf.mxu0 }
 0x2a8   : > { %v3730_v63 = vpop.f32.mrf.mxu1  ;;  %v3729_v1 = vadd.f32 %v3728_v56, %v3688_v59 }
 0x2a9   : > { %v3690_v3 = vpop.f32.mrf.mxu0 }
 0x2aa   : > { %v3731_v4 = vpop.f32.mrf.mxu1  ;;  %v3927_v5 = vcombine.low %v3727_v57, %v3729_v1 }
 0x2ac   : > { %v3941_v7 = vrot.slane %v3927_v5, %v6470_v26 }
 0x2ae   : > { %v3942_v30 = vcombine.low %v3934_v6, %v3941_v7 }
 0x2b0   : > { %3964 = vst [vmem:[%s6488_s26 + $0x8] sm:$0xff] %v3942_v30 }
 0x2e3   : > { %v3767_v12 = vpop.f32.mrf.mxu0 }
 0x2e4   : > { %v3808_v14 = vpop.f32.mrf.mxu1  ;;  %v3768_v16 = vadd.f32 %v3767_v12, %v1431_v9 }
 0x2e5   : > { %v3769_v19 = vpop.f32.mrf.mxu0 }
 0x2e6   : > { %v3810_v20 = vpop.f32.mrf.mxu1  ;;  %v3809_v0 = vadd.f32 %v3808_v14, %v3768_v16  ;;  %v3770_v11 = vadd.f32 %v3769_v19, %v1435_v10 }
 0x2e7   : > { %v3771_v21 = vpop.f32.mrf.mxu0 }
 0x2e8   : > { %v3812_v22 = vpop.f32.mrf.mxu1  ;;  %v3811_v23 = vadd.f32 %v3810_v20, %v3770_v11 }
 0x2e9   : > { %v3772_v24 = vpop.f32.mrf.mxu0 }
 0x2ea   : > { %v3813_v25 = vpop.f32.mrf.mxu1  ;;  %v3943_v27 = vcombine.low %v3809_v0, %v3811_v23 }
 0x2ec   : > { %v3951_v2 = vrot.slane %v3943_v27, %v6470_v26 }
 0x323   : > { %v3849_v28 = vpop.f32.mrf.mxu0 }
 0x324   : > { %v3890_v29 = vpop.f32.mrf.mxu1  ;;  %v3850_v32 = vadd.f32 %v3849_v28, %v1439_v31 }
 0x325   : > { %v3851_v33 = vpop.f32.mrf.mxu0 }
 0x326   : > { %v3892_v15 = vpop.f32.mrf.mxu1  ;;  %v3852_v18 = vadd.f32 %v3851_v33, %v1443_v34  ;;  %v3891_v37 = vadd.f32 %v3890_v29, %v3850_v32 }
 0x327   : > { %v3853_v35 = vpop.f32.mrf.mxu0 }
 0x328   : > { %v3894_v36 = vpop.f32.mrf.mxu1  ;;  %v3893_v38 = vadd.f32 %v3892_v15, %v3852_v18 }
 0x329   : > { %v3854_v39 = vpop.f32.mrf.mxu0 }
 0x32a   : > { %v3895_v40 = vpop.f32.mrf.mxu1  ;;  %v3944_v58 = vcombine.low %v3891_v37, %v3893_v38 }
 0x32c   : > { %v3958_v62 = vrot.slane %v3944_v58, %v6470_v26 }
 0x32e   : > { %v3959_v41 = vcombine.low %v3951_v2, %v3958_v62 }
 0x330   : > { %3965 = vst [vmem:[%s6488_s26 + $0x10] sm:$0xff] %v3959_v41 }
 0x331   : > { %5129 = shalt.err (!%p5126_p8)
}
 0x332   : > { %s5130_s10 = scalar_lea.hbm %s3981_s4, 384  ;;  %s5134_s18 = scalar_lea.hbm %s6604_s3, 768 }
 0x333   : > { %p5131_p11 = scmp.ne.s32.totalorder %s3981_s4, %s5130_s10  ;;  %p5135_p0 = scmp.lt.s32.totalorder %s3981_s4, %s6604_s3 }
 0x334   : > { %p5136_p1 = scmp.lt.s32.totalorder %s5134_s18, %s5130_s10 }
 0x335   : > { %p5132_p12 = pnand %p5131_p11, %p5256_p5 }
 0x336   : > { %p5137_p2 = por %p5136_p1, %p5135_p0 }
 0x337   : > { %p5133_p13 = pneg %p5132_p12 }
 0x339   : > { %p5138_p10 = pnand %p5137_p2, %p5133_p13 }
 0x33b   : > { %5141 = shalt.err (!%p5138_p10)
}
 0x33c   : > { %4483 = dma.vmem_to_hbm [thread:$0]  (%p5256_p5), %s3984_s28, 384, %s3981_s4, %s3967_s5  }
 0x33d PF: > { %s3995_s23 = sand.u32 1, %s5172_s12   ;;  %p6608_p3 = scmp.ge.s32.totalorder %s5192_s17, 2 }
 0x33e   : > { %s3996_s26 = scalar_lea.sflag [#allocation4], %s3995_s23 }
 0x33f   : > { %p4486_p4 = pnand %p6608_p3, %p5267_p9 }
 0x341   : > { %p4487_p6 = pneg %p4486_p4 }
 0x343   : > { %5167 = dma.done.wait (%p4487_p6), %s3996_s26, 384  }
 0x344   : > { %5169 = vsyncadd (%p4487_p6), %s3996_s26, 4294966912  ;;  %s16_s17 = sadd.s32 1, %s5192_s17   ;;  %s6609_s12 = smov %s5176_s13 }
 0x345   : > { %p13_p7 = scmp.ge.s32.totalorder %s16_s17, 4   ;;  %s6610_s13 = smov %s5180_s14 }
 0x346   : > { %s6611_s14 = smov %s5265_s24  ;;  %s6612_s15 = smov %s5188_s16 }
 0x347   : > { %s6613_s16 = smov %s6615_s20  ;;  %15 = sbr.rel (!%p13_p7) target bundleno = 4 (0x4), region = 101 }
 0x34c   :  { %4001 = vsyncpa [#allocation4], 1 }
 0x34d   :  { %4003 = vsyncpa [#allocation4 + $0x1], 1 }

</bundles_post_ra>
